<compile_context>
chip_gen: v6e
topology: v6e:2x2x1
jax: 0.10.0
libtpu: 0.0.40
codegen_flags: <defaults>
</compile_context>

<pallas_src>
import functools

import jax
import jax.numpy as jnp
from jax import lax
from jax.experimental import pallas as pl
from jax.experimental.pallas import tpu as pltpu

EPS = 1e-5                 # nn.BatchNorm2d default eps
LANE = 128                 # channel dims padded to a multiple of the lane width
ACC_DT = jnp.float32       # accumulator / BN math dtype
MM_DT = jnp.bfloat16       # MXU operand + streamed-activation dtype


# ------------------------------ small helpers ------------------------------ #

def _pad_to(n, mult):
    return ((n + mult - 1) // mult) * mult


def pad_channels(arr, axis, target, pad_value=0.0):
    pad = target - arr.shape[axis]
    if pad == 0:
        return arr
    widths = [(0, 0)] * arr.ndim
    widths[axis] = (0, pad)
    return jnp.pad(arr, widths, constant_values=pad_value)


def _pick_block_m(m, target):
    """Largest multiple-of-8 divisor of m that is <= target (fallback: m).

    Full tiles only: BN partial statistics must never see padded garbage rows.
    TODO(synk): for huge m with no friendly divisor this degrades to a single
                block; pad/split m upstream in that case.
    """
    target = min(target, m)
    start = target - (target % 8)
    for bm in range(start, 7, -8):
        if m % bm == 0:
            return bm
    return m


@functools.lru_cache(maxsize=None)
def _vmem_limit_bytes():
    """Scoped-VMEM budget: big tiles, but <= 3/4 of physical VMEM.

    v7x has 64 MiB/TC (-> 48 MiB budget); v5e/v6e have 128 MiB (-> 64 MiB).
    """
    try:
        cap = pltpu.get_tpu_info().vmem_capacity_bytes
    except Exception:                                   # conservative fallback
        cap = 64 * 1024 * 1024
    return int(min(64 * 1024 * 1024, max(32 * 1024 * 1024, (cap * 3) // 4)))


def _compiler_params(grid_rank):
    # Every grid axis is independent (cross-tile BN handled via partial stats),
    # so 'parallel' everywhere -> megacore sharding on v7x.
    return pltpu.CompilerParams(
        dimension_semantics=("parallel",) * grid_rank,
        vmem_limit_bytes=_vmem_limit_bytes(),
    )


# ----------------------------- Pallas kernels ------------------------------ #

def _partial_stats(z, stats_ref):
    """Per-tile per-channel (sum, sum-of-squares) for the cross-tile BN reduce."""
    s = jnp.sum(z, axis=0, keepdims=True)             # (1, C)
    ss = jnp.sum(z * z, axis=0, keepdims=True)        # (1, C)
    stats_ref[...] = jnp.concatenate([s, ss], axis=0)[None]   # (1, 2, C)


def conv1x1_stats_kernel(x_ref, w_ref, z_ref, stats_ref):
    """z = x @ w (bf16 operands, f32 accumulation) + BN partial stats."""
    z = jnp.dot(x_ref[...], w_ref[...], preferred_element_type=ACC_DT)
    z_ref[...] = z.astype(z_ref.dtype)
    _partial_stats(z, stats_ref)


def bn_relu_conv1x1_stats_kernel(z_in_ref, a_ref, b_ref, w_ref, z_ref, stats_ref):
    """y = relu(a*z_in + b) (f32); z = y @ w (bf16/f32); + BN partial stats."""
    y = jnp.maximum(z_in_ref[...].astype(ACC_DT) * a_ref[...] + b_ref[...], 0.0)
    z = jnp.dot(y.astype(MM_DT), w_ref[...], preferred_element_type=ACC_DT)
    z_ref[...] = z.astype(z_ref.dtype)
    _partial_stats(z, stats_ref)


def bn_relu_conv3x3_stats_kernel(z_ref, a_ref, b_ref, w_ref, z2_ref, stats_ref,
                                 rcol_ref, acc_ref, *, H, W):
    """One image per grid step.

    Applies BN1 scale/shift + ReLU, builds a row-im2col buffer
        rcol[r = i*W + w, t*C1:(t+1)*C1] = y_padded[i, w + t, :]   (t = kw)
    with lane-aligned 128-wide column blocks and border-only zeroing, then
    computes the 3x3 conv as three K = 3*C1 MXU matmuls (one per kh) that
    accumulate into an f32 VMEM scratch.
    """
    HW, C1 = z_ref.shape

    # BN1 apply + ReLU in f32, cast to bf16 for the MXU / im2col buffer.
    y = jnp.maximum(z_ref[...].astype(ACC_DT) * a_ref[...] + b_ref[...], 0.0)
    y = y.astype(MM_DT)

    # ---- row-im2col buffer (lane-aligned writes, border-only zeroing) ---- #
    halo = jnp.zeros((W, 3 * C1), MM_DT)
    rcol_ref[pl.ds(0, W), :] = halo                    # top padding rows
    rcol_ref[pl.ds((H + 1) * W, W), :] = halo          # bottom padding rows
    rcol_ref[pl.ds(W, HW), C1:2 * C1] = y              # kw = 1 (center column)

    # Left/right neighbours are read back from the centre lane block with a
    # +/-1 row offset (the zeroed halo rows supply the vertical padding), and
    # masked where the flattened index wraps across an image row boundary.
    q = lax.broadcasted_iota(jnp.int32, (HW, 1), 0)
    y_left = rcol_ref[pl.ds(W - 1, HW), C1:2 * C1]             # y[q-1] (0 at q=0)
    rcol_ref[pl.ds(W, HW), 0:C1] = jnp.where(
        (q % W) == 0, jnp.zeros_like(y_left), y_left)          # kw = 0
    y_right = rcol_ref[pl.ds(W + 1, HW), C1:2 * C1]            # y[q+1] (0 at end)
    rcol_ref[pl.ds(W, HW), 2 * C1:3 * C1] = jnp.where(
        (q % W) == (W - 1), jnp.zeros_like(y_right), y_right)  # kw = 2

    # ---- 3x3 conv = 3 matmuls with K = 3*C1, f32 accumulation in VMEM ---- #
    acc_ref[...] = jnp.dot(rcol_ref[pl.ds(0, HW), :], w_ref[0],
                           preferred_element_type=ACC_DT)
    acc_ref[...] += jnp.dot(rcol_ref[pl.ds(W, HW), :], w_ref[1],
                            preferred_element_type=ACC_DT)
    acc_ref[...] += jnp.dot(rcol_ref[pl.ds(2 * W, HW), :], w_ref[2],
                            preferred_element_type=ACC_DT)

    z = acc_ref[...]
    z2_ref[...] = z.astype(z2_ref.dtype)
    _partial_stats(z, stats_ref)


def bn_add_relu_kernel(z_ref, a_ref, b_ref, res_ref, out_ref):
    """out = relu(a*z + b + residual) — final BN3 apply + identity residual."""
    y = (z_ref[...].astype(ACC_DT) * a_ref[...] + b_ref[...]
         + res_ref[...].astype(ACC_DT))
    out_ref[...] = jnp.maximum(y, 0.0).astype(out_ref.dtype)


# ------------------------------ call wrappers ------------------------------ #

def _conv1x1_stats(x, w, block_m):
    M, K = x.shape
    C = w.shape[1]
    bm = _pick_block_m(M, block_m)
    nt = M // bm
    return pl.pallas_call(
        conv1x1_stats_kernel,
        grid=(nt,),
        in_specs=[pl.BlockSpec((bm, K), lambda i: (i, 0)),
                  pl.BlockSpec((K, C), lambda i: (0, 0))],
        out_specs=[pl.BlockSpec((bm, C), lambda i: (i, 0)),
                   pl.BlockSpec((1, 2, C), lambda i: (i, 0, 0))],
        out_shape=(jax.ShapeDtypeStruct((M, C), MM_DT),
                   jax.ShapeDtypeStruct((nt, 2, C), ACC_DT)),
        compiler_params=_compiler_params(1),
    )(x, w)


def _bn_relu_conv3x3_stats(z1, a, b, w2f, N, H, W):
    HW = H * W
    M, C1 = z1.shape
    C2 = w2f.shape[-1]
    kernel = functools.partial(bn_relu_conv3x3_stats_kernel, H=H, W=W)
    return pl.pallas_call(
        kernel,
        grid=(N,),
        in_specs=[pl.BlockSpec((HW, C1), lambda n: (n, 0)),
                  pl.BlockSpec((1, C1), lambda n: (0, 0)),
                  pl.BlockSpec((1, C1), lambda n: (0, 0)),
                  pl.BlockSpec((3, 3 * C1, C2), lambda n: (0, 0, 0))],
        out_specs=[pl.BlockSpec((HW, C2), lambda n: (n, 0)),
                   pl.BlockSpec((1, 2, C2), lambda n: (n, 0, 0))],
        out_shape=(jax.ShapeDtypeStruct((M, C2), MM_DT),
                   jax.ShapeDtypeStruct((N, 2, C2), ACC_DT)),
        scratch_shapes=[pltpu.VMEM(((H + 2) * W, 3 * C1), MM_DT),   # row-im2col
                        pltpu.VMEM((HW, C2), ACC_DT)],              # f32 acc
        compiler_params=_compiler_params(1),
    )(z1, a, b, w2f)


def _bn_relu_conv1x1_stats(z_in, a, b, w, block_m):
    M, Cin = z_in.shape
    C = w.shape[1]
    bm = _pick_block_m(M, block_m)
    nt = M // bm
    return pl.pallas_call(
        bn_relu_conv1x1_stats_kernel,
        grid=(nt,),
        in_specs=[pl.BlockSpec((bm, Cin), lambda i: (i, 0)),
                  pl.BlockSpec((1, Cin), lambda i: (0, 0)),
                  pl.BlockSpec((1, Cin), lambda i: (0, 0)),
                  pl.BlockSpec((Cin, C), lambda i: (0, 0))],
        out_specs=[pl.BlockSpec((bm, C), lambda i: (i, 0)),
                   pl.BlockSpec((1, 2, C), lambda i: (i, 0, 0))],
        out_shape=(jax.ShapeDtypeStruct((M, C), MM_DT),
                   jax.ShapeDtypeStruct((nt, 2, C), ACC_DT)),
        compiler_params=_compiler_params(1),
    )(z_in, a, b, w)


def _bn_add_relu(z_in, a, b, residual, block_m):
    M, C = z_in.shape
    bm = _pick_block_m(M, block_m)
    nt = M // bm
    return pl.pallas_call(
        bn_add_relu_kernel,
        grid=(nt,),
        in_specs=[pl.BlockSpec((bm, C), lambda i: (i, 0)),
                  pl.BlockSpec((1, C), lambda i: (0, 0)),
                  pl.BlockSpec((1, C), lambda i: (0, 0)),
                  pl.BlockSpec((bm, C), lambda i: (i, 0))],
        out_specs=pl.BlockSpec((bm, C), lambda i: (i, 0)),
        out_shape=jax.ShapeDtypeStruct((M, C), MM_DT),   # bf16 final store
        compiler_params=_compiler_params(1),
    )(z_in, a, b, residual)


def _stats_to_scale_shift(stats, count, gamma, beta):
    """Reduce per-tile (sum, sumsq) partials -> per-channel BN scale/shift.

    One-pass var = E[z^2] - mean^2 in f32; fine for O(1) activations.
    TODO(synk): switch to a shifted/Welford form for large activation means.
    """
    s = jnp.sum(stats, axis=0)                      # (2, C)
    mean = s[0:1] / count                           # (1, C)
    var = jnp.maximum(s[1:2] / count - mean * mean, 0.0)
    a = gamma * lax.rsqrt(var + EPS)
    b = beta - mean * a
    return a.astype(ACC_DT), b.astype(ACC_DT)


@functools.partial(jax.jit, static_argnames=("block_m",))
def bottleneck_forward(x_nhwc, params, *, block_m=512):
    """Bottleneck forward (identity residual).  Channel dims already padded."""
    N, H, W, Cin = x_nhwc.shape
    M = N * H * W
    count = float(M)
    # bf16 stream for both K1 and the K4 residual (halves those HBM reads).
    x_flat = x_nhwc.reshape(M, Cin).astype(MM_DT)

    # conv1 (1x1) + bn1 stats
    z1, st1 = _conv1x1_stats(x_flat, params["w1"], block_m)
    a1, b1 = _stats_to_scale_shift(st1, count, params["g1"], params["b1"])

    # bn1 apply + relu + conv2 (3x3, in-kernel row-im2col) + bn2 stats
    z2, st2 = _bn_relu_conv3x3_stats(z1, a1, b1, params["w2"], N, H, W)
    a2, b2 = _stats_to_scale_shift(st2, count, params["g2"], params["b2"])

    # bn2 apply + relu + conv3 (1x1) + bn3 stats
    z3, st3 = _bn_relu_conv1x1_stats(z2, a2, b2, params["w3"], block_m)
    a3, b3 = _stats_to_scale_shift(st3, count, params["g3"], params["b3"])

    # bn3 apply + residual add + relu
    out = _bn_add_relu(z3, a3, b3, x_flat, block_m)
    return out.reshape(N, H, W, -1)


# ------------------------- Pure-JAX reference check ------------------------ #

def reference_forward(x_nhwc, p):
    def bn(z, g, b):
        m = jnp.mean(z, axis=(0, 1, 2), keepdims=True)
        v = jnp.mean((z - m) ** 2, axis=(0, 1, 2), keepdims=True)
        return ((z - m) * lax.rsqrt(v + EPS) * g.reshape(1, 1, 1, -1)
                + b.reshape(1, 1, 1, -1))

    y = jnp.einsum("nhwc,cd->nhwd", x_nhwc, p["w1"])
    y = jnp.maximum(bn(y, p["g1"], p["b1"]), 0.0)
    y = lax.conv_general_dilated(
        y, p["w2"], window_strides=(1, 1), padding=((1, 1), (1, 1)),
        dimension_numbers=("NHWC", "HWIO", "NHWC"))
    y = jnp.maximum(bn(y, p["g2"], p["b2"]), 0.0)
    y = jnp.einsum("nhwc,cd->nhwd", y, p["w3"])
    y = bn(y, p["g3"], p["b3"]) + x_nhwc
    return jnp.maximum(y, 0.0)


# ------------------------------ Param init --------------------------------- #

def init_params(keys, inplanes, planes):
    expansion = 4
    out_planes = planes * expansion
    return {
        "w1": 0.1 * jax.random.normal(keys[0], (inplanes, planes), jnp.float32),
        "w2": 0.1 * jax.random.normal(keys[1], (3, 3, planes, planes), jnp.float32),
        "w3": 0.1 * jax.random.normal(keys[2], (planes, out_planes), jnp.float32),
        "g1": jax.random.uniform(keys[3], (1, planes), jnp.float32, 0.5, 1.5),
        "b1": 0.1 * jax.random.normal(keys[4], (1, planes), jnp.float32),
        "g2": jax.random.uniform(keys[5], (1, planes), jnp.float32, 0.5, 1.5),
        "b2": 0.1 * jax.random.normal(keys[6], (1, planes), jnp.float32),
        "g3": jax.random.uniform(keys[7], (1, out_planes), jnp.float32, 0.5, 1.5),
        "b3": 0.1 * jax.random.normal(keys[8], (1, out_planes), jnp.float32),
    }


def prepare_params(p):
    """Zero-pad channels to LANE multiples; pre-cast weights to bf16; fold the
    3x3 kernel's kw axis into the contraction dim: (3,3,Ci,Co)->(3, 3*Ci, Co)."""
    cin, planes = p["w1"].shape
    cout = p["w3"].shape[1]
    cin_p, pl_p, cout_p = _pad_to(cin, LANE), _pad_to(planes, LANE), _pad_to(cout, LANE)
    w2p = pad_channels(pad_channels(p["w2"], 2, pl_p), 3, pl_p)   # (3,3,Ci_p,Co_p)
    return {
        "w1": pad_channels(pad_channels(p["w1"], 0, cin_p), 1, pl_p).astype(MM_DT),
        "w2": w2p.reshape(3, 3 * pl_p, pl_p).astype(MM_DT),
        "w3": pad_channels(pad_channels(p["w3"], 0, pl_p), 1, cout_p).astype(MM_DT),
        "g1": pad_channels(p["g1"], 1, pl_p, 1.0),
        "b1": pad_channels(p["b1"], 1, pl_p),
        "g2": pad_channels(p["g2"], 1, pl_p, 1.0),
        "b2": pad_channels(p["b2"], 1, pl_p),
        "g3": pad_channels(p["g3"], 1, cout_p, 1.0),
        "b3": pad_channels(p["b3"], 1, cout_p),
    }


# --------------------------------- Main ------------------------------------ #

if __name__ == "__main__":
    key = jax.random.PRNGKey(0)
    keys = jax.random.split(key, 10)

    N, H, W = 2, 16, 16
    planes = 4
    inplanes = planes * 4  # identity residual requires inplanes == planes*expansion

    # PyTorch-style NCHW input.
    x_nchw = jax.random.normal(keys[0], (N, inplanes, H, W), jnp.float32)
    params = init_params(keys[1:], inplanes, planes)

    # NCHW -> NHWC boundary transpose (module interface), then pad channels to
    # the 128-lane width (real ResNet widths are already aligned).
    x_nhwc = jnp.transpose(x_nchw, (0, 2, 3, 1))
    x_pad = pad_channels(x_nhwc, 3, _pad_to(inplanes, LANE))
    p_pad = prepare_params(params)

    out_pad = bottleneck_forward(x_pad, p_pad)
    out_nhwc = out_pad[..., :inplanes].astype(jnp.float32)
    out_nchw = jnp.transpose(out_nhwc, (0, 3, 1, 2))
    jax.block_until_ready(out_nchw)

    ref_nhwc = reference_forward(x_nhwc, params)
    assert out_nchw.shape == (N, inplanes, H, W)
    # Tolerance reflects bf16 operands / bf16 streamed activations & output
    # (f32 MXU accumulation and f32 BN math) vs. the pure-f32 reference.
    assert jnp.allclose(out_nhwc, ref_nhwc, atol=1e-1, rtol=1e-1), \
        "mismatch vs JAX reference"

    print("KERNEL_OK")
</pallas_src>

<mosaic_0001>
module attributes {stable_mosaic.version = 11 : i64} {
  func.func @conv1x1_stats_kernel(%arg0: i32, %arg1: memref<512x128xbf16, #tpu.memory_space<vmem>>, %arg2: memref<128x128xbf16, #tpu.memory_space<vmem>>, %arg3: memref<512x128xbf16, #tpu.memory_space<vmem>>, %arg4: memref<1x2x128xf32, #tpu.memory_space<vmem>>) attributes {dimension_semantics = [#tpu.dimension_semantics<parallel>], iteration_bounds = array<i64: 1>, scalar_prefetch = 0 : i64, scratch_operands = 0 : i64, tpu.core_type = #tpu.core_type<tc>, window_params = [{transform_indices = @transform_0, window_bounds = array<i64: 512, 128>}, {pipeline_mode = #tpu.pipeline_mode<synchronous>, transform_indices = @transform_1, window_bounds = array<i64: 128, 128>}, {transform_indices = @transform_2, window_bounds = array<i64: 512, 128>}, {transform_indices = @transform_3, window_bounds = array<i64: 1, 2, 128>}]} {
    %c0 = arith.constant 0 : index
    %c0_0 = arith.constant 0 : index
    %0 = vector.load %arg1[%c0, %c0_0] : memref<512x128xbf16, #tpu.memory_space<vmem>>, vector<512x128xbf16>
    %c0_1 = arith.constant 0 : index
    %c0_2 = arith.constant 0 : index
    %1 = vector.load %arg2[%c0_1, %c0_2] : memref<128x128xbf16, #tpu.memory_space<vmem>>, vector<128x128xbf16>
    %cst = arith.constant dense<0.000000e+00> : vector<512x128xf32>
    %2 = tpu.matmul %0, %1, %cst {dimension_numbers = #tpu.dot_dimension_numbers<[1], [0], [0], [1], [0, 0, 1, 1], [], []>} : vector<512x128xbf16>, vector<128x128xbf16>, vector<512x128xf32> -> vector<512x128xf32>
    %3 = arith.truncf %2 : vector<512x128xf32> to vector<512x128xbf16>
    %c0_3 = arith.constant 0 : index
    %c0_4 = arith.constant 0 : index
    %4 = vector.load %arg3[%c0_3, %c0_4] : memref<512x128xbf16, #tpu.memory_space<vmem>>, vector<512x128xbf16>
    tpu.vector_store %arg3[%c0_3, %c0_4], %3 {strides = array<i32>} : memref<512x128xbf16, #tpu.memory_space<vmem>>, vector<512x128xbf16>,
    %cst_5 = arith.constant dense<0.000000e+00> : vector<128xf32>
    %5 = vector.multi_reduction <add>, %2, %cst_5 [0] : vector<512x128xf32> to vector<128xf32>
    %6 = vector.shape_cast %5 : vector<128xf32> to vector<1x128xf32>
    %7 = arith.mulf %2, %2 : vector<512x128xf32>
    %cst_6 = arith.constant dense<0.000000e+00> : vector<128xf32>
    %8 = vector.multi_reduction <add>, %7, %cst_6 [0] : vector<512x128xf32> to vector<128xf32>
    %9 = vector.shape_cast %8 : vector<128xf32> to vector<1x128xf32>
    %10 = tpu.concatenate %6, %9 in 0 : vector<1x128xf32>, vector<1x128xf32> -> vector<2x128xf32>
    %11 = vector.shape_cast %10 : vector<2x128xf32> to vector<1x2x128xf32>
    %c0_7 = arith.constant 0 : index
    %c0_8 = arith.constant 0 : index
    %c0_9 = arith.constant 0 : index
    %12 = vector.load %arg4[%c0_7, %c0_8, %c0_9] : memref<1x2x128xf32, #tpu.memory_space<vmem>>, vector<1x2x128xf32>
    tpu.vector_store %arg4[%c0_7, %c0_8, %c0_9], %11 {strides = array<i32>} : memref<1x2x128xf32, #tpu.memory_space<vmem>>, vector<1x2x128xf32>,
    return
  }
  func.func @transform_0(%arg0: i32) -> (i32, i32) {
    %c0_i32 = arith.constant 0 : i32
    %c0_i32_0 = arith.constant 0 : i32
    return %arg0, %c0_i32 : i32, i32
  }
  func.func @transform_1(%arg0: i32) -> (i32, i32) {
    %c0_i32 = arith.constant 0 : i32
    %c0_i32_0 = arith.constant 0 : i32
    %c0_i32_1 = arith.constant 0 : i32
    return %c0_i32, %c0_i32_0 : i32, i32
  }
  func.func @transform_2(%arg0: i32) -> (i32, i32) {
    %c0_i32 = arith.constant 0 : i32
    %c0_i32_0 = arith.constant 0 : i32
    return %arg0, %c0_i32 : i32, i32
  }
  func.func @transform_3(%arg0: i32) -> (i32, i32, i32) {
    %c0_i32 = arith.constant 0 : i32
    %c0_i32_0 = arith.constant 0 : i32
    %c0_i32_1 = arith.constant 0 : i32
    return %arg0, %c0_i32, %c0_i32_0 : i32, i32, i32
  }
}

module attributes {stable_mosaic.version = 11 : i64} {
  func.func @bn_relu_conv3x3_stats_kernel(%arg0: i32, %arg1: memref<256x128xbf16, #tpu.memory_space<vmem>>, %arg2: memref<1x128xf32, #tpu.memory_space<vmem>>, %arg3: memref<1x128xf32, #tpu.memory_space<vmem>>, %arg4: memref<3x384x128xbf16, #tpu.memory_space<vmem>>, %arg5: memref<256x128xbf16, #tpu.memory_space<vmem>>, %arg6: memref<1x2x128xf32, #tpu.memory_space<vmem>>, %arg7: memref<288x384xbf16, #tpu.memory_space<vmem>>, %arg8: memref<256x128xf32, #tpu.memory_space<vmem>>) attributes {dimension_semantics = [#tpu.dimension_semantics<parallel>], iteration_bounds = array<i64: 2>, scalar_prefetch = 0 : i64, scratch_operands = 2 : i64, tpu.core_type = #tpu.core_type<tc>, window_params = [{transform_indices = @transform_0, window_bounds = array<i64: 256, 128>}, {pipeline_mode = #tpu.pipeline_mode<synchronous>, transform_indices = @transform_1, window_bounds = array<i64: 1, 128>}, {pipeline_mode = #tpu.pipeline_mode<synchronous>, transform_indices = @transform_2, window_bounds = array<i64: 1, 128>}, {pipeline_mode = #tpu.pipeline_mode<synchronous>, transform_indices = @transform_3, window_bounds = array<i64: 3, 384, 128>}, {transform_indices = @transform_4, window_bounds = array<i64: 256, 128>}, {transform_indices = @transform_5, window_bounds = array<i64: 1, 2, 128>}]} {
    %c0 = arith.constant 0 : index
    %c0_0 = arith.constant 0 : index
    %0 = vector.load %arg1[%c0, %c0_0] : memref<256x128xbf16, #tpu.memory_space<vmem>>, vector<256x128xbf16>
    %1 = arith.extf %0 : vector<256x128xbf16> to vector<256x128xf32>
    %c0_1 = arith.constant 0 : index
    %c0_2 = arith.constant 0 : index
    %2 = vector.load %arg2[%c0_1, %c0_2] : memref<1x128xf32, #tpu.memory_space<vmem>>, vector<1x128xf32>
    %3 = vector.broadcast %2 : vector<1x128xf32> to vector<256x128xf32>
    %4 = arith.mulf %1, %3 : vector<256x128xf32>
    %c0_3 = arith.constant 0 : index
    %c0_4 = arith.constant 0 : index
    %5 = vector.load %arg3[%c0_3, %c0_4] : memref<1x128xf32, #tpu.memory_space<vmem>>, vector<1x128xf32>
    %6 = vector.broadcast %5 : vector<1x128xf32> to vector<256x128xf32>
    %7 = arith.addf %4, %6 : vector<256x128xf32>
    %cst = arith.constant 0.000000e+00 : f32
    %8 = vector.broadcast %cst : f32 to vector<256x128xf32>
    %9 = arith.maximumf %7, %8 : vector<256x128xf32>
    %10 = arith.truncf %9 : vector<256x128xf32> to vector<256x128xbf16>
    %cst_5 = arith.constant 0.000000e+00 : bf16
    %11 = vector.broadcast %cst_5 : bf16 to vector<16x384xbf16>
    %c0_6 = arith.constant 0 : index
    %c0_7 = arith.constant 0 : index
    %12 = vector.load %arg7[%c0_6, %c0_7] : memref<288x384xbf16, #tpu.memory_space<vmem>>, vector<16x384xbf16>
    tpu.vector_store %arg7[%c0_6, %c0_7], %11 {strides = array<i32>} : memref<288x384xbf16, #tpu.memory_space<vmem>>, vector<16x384xbf16>,
    %c272 = arith.constant 272 : index
    %c0_8 = arith.constant 0 : index
    %13 = vector.load %arg7[%c272, %c0_8] : memref<288x384xbf16, #tpu.memory_space<vmem>>, vector<16x384xbf16>
    tpu.vector_store %arg7[%c272, %c0_8], %11 {strides = array<i32>} : memref<288x384xbf16, #tpu.memory_space<vmem>>, vector<16x384xbf16>,
    %c16 = arith.constant 16 : index
    %c128 = arith.constant 128 : index
    %14 = vector.load %arg7[%c16, %c128] : memref<288x384xbf16, #tpu.memory_space<vmem>>, vector<256x128xbf16>
    tpu.vector_store %arg7[%c16, %c128], %10 {strides = array<i32>} : memref<288x384xbf16, #tpu.memory_space<vmem>>, vector<256x128xbf16>,
    %15 = tpu.iota {dimensions = array<i32: 0>} : vector<256x1xi32>
    %c15 = arith.constant 15 : index
    %c128_9 = arith.constant 128 : index
    %16 = vector.load %arg7[%c15, %c128_9] : memref<288x384xbf16, #tpu.memory_space<vmem>>, vector<256x128xbf16>
    %c16_i32 = arith.constant 16 : i32
    %c0_i32 = arith.constant 0 : i32
    %17 = arith.cmpi eq, %c16_i32, %c0_i32 : i32
    %c1_i32 = arith.constant 1 : i32
    %18 = arith.select %17, %c1_i32, %c16_i32 : i32
    %19 = vector.broadcast %18 : i32 to vector<256x1xi32>
    %20 = arith.remsi %15, %19 : vector<256x1xi32>
    %c0_i32_10 = arith.constant 0 : i32
    %21 = vector.broadcast %c0_i32_10 : i32 to vector<256x1xi32>
    %22 = arith.cmpi ne, %20, %21 : vector<256x1xi32>
    %c0_i32_11 = arith.constant 0 : i32
    %23 = vector.broadcast %c0_i32_11 : i32 to vector<256x1xi32>
    %24 = arith.cmpi slt, %20, %23 : vector<256x1xi32>
    %c0_i32_12 = arith.constant 0 : i32
    %25 = arith.cmpi slt, %18, %c0_i32_12 : i32
    %26 = vector.broadcast %25 : i1 to vector<256x1xi1>
    %27 = vector.broadcast %26 : vector<256x1xi1> to vector<256x1xi1>
    %28 = arith.xori %24, %27 : vector<256x1xi1>
    %29 = arith.andi %28, %22 : vector<256x1xi1>
    %30 = vector.broadcast %18 : i32 to vector<256x1xi32>
    %31 = arith.addi %20, %30 : vector<256x1xi32>
    %32 = arith.select %29, %31, %20 : vector<256x1xi1>, vector<256x1xi32>
    %c0_i32_13 = arith.constant 0 : i32
    %33 = vector.broadcast %c0_i32_13 : i32 to vector<256x1xi32>
    %34 = arith.cmpi eq, %32, %33 : vector<256x1xi32>
    %cst_14 = arith.constant 0.000000e+00 : bf16
    %35 = vector.broadcast %cst_14 : bf16 to vector<256x128xbf16>
    %36 = vector.shape_cast %34 : vector<256x1xi1> to vector<256x1xi1>
    %37 = vector.broadcast %36 : vector<256x1xi1> to vector<256x128xi1>
    %38 = arith.select %37, %35, %16 : vector<256x128xi1>, vector<256x128xbf16>
    %c16_15 = arith.constant 16 : index
    %c0_16 = arith.constant 0 : index
    %39 = vector.load %arg7[%c16_15, %c0_16] : memref<288x384xbf16, #tpu.memory_space<vmem>>, vector<256x128xbf16>
    tpu.vector_store %arg7[%c16_15, %c0_16], %38 {strides = array<i32>} : memref<288x384xbf16, #tpu.memory_space<vmem>>, vector<256x128xbf16>,
    %c17 = arith.constant 17 : index
    %c128_17 = arith.constant 128 : index
    %40 = vector.load %arg7[%c17, %c128_17] : memref<288x384xbf16, #tpu.memory_space<vmem>>, vector<256x128xbf16>
    %c16_i32_18 = arith.constant 16 : i32
    %c0_i32_19 = arith.constant 0 : i32
    %41 = arith.cmpi eq, %c16_i32_18, %c0_i32_19 : i32
    %c1_i32_20 = arith.constant 1 : i32
    %42 = arith.select %41, %c1_i32_20, %c16_i32_18 : i32
    %43 = vector.broadcast %42 : i32 to vector<256x1xi32>
    %44 = arith.remsi %15, %43 : vector<256x1xi32>
    %c0_i32_21 = arith.constant 0 : i32
    %45 = vector.broadcast %c0_i32_21 : i32 to vector<256x1xi32>
    %46 = arith.cmpi ne, %44, %45 : vector<256x1xi32>
    %c0_i32_22 = arith.constant 0 : i32
    %47 = vector.broadcast %c0_i32_22 : i32 to vector<256x1xi32>
    %48 = arith.cmpi slt, %44, %47 : vector<256x1xi32>
    %c0_i32_23 = arith.constant 0 : i32
    %49 = arith.cmpi slt, %42, %c0_i32_23 : i32
    %50 = vector.broadcast %49 : i1 to vector<256x1xi1>
    %51 = vector.broadcast %50 : vector<256x1xi1> to vector<256x1xi1>
    %52 = arith.xori %48, %51 : vector<256x1xi1>
    %53 = arith.andi %52, %46 : vector<256x1xi1>
    %54 = vector.broadcast %42 : i32 to vector<256x1xi32>
    %55 = arith.addi %44, %54 : vector<256x1xi32>
    %56 = arith.select %53, %55, %44 : vector<256x1xi1>, vector<256x1xi32>
    %c15_i32 = arith.constant 15 : i32
    %57 = vector.broadcast %c15_i32 : i32 to vector<256x1xi32>
    %58 = arith.cmpi eq, %56, %57 : vector<256x1xi32>
    %cst_24 = arith.constant 0.000000e+00 : bf16
    %59 = vector.broadcast %cst_24 : bf16 to vector<256x128xbf16>
    %60 = vector.shape_cast %58 : vector<256x1xi1> to vector<256x1xi1>
    %61 = vector.broadcast %60 : vector<256x1xi1> to vector<256x128xi1>
    %62 = arith.select %61, %59, %40 : vector<256x128xi1>, vector<256x128xbf16>
    %c16_25 = arith.constant 16 : index
    %c256 = arith.constant 256 : index
    %63 = vector.load %arg7[%c16_25, %c256] : memref<288x384xbf16, #tpu.memory_space<vmem>>, vector<256x128xbf16>
    tpu.vector_store %arg7[%c16_25, %c256], %62 {strides = array<i32>} : memref<288x384xbf16, #tpu.memory_space<vmem>>, vector<256x128xbf16>,
    %c0_26 = arith.constant 0 : index
    %c0_27 = arith.constant 0 : index
    %64 = vector.load %arg7[%c0_26, %c0_27] : memref<288x384xbf16, #tpu.memory_space<vmem>>, vector<256x384xbf16>
    %c0_28 = arith.constant 0 : index
    %c0_29 = arith.constant 0 : index
    %c0_30 = arith.constant 0 : index
    %65 = vector.load %arg4[%c0_28, %c0_29, %c0_30] : memref<3x384x128xbf16, #tpu.memory_space<vmem>>, vector<1x384x128xbf16>
    %66 = vector.shape_cast %65 : vector<1x384x128xbf16> to vector<384x128xbf16>
    %cst_31 = arith.constant dense<0.000000e+00> : vector<256x128xf32>
    %67 = tpu.matmul %64, %66, %cst_31 {dimension_numbers = #tpu.dot_dimension_numbers<[1], [0], [0], [1], [0, 0, 1, 1], [], []>} : vector<256x384xbf16>, vector<384x128xbf16>, vector<256x128xf32> -> vector<256x128xf32>
    %c0_32 = arith.constant 0 : index
    %c0_33 = arith.constant 0 : index
    %68 = vector.load %arg8[%c0_32, %c0_33] : memref<256x128xf32, #tpu.memory_space<vmem>>, vector<256x128xf32>
    tpu.vector_store %arg8[%c0_32, %c0_33], %67 {strides = array<i32>} : memref<256x128xf32, #tpu.memory_space<vmem>>, vector<256x128xf32>,
    %c0_34 = arith.constant 0 : index
    %c0_35 = arith.constant 0 : index
    %69 = vector.load %arg8[%c0_34, %c0_35] : memref<256x128xf32, #tpu.memory_space<vmem>>, vector<256x128xf32>
    %c16_36 = arith.constant 16 : index
    %c0_37 = arith.constant 0 : index
    %70 = vector.load %arg7[%c16_36, %c0_37] : memref<288x384xbf16, #tpu.memory_space<vmem>>, vector<256x384xbf16>
    %c1 = arith.constant 1 : index
    %c0_38 = arith.constant 0 : index
    %c0_39 = arith.constant 0 : index
    %71 = vector.load %arg4[%c1, %c0_38, %c0_39] : memref<3x384x128xbf16, #tpu.memory_space<vmem>>, vector<1x384x128xbf16>
    %72 = vector.shape_cast %71 : vector<1x384x128xbf16> to vector<384x128xbf16>
    %cst_40 = arith.constant dense<0.000000e+00> : vector<256x128xf32>
    %73 = tpu.matmul %70, %72, %cst_40 {dimension_numbers = #tpu.dot_dimension_numbers<[1], [0], [0], [1], [0, 0, 1, 1], [], []>} : vector<256x384xbf16>, vector<384x128xbf16>, vector<256x128xf32> -> vector<256x128xf32>
    %74 = arith.addf %69, %73 : vector<256x128xf32>
    %c0_41 = arith.constant 0 : index
    %c0_42 = arith.constant 0 : index
    %75 = vector.load %arg8[%c0_41, %c0_42] : memref<256x128xf32, #tpu.memory_space<vmem>>, vector<256x128xf32>
    tpu.vector_store %arg8[%c0_41, %c0_42], %74 {strides = array<i32>} : memref<256x128xf32, #tpu.memory_space<vmem>>, vector<256x128xf32>,
    %c0_43 = arith.constant 0 : index
    %c0_44 = arith.constant 0 : index
    %76 = vector.load %arg8[%c0_43, %c0_44] : memref<256x128xf32, #tpu.memory_space<vmem>>, vector<256x128xf32>
    %c32 = arith.constant 32 : index
    %c0_45 = arith.constant 0 : index
    %77 = vector.load %arg7[%c32, %c0_45] : memref<288x384xbf16, #tpu.memory_space<vmem>>, vector<256x384xbf16>
    %c2 = arith.constant 2 : index
    %c0_46 = arith.constant 0 : index
    %c0_47 = arith.constant 0 : index
    %78 = vector.load %arg4[%c2, %c0_46, %c0_47] : memref<3x384x128xbf16, #tpu.memory_space<vmem>>, vector<1x384x128xbf16>
    %79 = vector.shape_cast %78 : vector<1x384x128xbf16> to vector<384x128xbf16>
    %cst_48 = arith.constant dense<0.000000e+00> : vector<256x128xf32>
    %80 = tpu.matmul %77, %79, %cst_48 {dimension_numbers = #tpu.dot_dimension_numbers<[1], [0], [0], [1], [0, 0, 1, 1], [], []>} : vector<256x384xbf16>, vector<384x128xbf16>, vector<256x128xf32> -> vector<256x128xf32>
    %81 = arith.addf %76, %80 : vector<256x128xf32>
    %c0_49 = arith.constant 0 : index
    %c0_50 = arith.constant 0 : index
    %82 = vector.load %arg8[%c0_49, %c0_50] : memref<256x128xf32, #tpu.memory_space<vmem>>, vector<256x128xf32>
    tpu.vector_store %arg8[%c0_49, %c0_50], %81 {strides = array<i32>} : memref<256x128xf32, #tpu.memory_space<vmem>>, vector<256x128xf32>,
    %c0_51 = arith.constant 0 : index
    %c0_52 = arith.constant 0 : index
    %83 = vector.load %arg8[%c0_51, %c0_52] : memref<256x128xf32, #tpu.memory_space<vmem>>, vector<256x128xf32>
    %84 = arith.truncf %83 : vector<256x128xf32> to vector<256x128xbf16>
    %c0_53 = arith.constant 0 : index
    %c0_54 = arith.constant 0 : index
    %85 = vector.load %arg5[%c0_53, %c0_54] : memref<256x128xbf16, #tpu.memory_space<vmem>>, vector<256x128xbf16>
    tpu.vector_store %arg5[%c0_53, %c0_54], %84 {strides = array<i32>} : memref<256x128xbf16, #tpu.memory_space<vmem>>, vector<256x128xbf16>,
    %cst_55 = arith.constant dense<0.000000e+00> : vector<128xf32>
    %86 = vector.multi_reduction <add>, %83, %cst_55 [0] : vector<256x128xf32> to vector<128xf32>
    %87 = vector.shape_cast %86 : vector<128xf32> to vector<1x128xf32>
    %88 = arith.mulf %83, %83 : vector<256x128xf32>
    %cst_56 = arith.constant dense<0.000000e+00> : vector<128xf32>
    %89 = vector.multi_reduction <add>, %88, %cst_56 [0] : vector<256x128xf32> to vector<128xf32>
    %90 = vector.shape_cast %89 : vector<128xf32> to vector<1x128xf32>
    %91 = tpu.concatenate %87, %90 in 0 : vector<1x128xf32>, vector<1x128xf32> -> vector<2x128xf32>
    %92 = vector.shape_cast %91 : vector<2x128xf32> to vector<1x2x128xf32>
    %c0_57 = arith.constant 0 : index
    %c0_58 = arith.constant 0 : index
    %c0_59 = arith.constant 0 : index
    %93 = vector.load %arg6[%c0_57, %c0_58, %c0_59] : memref<1x2x128xf32, #tpu.memory_space<vmem>>, vector<1x2x128xf32>
    tpu.vector_store %arg6[%c0_57, %c0_58, %c0_59], %92 {strides = array<i32>} : memref<1x2x128xf32, #tpu.memory_space<vmem>>, vector<1x2x128xf32>,
    return
  }
  func.func @transform_0(%arg0: i32) -> (i32, i32) {
    %c0_i32 = arith.constant 0 : i32
    %c0_i32_0 = arith.constant 0 : i32
    return %arg0, %c0_i32 : i32, i32
  }
  func.func @transform_1(%arg0: i32) -> (i32, i32) {
    %c0_i32 = arith.constant 0 : i32
    %c0_i32_0 = arith.constant 0 : i32
    %c0_i32_1 = arith.constant 0 : i32
    return %c0_i32, %c0_i32_0 : i32, i32
  }
  func.func @transform_2(%arg0: i32) -> (i32, i32) {
    %c0_i32 = arith.constant 0 : i32
    %c0_i32_0 = arith.constant 0 : i32
    %c0_i32_1 = arith.constant 0 : i32
    return %c0_i32, %c0_i32_0 : i32, i32
  }
  func.func @transform_3(%arg0: i32) -> (i32, i32, i32) {
    %c0_i32 = arith.constant 0 : i32
    %c0_i32_0 = arith.constant 0 : i32
    %c0_i32_1 = arith.constant 0 : i32
    %c0_i32_2 = arith.constant 0 : i32
    return %c0_i32, %c0_i32_0, %c0_i32_1 : i32, i32, i32
  }
  func.func @transform_4(%arg0: i32) -> (i32, i32) {
    %c0_i32 = arith.constant 0 : i32
    %c0_i32_0 = arith.constant 0 : i32
    return %arg0, %c0_i32 : i32, i32
  }
  func.func @transform_5(%arg0: i32) -> (i32, i32, i32) {
    %c0_i32 = arith.constant 0 : i32
    %c0_i32_0 = arith.constant 0 : i32
    %c0_i32_1 = arith.constant 0 : i32
    return %arg0, %c0_i32, %c0_i32_0 : i32, i32, i32
  }
}

module attributes {stable_mosaic.version = 11 : i64} {
  func.func @bn_relu_conv1x1_stats_kernel(%arg0: i32, %arg1: memref<512x128xbf16, #tpu.memory_space<vmem>>, %arg2: memref<1x128xf32, #tpu.memory_space<vmem>>, %arg3: memref<1x128xf32, #tpu.memory_space<vmem>>, %arg4: memref<128x128xbf16, #tpu.memory_space<vmem>>, %arg5: memref<512x128xbf16, #tpu.memory_space<vmem>>, %arg6: memref<1x2x128xf32, #tpu.memory_space<vmem>>) attributes {dimension_semantics = [#tpu.dimension_semantics<parallel>], iteration_bounds = array<i64: 1>, scalar_prefetch = 0 : i64, scratch_operands = 0 : i64, tpu.core_type = #tpu.core_type<tc>, window_params = [{transform_indices = @transform_0, window_bounds = array<i64: 512, 128>}, {pipeline_mode = #tpu.pipeline_mode<synchronous>, transform_indices = @transform_1, window_bounds = array<i64: 1, 128>}, {pipeline_mode = #tpu.pipeline_mode<synchronous>, transform_indices = @transform_2, window_bounds = array<i64: 1, 128>}, {pipeline_mode = #tpu.pipeline_mode<synchronous>, transform_indices = @transform_3, window_bounds = array<i64: 128, 128>}, {transform_indices = @transform_4, window_bounds = array<i64: 512, 128>}, {transform_indices = @transform_5, window_bounds = array<i64: 1, 2, 128>}]} {
    %c0 = arith.constant 0 : index
    %c0_0 = arith.constant 0 : index
    %0 = vector.load %arg1[%c0, %c0_0] : memref<512x128xbf16, #tpu.memory_space<vmem>>, vector<512x128xbf16>
    %1 = arith.extf %0 : vector<512x128xbf16> to vector<512x128xf32>
    %c0_1 = arith.constant 0 : index
    %c0_2 = arith.constant 0 : index
    %2 = vector.load %arg2[%c0_1, %c0_2] : memref<1x128xf32, #tpu.memory_space<vmem>>, vector<1x128xf32>
    %3 = vector.broadcast %2 : vector<1x128xf32> to vector<512x128xf32>
    %4 = arith.mulf %1, %3 : vector<512x128xf32>
    %c0_3 = arith.constant 0 : index
    %c0_4 = arith.constant 0 : index
    %5 = vector.load %arg3[%c0_3, %c0_4] : memref<1x128xf32, #tpu.memory_space<vmem>>, vector<1x128xf32>
    %6 = vector.broadcast %5 : vector<1x128xf32> to vector<512x128xf32>
    %7 = arith.addf %4, %6 : vector<512x128xf32>
    %cst = arith.constant 0.000000e+00 : f32
    %8 = vector.broadcast %cst : f32 to vector<512x128xf32>
    %9 = arith.maximumf %7, %8 : vector<512x128xf32>
    %10 = arith.truncf %9 : vector<512x128xf32> to vector<512x128xbf16>
    %c0_5 = arith.constant 0 : index
    %c0_6 = arith.constant 0 : index
    %11 = vector.load %arg4[%c0_5, %c0_6] : memref<128x128xbf16, #tpu.memory_space<vmem>>, vector<128x128xbf16>
    %cst_7 = arith.constant dense<0.000000e+00> : vector<512x128xf32>
    %12 = tpu.matmul %10, %11, %cst_7 {dimension_numbers = #tpu.dot_dimension_numbers<[1], [0], [0], [1], [0, 0, 1, 1], [], []>} : vector<512x128xbf16>, vector<128x128xbf16>, vector<512x128xf32> -> vector<512x128xf32>
    %13 = arith.truncf %12 : vector<512x128xf32> to vector<512x128xbf16>
    %c0_8 = arith.constant 0 : index
    %c0_9 = arith.constant 0 : index
    %14 = vector.load %arg5[%c0_8, %c0_9] : memref<512x128xbf16, #tpu.memory_space<vmem>>, vector<512x128xbf16>
    tpu.vector_store %arg5[%c0_8, %c0_9], %13 {strides = array<i32>} : memref<512x128xbf16, #tpu.memory_space<vmem>>, vector<512x128xbf16>,
    %cst_10 = arith.constant dense<0.000000e+00> : vector<128xf32>
    %15 = vector.multi_reduction <add>, %12, %cst_10 [0] : vector<512x128xf32> to vector<128xf32>
    %16 = vector.shape_cast %15 : vector<128xf32> to vector<1x128xf32>
    %17 = arith.mulf %12, %12 : vector<512x128xf32>
    %cst_11 = arith.constant dense<0.000000e+00> : vector<128xf32>
    %18 = vector.multi_reduction <add>, %17, %cst_11 [0] : vector<512x128xf32> to vector<128xf32>
    %19 = vector.shape_cast %18 : vector<128xf32> to vector<1x128xf32>
    %20 = tpu.concatenate %16, %19 in 0 : vector<1x128xf32>, vector<1x128xf32> -> vector<2x128xf32>
    %21 = vector.shape_cast %20 : vector<2x128xf32> to vector<1x2x128xf32>
    %c0_12 = arith.constant 0 : index
    %c0_13 = arith.constant 0 : index
    %c0_14 = arith.constant 0 : index
    %22 = vector.load %arg6[%c0_12, %c0_13, %c0_14] : memref<1x2x128xf32, #tpu.memory_space<vmem>>, vector<1x2x128xf32>
    tpu.vector_store %arg6[%c0_12, %c0_13, %c0_14], %21 {strides = array<i32>} : memref<1x2x128xf32, #tpu.memory_space<vmem>>, vector<1x2x128xf32>,
    return
  }
  func.func @transform_0(%arg0: i32) -> (i32, i32) {
    %c0_i32 = arith.constant 0 : i32
    %c0_i32_0 = arith.constant 0 : i32
    return %arg0, %c0_i32 : i32, i32
  }
  func.func @transform_1(%arg0: i32) -> (i32, i32) {
    %c0_i32 = arith.constant 0 : i32
    %c0_i32_0 = arith.constant 0 : i32
    %c0_i32_1 = arith.constant 0 : i32
    return %c0_i32, %c0_i32_0 : i32, i32
  }
  func.func @transform_2(%arg0: i32) -> (i32, i32) {
    %c0_i32 = arith.constant 0 : i32
    %c0_i32_0 = arith.constant 0 : i32
    %c0_i32_1 = arith.constant 0 : i32
    return %c0_i32, %c0_i32_0 : i32, i32
  }
  func.func @transform_3(%arg0: i32) -> (i32, i32) {
    %c0_i32 = arith.constant 0 : i32
    %c0_i32_0 = arith.constant 0 : i32
    %c0_i32_1 = arith.constant 0 : i32
    return %c0_i32, %c0_i32_0 : i32, i32
  }
  func.func @transform_4(%arg0: i32) -> (i32, i32) {
    %c0_i32 = arith.constant 0 : i32
    %c0_i32_0 = arith.constant 0 : i32
    return %arg0, %c0_i32 : i32, i32
  }
  func.func @transform_5(%arg0: i32) -> (i32, i32, i32) {
    %c0_i32 = arith.constant 0 : i32
    %c0_i32_0 = arith.constant 0 : i32
    %c0_i32_1 = arith.constant 0 : i32
    return %arg0, %c0_i32, %c0_i32_0 : i32, i32, i32
  }
}

module attributes {stable_mosaic.version = 11 : i64} {
  func.func @bn_add_relu_kernel(%arg0: i32, %arg1: memref<512x128xbf16, #tpu.memory_space<vmem>>, %arg2: memref<1x128xf32, #tpu.memory_space<vmem>>, %arg3: memref<1x128xf32, #tpu.memory_space<vmem>>, %arg4: memref<512x128xbf16, #tpu.memory_space<vmem>>, %arg5: memref<512x128xbf16, #tpu.memory_space<vmem>>) attributes {dimension_semantics = [#tpu.dimension_semantics<parallel>], iteration_bounds = array<i64: 1>, scalar_prefetch = 0 : i64, scratch_operands = 0 : i64, tpu.core_type = #tpu.core_type<tc>, window_params = [{transform_indices = @transform_0, window_bounds = array<i64: 512, 128>}, {pipeline_mode = #tpu.pipeline_mode<synchronous>, transform_indices = @transform_1, window_bounds = array<i64: 1, 128>}, {pipeline_mode = #tpu.pipeline_mode<synchronous>, transform_indices = @transform_2, window_bounds = array<i64: 1, 128>}, {transform_indices = @transform_3, window_bounds = array<i64: 512, 128>}, {transform_indices = @transform_4, window_bounds = array<i64: 512, 128>}]} {
    %c0 = arith.constant 0 : index
    %c0_0 = arith.constant 0 : index
    %0 = vector.load %arg1[%c0, %c0_0] : memref<512x128xbf16, #tpu.memory_space<vmem>>, vector<512x128xbf16>
    %1 = arith.extf %0 : vector<512x128xbf16> to vector<512x128xf32>
    %c0_1 = arith.constant 0 : index
    %c0_2 = arith.constant 0 : index
    %2 = vector.load %arg2[%c0_1, %c0_2] : memref<1x128xf32, #tpu.memory_space<vmem>>, vector<1x128xf32>
    %3 = vector.broadcast %2 : vector<1x128xf32> to vector<512x128xf32>
    %4 = arith.mulf %1, %3 : vector<512x128xf32>
    %c0_3 = arith.constant 0 : index
    %c0_4 = arith.constant 0 : index
    %5 = vector.load %arg3[%c0_3, %c0_4] : memref<1x128xf32, #tpu.memory_space<vmem>>, vector<1x128xf32>
    %6 = vector.broadcast %5 : vector<1x128xf32> to vector<512x128xf32>
    %7 = arith.addf %4, %6 : vector<512x128xf32>
    %c0_5 = arith.constant 0 : index
    %c0_6 = arith.constant 0 : index
    %8 = vector.load %arg4[%c0_5, %c0_6] : memref<512x128xbf16, #tpu.memory_space<vmem>>, vector<512x128xbf16>
    %9 = arith.extf %8 : vector<512x128xbf16> to vector<512x128xf32>
    %10 = arith.addf %7, %9 : vector<512x128xf32>
    %cst = arith.constant 0.000000e+00 : f32
    %11 = vector.broadcast %cst : f32 to vector<512x128xf32>
    %12 = arith.maximumf %10, %11 : vector<512x128xf32>
    %13 = arith.truncf %12 : vector<512x128xf32> to vector<512x128xbf16>
    %c0_7 = arith.constant 0 : index
    %c0_8 = arith.constant 0 : index
    %14 = vector.load %arg5[%c0_7, %c0_8] : memref<512x128xbf16, #tpu.memory_space<vmem>>, vector<512x128xbf16>
    tpu.vector_store %arg5[%c0_7, %c0_8], %13 {strides = array<i32>} : memref<512x128xbf16, #tpu.memory_space<vmem>>, vector<512x128xbf16>,
    return
  }
  func.func @transform_0(%arg0: i32) -> (i32, i32) {
    %c0_i32 = arith.constant 0 : i32
    %c0_i32_0 = arith.constant 0 : i32
    return %arg0, %c0_i32 : i32, i32
  }
  func.func @transform_1(%arg0: i32) -> (i32, i32) {
    %c0_i32 = arith.constant 0 : i32
    %c0_i32_0 = arith.constant 0 : i32
    %c0_i32_1 = arith.constant 0 : i32
    return %c0_i32, %c0_i32_0 : i32, i32
  }
  func.func @transform_2(%arg0: i32) -> (i32, i32) {
    %c0_i32 = arith.constant 0 : i32
    %c0_i32_0 = arith.constant 0 : i32
    %c0_i32_1 = arith.constant 0 : i32
    return %c0_i32, %c0_i32_0 : i32, i32
  }
  func.func @transform_3(%arg0: i32) -> (i32, i32) {
    %c0_i32 = arith.constant 0 : i32
    %c0_i32_0 = arith.constant 0 : i32
    return %arg0, %c0_i32 : i32, i32
  }
  func.func @transform_4(%arg0: i32) -> (i32, i32) {
    %c0_i32 = arith.constant 0 : i32
    %c0_i32_0 = arith.constant 0 : i32
    return %arg0, %c0_i32 : i32, i32
  }
}

</mosaic_0001>

<bundles_post_ra>
// kernel: bottleneck_forward.4
= control target key start
LH: loop header
LB: loop body
LE: loop exit
PB: predicated region body
PF: predicated region fallthrough
CT: control target
= control target key end

     0   :  { %vm1145_vm0 = vcmask 1040384   ;;  %s2122_s1 = inlined_call_operand.vmem [shape: bf16[128,128], index: 1, kind: input, shape index: {}]   ;;  %s2123_s0 = inlined_call_operand.vmem [shape: bf16[512,128], index: 0, kind: input, shape index: {}]   ;;  %s2124_s2 = inlined_call_operand.vmem [shape: bf16[512,128], index: 2, kind: output, shape index: {0}]   ;;  %s2125_s3 = inlined_call_operand.vmem [shape: f32[1,2,128], index: 3, kind: output, shape index: {1}]  }
   0x1   :  { %v1651_v0 = vld [vmem:[%s2122_s1 + $0x38] sm:$0xff]   ;;  %v1652_v1 = vld [vmem:[%s2122_s1 + $0x30] sm:$0xff]   ;;  %v1653_v2 = vld [vmem:[%s2122_s1 + $0x28] sm:$0xff]  }
   0x2   :  { %1555 = vmatprep.subr.bf16.mxu0 %v1651_v0  ;;  %1635 = vmatprep.subr.bf16.mxu1 %v1651_v0  ;;  %v1654_v3 = vld [vmem:[%s2122_s1 + $0x20] sm:$0xff]   ;;  %v1655_v5 = vld [vmem:[%s2122_s1 + $0x18] sm:$0xff]   ;;  %v1656_v6 = vld [vmem:[%s2122_s1 + $0x10] sm:$0xff]  }
   0x3   :  { %1556 = vmatpush3.bf16.msra.mxu0 %v1651_v0  ;;  %1643 = vmatpush3.bf16.msra.mxu1 %v1651_v0  ;;  %v1659_v4 = vld [vmem:[%s2123_s0] sm:$0xff]   ;;  %v1657_v7 = vld [vmem:[%s2122_s1 + $0x8] sm:$0xff]   ;;  %v1661_v11 = vld [vmem:[%s2123_s0 + $0x10] sm:$0xff]  }
   0x4   :  { %1557 = vmatprep.subr.bf16.mxu0 %v1652_v1  ;;  %1636 = vmatprep.subr.bf16.mxu1 %v1652_v1  ;;  %v1658_v8 = vld [vmem:[%s2122_s1] sm:$0xff]   ;;  %v1660_v10 = vld [vmem:[%s2123_s0 + $0x8] sm:$0xff]   ;;  %v1677_v13 = vld [vmem:[%s2123_s0 + $0x90] sm:$0xff]  }
   0x5   :  { %1571 = vmatprep.mubr.bf16.mxu0 %v1659_v4  ;;  %v1675_v9 = vld [vmem:[%s2123_s0 + $0x80] sm:$0xff]   ;;  %v1676_v12 = vld [vmem:[%s2123_s0 + $0x88] sm:$0xff]   ;;  %v1662_v14 = vld [vmem:[%s2123_s0 + $0x18] sm:$0xff]  }
   0x6   :  { %1603 = vmatprep.mubr.bf16.mxu1 %v1675_v9  ;;  %v1663_v15 = vld [vmem:[%s2123_s0 + $0x20] sm:$0xff]   ;;  %v1678_v16 = vld [vmem:[%s2123_s0 + $0x98] sm:$0xff]   ;;  %v1664_v18 = vld [vmem:[%s2123_s0 + $0x28] sm:$0xff]  }
   0x7   :  { %1558 = vmatpush3.bf16.msra.mxu0 %v1652_v1  ;;  %1644 = vmatpush3.bf16.msra.mxu1 %v1652_v1  ;;  %v1679_v17 = vld [vmem:[%s2123_s0 + $0xa0] sm:$0xff]   ;;  %v1680_v19 = vld [vmem:[%s2123_s0 + $0xa8] sm:$0xff]   ;;  %v1665_v20 = vld [vmem:[%s2123_s0 + $0x30] sm:$0xff]  }
   0x8   :  { %1559 = vmatprep.subr.bf16.mxu0 %v1653_v2  ;;  %1637 = vmatprep.subr.bf16.mxu1 %v1653_v2  ;;  %v1681_v21 = vld [vmem:[%s2123_s0 + $0xb0] sm:$0xff]   ;;  %v1666_v22 = vld [vmem:[%s2123_s0 + $0x38] sm:$0xff]   ;;  %v1667_v24 = vld [vmem:[%s2123_s0 + $0x40] sm:$0xff]  }
   0x9   :  { %v1682_v23 = vld [vmem:[%s2123_s0 + $0xb8] sm:$0xff]   ;;  %v1683_v25 = vld [vmem:[%s2123_s0 + $0xc0] sm:$0xff]   ;;  %v1668_v26 = vld [vmem:[%s2123_s0 + $0x48] sm:$0xff]  }
   0xa   :  { %v1684_v27 = vld [vmem:[%s2123_s0 + $0xc8] sm:$0xff]   ;;  %v1669_v28 = vld [vmem:[%s2123_s0 + $0x50] sm:$0xff]   ;;  %v1670_v30 = vld [vmem:[%s2123_s0 + $0x58] sm:$0xff]  }
   0xb   :  { %1560 = vmatpush3.bf16.msra.mxu0 %v1653_v2  ;;  %1645 = vmatpush3.bf16.msra.mxu1 %v1653_v2  ;;  %v1685_v29 = vld [vmem:[%s2123_s0 + $0xd0] sm:$0xff]   ;;  %v1686_v31 = vld [vmem:[%s2123_s0 + $0xd8] sm:$0xff]   ;;  %v1671_v32 = vld [vmem:[%s2123_s0 + $0x60] sm:$0xff]  }
   0xc   :  { %1561 = vmatprep.subr.bf16.mxu0 %v1654_v3  ;;  %1638 = vmatprep.subr.bf16.mxu1 %v1654_v3  ;;  %v1687_v33 = vld [vmem:[%s2123_s0 + $0xe0] sm:$0xff]   ;;  %v1672_v34 = vld [vmem:[%s2123_s0 + $0x68] sm:$0xff]   ;;  %v1673_v36 = vld [vmem:[%s2123_s0 + $0x70] sm:$0xff]  }
   0xd   :  { %v1688_v35 = vld [vmem:[%s2123_s0 + $0xe8] sm:$0xff]   ;;  %v1689_v37 = vld [vmem:[%s2123_s0 + $0xf0] sm:$0xff]   ;;  %v1674_v38 = vld [vmem:[%s2123_s0 + $0x78] sm:$0xff]  }
   0xe   :  { %v1690_v39 = vld [vmem:[%s2123_s0 + $0xf8] sm:$0xff]  }
   0xf   :  { %1562 = vmatpush3.bf16.msra.mxu0 %v1654_v3  ;;  %1646 = vmatpush3.bf16.msra.mxu1 %v1654_v3 }
  0x10   :  { %1563 = vmatprep.subr.bf16.mxu0 %v1655_v5  ;;  %1639 = vmatprep.subr.bf16.mxu1 %v1655_v5 }
  0x13   :  { %1564 = vmatpush3.bf16.msra.mxu0 %v1655_v5  ;;  %1647 = vmatpush3.bf16.msra.mxu1 %v1655_v5 }
  0x14   :  { %1565 = vmatprep.subr.bf16.mxu0 %v1656_v6  ;;  %1640 = vmatprep.subr.bf16.mxu1 %v1656_v6 }
  0x17   :  { %1566 = vmatpush3.bf16.msra.mxu0 %v1656_v6  ;;  %1648 = vmatpush3.bf16.msra.mxu1 %v1656_v6 }
  0x18   :  { %1567 = vmatprep.subr.bf16.mxu0 %v1657_v7  ;;  %1641 = vmatprep.subr.bf16.mxu1 %v1657_v7 }
  0x1b   :  { %1568 = vmatpush3.bf16.msra.mxu0 %v1657_v7  ;;  %1649 = vmatpush3.bf16.msra.mxu1 %v1657_v7 }
  0x1c   :  { %1569 = vmatprep.subr.bf16.mxu0 %v1658_v8  ;;  %1642 = vmatprep.subr.bf16.mxu1 %v1658_v8 }
  0x1f   :  { %1570 = vmatpush3.bf16.msra.mxu0 %v1658_v8  ;;  %1650 = vmatpush3.bf16.msra.mxu1 %v1658_v8 }
  0x22   :  { %1572 = vmatmul.mubr.bf16.vlgmr.msra.gmra.mxu0 %v1660_v10  ;;  %1604 = vmatmul.mubr.bf16.vlgmr.msra.gmra.mxu1 %v1676_v12 }
  0x23   :  { %1575 = vmatprep.mubr.bf16.mxu0 %v1661_v11  ;;  %1607 = vmatprep.mubr.bf16.mxu1 %v1677_v13 }
  0x2a   :  { %1576 = vmatmul.mubr.bf16.gmra.mxu0 %v1662_v14  ;;  %1608 = vmatmul.mubr.bf16.gmra.mxu1 %v1678_v16 }
  0x2b   :  { %1579 = vmatprep.mubr.bf16.mxu0 %v1663_v15  ;;  %1611 = vmatprep.mubr.bf16.mxu1 %v1679_v17 }
  0x32   :  { %1580 = vmatmul.mubr.bf16.gmra.mxu0 %v1664_v18  ;;  %1612 = vmatmul.mubr.bf16.gmra.mxu1 %v1680_v19 }
  0x33   :  { %1583 = vmatprep.mubr.bf16.mxu0 %v1665_v20  ;;  %1615 = vmatprep.mubr.bf16.mxu1 %v1681_v21 }
  0x3a   :  { %1584 = vmatmul.mubr.bf16.gmra.mxu0 %v1666_v22  ;;  %1616 = vmatmul.mubr.bf16.gmra.mxu1 %v1682_v23 }
  0x3b   :  { %1587 = vmatprep.mubr.bf16.mxu0 %v1667_v24  ;;  %1619 = vmatprep.mubr.bf16.mxu1 %v1683_v25 }
  0x42   :  { %1588 = vmatmul.mubr.bf16.gmra.mxu0 %v1668_v26  ;;  %1620 = vmatmul.mubr.bf16.gmra.mxu1 %v1684_v27 }
  0x43   :  { %1591 = vmatprep.mubr.bf16.mxu0 %v1669_v28  ;;  %1623 = vmatprep.mubr.bf16.mxu1 %v1685_v29 }
  0x4a   :  { %1592 = vmatmul.mubr.bf16.gmra.mxu0 %v1670_v30  ;;  %1624 = vmatmul.mubr.bf16.gmra.mxu1 %v1686_v31 }
  0x4b   :  { %1595 = vmatprep.mubr.bf16.mxu0 %v1671_v32  ;;  %1627 = vmatprep.mubr.bf16.mxu1 %v1687_v33 }
  0x52   :  { %1596 = vmatmul.mubr.bf16.gmra.mxu0 %v1672_v34  ;;  %1628 = vmatmul.mubr.bf16.gmra.mxu1 %v1688_v35 }
  0x53   :  { %1599 = vmatprep.mubr.bf16.mxu0 %v1673_v36  ;;  %1631 = vmatprep.mubr.bf16.mxu1 %v1689_v37 }
  0x5a   :  { %1600 = vmatmul.mubr.bf16.gmra.mxu0 %v1674_v38  ;;  %1632 = vmatmul.mubr.bf16.gmra.mxu1 %v1690_v39 }
  0xe2   :  { %v1573_v40 = vpop.f32.mrf.mxu0  ;;  %v1831_v41 = vpop.f32.mrf.mxu1 }
  0xe3   :  { %v1014_v57 = vmul.f32 %v1573_v40, %v1573_v40 }
  0xe4   :  { %v368_v42 = vpop.f32.mrf.mxu0  ;;  %v1833_v43 = vpop.f32.mrf.mxu1 }
  0xe5   :  { %v1012_v48 = vmul.f32 %v368_v42, %v368_v42 }
  0xe6   :  { %v1574_v44 = vpop.f32.mrf.mxu0  ;;  %v1835_v45 = vpop.f32.mrf.mxu1 }
  0xe7   :  { %v1332_v46 = vpack.c.bf16 %v1574_v44, %v1573_v40  ;;  %v1412_v47 = vpack.c.bf16 %v1835_v45, %v1831_v41  ;;  %v1015_v62 = vmul.f32 %v1574_v44, %v1574_v44 }
  0xe8   :  { %v371_v49 = vpop.f32.mrf.mxu0  ;;  %v1839_v50 = vpop.f32.mrf.mxu1 }
  0xe9   :  { %1484 = vst [vmem:[%s2124_s2 + $0x8] sm:$0xff] %v1332_v46   ;;  %v1327_v51 = vpack.c.bf16 %v371_v49, %v368_v42  ;;  %v943_v52 = vadd.f32 %v371_v49, %v368_v42  ;;  %v1013_v53 = vmul.f32 %v371_v49, %v371_v49  ;;  %1500 = vst [vmem:[%s2124_s2 + $0x88] sm:$0xff] %v1412_v47  }
  0xea   :  { %v1407_v54 = vpack.c.bf16 %v1839_v50, %v1833_v43  ;;  %v1577_v55 = vpop.f32.mrf.mxu0  ;;  %v1849_v56 = vpop.f32.mrf.mxu1 }
  0xeb   :  { %1328 = vst [vmem:[%s2124_s2] sm:$0xff] %v1327_v51   ;;  %v944_v58 = vadd.f32 %v1573_v40, %v943_v52  ;;  %v1076_v59 = vadd.f32 %v1013_v53, %v1012_v48  ;;  %v1018_v17 = vmul.f32 %v1577_v55, %v1577_v55 }
  0xec   :  { %1499 = vst [vmem:[%s2124_s2 + $0x80] sm:$0xff] %v1407_v54   ;;  %v384_v60 = vpop.f32.mrf.mxu0  ;;  %v1857_v61 = vpop.f32.mrf.mxu1 }
  0xed   :  { %v1077_v63 = vadd.f32 %v1076_v59, %v1014_v57  ;;  %v945_v0 = vadd.f32 %v1574_v44, %v944_v58  ;;  %v1016_v4 = vmul.f32 %v384_v60, %v384_v60 }
  0xee   :  { %v1578_v1 = vpop.f32.mrf.mxu0  ;;  %v1859_v2 = vpop.f32.mrf.mxu1 }
  0xef   :  { %v946_v3 = vadd.f32 %v945_v0, %v384_v60  ;;  %v1078_v5 = vadd.f32 %v1077_v63, %v1015_v62  ;;  %v1342_v6 = vpack.c.bf16 %v1578_v1, %v1577_v55  ;;  %v1422_v8 = vpack.c.bf16 %v1859_v2, %v1849_v56 }
  0xf0   :  { %v387_v7 = vpop.f32.mrf.mxu0  ;;  %v1863_v9 = vpop.f32.mrf.mxu1  ;;  %v1019_v22 = vmul.f32 %v1578_v1, %v1578_v1 }
  0xf1   :  { %v1079_v10 = vadd.f32 %v1078_v5, %v1016_v4  ;;  %1486 = vst [vmem:[%s2124_s2 + $0x18] sm:$0xff] %v1342_v6   ;;  %v1337_v11 = vpack.c.bf16 %v387_v7, %v384_v60  ;;  %v947_v12 = vadd.f32 %v946_v3, %v387_v7  ;;  %v1017_v13 = vmul.f32 %v387_v7, %v387_v7 }
  0xf2   :  { %v1581_v14 = vpop.f32.mrf.mxu0  ;;  %1502 = vst [vmem:[%s2124_s2 + $0x98] sm:$0xff] %v1422_v8   ;;  %v1417_v15 = vpack.c.bf16 %v1863_v9, %v1857_v61  ;;  %v1873_v16 = vpop.f32.mrf.mxu1 }
  0xf3   :  { %1485 = vst [vmem:[%s2124_s2 + $0x10] sm:$0xff] %v1337_v11   ;;  %v948_v18 = vadd.f32 %v1577_v55, %v947_v12  ;;  %v1080_v19 = vadd.f32 %v1079_v10, %v1017_v13  ;;  %v1022_v42 = vmul.f32 %v1581_v14, %v1581_v14 }
  0xf4   :  { %v400_v20 = vpop.f32.mrf.mxu0  ;;  %1501 = vst [vmem:[%s2124_s2 + $0x90] sm:$0xff] %v1417_v15   ;;  %v1881_v21 = vpop.f32.mrf.mxu1 }
  0xf5   :  { %v1081_v23 = vadd.f32 %v1080_v19, %v1018_v17  ;;  %v949_v24 = vadd.f32 %v1578_v1, %v948_v18  ;;  %v1020_v28 = vmul.f32 %v400_v20, %v400_v20 }
  0xf6   :  { %v1582_v25 = vpop.f32.mrf.mxu0  ;;  %v1883_v26 = vpop.f32.mrf.mxu1 }
  0xf7   :  { %v950_v27 = vadd.f32 %v949_v24, %v400_v20  ;;  %v1082_v29 = vadd.f32 %v1081_v23, %v1019_v22  ;;  %v1352_v30 = vpack.c.bf16 %v1582_v25, %v1581_v14  ;;  %v1432_v32 = vpack.c.bf16 %v1883_v26, %v1873_v16 }
  0xf8   :  { %v403_v31 = vpop.f32.mrf.mxu0  ;;  %v1887_v33 = vpop.f32.mrf.mxu1  ;;  %v1023_v49 = vmul.f32 %v1582_v25, %v1582_v25 }
  0xf9   :  { %v1083_v34 = vadd.f32 %v1082_v29, %v1020_v28  ;;  %1488 = vst [vmem:[%s2124_s2 + $0x28] sm:$0xff] %v1352_v30   ;;  %v1347_v35 = vpack.c.bf16 %v403_v31, %v400_v20  ;;  %v951_v36 = vadd.f32 %v950_v27, %v403_v31  ;;  %v1021_v37 = vmul.f32 %v403_v31, %v403_v31 }
  0xfa   :  { %v1585_v38 = vpop.f32.mrf.mxu0  ;;  %1504 = vst [vmem:[%s2124_s2 + $0xa8] sm:$0xff] %v1432_v32   ;;  %v1427_v39 = vpack.c.bf16 %v1887_v33, %v1881_v21  ;;  %v1897_v40 = vpop.f32.mrf.mxu1 }
  0xfb   :  { %1487 = vst [vmem:[%s2124_s2 + $0x20] sm:$0xff] %v1347_v35   ;;  %v952_v44 = vadd.f32 %v1581_v14, %v951_v36  ;;  %v1084_v46 = vadd.f32 %v1083_v34, %v1021_v37  ;;  %v1026_v8 = vmul.f32 %v1585_v38, %v1585_v38 }
  0xfc   :  { %v416_v47 = vpop.f32.mrf.mxu0  ;;  %1503 = vst [vmem:[%s2124_s2 + $0xa0] sm:$0xff] %v1427_v39   ;;  %v1905_v48 = vpop.f32.mrf.mxu1 }
  0xfd   :  { %v1085_v51 = vadd.f32 %v1084_v46, %v1022_v42  ;;  %v953_v52 = vadd.f32 %v1582_v25, %v952_v44  ;;  %v1024_v57 = vmul.f32 %v416_v47, %v416_v47 }
  0xfe   :  { %v1586_v53 = vpop.f32.mrf.mxu0  ;;  %v1907_v54 = vpop.f32.mrf.mxu1 }
  0xff   :  { %v954_v55 = vadd.f32 %v953_v52, %v416_v47  ;;  %v1086_v58 = vadd.f32 %v1085_v51, %v1023_v49  ;;  %v1362_v59 = vpack.c.bf16 %v1586_v53, %v1585_v38  ;;  %v1442_v62 = vpack.c.bf16 %v1907_v54, %v1897_v40 }
 0x100   :  { %v419_v60 = vpop.f32.mrf.mxu0  ;;  %v1911_v63 = vpop.f32.mrf.mxu1  ;;  %v1027_v14 = vmul.f32 %v1586_v53, %v1586_v53 }
 0x101   :  { %v1087_v0 = vadd.f32 %v1086_v58, %v1024_v57  ;;  %1490 = vst [vmem:[%s2124_s2 + $0x38] sm:$0xff] %v1362_v59   ;;  %v1357_v1 = vpack.c.bf16 %v419_v60, %v416_v47  ;;  %v955_v3 = vadd.f32 %v954_v55, %v419_v60  ;;  %v1025_v4 = vmul.f32 %v419_v60, %v419_v60 }
 0x102   :  { %v1589_v5 = vpop.f32.mrf.mxu0  ;;  %1506 = vst [vmem:[%s2124_s2 + $0xb8] sm:$0xff] %v1442_v62   ;;  %v1437_v6 = vpack.c.bf16 %v1911_v63, %v1905_v48  ;;  %v1921_v7 = vpop.f32.mrf.mxu1 }
 0x103   :  { %1489 = vst [vmem:[%s2124_s2 + $0x30] sm:$0xff] %v1357_v1   ;;  %v956_v10 = vadd.f32 %v1585_v38, %v955_v3  ;;  %v1088_v11 = vadd.f32 %v1087_v0, %v1025_v4  ;;  %v1030_v37 = vmul.f32 %v1589_v5, %v1589_v5 }
 0x104   :  { %v432_v12 = vpop.f32.mrf.mxu0  ;;  %1505 = vst [vmem:[%s2124_s2 + $0xb0] sm:$0xff] %v1437_v6   ;;  %v1929_v13 = vpop.f32.mrf.mxu1 }
 0x105   :  { %v1089_v15 = vadd.f32 %v1088_v11, %v1026_v8  ;;  %v957_v17 = vadd.f32 %v1586_v53, %v956_v10  ;;  %v1028_v22 = vmul.f32 %v432_v12, %v432_v12 }
 0x106   :  { %v1590_v18 = vpop.f32.mrf.mxu0  ;;  %v1931_v19 = vpop.f32.mrf.mxu1 }
 0x107   :  { %v958_v20 = vadd.f32 %v957_v17, %v432_v12  ;;  %v1090_v23 = vadd.f32 %v1089_v15, %v1027_v14  ;;  %v1372_v24 = vpack.c.bf16 %v1590_v18, %v1589_v5  ;;  %v1452_v27 = vpack.c.bf16 %v1931_v19, %v1921_v7 }
 0x108   :  { %v435_v25 = vpop.f32.mrf.mxu0  ;;  %v1935_v28 = vpop.f32.mrf.mxu1  ;;  %v1031_v46 = vmul.f32 %v1590_v18, %v1590_v18 }
 0x109   :  { %v1091_v29 = vadd.f32 %v1090_v23, %v1028_v22  ;;  %1492 = vst [vmem:[%s2124_s2 + $0x48] sm:$0xff] %v1372_v24   ;;  %v1367_v30 = vpack.c.bf16 %v435_v25, %v432_v12  ;;  %v959_v31 = vadd.f32 %v958_v20, %v435_v25  ;;  %v1029_v32 = vmul.f32 %v435_v25, %v435_v25 }
 0x10a   :  { %v1593_v34 = vpop.f32.mrf.mxu0  ;;  %1508 = vst [vmem:[%s2124_s2 + $0xc8] sm:$0xff] %v1452_v27   ;;  %v1447_v35 = vpack.c.bf16 %v1935_v28, %v1929_v13  ;;  %v1945_v36 = vpop.f32.mrf.mxu1 }
 0x10b   :  { %1491 = vst [vmem:[%s2124_s2 + $0x40] sm:$0xff] %v1367_v30   ;;  %v960_v38 = vadd.f32 %v1589_v5, %v959_v31  ;;  %v1092_v39 = vadd.f32 %v1091_v29, %v1029_v32  ;;  %v1034_v10 = vmul.f32 %v1593_v34, %v1593_v34 }
 0x10c   :  { %v448_v42 = vpop.f32.mrf.mxu0  ;;  %1507 = vst [vmem:[%s2124_s2 + $0xc0] sm:$0xff] %v1447_v35   ;;  %v1953_v44 = vpop.f32.mrf.mxu1 }
 0x10d   :  { %v1093_v47 = vadd.f32 %v1092_v39, %v1030_v37  ;;  %v961_v49 = vadd.f32 %v1590_v18, %v960_v38  ;;  %v1032_v55 = vmul.f32 %v448_v42, %v448_v42 }
 0x10e   :  { %v1594_v51 = vpop.f32.mrf.mxu0  ;;  %v1955_v52 = vpop.f32.mrf.mxu1 }
 0x10f   :  { %v962_v53 = vadd.f32 %v961_v49, %v448_v42  ;;  %v1094_v57 = vadd.f32 %v1093_v47, %v1031_v46  ;;  %v1382_v58 = vpack.c.bf16 %v1594_v51, %v1593_v34  ;;  %v1462_v60 = vpack.c.bf16 %v1955_v52, %v1945_v36 }
 0x110   :  { %v451_v59 = vpop.f32.mrf.mxu0  ;;  %v1959_v62 = vpop.f32.mrf.mxu1  ;;  %v1035_v17 = vmul.f32 %v1594_v51, %v1594_v51 }
 0x111   :  { %v1095_v0 = vadd.f32 %v1094_v57, %v1032_v55  ;;  %1494 = vst [vmem:[%s2124_s2 + $0x58] sm:$0xff] %v1382_v58   ;;  %v1377_v1 = vpack.c.bf16 %v451_v59, %v448_v42  ;;  %v963_v3 = vadd.f32 %v962_v53, %v451_v59  ;;  %v1033_v4 = vmul.f32 %v451_v59, %v451_v59 }
 0x112   :  { %v1597_v5 = vpop.f32.mrf.mxu0  ;;  %1510 = vst [vmem:[%s2124_s2 + $0xd8] sm:$0xff] %v1462_v60   ;;  %v1457_v6 = vpack.c.bf16 %v1959_v62, %v1953_v44  ;;  %v1969_v8 = vpop.f32.mrf.mxu1 }
 0x113   :  { %1493 = vst [vmem:[%s2124_s2 + $0x50] sm:$0xff] %v1377_v1   ;;  %v964_v11 = vadd.f32 %v1593_v34, %v963_v3  ;;  %v1096_v12 = vadd.f32 %v1095_v0, %v1033_v4  ;;  %v1038_v47 = vmul.f32 %v1597_v5, %v1597_v5 }
 0x114   :  { %v464_v14 = vpop.f32.mrf.mxu0  ;;  %1509 = vst [vmem:[%s2124_s2 + $0xd0] sm:$0xff] %v1457_v6   ;;  %v1977_v15 = vpop.f32.mrf.mxu1 }
 0x115   :  { %v1097_v18 = vadd.f32 %v1096_v12, %v1034_v10  ;;  %v965_v20 = vadd.f32 %v1594_v51, %v964_v11  ;;  %v1036_v25 = vmul.f32 %v464_v14, %v464_v14 }
 0x116   :  { %v1598_v22 = vpop.f32.mrf.mxu0  ;;  %v1979_v23 = vpop.f32.mrf.mxu1 }
 0x117   :  { %v966_v24 = vadd.f32 %v965_v20, %v464_v14  ;;  %v1098_v27 = vadd.f32 %v1097_v18, %v1035_v17  ;;  %v1392_v29 = vpack.c.bf16 %v1598_v22, %v1597_v5  ;;  %v1472_v31 = vpack.c.bf16 %v1979_v23, %v1969_v8 }
 0x118   :  { %v467_v30 = vpop.f32.mrf.mxu0  ;;  %v1983_v32 = vpop.f32.mrf.mxu1  ;;  %v1039_v57 = vmul.f32 %v1598_v22, %v1598_v22 }
 0x119   :  { %v1099_v34 = vadd.f32 %v1098_v27, %v1036_v25  ;;  %1496 = vst [vmem:[%s2124_s2 + $0x68] sm:$0xff] %v1392_v29   ;;  %v1387_v35 = vpack.c.bf16 %v467_v30, %v464_v14  ;;  %v967_v37 = vadd.f32 %v966_v24, %v467_v30  ;;  %v1037_v38 = vmul.f32 %v467_v30, %v467_v30 }
 0x11a   :  { %v1601_v39 = vpop.f32.mrf.mxu0  ;;  %1512 = vst [vmem:[%s2124_s2 + $0xe8] sm:$0xff] %v1472_v31   ;;  %v1467_v42 = vpack.c.bf16 %v1983_v32, %v1977_v15  ;;  %v1993_v46 = vpop.f32.mrf.mxu1  ;;  %v1044_v31 = vmul.f32 %v1833_v43, %v1833_v43 }
 0x11b   :  { %1495 = vst [vmem:[%s2124_s2 + $0x60] sm:$0xff] %v1387_v35   ;;  %v968_v49 = vadd.f32 %v1597_v5, %v967_v37  ;;  %v1100_v51 = vadd.f32 %v1099_v34, %v1037_v38  ;;  %v1045_v38 = vmul.f32 %v1839_v50, %v1839_v50 }
 0x11c   :  { %v480_v53 = vpop.f32.mrf.mxu0  ;;  %1511 = vst [vmem:[%s2124_s2 + $0xe0] sm:$0xff] %v1467_v42   ;;  %v2001_v55 = vpop.f32.mrf.mxu1  ;;  %v1046_v42 = vmul.f32 %v1831_v41, %v1831_v41 }
 0x11d   :  { %v1101_v58 = vadd.f32 %v1100_v51, %v1038_v47  ;;  %v969_v59 = vadd.f32 %v1598_v22, %v968_v49  ;;  %v1040_v3 = vmul.f32 %v480_v53, %v480_v53  ;;  %v1042_v22 = vmul.f32 %v1601_v39, %v1601_v39 }
 0x11e   :  { %v1602_v60 = vpop.f32.mrf.mxu0  ;;  %v2003_v0 = vpop.f32.mrf.mxu1  ;;  %v1047_v51 = vmul.f32 %v1835_v45, %v1835_v45 }
 0x11f   :  { %v970_v1 = vadd.f32 %v969_v59, %v480_v53  ;;  %v1102_v4 = vadd.f32 %v1101_v58, %v1039_v57  ;;  %v1402_v6 = vpack.c.bf16 %v1602_v60, %v1601_v39  ;;  %v1482_v5 = vpack.c.bf16 %v2003_v0, %v1993_v46 }
 0x120   :  { %v483_v10 = vpop.f32.mrf.mxu0  ;;  %v2007_v11 = vpop.f32.mrf.mxu1  ;;  %v1043_v27 = vmul.f32 %v1602_v60, %v1602_v60  ;;  %v1048_v58 = vmul.f32 %v1857_v61, %v1857_v61 }
 0x121   :  { %v1103_v12 = vadd.f32 %v1102_v4, %v1040_v3  ;;  %1498 = vst [vmem:[%s2124_s2 + $0x78] sm:$0xff] %v1402_v6   ;;  %v1397_v14 = vpack.c.bf16 %v483_v10, %v480_v53  ;;  %v971_v17 = vadd.f32 %v970_v1, %v483_v10  ;;  %v1041_v18 = vmul.f32 %v483_v10, %v483_v10 }
 0x122   :  { %1514 = vst [vmem:[%s2124_s2 + $0xf8] sm:$0xff] %v1482_v5   ;;  %v1477_v20 = vpack.c.bf16 %v2007_v11, %v2001_v55  ;;  %v1049_v1 = vmul.f32 %v1863_v9, %v1863_v9  ;;  %v1052_v5 = vmul.f32 %v1881_v21, %v1881_v21 }
 0x123   :  { %1497 = vst [vmem:[%s2124_s2 + $0x70] sm:$0xff] %v1397_v14   ;;  %v972_v24 = vadd.f32 %v1601_v39, %v971_v17  ;;  %v1104_v25 = vadd.f32 %v1103_v12, %v1041_v18  ;;  %v1053_v17 = vmul.f32 %v1887_v33, %v1887_v33 }
 0x124   :  { %1513 = vst [vmem:[%s2124_s2 + $0xf0] sm:$0xff] %v1477_v20  }
 0x125   :  { %v973_v29 = vadd.f32 %v1602_v60, %v972_v24  ;;  %v1105_v30 = vadd.f32 %v1104_v25, %v1042_v22  ;;  %v1056_v25 = vmul.f32 %v1905_v48, %v1905_v48 }
 0x127   :  { %v1106_v34 = vadd.f32 %v1105_v30, %v1043_v27  ;;  %v974_v35 = vadd.f32 %v973_v29, %v1833_v43  ;;  %v1057_v30 = vmul.f32 %v1911_v63, %v1911_v63 }
 0x129   :  { %v975_v37 = vadd.f32 %v974_v35, %v1839_v50  ;;  %v1107_v39 = vadd.f32 %v1106_v34, %v1044_v31 }
 0x12b   :  { %v976_v47 = vadd.f32 %v1831_v41, %v975_v37  ;;  %v1108_v49 = vadd.f32 %v1107_v39, %v1045_v38  ;;  %v1050_v41 = vmul.f32 %v1849_v56, %v1849_v56  ;;  %v1060_v38 = vmul.f32 %v1929_v13, %v1929_v13 }
 0x12d   :  { %v1109_v53 = vadd.f32 %v1108_v49, %v1046_v42  ;;  %v977_v57 = vadd.f32 %v1835_v45, %v976_v47  ;;  %v1051_v45 = vmul.f32 %v1859_v2, %v1859_v2  ;;  %v1061_v47 = vmul.f32 %v1935_v28, %v1935_v28 }
 0x12f   :  { %v978_v43 = vadd.f32 %v977_v57, %v1857_v61  ;;  %v1110_v59 = vadd.f32 %v1109_v53, %v1047_v51 }
 0x131   :  { %v1111_v50 = vadd.f32 %v1110_v59, %v1048_v58  ;;  %v979_v60 = vadd.f32 %v978_v43, %v1863_v9  ;;  %v1064_v43 = vmul.f32 %v1953_v44, %v1953_v44 }
 0x133   :  { %v980_v3 = vadd.f32 %v1849_v56, %v979_v60  ;;  %v1112_v4 = vadd.f32 %v1111_v50, %v1049_v1  ;;  %v1054_v56 = vmul.f32 %v1873_v16, %v1873_v16  ;;  %v1065_v50 = vmul.f32 %v1959_v62, %v1959_v62 }
 0x135   :  { %v1113_v6 = vadd.f32 %v1112_v4, %v1050_v41  ;;  %v981_v10 = vadd.f32 %v1859_v2, %v980_v3  ;;  %v1055_v2 = vmul.f32 %v1883_v26, %v1883_v26  ;;  %v1068_v4 = vmul.f32 %v1977_v15, %v1977_v15 }
 0x137   :  { %v982_v61 = vadd.f32 %v981_v10, %v1881_v21  ;;  %v1114_v12 = vadd.f32 %v1113_v6, %v1051_v45  ;;  %v1069_v10 = vmul.f32 %v1983_v32, %v1983_v32 }
 0x139   :  { %v1115_v14 = vadd.f32 %v1114_v12, %v1052_v5  ;;  %v983_v9 = vadd.f32 %v982_v61, %v1887_v33 }
 0x13b   :  { %v984_v18 = vadd.f32 %v1873_v16, %v983_v9  ;;  %v1116_v20 = vadd.f32 %v1115_v14, %v1053_v17  ;;  %v1058_v16 = vmul.f32 %v1897_v40, %v1897_v40  ;;  %v1072_v9 = vmul.f32 %v2001_v55, %v2001_v55 }
 0x13d   :  { %v1117_v22 = vadd.f32 %v1116_v20, %v1054_v56  ;;  %v985_v24 = vadd.f32 %v1883_v26, %v984_v18  ;;  %v1059_v26 = vmul.f32 %v1907_v54, %v1907_v54  ;;  %v1073_v18 = vmul.f32 %v2007_v11, %v2007_v11 }
 0x13f   :  { %v986_v21 = vadd.f32 %v985_v24, %v1905_v48  ;;  %v1118_v27 = vadd.f32 %v1117_v22, %v1055_v2 }
 0x141   :  { %v1119_v29 = vadd.f32 %v1118_v27, %v1056_v25  ;;  %v987_v33 = vadd.f32 %v986_v21, %v1911_v63 }
 0x143   :  { %v988_v31 = vadd.f32 %v1897_v40, %v987_v33  ;;  %v1120_v34 = vadd.f32 %v1119_v29, %v1057_v30  ;;  %v1062_v40 = vmul.f32 %v1921_v7, %v1921_v7 }
 0x145   :  { %v1121_v35 = vadd.f32 %v1120_v34, %v1058_v16  ;;  %v989_v37 = vadd.f32 %v1907_v54, %v988_v31  ;;  %v1063_v54 = vmul.f32 %v1931_v19, %v1931_v19 }
 0x147   :  { %v990_v48 = vadd.f32 %v989_v37, %v1929_v13  ;;  %v1122_v39 = vadd.f32 %v1121_v35, %v1059_v26 }
 0x149   :  { %v1123_v42 = vadd.f32 %v1122_v39, %v1060_v38  ;;  %v991_v63 = vadd.f32 %v990_v48, %v1935_v28 }
 0x14b   :  { %v992_v49 = vadd.f32 %v1921_v7, %v991_v63  ;;  %v1124_v51 = vadd.f32 %v1123_v42, %v1061_v47  ;;  %v1066_v7 = vmul.f32 %v1945_v36, %v1945_v36 }
 0x14d   :  { %v1125_v53 = vadd.f32 %v1124_v51, %v1062_v40  ;;  %v993_v57 = vadd.f32 %v1931_v19, %v992_v49  ;;  %v1067_v19 = vmul.f32 %v1955_v52, %v1955_v52 }
 0x14f   :  { %v994_v13 = vadd.f32 %v993_v57, %v1953_v44  ;;  %v1126_v58 = vadd.f32 %v1125_v53, %v1063_v54 }
 0x151   :  { %v1127_v59 = vadd.f32 %v1126_v58, %v1064_v43  ;;  %v995_v28 = vadd.f32 %v994_v13, %v1959_v62 }
 0x153   :  { %v996_v60 = vadd.f32 %v1945_v36, %v995_v28  ;;  %v1128_v1 = vadd.f32 %v1127_v59, %v1065_v50  ;;  %v1070_v36 = vmul.f32 %v1969_v8, %v1969_v8 }
 0x155   :  { %v1129_v41 = vadd.f32 %v1128_v1, %v1066_v7  ;;  %v997_v3 = vadd.f32 %v1955_v52, %v996_v60  ;;  %v1071_v52 = vmul.f32 %v1979_v23, %v1979_v23 }
 0x157   :  { %v998_v44 = vadd.f32 %v997_v3, %v1977_v15  ;;  %v1130_v45 = vadd.f32 %v1129_v41, %v1067_v19 }
 0x159   :  { %v1131_v6 = vadd.f32 %v1130_v45, %v1068_v4  ;;  %v999_v62 = vadd.f32 %v998_v44, %v1983_v32 }
 0x15b   :  { %v1000_v61 = vadd.f32 %v1969_v8, %v999_v62  ;;  %v1132_v5 = vadd.f32 %v1131_v6, %v1069_v10  ;;  %v1074_v8 = vmul.f32 %v1993_v46, %v1993_v46 }
 0x15d   :  { %v1133_v12 = vadd.f32 %v1132_v5, %v1070_v36  ;;  %v1001_v14 = vadd.f32 %v1979_v23, %v1000_v61  ;;  %v1075_v23 = vmul.f32 %v2003_v0, %v2003_v0 }
 0x15f   :  { %v1002_v15 = vadd.f32 %v1001_v14, %v2001_v55  ;;  %v1134_v17 = vadd.f32 %v1133_v12, %v1071_v52 }
 0x161   :  { %v1135_v56 = vadd.f32 %v1134_v17, %v1072_v9  ;;  %v1003_v32 = vadd.f32 %v1002_v15, %v2007_v11 }
 0x163   :  { %v1004_v20 = vadd.f32 %v1993_v46, %v1003_v32  ;;  %v1136_v2 = vadd.f32 %v1135_v56, %v1073_v18 }
 0x165   :  { %v1005_v22 = vadd.f32 %v2003_v0, %v1004_v20  ;;  %v1137_v24 = vadd.f32 %v1136_v2, %v1074_v8 }
 0x167   :  { %v1006_v55 = vrot.slane %v1005_v22, 4  ;;  %v1138_v21 = vadd.f32 %v1137_v24, %v1075_v23 }
 0x169   :  { %v1007_v25 = vadd.f32 %v1006_v55, %v1005_v22  ;;  %v1139_v27 = vrot.slane %v1138_v21, 4 }
 0x16b   :  { %v1008_v29 = vrot.slane %v1007_v25, 2  ;;  %v1140_v33 = vadd.f32 %v1139_v27, %v1138_v21 }
 0x16d   :  { %v1009_v30 = vadd.f32 %v1008_v29, %v1007_v25  ;;  %v1141_v11 = vrot.slane %v1140_v33, 2 }
 0x16f   :  { %v1010_v16 = vrot.slane %v1009_v30, 1  ;;  %v1142_v31 = vadd.f32 %v1141_v11, %v1140_v33 }
 0x171   :  { %v1143_v34 = vrot.slane %v1142_v31, 1  ;;  %v1011_v46 = vadd.f32 %v1010_v16, %v1009_v30 }
 0x173   :  { %v1144_v26 = vadd.f32 %v1143_v34, %v1142_v31 }
 0x175   :  { %v1146_v35 = vsel %vm1145_vm0, %v1011_v46, %v1144_v26 }
 0x176   :  { %1147 = vst [vmem:[%s2125_s3] sm:$0x3] %v1146_v35 }

// kernel: bottleneck_forward.6
= control target key start
LH: loop header
LB: loop body
LE: loop exit
PB: predicated region body
PF: predicated region fallthrough
CT: control target
= control target key end

     0   :  { %vm1261_vm0 = vcmask 1040384   ;;  %s2517_s3 = inlined_call_operand.vmem [shape: bf16[128,128], index: 3, kind: input, shape index: {}]   ;;  %s2518_s0 = inlined_call_operand.vmem [shape: bf16[512,128], index: 0, kind: input, shape index: {}]   ;;  %s2519_s1 = inlined_call_operand.vmem [shape: f32[1,128], index: 1, kind: input, shape index: {}]   ;;  %s2520_s2 = inlined_call_operand.vmem [shape: f32[1,128], index: 2, kind: input, shape index: {}]   ;;  %s2521_s4 = inlined_call_operand.vmem [shape: bf16[512,128], index: 4, kind: output, shape index: {0}]   ;;  %s2522_s5 = inlined_call_operand.vmem [shape: f32[1,2,128], index: 5, kind: output, shape index: {1}]  }
   0x1   :  { %v1896_v0 = vld [vmem:[%s2517_s3 + $0x38] sm:$0xff]   ;;  %v1897_v1 = vld [vmem:[%s2517_s3 + $0x30] sm:$0xff]   ;;  %v1898_v2 = vld [vmem:[%s2517_s3 + $0x28] sm:$0xff]  }
   0x2   :  { %1800 = vmatprep.subr.bf16.mxu0 %v1896_v0  ;;  %1880 = vmatprep.subr.bf16.mxu1 %v1896_v0  ;;  %v1899_v3 = vld [vmem:[%s2517_s3 + $0x20] sm:$0xff]   ;;  %v1698_v8 = vld [vmem:[%s2518_s0 + $0x8] sm:$0xff]   ;;  %v1699_v9 = vld [vmem:[%s2518_s0 + $0x10] sm:$0xff]  }
   0x3   :  { %1801 = vmatpush3.bf16.msra.mxu0 %v1896_v0  ;;  %1888 = vmatpush3.bf16.msra.mxu1 %v1896_v0  ;;  %v1411_v4 = vld [vmem:[%s2518_s0] sm:$0xff]   ;;  %v1900_v13 = vld [vmem:[%s2517_s3 + $0x18] sm:$0xff]   ;;  %v1416_v14 = vunpack.c.l.bf16 %v1698_v8  ;;  %v1417_v15 = vunpack.c.h.bf16 %v1698_v8  ;;  %v1420_v16 = vunpack.c.l.bf16 %v1699_v9  ;;  %v1421_v19 = vunpack.c.h.bf16 %v1699_v9  ;;  %v1901_v22 = vld [vmem:[%s2517_s3 + $0x10] sm:$0xff]  }
   0x4   :  { %1802 = vmatprep.subr.bf16.mxu0 %v1897_v1  ;;  %1881 = vmatprep.subr.bf16.mxu1 %v1897_v1  ;;  %v1952_v5 = vld [vmem:[%s2519_s1] ss:$0 sm:$0xff]  ;;  %v1412_v6 = vunpack.c.l.bf16 %v1411_v4  ;;  %v1413_v7 = vunpack.c.h.bf16 %v1411_v4  ;;  %v1700_v26 = vld [vmem:[%s2518_s0 + $0x18] sm:$0xff]   ;;  %v1902_v31 = vld [vmem:[%s2517_s3 + $0x8] sm:$0xff]  }
   0x5   :  { %v1963_v10 = vld [vmem:[%s2520_s2] ss:$0 sm:$0xff]  ;;  %v157_v23 = vmul.f32 %v1416_v14, %v1952_v5  ;;  %v158_v24 = vmul.f32 %v1417_v15, %v1952_v5  ;;  %v159_v25 = vmul.f32 %v1420_v16, %v1952_v5  ;;  %v160_v28 = vmul.f32 %v1421_v19, %v1952_v5  ;;  %v1702_v38 = vld [vmem:[%s2518_s0 + $0x28] sm:$0xff]   ;;  %v1703_v41 = vld [vmem:[%s2518_s0 + $0x30] sm:$0xff]  }
   0x6   :  { %v155_v11 = vmul.f32 %v1412_v6, %v1952_v5  ;;  %v156_v12 = vmul.f32 %v1413_v7, %v1952_v5  ;;  %v1701_v29 = vld [vmem:[%s2518_s0 + $0x20] sm:$0xff]   ;;  %v1424_v30 = vunpack.c.l.bf16 %v1700_v26  ;;  %v1425_v35 = vunpack.c.h.bf16 %v1700_v26  ;;  %v1704_v42 = vld [vmem:[%s2518_s0 + $0x38] sm:$0xff]   ;;  %v1706_v63 = vld [vmem:[%s2518_s0 + $0x48] sm:$0xff]  }
   0x7   :  { %1803 = vmatpush3.bf16.msra.mxu0 %v1897_v1  ;;  %1889 = vmatpush3.bf16.msra.mxu1 %v1897_v1  ;;  %v228_v32 = vadd.f32 %v1963_v10, %v157_v23  ;;  %v229_v33 = vadd.f32 %v1963_v10, %v158_v24  ;;  %v230_v34 = vadd.f32 %v1963_v10, %v159_v25  ;;  %v1428_v37 = vunpack.c.l.bf16 %v1701_v29  ;;  %v1903_v43 = vld [vmem:[%s2517_s3] sm:$0xff]   ;;  %v1707_v4 = vld [vmem:[%s2518_s0 + $0x50] sm:$0xff]   ;;  %v1708_v23 = vld [vmem:[%s2518_s0 + $0x58] sm:$0xff]  }
   0x8   :  { %1804 = vmatprep.subr.bf16.mxu0 %v1898_v2  ;;  %1882 = vmatprep.subr.bf16.mxu1 %v1898_v2  ;;  %v226_v17 = vadd.f32 %v1963_v10, %v155_v11  ;;  %v227_v18 = vadd.f32 %v1963_v10, %v156_v12  ;;  %v231_v36 = vadd.f32 %v1963_v10, %v160_v28  ;;  %v1429_v40 = vunpack.c.h.bf16 %v1701_v29  ;;  %v1705_v48 = vld [vmem:[%s2518_s0 + $0x40] sm:$0xff]  }
   0x9   :  { %v161_v39 = vmul.f32 %v1424_v30, %v1952_v5  ;;  %v292_v44 = vmax.f32 %v228_v32, 0.0  ;;  %v293_v45 = vmax.f32 %v229_v33, 0.0  ;;  %v294_v46 = vmax.f32 %v230_v34, 0.0 }
   0xa   :  { %v290_v20 = vmax.f32 %v226_v17, 0.0  ;;  %v291_v21 = vmax.f32 %v227_v18, 0.0  ;;  %v162_v47 = vmul.f32 %v1425_v35, %v1952_v5  ;;  %v295_v49 = vmax.f32 %v231_v36, 0.0 }
   0xb   :  { %1805 = vmatpush3.bf16.msra.mxu0 %v1898_v2  ;;  %1890 = vmatpush3.bf16.msra.mxu1 %v1898_v2  ;;  %v163_v50 = vmul.f32 %v1428_v37, %v1952_v5  ;;  %v1432_v51 = vunpack.c.l.bf16 %v1702_v38  ;;  %v1433_v52 = vunpack.c.h.bf16 %v1702_v38  ;;  %v1436_v53 = vunpack.c.l.bf16 %v1703_v41 }
   0xc   :  { %1806 = vmatprep.subr.bf16.mxu0 %v1899_v3  ;;  %1883 = vmatprep.subr.bf16.mxu1 %v1899_v3  ;;  %v354_v27 = vpack.c.bf16 %v291_v21, %v290_v20  ;;  %v1437_v54 = vunpack.c.h.bf16 %v1703_v41  ;;  %v1440_v55 = vunpack.c.l.bf16 %v1704_v42  ;;  %v1441_v56 = vunpack.c.h.bf16 %v1704_v42 }
   0xd   :  { %v164_v57 = vmul.f32 %v1429_v40, %v1952_v5  ;;  %v1444_v58 = vunpack.c.l.bf16 %v1705_v48  ;;  %v1445_v59 = vunpack.c.h.bf16 %v1705_v48  ;;  %v355_v60 = vpack.c.bf16 %v293_v45, %v292_v44  ;;  %v1713_v44 = vld [vmem:[%s2518_s0 + $0x80] sm:$0xff]  }
   0xe   :  { %1816 = vmatprep.mubr.bf16.mxu0 %v354_v27  ;;  %v232_v61 = vadd.f32 %v1963_v10, %v161_v39  ;;  %v233_v62 = vadd.f32 %v1963_v10, %v162_v47  ;;  %v356_v0 = vpack.c.bf16 %v295_v49, %v294_v46  ;;  %v234_v1 = vadd.f32 %v1963_v10, %v163_v50 }
   0xf   :  { %1807 = vmatpush3.bf16.msra.mxu0 %v1899_v3  ;;  %1891 = vmatpush3.bf16.msra.mxu1 %v1899_v3  ;;  %v165_v2 = vmul.f32 %v1432_v51, %v1952_v5  ;;  %v166_v3 = vmul.f32 %v1433_v52, %v1952_v5  ;;  %v167_v6 = vmul.f32 %v1436_v53, %v1952_v5  ;;  %v1448_v14 = vunpack.c.l.bf16 %v1706_v63  ;;  %v2056_v52 = vld [vmem:[%s2518_s0 + $0x60] sm:$0xff]  }
  0x10   :  { %1808 = vmatprep.subr.bf16.mxu0 %v1900_v13  ;;  %1884 = vmatprep.subr.bf16.mxu1 %v1900_v13  ;;  %v168_v7 = vmul.f32 %v1437_v54, %v1952_v5  ;;  %v169_v8 = vmul.f32 %v1440_v55, %v1952_v5  ;;  %v170_v9 = vmul.f32 %v1441_v56, %v1952_v5  ;;  %v296_v15 = vmax.f32 %v232_v61, 0.0 }
  0x11   :  { %v235_v11 = vadd.f32 %v1963_v10, %v164_v57  ;;  %v171_v12 = vmul.f32 %v1444_v58, %v1952_v5  ;;  %v297_v16 = vmax.f32 %v233_v62, 0.0  ;;  %v1449_v17 = vunpack.c.h.bf16 %v1706_v63 }
  0x12   :  { %v1452_v18 = vunpack.c.l.bf16 %v1707_v4  ;;  %v298_v19 = vmax.f32 %v234_v1, 0.0  ;;  %v236_v20 = vadd.f32 %v1963_v10, %v165_v2  ;;  %v237_v21 = vadd.f32 %v1963_v10, %v166_v3 }
  0x13   :  { %1809 = vmatpush3.bf16.msra.mxu0 %v1900_v13  ;;  %1892 = vmatpush3.bf16.msra.mxu1 %v1900_v13  ;;  %v172_v13 = vmul.f32 %v1445_v59, %v1952_v5  ;;  %v238_v24 = vadd.f32 %v1963_v10, %v167_v6  ;;  %v239_v25 = vadd.f32 %v1963_v10, %v168_v7  ;;  %v299_v28 = vmax.f32 %v235_v11, 0.0  ;;  %v1714_v59 = vld [vmem:[%s2518_s0 + $0x88] sm:$0xff]   ;;  %v1716_v11 = vld [vmem:[%s2518_s0 + $0x98] sm:$0xff]  }
  0x14   :  { %1810 = vmatprep.subr.bf16.mxu0 %v1901_v22  ;;  %1885 = vmatprep.subr.bf16.mxu1 %v1901_v22  ;;  %v240_v26 = vadd.f32 %v1963_v10, %v169_v8  ;;  %v241_v27 = vadd.f32 %v1963_v10, %v170_v9  ;;  %v242_v29 = vadd.f32 %v1963_v10, %v171_v12  ;;  %v1456_v35 = vunpack.c.l.bf16 %v1708_v23 }
  0x15   :  { %v243_v30 = vadd.f32 %v1963_v10, %v172_v13  ;;  %v357_v32 = vpack.c.bf16 %v297_v16, %v296_v15  ;;  %v174_v33 = vmul.f32 %v1449_v17, %v1952_v5  ;;  %v175_v34 = vmul.f32 %v1452_v18, %v1952_v5 }
  0x16   :  { %v300_v36 = vmax.f32 %v236_v20, 0.0  ;;  %v301_v37 = vmax.f32 %v237_v21, 0.0  ;;  %v1457_v39 = vunpack.c.h.bf16 %v1708_v23  ;;  %v302_v40 = vmax.f32 %v238_v24, 0.0  ;;  %v1717_v24 = vld [vmem:[%s2518_s0 + $0xa0] sm:$0xff]  }
  0x17   :  { %1811 = vmatpush3.bf16.msra.mxu0 %v1901_v22  ;;  %1893 = vmatpush3.bf16.msra.mxu1 %v1901_v22  ;;  %v1453_v22 = vunpack.c.h.bf16 %v1707_v4  ;;  %v303_v41 = vmax.f32 %v239_v25, 0.0  ;;  %v304_v42 = vmax.f32 %v240_v26, 0.0  ;;  %v358_v45 = vpack.c.bf16 %v299_v28, %v298_v19 }
  0x18   :  { %1812 = vmatprep.subr.bf16.mxu0 %v1902_v31  ;;  %1886 = vmatprep.subr.bf16.mxu1 %v1902_v31  ;;  %v306_v46 = vmax.f32 %v242_v29, 0.0  ;;  %v307_v47 = vmax.f32 %v243_v30, 0.0  ;;  %v245_v49 = vadd.f32 %v1963_v10, %v174_v33  ;;  %v2050_v50 = vadd.f32 %v1963_v10, %v175_v34  ;;  %v1718_v33 = vld [vmem:[%s2518_s0 + $0xa8] sm:$0xff]  }
  0x19   :  { %v176_v38 = vmul.f32 %v1453_v22, %v1952_v5  ;;  %v177_v51 = vmul.f32 %v1456_v35, %v1952_v5  ;;  %v178_v54 = vmul.f32 %v1457_v39, %v1952_v5  ;;  %v1476_v55 = vunpack.c.l.bf16 %v1713_v44 }
  0x1a   :  { %v359_v56 = vpack.c.bf16 %v301_v37, %v300_v36  ;;  %v360_v57 = vpack.c.bf16 %v303_v41, %v302_v40  ;;  %v1460_v62 = vunpack.c.l.bf16 %v2056_v52  ;;  %v1477_v63 = vunpack.c.h.bf16 %v1713_v44 }
  0x1b   :  { %1813 = vmatpush3.bf16.msra.mxu0 %v1902_v31  ;;  %1894 = vmatpush3.bf16.msra.mxu1 %v1902_v31  ;;  %v173_v31 = vmul.f32 %v1448_v14, %v1952_v5  ;;  %v2059_v53 = vadd.f32 %v1963_v10, %v176_v38  ;;  %v309_v1 = vmax.f32 %v245_v49, 0.0  ;;  %v310_v2 = vmax.f32 %v2050_v50, 0.0 }
  0x1c   :  { %1814 = vmatprep.subr.bf16.mxu0 %v1903_v43  ;;  %1887 = vmatprep.subr.bf16.mxu1 %v1903_v43  ;;  %v2075_v3 = vadd.f32 %v1963_v10, %v177_v51  ;;  %v187_v4 = vmul.f32 %v1476_v55, %v1952_v5  ;;  %v2080_v7 = vadd.f32 %v1963_v10, %v178_v54  ;;  %v1480_v9 = vunpack.c.l.bf16 %v1714_v59 }
  0x1d   :  { %v244_v48 = vadd.f32 %v1963_v10, %v173_v31  ;;  %v311_v6 = vmax.f32 %v2059_v53, 0.0  ;;  %v188_v8 = vmul.f32 %v1477_v63, %v1952_v5  ;;  %v1461_v12 = vunpack.c.h.bf16 %v2056_v52 }
  0x1e   :  { %v258_v13 = vadd.f32 %v1963_v10, %v187_v4  ;;  %v1481_v14 = vunpack.c.h.bf16 %v1714_v59  ;;  %v2089_v16 = vmul.f32 %v1460_v62, %v1952_v5  ;;  %v189_v18 = vmul.f32 %v1480_v9, %v1952_v5 }
  0x1f   :  { %1815 = vmatpush3.bf16.msra.mxu0 %v1903_v43  ;;  %1895 = vmatpush3.bf16.msra.mxu1 %v1903_v43  ;;  %v305_v43 = vmax.f32 %v241_v27, 0.0  ;;  %v308_v61 = vmax.f32 %v244_v48, 0.0  ;;  %v259_v17 = vadd.f32 %v1963_v10, %v188_v8  ;;  %v1488_v23 = vunpack.c.l.bf16 %v1716_v11 }
  0x20   :  { %v322_v20 = vmax.f32 %v258_v13, 0.0  ;;  %v190_v21 = vmul.f32 %v1481_v14, %v1952_v5  ;;  %v260_v27 = vadd.f32 %v1963_v10, %v189_v18  ;;  %v1489_v31 = vunpack.c.h.bf16 %v1716_v11  ;;  %v1721_v18 = vld [vmem:[%s2518_s0 + $0xc0] sm:$0xff]  }
  0x21   :  { %v2062_v58 = vpack.c.bf16 %v305_v43, %v304_v42  ;;  %v2098_v25 = vpack.c.bf16 %v309_v1, %v308_v61  ;;  %v323_v26 = vmax.f32 %v259_v17, 0.0  ;;  %v1492_v37 = vunpack.c.l.bf16 %v1717_v24  ;;  %v1720_v1 = vld [vmem:[%s2518_s0 + $0xb8] sm:$0xff]  }
  0x22   :  { %1817 = vmatmul.mubr.bf16.vlgmr.msra.gmra.mxu0 %v355_v60  ;;  %v2067_v60 = vpack.c.bf16 %v307_v47, %v306_v46  ;;  %v261_v29 = vadd.f32 %v1963_v10, %v190_v21  ;;  %v324_v35 = vmax.f32 %v260_v27, 0.0  ;;  %v194_v40 = vmul.f32 %v1489_v31, %v1952_v5  ;;  %v1719_v46 = vld [vmem:[%s2518_s0 + $0xb0] sm:$0xff]   ;;  %v1710_v47 = vld [vmem:[%s2518_s0 + $0x68] sm:$0xff]  }
  0x23   :  { %1820 = vmatprep.mubr.bf16.mxu0 %v356_v0  ;;  %v1715_v0 = vld [vmem:[%s2518_s0 + $0x90] sm:$0xff]   ;;  %v370_v34 = vpack.c.bf16 %v323_v26, %v322_v20  ;;  %v1493_v43 = vunpack.c.h.bf16 %v1717_v24  ;;  %v195_v44 = vmul.f32 %v1492_v37, %v1952_v5  ;;  %v1497_v54 = vunpack.c.h.bf16 %v1718_v33 }
  0x24   :  { %v1484_v15 = vunpack.c.l.bf16 %v1715_v0  ;;  %v1485_v19 = vunpack.c.h.bf16 %v1715_v0  ;;  %v325_v38 = vmax.f32 %v261_v29, 0.0  ;;  %v265_v49 = vadd.f32 %v1963_v10, %v194_v40  ;;  %v1723_v40 = vld [vmem:[%s2518_s0 + $0xd0] sm:$0xff]  }
  0x25   :  { %1848 = vmatprep.mubr.bf16.mxu1 %v370_v34  ;;  %v198_v62 = vmul.f32 %v1497_v54, %v1952_v5  ;;  %v1500_v63 = vunpack.c.l.bf16 %v1719_v46  ;;  %v1501_v0 = vunpack.c.h.bf16 %v1719_v46  ;;  %v312_v4 = vmax.f32 %v2075_v3, 0.0 }
  0x26   :  { %v191_v22 = vmul.f32 %v1484_v15, %v1952_v5  ;;  %v192_v28 = vmul.f32 %v1485_v19, %v1952_v5  ;;  %v371_v48 = vpack.c.bf16 %v325_v38, %v324_v35  ;;  %v329_v61 = vmax.f32 %v265_v49, 0.0 }
  0x27   :  { %v1464_v8 = vunpack.c.l.bf16 %v1710_v47  ;;  %v313_v13 = vmax.f32 %v2080_v7, 0.0  ;;  %v1465_v14 = vunpack.c.h.bf16 %v1710_v47  ;;  %v199_v15 = vmul.f32 %v1500_v63, %v1952_v5 }
  0x28   :  { %v262_v30 = vadd.f32 %v1963_v10, %v191_v22  ;;  %v263_v36 = vadd.f32 %v1963_v10, %v192_v28  ;;  %1849 = vmatmul.mubr.bf16.vlgmr.msra.gmra.mxu1 %v371_v48  ;;  %v200_v17 = vmul.f32 %v1501_v0, %v1952_v5  ;;  %v180_v3 = vmul.f32 %v1461_v12, %v1952_v5 }
  0x29   :  { %v1504_v19 = vunpack.c.l.bf16 %v1720_v1  ;;  %v1505_v20 = vunpack.c.h.bf16 %v1720_v1  ;;  %v270_v24 = vadd.f32 %v1963_v10, %v199_v15  ;;  %v1508_v27 = vunpack.c.l.bf16 %v1721_v18  ;;  %v1724_v15 = vld [vmem:[%s2518_s0 + $0xd8] sm:$0xff]  }
  0x2a   :  { %1821 = vmatmul.mubr.bf16.gmra.mxu0 %v357_v32  ;;  %v193_v32 = vmul.f32 %v1488_v23, %v1952_v5  ;;  %v326_v39 = vmax.f32 %v262_v30, 0.0  ;;  %v327_v42 = vmax.f32 %v263_v36, 0.0  ;;  %v269_v23 = vadd.f32 %v1963_v10, %v198_v62 }
  0x2b   :  { %1824 = vmatprep.mubr.bf16.mxu0 %v358_v45  ;;  %v1496_v45 = vunpack.c.l.bf16 %v1718_v33  ;;  %v1509_v52 = vunpack.c.h.bf16 %v1721_v18  ;;  %v364_v12 = vpack.c.bf16 %v311_v6, %v310_v2  ;;  %v250_v28 = vadd.f32 %v1963_v10, %v2089_v16  ;;  %v1712_v33 = vld [vmem:[%s2518_s0 + $0x78] sm:$0xff]   ;;  %v1722_v16 = vld [vmem:[%s2518_s0 + $0xc8] sm:$0xff]  }
  0x2c   :  { %v264_v41 = vadd.f32 %v1963_v10, %v193_v32  ;;  %v372_v55 = vpack.c.bf16 %v327_v42, %v326_v39  ;;  %v251_v31 = vadd.f32 %v1963_v10, %v180_v3  ;;  %v181_v32 = vmul.f32 %v1464_v8, %v1952_v5 }
  0x2d   :  { %v197_v59 = vmul.f32 %v1496_v45, %v1952_v5  ;;  %v201_v34 = vmul.f32 %v1504_v19, %v1952_v5  ;;  %v202_v50 = vmul.f32 %v1505_v20, %v1952_v5  ;;  %v365_v35 = vpack.c.bf16 %v313_v13, %v312_v4 }
  0x2e   :  { %v328_v51 = vmax.f32 %v264_v41, 0.0  ;;  %1852 = vmatprep.mubr.bf16.mxu1 %v372_v55  ;;  %v182_v53 = vmul.f32 %v1465_v14, %v1952_v5  ;;  %v333_v6 = vmax.f32 %v269_v23, 0.0  ;;  %v334_v36 = vmax.f32 %v270_v24, 0.0 }
  0x2f   :  { %v268_v22 = vadd.f32 %v1963_v10, %v197_v59  ;;  %v203_v38 = vmul.f32 %v1508_v27, %v1952_v5  ;;  %v204_v39 = vmul.f32 %v1509_v52, %v1952_v5  ;;  %v314_v41 = vmax.f32 %v250_v28, 0.0 }
  0x30   :  { %v373_v21 = vpack.c.bf16 %v329_v61, %v328_v51  ;;  %v315_v45 = vmax.f32 %v251_v31, 0.0  ;;  %v272_v46 = vadd.f32 %v1963_v10, %v201_v34  ;;  %v273_v47 = vadd.f32 %v1963_v10, %v202_v50 }
  0x31   :  { %v332_v2 = vmax.f32 %v268_v22, 0.0  ;;  %v1512_v48 = vunpack.c.l.bf16 %v1722_v16  ;;  %v1513_v51 = vunpack.c.h.bf16 %v1722_v16  ;;  %v1516_v54 = vunpack.c.l.bf16 %v1723_v40 }
  0x32   :  { %1825 = vmatmul.mubr.bf16.gmra.mxu0 %v359_v56  ;;  %v196_v56 = vmul.f32 %v1493_v43, %v1952_v5  ;;  %1853 = vmatmul.mubr.bf16.gmra.mxu1 %v373_v21  ;;  %v1517_v55 = vunpack.c.h.bf16 %v1723_v40  ;;  %v275_v59 = vadd.f32 %v1963_v10, %v204_v39  ;;  %v253_v61 = vadd.f32 %v1963_v10, %v182_v53  ;;  %v1725_v21 = vld [vmem:[%s2518_s0 + $0xe0] sm:$0xff]  }
  0x33   :  { %1828 = vmatprep.mubr.bf16.mxu0 %v360_v57  ;;  %v266_v57 = vadd.f32 %v1963_v10, %v195_v44  ;;  %v1472_v44 = vunpack.c.l.bf16 %v1712_v33  ;;  %v375_v49 = vpack.c.bf16 %v333_v6, %v332_v2  ;;  %v1473_v0 = vunpack.c.h.bf16 %v1712_v33 }
  0x34   :  { %v267_v9 = vadd.f32 %v1963_v10, %v196_v56  ;;  %v252_v56 = vadd.f32 %v1963_v10, %v181_v32  ;;  %v366_v1 = vpack.c.bf16 %v315_v45, %v314_v41  ;;  %v336_v4 = vmax.f32 %v272_v46, 0.0  ;;  %v1727_v41 = vld [vmem:[%s2518_s0 + $0xf0] sm:$0xff]  }
  0x35   :  { %v330_v11 = vmax.f32 %v266_v57, 0.0  ;;  %v274_v57 = vadd.f32 %v1963_v10, %v203_v38  ;;  %v337_v8 = vmax.f32 %v273_v47, 0.0  ;;  %v207_v13 = vmul.f32 %v1516_v54, %v1952_v5 }
  0x36   :  { %v331_v7 = vmax.f32 %v267_v9, 0.0  ;;  %v205_v9 = vmul.f32 %v1512_v48, %v1952_v5  ;;  %v208_v14 = vmul.f32 %v1517_v55, %v1952_v5  ;;  %v339_v3 = vmax.f32 %v275_v59, 0.0 }
  0x37   :  { %v338_v18 = vmax.f32 %v274_v57, 0.0  ;;  %v186_v20 = vmul.f32 %v1473_v0, %v1952_v5  ;;  %v377_v23 = vpack.c.bf16 %v337_v8, %v336_v4  ;;  %v278_v27 = vadd.f32 %v1963_v10, %v207_v13 }
  0x38   :  { %v374_v26 = vpack.c.bf16 %v331_v7, %v330_v11  ;;  %v206_v11 = vmul.f32 %v1513_v51, %v1952_v5  ;;  %v317_v7 = vmax.f32 %v253_v61, 0.0  ;;  %v276_v24 = vadd.f32 %v1963_v10, %v205_v9 }
  0x39   :  { %v279_v52 = vadd.f32 %v1963_v10, %v208_v14  ;;  %v378_v28 = vpack.c.bf16 %v339_v3, %v338_v18  ;;  %v257_v33 = vadd.f32 %v1963_v10, %v186_v20  ;;  %v342_v2 = vmax.f32 %v278_v27, 0.0 }
  0x3a   :  { %1829 = vmatmul.mubr.bf16.gmra.mxu0 %v2062_v58  ;;  %v1711_v58 = vld [vmem:[%s2518_s0 + $0x70] sm:$0xff]   ;;  %1856 = vmatprep.mubr.bf16.mxu1 %v374_v26  ;;  %v1520_v26 = vunpack.c.l.bf16 %v1724_v15  ;;  %v340_v50 = vmax.f32 %v276_v24, 0.0  ;;  %v1532_v51 = vunpack.c.l.bf16 %v1727_v41  ;;  %v1533_v54 = vunpack.c.h.bf16 %v1727_v41 }
  0x3b   :  { %1832 = vmatprep.mubr.bf16.mxu0 %v2067_v60  ;;  %v271_v60 = vadd.f32 %v1963_v10, %v200_v17  ;;  %v1468_v29 = vunpack.c.l.bf16 %v1711_v58  ;;  %v1469_v30 = vunpack.c.h.bf16 %v1711_v58  ;;  %1857 = vmatmul.mubr.bf16.gmra.mxu1 %v375_v49  ;;  %v185_v17 = vmul.f32 %v1472_v44, %v1952_v5 }
  0x3c   :  { %v316_v58 = vmax.f32 %v252_v56, 0.0  ;;  %v343_v6 = vmax.f32 %v279_v52, 0.0  ;;  %v321_v40 = vmax.f32 %v257_v33, 0.0  ;;  %v216_v0 = vmul.f32 %v1533_v54, %v1952_v5 }
  0x3d   :  { %v335_v37 = vmax.f32 %v271_v60, 0.0  ;;  %v183_v42 = vmul.f32 %v1468_v29, %v1952_v5  ;;  %v184_v43 = vmul.f32 %v1469_v30, %v1952_v5  ;;  %v277_v60 = vadd.f32 %v1963_v10, %v206_v11 }
  0x3e   :  { %v1524_v29 = vunpack.c.l.bf16 %v1725_v21  ;;  %v1525_v30 = vunpack.c.h.bf16 %v1725_v21  ;;  %v367_v31 = vpack.c.bf16 %v317_v7, %v316_v58  ;;  %v256_v32 = vadd.f32 %v1963_v10, %v185_v17 }
  0x3f   :  { %v254_v62 = vadd.f32 %v1963_v10, %v183_v42  ;;  %v255_v63 = vadd.f32 %v1963_v10, %v184_v43  ;;  %v341_v53 = vmax.f32 %v277_v60, 0.0  ;;  %v380_v45 = vpack.c.bf16 %v343_v6, %v342_v2 }
  0x40   :  { %v212_v38 = vmul.f32 %v1525_v30, %v1952_v5  ;;  %v320_v39 = vmax.f32 %v256_v32, 0.0  ;;  %v287_v17 = vadd.f32 %v1963_v10, %v216_v0 }
  0x41   :  { %v318_v19 = vmax.f32 %v254_v62, 0.0  ;;  %v319_v22 = vmax.f32 %v255_v63, 0.0  ;;  %v379_v44 = vpack.c.bf16 %v341_v53, %v340_v50  ;;  %v215_v63 = vmul.f32 %v1532_v51, %v1952_v5 }
  0x42   :  { %1833 = vmatmul.mubr.bf16.gmra.mxu0 %v2098_v25  ;;  %v376_v25 = vpack.c.bf16 %v335_v37, %v334_v36  ;;  %v1726_v36 = vld [vmem:[%s2518_s0 + $0xe8] sm:$0xff]   ;;  %v211_v37 = vmul.f32 %v1524_v29, %v1952_v5  ;;  %v283_v49 = vadd.f32 %v1963_v10, %v212_v38  ;;  %v369_v55 = vpack.c.bf16 %v321_v40, %v320_v39 }
  0x43   :  { %1836 = vmatprep.mubr.bf16.mxu0 %v364_v12  ;;  %v1521_v12 = vunpack.c.h.bf16 %v1724_v15  ;;  %v368_v34 = vpack.c.bf16 %v319_v22, %v318_v19  ;;  %v1528_v43 = vunpack.c.l.bf16 %v1726_v36  ;;  %v1529_v47 = vunpack.c.h.bf16 %v1726_v36 }
  0x44   :  { %1860 = vmatprep.mubr.bf16.mxu1 %v376_v25  ;;  %v282_v48 = vadd.f32 %v1963_v10, %v211_v37  ;;  %v347_v62 = vmax.f32 %v283_v49, 0.0  ;;  %v286_v15 = vadd.f32 %v1963_v10, %v215_v63  ;;  %v351_v20 = vmax.f32 %v287_v17, 0.0 }
  0x45   :  { %1861 = vmatmul.mubr.bf16.gmra.mxu1 %v377_v23  ;;  %v210_v16 = vmul.f32 %v1521_v12, %v1952_v5  ;;  %v213_v56 = vmul.f32 %v1528_v43, %v1952_v5  ;;  %v214_v59 = vmul.f32 %v1529_v47, %v1952_v5 }
  0x46   :  { %1864 = vmatprep.mubr.bf16.mxu1 %v378_v28  ;;  %v346_v61 = vmax.f32 %v282_v48, 0.0  ;;  %v350_v19 = vmax.f32 %v286_v15, 0.0 }
  0x47   :  { %v281_v46 = vadd.f32 %v1963_v10, %v210_v16  ;;  %v284_v4 = vadd.f32 %v1963_v10, %v213_v56  ;;  %v285_v9 = vadd.f32 %v1963_v10, %v214_v59 }
  0x48   :  { %v382_v14 = vpack.c.bf16 %v347_v62, %v346_v61  ;;  %v384_v24 = vpack.c.bf16 %v351_v20, %v350_v19 }
  0x49   :  { %v345_v57 = vmax.f32 %v281_v46, 0.0  ;;  %v348_v18 = vmax.f32 %v284_v4, 0.0  ;;  %v349_v3 = vmax.f32 %v285_v9, 0.0 }
  0x4a   :  { %1837 = vmatmul.mubr.bf16.gmra.mxu0 %v365_v35  ;;  %v209_v35 = vmul.f32 %v1520_v26, %v1952_v5 }
  0x4b   :  { %1840 = vmatprep.mubr.bf16.mxu0 %v366_v1  ;;  %v1728_v1 = vld [vmem:[%s2518_s0 + $0xf8] sm:$0xff]   ;;  %v383_v21 = vpack.c.bf16 %v349_v3, %v348_v18 }
  0x4c   :  { %v280_v42 = vadd.f32 %v1963_v10, %v209_v35  ;;  %v1536_v11 = vunpack.c.l.bf16 %v1728_v1  ;;  %v1537_v13 = vunpack.c.h.bf16 %v1728_v1 }
  0x4d   :  { %1865 = vmatmul.mubr.bf16.gmra.mxu1 %v379_v44 }
  0x4e   :  { %v344_v25 = vmax.f32 %v280_v42, 0.0  ;;  %1868 = vmatprep.mubr.bf16.mxu1 %v380_v45  ;;  %v217_v58 = vmul.f32 %v1536_v11, %v1952_v5  ;;  %v218_v7 = vmul.f32 %v1537_v13, %v1952_v5 }
  0x50   :  { %v381_v8 = vpack.c.bf16 %v345_v57, %v344_v25  ;;  %v288_v22 = vadd.f32 %v1963_v10, %v217_v58  ;;  %v289_v23 = vadd.f32 %v1963_v10, %v218_v7 }
  0x52   :  { %1841 = vmatmul.mubr.bf16.gmra.mxu0 %v367_v31  ;;  %v352_v26 = vmax.f32 %v288_v22, 0.0  ;;  %v353_v60 = vmax.f32 %v289_v23, 0.0 }
  0x53   :  { %1844 = vmatprep.mubr.bf16.mxu0 %v368_v34 }
  0x54   :  { %v385_v27 = vpack.c.bf16 %v353_v60, %v352_v26 }
  0x55   :  { %1869 = vmatmul.mubr.bf16.gmra.mxu1 %v381_v8 }
  0x56   :  { %1872 = vmatprep.mubr.bf16.mxu1 %v382_v14 }
  0x5a   :  { %1845 = vmatmul.mubr.bf16.gmra.mxu0 %v369_v55 }
  0x5d   :  { %1873 = vmatmul.mubr.bf16.gmra.mxu1 %v383_v21 }
  0x5e   :  { %1876 = vmatprep.mubr.bf16.mxu1 %v384_v24 }
  0x65   :  { %1877 = vmatmul.mubr.bf16.gmra.mxu1 %v385_v27 }
  0xe2   :  { %v1818_v52 = vpop.f32.mrf.mxu0 }
  0xe3   :  { %v1130_v34 = vmul.f32 %v1818_v52, %v1818_v52 }
  0xe4   :  { %v484_v12 = vpop.f32.mrf.mxu0 }
  0xe5   :  { %v1128_v30 = vmul.f32 %v484_v12, %v484_v12 }
  0xe6   :  { %v1819_v28 = vpop.f32.mrf.mxu0 }
  0xe7   :  { %v1546_v29 = vpack.c.bf16 %v1819_v28, %v1818_v52  ;;  %v1131_v2 = vmul.f32 %v1819_v28, %v1819_v28 }
  0xe8   :  { %v487_v5 = vpop.f32.mrf.mxu0  ;;  %v2238_v0 = vpop.f32.mrf.mxu1 }
  0xe9   :  { %1729 = vst [vmem:[%s2521_s4 + $0x8] sm:$0xff] %v1546_v29   ;;  %v1541_v31 = vpack.c.bf16 %v487_v5, %v484_v12  ;;  %v1059_v32 = vadd.f32 %v487_v5, %v484_v12  ;;  %v1129_v10 = vmul.f32 %v487_v5, %v487_v5 }
  0xea   :  { %v1822_v33 = vpop.f32.mrf.mxu0  ;;  %v2243_v13 = vpop.f32.mrf.mxu1 }
  0xeb   :  { %1542 = vst [vmem:[%s2521_s4] sm:$0xff] %v1541_v31   ;;  %v1060_v50 = vadd.f32 %v1818_v52, %v1059_v32  ;;  %v1192_v35 = vadd.f32 %v1129_v10, %v1128_v30  ;;  %v1134_v47 = vmul.f32 %v1822_v33, %v1822_v33 }
  0xec   :  { %v500_v53 = vpop.f32.mrf.mxu0  ;;  %v2248_v3 = vpop.f32.mrf.mxu1 }
  0xed   :  { %v1193_v6 = vadd.f32 %v1192_v35, %v1130_v34  ;;  %v1061_v16 = vadd.f32 %v1819_v28, %v1060_v50  ;;  %v1132_v38 = vmul.f32 %v500_v53, %v500_v53  ;;  %v1626_v20 = vpack.c.bf16 %v2248_v3, %v2238_v0 }
  0xee   :  { %v1823_v36 = vpop.f32.mrf.mxu0  ;;  %v2252_v22 = vpop.f32.mrf.mxu1 }
  0xef   :  { %v1062_v37 = vadd.f32 %v1061_v16, %v500_v53  ;;  %v1194_v39 = vadd.f32 %v1193_v6, %v1131_v2  ;;  %v1556_v40 = vpack.c.bf16 %v1823_v36, %v1822_v33  ;;  %v1135_v54 = vmul.f32 %v1823_v36, %v1823_v36  ;;  %1745 = vst [vmem:[%s2521_s4 + $0x88] sm:$0xff] %v1626_v20  }
  0xf0   :  { %v503_v41 = vpop.f32.mrf.mxu0  ;;  %v1621_v52 = vpack.c.bf16 %v2252_v22, %v2243_v13 }
  0xf1   :  { %v1195_v42 = vadd.f32 %v1194_v39, %v1132_v38  ;;  %1731 = vst [vmem:[%s2521_s4 + $0x18] sm:$0xff] %v1556_v40   ;;  %v1551_v43 = vpack.c.bf16 %v503_v41, %v500_v53  ;;  %v1063_v44 = vadd.f32 %v1062_v37, %v503_v41  ;;  %v1133_v45 = vmul.f32 %v503_v41, %v503_v41 }
  0xf2   :  { %v1826_v46 = vpop.f32.mrf.mxu0  ;;  %v2259_v12 = vpop.f32.mrf.mxu1  ;;  %1744 = vst [vmem:[%s2521_s4 + $0x80] sm:$0xff] %v1621_v52  }
  0xf3   :  { %1730 = vst [vmem:[%s2521_s4 + $0x10] sm:$0xff] %v1551_v43   ;;  %v1064_v48 = vadd.f32 %v1822_v33, %v1063_v44  ;;  %v1196_v49 = vadd.f32 %v1195_v42, %v1133_v45  ;;  %v1138_v14 = vmul.f32 %v1826_v46, %v1826_v46 }
  0xf4   :  { %v516_v51 = vpop.f32.mrf.mxu0  ;;  %v2267_v32 = vpop.f32.mrf.mxu1 }
  0xf5   :  { %v1197_v55 = vadd.f32 %v1196_v49, %v1134_v47  ;;  %v1065_v56 = vadd.f32 %v1823_v36, %v1064_v48  ;;  %v1136_v59 = vmul.f32 %v516_v51, %v516_v51 }
  0xf6   :  { %v1827_v25 = vpop.f32.mrf.mxu0  ;;  %v2272_v35 = vpop.f32.mrf.mxu1 }
  0xf7   :  { %v1066_v57 = vadd.f32 %v1065_v56, %v516_v51  ;;  %v1198_v61 = vadd.f32 %v1197_v55, %v1135_v54  ;;  %v1566_v62 = vpack.c.bf16 %v1827_v25, %v1826_v46  ;;  %v1139_v58 = vmul.f32 %v1827_v25, %v1827_v25 }
  0xf8   :  { %v519_v63 = vpop.f32.mrf.mxu0  ;;  %v1636_v16 = vpack.c.bf16 %v2272_v35, %v2259_v12  ;;  %v2276_v37 = vpop.f32.mrf.mxu1 }
  0xf9   :  { %v1199_v1 = vadd.f32 %v1198_v61, %v1136_v59  ;;  %1733 = vst [vmem:[%s2521_s4 + $0x28] sm:$0xff] %v1566_v62   ;;  %v1561_v4 = vpack.c.bf16 %v519_v63, %v516_v51  ;;  %v1067_v8 = vadd.f32 %v1066_v57, %v519_v63  ;;  %v1137_v9 = vmul.f32 %v519_v63, %v519_v63 }
  0xfa   :  { %v1830_v11 = vpop.f32.mrf.mxu0  ;;  %1747 = vst [vmem:[%s2521_s4 + $0x98] sm:$0xff] %v1636_v16   ;;  %v1631_v43 = vpack.c.bf16 %v2276_v37, %v2267_v32 }
  0xfb   :  { %1732 = vst [vmem:[%s2521_s4 + $0x20] sm:$0xff] %v1561_v4   ;;  %v1068_v15 = vadd.f32 %v1826_v46, %v1067_v8  ;;  %v1200_v17 = vadd.f32 %v1199_v1, %v1137_v9  ;;  %v1142_v10 = vmul.f32 %v1830_v11, %v1830_v11  ;;  %v2283_v44 = vpop.f32.mrf.mxu1 }
  0xfc   :  { %v532_v18 = vpop.f32.mrf.mxu0  ;;  %1746 = vst [vmem:[%s2521_s4 + $0x90] sm:$0xff] %v1631_v43  }
  0xfd   :  { %v1201_v7 = vadd.f32 %v1200_v17, %v1138_v14  ;;  %v1069_v19 = vadd.f32 %v1827_v25, %v1068_v15  ;;  %v1140_v24 = vmul.f32 %v532_v18, %v532_v18  ;;  %v2291_v51 = vpop.f32.mrf.mxu1 }
  0xfe   :  { %v1831_v21 = vpop.f32.mrf.mxu0 }
  0xff   :  { %v1070_v23 = vadd.f32 %v1069_v19, %v532_v18  ;;  %v1202_v26 = vadd.f32 %v1201_v7, %v1139_v58  ;;  %v1576_v60 = vpack.c.bf16 %v1831_v21, %v1830_v11  ;;  %v1143_v53 = vmul.f32 %v1831_v21, %v1831_v21  ;;  %v2296_v57 = vpop.f32.mrf.mxu1 }
 0x100   :  { %v535_v27 = vpop.f32.mrf.mxu0  ;;  %v1646_v63 = vpack.c.bf16 %v2296_v57, %v2283_v44 }
 0x101   :  { %v1203_v28 = vadd.f32 %v1202_v26, %v1140_v24  ;;  %1735 = vst [vmem:[%s2521_s4 + $0x38] sm:$0xff] %v1576_v60   ;;  %v1571_v29 = vpack.c.bf16 %v535_v27, %v532_v18  ;;  %v1071_v5 = vadd.f32 %v1070_v23, %v535_v27  ;;  %v1141_v30 = vmul.f32 %v535_v27, %v535_v27  ;;  %v2300_v4 = vpop.f32.mrf.mxu1 }
 0x102   :  { %v1834_v31 = vpop.f32.mrf.mxu0  ;;  %1749 = vst [vmem:[%s2521_s4 + $0xa8] sm:$0xff] %v1646_v63   ;;  %v1641_v17 = vpack.c.bf16 %v2300_v4, %v2291_v51 }
 0x103   :  { %1734 = vst [vmem:[%s2521_s4 + $0x30] sm:$0xff] %v1571_v29   ;;  %v1072_v33 = vadd.f32 %v1830_v11, %v1071_v5  ;;  %v1204_v34 = vadd.f32 %v1203_v28, %v1141_v30  ;;  %v1146_v54 = vmul.f32 %v1834_v31, %v1834_v31 }
 0x104   :  { %v548_v50 = vpop.f32.mrf.mxu0  ;;  %1748 = vst [vmem:[%s2521_s4 + $0xa0] sm:$0xff] %v1641_v17  }
 0x105   :  { %v1205_v2 = vadd.f32 %v1204_v34, %v1142_v10  ;;  %v1073_v6 = vadd.f32 %v1831_v21, %v1072_v33  ;;  %v1144_v39 = vmul.f32 %v548_v50, %v548_v50  ;;  %v2307_v18 = vpop.f32.mrf.mxu1 }
 0x106   :  { %v1835_v36 = vpop.f32.mrf.mxu0 }
 0x107   :  { %v1074_v38 = vadd.f32 %v1073_v6, %v548_v50  ;;  %v1206_v40 = vadd.f32 %v1205_v2, %v1143_v53  ;;  %v1586_v41 = vpack.c.bf16 %v1835_v36, %v1834_v31  ;;  %v1147_v59 = vmul.f32 %v1835_v36, %v1835_v36  ;;  %v2315_v23 = vpop.f32.mrf.mxu1 }
 0x108   :  { %v551_v42 = vpop.f32.mrf.mxu0 }
 0x109   :  { %v1207_v45 = vadd.f32 %v1206_v40, %v1144_v39  ;;  %1737 = vst [vmem:[%s2521_s4 + $0x48] sm:$0xff] %v1586_v41   ;;  %v1581_v46 = vpack.c.bf16 %v551_v42, %v548_v50  ;;  %v1075_v47 = vadd.f32 %v1074_v38, %v551_v42  ;;  %v1145_v48 = vmul.f32 %v551_v42, %v551_v42  ;;  %v2320_v52 = vpop.f32.mrf.mxu1 }
 0x10a   :  { %v1838_v49 = vpop.f32.mrf.mxu0  ;;  %v1656_v30 = vpack.c.bf16 %v2320_v52, %v2307_v18 }
 0x10b   :  { %1736 = vst [vmem:[%s2521_s4 + $0x40] sm:$0xff] %v1581_v46   ;;  %v1076_v55 = vadd.f32 %v1834_v31, %v1075_v47  ;;  %v1208_v56 = vadd.f32 %v1207_v45, %v1145_v48  ;;  %v1150_v24 = vmul.f32 %v1838_v49, %v1838_v49  ;;  %v2324_v10 = vpop.f32.mrf.mxu1 }
 0x10c   :  { %v564_v25 = vpop.f32.mrf.mxu0  ;;  %1751 = vst [vmem:[%s2521_s4 + $0xb8] sm:$0xff] %v1656_v30   ;;  %v1651_v6 = vpack.c.bf16 %v2324_v10, %v2315_v23 }
 0x10d   :  { %v1209_v61 = vadd.f32 %v1208_v56, %v1146_v54  ;;  %v1077_v62 = vadd.f32 %v1835_v36, %v1076_v55  ;;  %v1148_v9 = vmul.f32 %v564_v25, %v564_v25  ;;  %v2331_v16 = vpop.f32.mrf.mxu1 }
 0x10e   :  { %v1839_v1 = vpop.f32.mrf.mxu0  ;;  %1750 = vst [vmem:[%s2521_s4 + $0xb0] sm:$0xff] %v1651_v6   ;;  %v1162_v6 = vmul.f32 %v2238_v0, %v2238_v0 }
 0x10f   :  { %v1078_v8 = vadd.f32 %v1077_v62, %v564_v25  ;;  %v1210_v11 = vadd.f32 %v1209_v61, %v1147_v59  ;;  %v1596_v14 = vpack.c.bf16 %v1839_v1, %v1838_v49  ;;  %v1151_v28 = vmul.f32 %v1839_v1, %v1839_v1  ;;  %v2339_v42 = vpop.f32.mrf.mxu1 }
 0x110   :  { %v567_v15 = vpop.f32.mrf.mxu0 }
 0x111   :  { %v1211_v58 = vadd.f32 %v1210_v11, %v1148_v9  ;;  %1739 = vst [vmem:[%s2521_s4 + $0x58] sm:$0xff] %v1596_v14   ;;  %v1591_v7 = vpack.c.bf16 %v567_v15, %v564_v25  ;;  %v1079_v19 = vadd.f32 %v1078_v8, %v567_v15  ;;  %v1149_v20 = vmul.f32 %v567_v15, %v567_v15  ;;  %v2344_v48 = vpop.f32.mrf.mxu1 }
 0x112   :  { %v1842_v21 = vpop.f32.mrf.mxu0  ;;  %v1666_v56 = vpack.c.bf16 %v2344_v48, %v2331_v16 }
 0x113   :  { %1738 = vst [vmem:[%s2521_s4 + $0x50] sm:$0xff] %v1591_v7   ;;  %v1080_v26 = vadd.f32 %v1838_v49, %v1079_v19  ;;  %v1212_v60 = vadd.f32 %v1211_v58, %v1149_v20  ;;  %v1154_v43 = vmul.f32 %v1842_v21, %v1842_v21  ;;  %v2348_v59 = vpop.f32.mrf.mxu1 }
 0x114   :  { %v580_v27 = vpop.f32.mrf.mxu0  ;;  %1753 = vst [vmem:[%s2521_s4 + $0xc8] sm:$0xff] %v1666_v56   ;;  %v1661_v9 = vpack.c.bf16 %v2348_v59, %v2339_v42  ;;  %v1165_v56 = vmul.f32 %v2276_v37, %v2276_v37 }
 0x115   :  { %v1213_v29 = vadd.f32 %v1212_v60, %v1150_v24  ;;  %v1081_v5 = vadd.f32 %v1839_v1, %v1080_v26  ;;  %v1152_v34 = vmul.f32 %v580_v27, %v580_v27  ;;  %v2355_v11 = vpop.f32.mrf.mxu1 }
 0x116   :  { %v1843_v31 = vpop.f32.mrf.mxu0  ;;  %1752 = vst [vmem:[%s2521_s4 + $0xc0] sm:$0xff] %v1661_v9  }
 0x117   :  { %v1082_v33 = vadd.f32 %v1081_v5, %v580_v27  ;;  %v1214_v50 = vadd.f32 %v1213_v29, %v1151_v28  ;;  %v1606_v53 = vpack.c.bf16 %v1843_v31, %v1842_v21  ;;  %v1155_v49 = vmul.f32 %v1843_v31, %v1843_v31  ;;  %v2363_v7 = vpop.f32.mrf.mxu1 }
 0x118   :  { %v583_v2 = vpop.f32.mrf.mxu0  ;;  %v1160_v5 = vmul.f32 %v2243_v13, %v2243_v13 }
 0x119   :  { %v1215_v36 = vadd.f32 %v1214_v50, %v1152_v34  ;;  %1741 = vst [vmem:[%s2521_s4 + $0x68] sm:$0xff] %v1606_v53   ;;  %v1601_v38 = vpack.c.bf16 %v583_v2, %v580_v27  ;;  %v1083_v39 = vadd.f32 %v1082_v33, %v583_v2  ;;  %v1153_v40 = vmul.f32 %v583_v2, %v583_v2  ;;  %v2368_v24 = vpop.f32.mrf.mxu1 }
 0x11a   :  { %v1846_v41 = vpop.f32.mrf.mxu0  ;;  %v1676_v28 = vpack.c.bf16 %v2368_v24, %v2355_v11  ;;  %v1161_v53 = vmul.f32 %v2252_v22, %v2252_v22 }
 0x11b   :  { %1740 = vst [vmem:[%s2521_s4 + $0x60] sm:$0xff] %v1601_v38   ;;  %v1084_v45 = vadd.f32 %v1842_v21, %v1083_v39  ;;  %v1216_v46 = vadd.f32 %v1215_v36, %v1153_v40  ;;  %v1158_v19 = vmul.f32 %v1846_v41, %v1846_v41  ;;  %v2372_v29 = vpop.f32.mrf.mxu1  ;;  %v1163_v40 = vmul.f32 %v2248_v3, %v2248_v3 }
 0x11c   :  { %v596_v47 = vpop.f32.mrf.mxu0  ;;  %1755 = vst [vmem:[%s2521_s4 + $0xd8] sm:$0xff] %v1676_v28   ;;  %v1671_v33 = vpack.c.bf16 %v2372_v29, %v2363_v7 }
 0x11d   :  { %v1217_v54 = vadd.f32 %v1216_v46, %v1154_v43  ;;  %v1085_v55 = vadd.f32 %v1843_v31, %v1084_v45  ;;  %v1156_v62 = vmul.f32 %v596_v47, %v596_v47  ;;  %v2382_v34 = vpop.f32.mrf.mxu1 }
 0x11e   :  { %v1847_v25 = vpop.f32.mrf.mxu0  ;;  %1754 = vst [vmem:[%s2521_s4 + $0xd0] sm:$0xff] %v1671_v33  }
 0x11f   :  { %v1086_v61 = vadd.f32 %v1085_v55, %v596_v47  ;;  %v1218_v63 = vadd.f32 %v1217_v54, %v1155_v49  ;;  %v1616_v1 = vpack.c.bf16 %v1847_v25, %v1846_v41  ;;  %v1159_v26 = vmul.f32 %v1847_v25, %v1847_v25 }
 0x120   :  { %v599_v8 = vpop.f32.mrf.mxu0 }
 0x121   :  { %v1219_v14 = vadd.f32 %v1218_v63, %v1156_v62  ;;  %1743 = vst [vmem:[%s2521_s4 + $0x78] sm:$0xff] %v1616_v1   ;;  %v1611_v15 = vpack.c.bf16 %v599_v8, %v596_v47  ;;  %v1087_v17 = vadd.f32 %v1086_v61, %v599_v8  ;;  %v1157_v58 = vmul.f32 %v599_v8, %v599_v8 }
 0x122   :  { %v1164_v47 = vmul.f32 %v2267_v32, %v2267_v32  ;;  %v1167_v1 = vmul.f32 %v2272_v35, %v2272_v35 }
 0x123   :  { %1742 = vst [vmem:[%s2521_s4 + $0x70] sm:$0xff] %v1611_v15   ;;  %v1088_v20 = vadd.f32 %v1846_v41, %v1087_v17  ;;  %v1220_v21 = vadd.f32 %v1219_v14, %v1157_v58  ;;  %v1168_v17 = vmul.f32 %v2291_v51, %v2291_v51 }
 0x125   :  { %v1089_v60 = vadd.f32 %v1847_v25, %v1088_v20  ;;  %v1221_v27 = vadd.f32 %v1220_v21, %v1158_v19  ;;  %v1166_v25 = vmul.f32 %v2259_v12, %v2259_v12  ;;  %v1169_v20 = vmul.f32 %v2300_v4, %v2300_v4 }
 0x127   :  { %v1222_v30 = vadd.f32 %v1221_v27, %v1159_v26  ;;  %v1090_v31 = vadd.f32 %v1089_v60, %v2243_v13  ;;  %v2390_v13 = vpop.f32.mrf.mxu1  ;;  %v1171_v60 = vmul.f32 %v2296_v57, %v2296_v57 }
 0x129   :  { %v1091_v50 = vadd.f32 %v1090_v31, %v2252_v22  ;;  %v1223_v2 = vadd.f32 %v1222_v30, %v1160_v5  ;;  %v2395_v39 = vpop.f32.mrf.mxu1 }
 0x12a   :  { %v1686_v43 = vpack.c.bf16 %v2395_v39, %v2382_v34 }
 0x12b   :  { %v1092_v36 = vadd.f32 %v2238_v0, %v1091_v50  ;;  %v1224_v38 = vadd.f32 %v1223_v2, %v1161_v53  ;;  %v2402_v45 = vpop.f32.mrf.mxu1  ;;  %v1173_v50 = vmul.f32 %v2324_v10, %v2324_v10 }
 0x12c   :  { %1757 = vst [vmem:[%s2521_s4 + $0xe8] sm:$0xff] %v1686_v43   ;;  %v1681_v49 = vpack.c.bf16 %v2402_v45, %v2390_v13 }
 0x12d   :  { %v1225_v41 = vadd.f32 %v1224_v38, %v1162_v6  ;;  %v1093_v22 = vadd.f32 %v2248_v3, %v1092_v36  ;;  %v2412_v54 = vpop.f32.mrf.mxu1  ;;  %v1176_v38 = vmul.f32 %v2339_v42, %v2339_v42 }
 0x12e   :  { %1756 = vst [vmem:[%s2521_s4 + $0xe0] sm:$0xff] %v1681_v49   ;;  %v1180_v49 = vmul.f32 %v2363_v7, %v2363_v7 }
 0x12f   :  { %v1094_v46 = vadd.f32 %v1093_v22, %v2267_v32  ;;  %v1226_v0 = vadd.f32 %v1225_v41, %v1163_v40  ;;  %v2420_v32 = vpop.f32.mrf.mxu1  ;;  %v1177_v22 = vmul.f32 %v2348_v59, %v2348_v59 }
 0x131   :  { %v1227_v3 = vadd.f32 %v1226_v0, %v1164_v47  ;;  %v1095_v55 = vadd.f32 %v1094_v46, %v2276_v37  ;;  %v2425_v63 = vpop.f32.mrf.mxu1 }
 0x132   :  { %v1696_v9 = vpack.c.bf16 %v2425_v63, %v2412_v54 }
 0x133   :  { %v1096_v61 = vadd.f32 %v2259_v12, %v1095_v55  ;;  %v1228_v62 = vadd.f32 %v1227_v3, %v1165_v56  ;;  %v2432_v14 = vpop.f32.mrf.mxu1  ;;  %v1181_v56 = vmul.f32 %v2372_v29, %v2372_v29 }
 0x134   :  { %1759 = vst [vmem:[%s2521_s4 + $0xf8] sm:$0xff] %v1696_v9   ;;  %v1691_v58 = vpack.c.bf16 %v2432_v14, %v2420_v32 }
 0x135   :  { %v1229_v8 = vadd.f32 %v1228_v62, %v1166_v25  ;;  %v1097_v37 = vadd.f32 %v2272_v35, %v1096_v61 }
 0x136   :  { %1758 = vst [vmem:[%s2521_s4 + $0xf0] sm:$0xff] %v1691_v58  }
 0x137   :  { %v1098_v15 = vadd.f32 %v1097_v37, %v2291_v51  ;;  %v1230_v12 = vadd.f32 %v1229_v8, %v1167_v1  ;;  %v1170_v51 = vmul.f32 %v2283_v44, %v2283_v44  ;;  %v1184_v8 = vmul.f32 %v2390_v13, %v2390_v13 }
 0x139   :  { %v1231_v19 = vadd.f32 %v1230_v12, %v1168_v17  ;;  %v1099_v35 = vadd.f32 %v1098_v15, %v2300_v4  ;;  %v1172_v4 = vmul.f32 %v2315_v23, %v2315_v23  ;;  %v1185_v15 = vmul.f32 %v2402_v45, %v2402_v45 }
 0x13b   :  { %v1100_v21 = vadd.f32 %v2283_v44, %v1099_v35  ;;  %v1232_v26 = vadd.f32 %v1231_v19, %v1169_v20  ;;  %v1174_v44 = vmul.f32 %v2307_v18, %v2307_v18  ;;  %v1188_v35 = vmul.f32 %v2420_v32, %v2420_v32 }
 0x13d   :  { %v1233_v27 = vadd.f32 %v1232_v26, %v1170_v51  ;;  %v1101_v28 = vadd.f32 %v2296_v57, %v1100_v21  ;;  %v1175_v57 = vmul.f32 %v2320_v52, %v2320_v52  ;;  %v1189_v21 = vmul.f32 %v2432_v14, %v2432_v14 }
 0x13f   :  { %v1102_v5 = vadd.f32 %v1101_v28, %v2315_v23  ;;  %v1234_v30 = vadd.f32 %v1233_v27, %v1171_v60 }
 0x141   :  { %v1235_v31 = vadd.f32 %v1234_v30, %v1172_v4  ;;  %v1103_v33 = vadd.f32 %v1102_v5, %v2324_v10 }
 0x143   :  { %v1104_v53 = vadd.f32 %v2307_v18, %v1103_v33  ;;  %v1236_v2 = vadd.f32 %v1235_v31, %v1173_v50  ;;  %v1178_v18 = vmul.f32 %v2331_v16, %v2331_v16 }
 0x145   :  { %v1237_v6 = vadd.f32 %v1236_v2, %v1174_v44  ;;  %v1105_v36 = vadd.f32 %v2320_v52, %v1104_v53  ;;  %v1179_v52 = vmul.f32 %v2344_v48, %v2344_v48 }
 0x147   :  { %v1106_v23 = vadd.f32 %v1105_v36, %v2339_v42  ;;  %v1238_v40 = vadd.f32 %v1237_v6, %v1175_v57 }
 0x149   :  { %v1239_v41 = vadd.f32 %v1238_v40, %v1176_v38  ;;  %v1107_v10 = vadd.f32 %v1106_v23, %v2348_v59 }
 0x14b   :  { %v1108_v43 = vadd.f32 %v2331_v16, %v1107_v10  ;;  %v1240_v46 = vadd.f32 %v1239_v41, %v1177_v22  ;;  %v1182_v16 = vmul.f32 %v2355_v11, %v2355_v11 }
 0x14d   :  { %v1241_v47 = vadd.f32 %v1240_v46, %v1178_v18  ;;  %v1109_v0 = vadd.f32 %v2344_v48, %v1108_v43  ;;  %v1183_v48 = vmul.f32 %v2368_v24, %v2368_v24 }
 0x14f   :  { %v1110_v42 = vadd.f32 %v1109_v0, %v2363_v7  ;;  %v1242_v3 = vadd.f32 %v1241_v47, %v1179_v52 }
 0x151   :  { %v1243_v55 = vadd.f32 %v1242_v3, %v1180_v49  ;;  %v1111_v59 = vadd.f32 %v1110_v42, %v2372_v29 }
 0x153   :  { %v1112_v25 = vadd.f32 %v2355_v11, %v1111_v59  ;;  %v1244_v61 = vadd.f32 %v1243_v55, %v1181_v56  ;;  %v1186_v11 = vmul.f32 %v2382_v34, %v2382_v34 }
 0x155   :  { %v1245_v62 = vadd.f32 %v1244_v61, %v1182_v16  ;;  %v1113_v1 = vadd.f32 %v2368_v24, %v1112_v25  ;;  %v1187_v24 = vmul.f32 %v2395_v39, %v2395_v39 }
 0x157   :  { %v1114_v7 = vadd.f32 %v1113_v1, %v2390_v13  ;;  %v1246_v37 = vadd.f32 %v1245_v62, %v1183_v48 }
 0x159   :  { %v1247_v9 = vadd.f32 %v1246_v37, %v1184_v8  ;;  %v1115_v29 = vadd.f32 %v1114_v7, %v2402_v45 }
 0x15b   :  { %v1116_v17 = vadd.f32 %v2382_v34, %v1115_v29  ;;  %v1248_v12 = vadd.f32 %v1247_v9, %v1185_v15  ;;  %v1190_v34 = vmul.f32 %v2412_v54, %v2412_v54 }
 0x15d   :  { %v1249_v58 = vadd.f32 %v1248_v12, %v1186_v11  ;;  %v1117_v19 = vadd.f32 %v2395_v39, %v1116_v17  ;;  %v1191_v39 = vmul.f32 %v2425_v63, %v2425_v63 }
 0x15f   :  { %v1118_v13 = vadd.f32 %v1117_v19, %v2420_v32  ;;  %v1250_v20 = vadd.f32 %v1249_v58, %v1187_v24 }
 0x161   :  { %v1251_v51 = vadd.f32 %v1250_v20, %v1188_v35  ;;  %v1119_v45 = vadd.f32 %v1118_v13, %v2432_v14 }
 0x163   :  { %v1120_v26 = vadd.f32 %v2412_v54, %v1119_v45  ;;  %v1252_v60 = vadd.f32 %v1251_v51, %v1189_v21 }
 0x165   :  { %v1121_v27 = vadd.f32 %v2425_v63, %v1120_v26  ;;  %v1253_v28 = vadd.f32 %v1252_v60, %v1190_v34 }
 0x167   :  { %v1122_v32 = vrot.slane %v1121_v27, 4  ;;  %v1254_v5 = vadd.f32 %v1253_v28, %v1191_v39 }
 0x169   :  { %v1123_v4 = vadd.f32 %v1122_v32, %v1121_v27  ;;  %v1255_v30 = vrot.slane %v1254_v5, 4 }
 0x16b   :  { %v1124_v31 = vrot.slane %v1123_v4, 2  ;;  %v1256_v33 = vadd.f32 %v1255_v30, %v1254_v5 }
 0x16d   :  { %v1125_v50 = vadd.f32 %v1124_v31, %v1123_v4  ;;  %v1257_v14 = vrot.slane %v1256_v33, 2 }
 0x16f   :  { %v1126_v44 = vrot.slane %v1125_v50, 1  ;;  %v1258_v53 = vadd.f32 %v1257_v14, %v1256_v33 }
 0x171   :  { %v1259_v2 = vrot.slane %v1258_v53, 1  ;;  %v1127_v54 = vadd.f32 %v1126_v44, %v1125_v50 }
 0x173   :  { %v1260_v57 = vadd.f32 %v1259_v2, %v1258_v53 }
 0x175   :  { %v1262_v6 = vsel %vm1261_vm0, %v1127_v54, %v1260_v57 }
 0x176   :  { %1263 = vst [vmem:[%s2522_s5] sm:$0x3] %v1262_v6 }

// kernel: bottleneck_forward.7
= control target key start
LH: loop header
LB: loop body
LE: loop exit
PB: predicated region body
PF: predicated region fallthrough
CT: control target
= control target key end

     0   :  { %s1905_s0 = inlined_call_operand.vmem [shape: bf16[512,128], index: 0, kind: input, shape index: {}]   ;;  %s1906_s1 = inlined_call_operand.vmem [shape: f32[1,128], index: 1, kind: input, shape index: {}]   ;;  %s1907_s2 = inlined_call_operand.vmem [shape: f32[1,128], index: 2, kind: input, shape index: {}]   ;;  %s1908_s3 = inlined_call_operand.vmem [shape: bf16[512,128], index: 3, kind: input, shape index: {}]   ;;  %s1909_s4 = inlined_call_operand.hbm [shape: bf16[512,128], index: 4, kind: output, shape index: {}]  }
   0x1   :  { %v1011_v0 = vld [vmem:[%s1905_s0] sm:$0xff]   ;;  %v1426_v5 = vld [vmem:[%s1905_s0 + $0x8] sm:$0xff]   ;;  %v1427_v12 = vld [vmem:[%s1905_s0 + $0x10] sm:$0xff]  }
   0x2   :  { %v1578_v1 = vld [vmem:[%s1906_s1] ss:$0 sm:$0xff]  ;;  %v1012_v2 = vunpack.c.l.bf16 %v1011_v0  ;;  %v1013_v3 = vunpack.c.h.bf16 %v1011_v0  ;;  %v1457_v6 = vld [vmem:[%s1908_s3 + $0x8] sm:$0xff]   ;;  %v1016_v10 = vunpack.c.l.bf16 %v1426_v5  ;;  %v1017_v11 = vunpack.c.h.bf16 %v1426_v5  ;;  %v1458_v13 = vld [vmem:[%s1908_s3 + $0x10] sm:$0xff]  }
   0x3   :  { %v1139_v4 = vld [vmem:[%s1908_s3] sm:$0xff]   ;;  %v1144_v16 = vunpack.c.l.bf16 %v1457_v6  ;;  %v1145_v17 = vunpack.c.h.bf16 %v1457_v6  ;;  %v1020_v20 = vunpack.c.l.bf16 %v1427_v12  ;;  %v1021_v21 = vunpack.c.h.bf16 %v1427_v12  ;;  %v1428_v22 = vld [vmem:[%s1905_s0 + $0x18] sm:$0xff]   ;;  %v1430_v54 = vld [vmem:[%s1905_s0 + $0x28] sm:$0xff]  }
   0x4   :  { %v1592_v7 = vld [vmem:[%s1907_s2] ss:$0 sm:$0xff]  ;;  %v1140_v8 = vunpack.c.l.bf16 %v1139_v4  ;;  %v1141_v9 = vunpack.c.h.bf16 %v1139_v4  ;;  %v153_v14 = vmul.f32 %v1012_v2, %v1578_v1  ;;  %v154_v15 = vmul.f32 %v1013_v3, %v1578_v1  ;;  %v1459_v39 = vld [vmem:[%s1908_s3 + $0x18] sm:$0xff]   ;;  %v1461_v63 = vld [vmem:[%s1908_s3 + $0x28] sm:$0xff]  }
   0x5   :  { %v155_v18 = vmul.f32 %v1016_v10, %v1578_v1  ;;  %v156_v19 = vmul.f32 %v1017_v11, %v1578_v1  ;;  %v1148_v25 = vunpack.c.l.bf16 %v1458_v13  ;;  %v1149_v26 = vunpack.c.h.bf16 %v1458_v13  ;;  %v1429_v48 = vld [vmem:[%s1905_s0 + $0x20] sm:$0xff]   ;;  %v1431_v5 = vld [vmem:[%s1905_s0 + $0x30] sm:$0xff]  }
   0x6   :  { %v224_v23 = vadd.f32 %v1592_v7, %v153_v14  ;;  %v225_v24 = vadd.f32 %v1592_v7, %v154_v15  ;;  %v157_v29 = vmul.f32 %v1020_v20, %v1578_v1  ;;  %v158_v30 = vmul.f32 %v1021_v21, %v1578_v1  ;;  %v1460_v49 = vld [vmem:[%s1908_s3 + $0x20] sm:$0xff]   ;;  %v1462_v11 = vld [vmem:[%s1908_s3 + $0x30] sm:$0xff]   ;;  %v1432_v20 = vld [vmem:[%s1905_s0 + $0x38] sm:$0xff]  }
   0x7   :  { %v226_v27 = vadd.f32 %v1592_v7, %v155_v18  ;;  %v227_v28 = vadd.f32 %v1592_v7, %v156_v19  ;;  %v1024_v33 = vunpack.c.l.bf16 %v1428_v22  ;;  %v1025_v34 = vunpack.c.h.bf16 %v1428_v22 }
   0x8   :  { %v416_v31 = vadd.f32 %v1140_v8, %v224_v23  ;;  %v417_v32 = vadd.f32 %v1141_v9, %v225_v24  ;;  %v228_v37 = vadd.f32 %v1592_v7, %v157_v29  ;;  %v229_v38 = vadd.f32 %v1592_v7, %v158_v30 }
   0x9   :  { %v418_v35 = vadd.f32 %v1144_v16, %v226_v27  ;;  %v419_v36 = vadd.f32 %v1145_v17, %v227_v28  ;;  %v159_v42 = vmul.f32 %v1024_v33, %v1578_v1  ;;  %v160_v43 = vmul.f32 %v1025_v34, %v1578_v1  ;;  %v1463_v33 = vld [vmem:[%s1908_s3 + $0x38] sm:$0xff]  }
   0xa   :  { %v480_v40 = vmax.f32 %v416_v31, 0.0  ;;  %v481_v41 = vmax.f32 %v417_v32, 0.0  ;;  %v420_v46 = vadd.f32 %v1148_v25, %v228_v37  ;;  %v421_v47 = vadd.f32 %v1149_v26, %v229_v38 }
   0xb   :  { %v482_v44 = vmax.f32 %v418_v35, 0.0  ;;  %v483_v45 = vmax.f32 %v419_v36, 0.0  ;;  %v230_v51 = vadd.f32 %v1592_v7, %v159_v42  ;;  %v231_v52 = vadd.f32 %v1592_v7, %v160_v43  ;;  %v1433_v42 = vld [vmem:[%s1905_s0 + $0x40] sm:$0xff]  }
   0xc   :  { %v1269_v50 = vpack.c.bf16 %v481_v41, %v480_v40  ;;  %v1152_v53 = vunpack.c.l.bf16 %v1459_v39  ;;  %v484_v56 = vmax.f32 %v420_v46, 0.0  ;;  %v485_v57 = vmax.f32 %v421_v47, 0.0 }
   0xd   :  { %v1274_v55 = vpack.c.bf16 %v483_v45, %v482_v44  ;;  %v1153_v58 = vunpack.c.h.bf16 %v1459_v39  ;;  %v1028_v60 = vunpack.c.l.bf16 %v1429_v48  ;;  %v1029_v61 = vunpack.c.h.bf16 %v1429_v48 }
   0xe   :  { %1270 = vst [vmem:[#allocation2] sm:$0xff] %v1269_v50   ;;  %v422_v59 = vadd.f32 %v1152_v53, %v230_v51  ;;  %v1156_v62 = vunpack.c.l.bf16 %v1460_v49  ;;  %v1279_v0 = vpack.c.bf16 %v485_v57, %v484_v56  ;;  %v1157_v3 = vunpack.c.h.bf16 %v1460_v49 }
   0xf   :  { %1488 = vst [vmem:[#allocation2 + $0x8] sm:$0xff] %v1274_v55   ;;  %v423_v2 = vadd.f32 %v1153_v58, %v231_v52  ;;  %v1032_v4 = vunpack.c.l.bf16 %v1430_v54  ;;  %v161_v8 = vmul.f32 %v1028_v60, %v1578_v1  ;;  %v162_v9 = vmul.f32 %v1029_v61, %v1578_v1 }
  0x10   :  { %v486_v6 = vmax.f32 %v422_v59, 0.0  ;;  %v1033_v10 = vunpack.c.h.bf16 %v1430_v54  ;;  %1489 = vst [vmem:[#allocation2 + $0x10] sm:$0xff] %v1279_v0   ;;  %v1160_v14 = vunpack.c.l.bf16 %v1461_v63  ;;  %v1161_v15 = vunpack.c.h.bf16 %v1461_v63 }
  0x11   :  { %v487_v12 = vmax.f32 %v423_v2, 0.0  ;;  %v163_v13 = vmul.f32 %v1032_v4, %v1578_v1  ;;  %v232_v16 = vadd.f32 %v1592_v7, %v161_v8  ;;  %v233_v17 = vadd.f32 %v1592_v7, %v162_v9 }
  0x12   :  { %v164_v18 = vmul.f32 %v1033_v10, %v1578_v1  ;;  %v1036_v19 = vunpack.c.l.bf16 %v1431_v5  ;;  %v1037_v23 = vunpack.c.h.bf16 %v1431_v5  ;;  %v1164_v24 = vunpack.c.l.bf16 %v1462_v11 }
  0x13   :  { %v1284_v21 = vpack.c.bf16 %v487_v12, %v486_v6  ;;  %v234_v22 = vadd.f32 %v1592_v7, %v163_v13  ;;  %v424_v25 = vadd.f32 %v1156_v62, %v232_v16  ;;  %v425_v26 = vadd.f32 %v1157_v3, %v233_v17 }
  0x14   :  { %v235_v27 = vadd.f32 %v1592_v7, %v164_v18  ;;  %v165_v28 = vmul.f32 %v1036_v19, %v1578_v1  ;;  %v166_v30 = vmul.f32 %v1037_v23, %v1578_v1  ;;  %v1165_v31 = vunpack.c.h.bf16 %v1462_v11 }
  0x15   :  { %1490 = vst [vmem:[#allocation2 + $0x18] sm:$0xff] %v1284_v21   ;;  %v426_v29 = vadd.f32 %v1160_v14, %v234_v22  ;;  %v1040_v32 = vunpack.c.l.bf16 %v1432_v20  ;;  %v488_v34 = vmax.f32 %v424_v25, 0.0  ;;  %v489_v35 = vmax.f32 %v425_v26, 0.0 }
  0x16   :  { %v427_v36 = vadd.f32 %v1161_v15, %v235_v27  ;;  %v236_v37 = vadd.f32 %v1592_v7, %v165_v28  ;;  %v237_v39 = vadd.f32 %v1592_v7, %v166_v30  ;;  %v1041_v40 = vunpack.c.h.bf16 %v1432_v20 }
  0x17   :  { %v490_v38 = vmax.f32 %v426_v29, 0.0  ;;  %v167_v41 = vmul.f32 %v1040_v32, %v1578_v1 }
  0x18   :  { %9 = vsyncpa [#allocation3], 0  ;;  %v1289_v43 = vpack.c.bf16 %v489_v35, %v488_v34  ;;  %v491_v44 = vmax.f32 %v427_v36, 0.0  ;;  %v428_v45 = vadd.f32 %v1164_v24, %v236_v37  ;;  %v1168_v46 = vunpack.c.l.bf16 %v1463_v33  ;;  %v1464_v47 = vld [vmem:[%s1908_s3 + $0x40] sm:$0xff]   ;;  %v1434_v52 = vld [vmem:[%s1905_s0 + $0x48] sm:$0xff]  }
  0x19   :  { %v429_v48 = vadd.f32 %v1165_v31, %v237_v39  ;;  %v168_v49 = vmul.f32 %v1041_v40, %v1578_v1  ;;  %v238_v50 = vadd.f32 %v1592_v7, %v167_v41  ;;  %v1169_v51 = vunpack.c.h.bf16 %v1463_v33  ;;  %v1465_v61 = vld [vmem:[%s1908_s3 + $0x48] sm:$0xff]   ;;  %v1435_v3 = vld [vmem:[%s1905_s0 + $0x50] sm:$0xff]   ;;  %v1436_v22 = vld [vmem:[%s1905_s0 + $0x58] sm:$0xff]  }
  0x1a   :  { %1491 = vst [vmem:[#allocation2 + $0x20] sm:$0xff] %v1289_v43   ;;  %v1294_v53 = vpack.c.bf16 %v491_v44, %v490_v38  ;;  %v492_v54 = vmax.f32 %v428_v45, 0.0  ;;  %v1044_v55 = vunpack.c.l.bf16 %v1433_v42  ;;  %v1045_v56 = vunpack.c.h.bf16 %v1433_v42  ;;  %v1466_v13 = vld [vmem:[%s1908_s3 + $0x50] sm:$0xff]   ;;  %v1467_v31 = vld [vmem:[%s1908_s3 + $0x58] sm:$0xff]   ;;  %v1437_v36 = vld [vmem:[%s1905_s0 + $0x60] sm:$0xff]  }
  0x1b   :  { %v493_v57 = vmax.f32 %v429_v48, 0.0  ;;  %v239_v58 = vadd.f32 %v1592_v7, %v168_v49  ;;  %v430_v59 = vadd.f32 %v1168_v46, %v238_v50  ;;  %v1172_v60 = vunpack.c.l.bf16 %v1464_v47  ;;  %v1468_v45 = vld [vmem:[%s1908_s3 + $0x60] sm:$0xff]   ;;  %v1438_v50 = vld [vmem:[%s1905_s0 + $0x68] sm:$0xff]  }
  0x1c   :  { %1492 = vst [vmem:[#allocation2 + $0x28] sm:$0xff] %v1294_v53   ;;  %v169_v62 = vmul.f32 %v1044_v55, %v1578_v1  ;;  %v170_v63 = vmul.f32 %v1045_v56, %v1578_v1  ;;  %v1173_v0 = vunpack.c.h.bf16 %v1464_v47  ;;  %v1048_v2 = vunpack.c.l.bf16 %v1434_v52 }
  0x1d   :  { %v1299_v4 = vpack.c.bf16 %v493_v57, %v492_v54  ;;  %v431_v5 = vadd.f32 %v1169_v51, %v239_v58  ;;  %v494_v6 = vmax.f32 %v430_v59, 0.0  ;;  %v1049_v8 = vunpack.c.h.bf16 %v1434_v52  ;;  %v1469_v59 = vld [vmem:[%s1908_s3 + $0x68] sm:$0xff]  }
  0x1e   :  { %v240_v9 = vadd.f32 %v1592_v7, %v169_v62  ;;  %v241_v10 = vadd.f32 %v1592_v7, %v170_v63  ;;  %v171_v11 = vmul.f32 %v1048_v2, %v1578_v1  ;;  %v1176_v12 = vunpack.c.l.bf16 %v1465_v61 }
  0x1f   :  { %1493 = vst [vmem:[#allocation2 + $0x30] sm:$0xff] %v1299_v4   ;;  %v495_v14 = vmax.f32 %v431_v5, 0.0  ;;  %v172_v15 = vmul.f32 %v1049_v8, %v1578_v1  ;;  %v1177_v16 = vunpack.c.h.bf16 %v1465_v61  ;;  %v1052_v17 = vunpack.c.l.bf16 %v1435_v3  ;;  %v1439_v5 = vld [vmem:[%s1905_s0 + $0x70] sm:$0xff]  }
  0x20   :  { %v432_v18 = vadd.f32 %v1172_v60, %v240_v9  ;;  %v433_v19 = vadd.f32 %v1173_v0, %v241_v10  ;;  %v242_v20 = vadd.f32 %v1592_v7, %v171_v11  ;;  %v1053_v21 = vunpack.c.h.bf16 %v1435_v3  ;;  %v1470_v11 = vld [vmem:[%s1908_s3 + $0x70] sm:$0xff]  }
  0x21   :  { %v1304_v23 = vpack.c.bf16 %v495_v14, %v494_v6  ;;  %v243_v24 = vadd.f32 %v1592_v7, %v172_v15  ;;  %v173_v25 = vmul.f32 %v1052_v17, %v1578_v1  ;;  %v1180_v26 = vunpack.c.l.bf16 %v1466_v13 }
  0x22   :  { %v496_v27 = vmax.f32 %v432_v18, 0.0  ;;  %v497_v28 = vmax.f32 %v433_v19, 0.0  ;;  %v434_v29 = vadd.f32 %v1176_v12, %v242_v20  ;;  %v174_v30 = vmul.f32 %v1053_v21, %v1578_v1  ;;  %v1440_v20 = vld [vmem:[%s1905_s0 + $0x78] sm:$0xff]  }
  0x23   :  { %1494 = vst [vmem:[#allocation2 + $0x38] sm:$0xff] %v1304_v23   ;;  %v435_v32 = vadd.f32 %v1177_v16, %v243_v24  ;;  %v244_v33 = vadd.f32 %v1592_v7, %v173_v25  ;;  %v1181_v34 = vunpack.c.h.bf16 %v1466_v13  ;;  %v1056_v35 = vunpack.c.l.bf16 %v1436_v22 }
  0x24   :  { %v1309_v37 = vpack.c.bf16 %v497_v28, %v496_v27  ;;  %v498_v38 = vmax.f32 %v434_v29, 0.0  ;;  %v245_v39 = vadd.f32 %v1592_v7, %v174_v30  ;;  %v1057_v40 = vunpack.c.h.bf16 %v1436_v22  ;;  %v1471_v29 = vld [vmem:[%s1908_s3 + $0x78] sm:$0xff]  }
  0x25   :  { %v499_v41 = vmax.f32 %v435_v32, 0.0  ;;  %v436_v42 = vadd.f32 %v1180_v26, %v244_v33  ;;  %v175_v43 = vmul.f32 %v1056_v35, %v1578_v1  ;;  %v1184_v44 = vunpack.c.l.bf16 %v1467_v31 }
  0x26   :  { %1495 = vst [vmem:[#allocation2 + $0x40] sm:$0xff] %v1309_v37   ;;  %v437_v46 = vadd.f32 %v1181_v34, %v245_v39  ;;  %v176_v47 = vmul.f32 %v1057_v40, %v1578_v1  ;;  %v1185_v48 = vunpack.c.h.bf16 %v1467_v31  ;;  %v1060_v49 = vunpack.c.l.bf16 %v1437_v36  ;;  %v1441_v34 = vld [vmem:[%s1905_s0 + $0x80] sm:$0xff]  }
  0x27   :  { %v1314_v51 = vpack.c.bf16 %v499_v41, %v498_v38  ;;  %v500_v52 = vmax.f32 %v436_v42, 0.0  ;;  %v246_v53 = vadd.f32 %v1592_v7, %v175_v43  ;;  %v1061_v54 = vunpack.c.h.bf16 %v1437_v36  ;;  %v1472_v43 = vld [vmem:[%s1908_s3 + $0x80] sm:$0xff]  }
  0x28   :  { %v501_v55 = vmax.f32 %v437_v46, 0.0  ;;  %v247_v56 = vadd.f32 %v1592_v7, %v176_v47  ;;  %v177_v57 = vmul.f32 %v1060_v49, %v1578_v1  ;;  %v1188_v58 = vunpack.c.l.bf16 %v1468_v45 }
  0x29   :  { %1496 = vst [vmem:[#allocation2 + $0x48] sm:$0xff] %v1314_v51   ;;  %v438_v60 = vadd.f32 %v1184_v44, %v246_v53  ;;  %v178_v61 = vmul.f32 %v1061_v54, %v1578_v1  ;;  %v1189_v62 = vunpack.c.h.bf16 %v1468_v45  ;;  %v1064_v63 = vunpack.c.l.bf16 %v1438_v50 }
  0x2a   :  { %v1319_v0 = vpack.c.bf16 %v501_v55, %v500_v52  ;;  %v439_v2 = vadd.f32 %v1185_v48, %v247_v56  ;;  %v248_v3 = vadd.f32 %v1592_v7, %v177_v57  ;;  %v1065_v4 = vunpack.c.h.bf16 %v1438_v50  ;;  %v1442_v52 = vld [vmem:[%s1905_s0 + $0x88] sm:$0xff]  }
  0x2b   :  { %v502_v6 = vmax.f32 %v438_v60, 0.0  ;;  %v249_v8 = vadd.f32 %v1592_v7, %v178_v61  ;;  %v179_v9 = vmul.f32 %v1064_v63, %v1578_v1  ;;  %v1192_v10 = vunpack.c.l.bf16 %v1469_v59  ;;  %v1473_v57 = vld [vmem:[%s1908_s3 + $0x88] sm:$0xff]  }
  0x2c   :  { %1497 = vst [vmem:[#allocation2 + $0x50] sm:$0xff] %v1319_v0   ;;  %v503_v12 = vmax.f32 %v439_v2, 0.0  ;;  %v440_v13 = vadd.f32 %v1188_v58, %v248_v3  ;;  %v180_v14 = vmul.f32 %v1065_v4, %v1578_v1  ;;  %v1193_v15 = vunpack.c.h.bf16 %v1469_v59  ;;  %v1443_v3 = vld [vmem:[%s1905_s0 + $0x90] sm:$0xff]  }
  0x2d   :  { %v441_v16 = vadd.f32 %v1189_v62, %v249_v8  ;;  %v250_v17 = vadd.f32 %v1592_v7, %v179_v9  ;;  %v1068_v18 = vunpack.c.l.bf16 %v1439_v5  ;;  %v1069_v19 = vunpack.c.h.bf16 %v1439_v5  ;;  %v1474_v9 = vld [vmem:[%s1908_s3 + $0x90] sm:$0xff]  }
  0x2e   :  { %v1324_v21 = vpack.c.bf16 %v503_v12, %v502_v6  ;;  %v504_v22 = vmax.f32 %v440_v13, 0.0  ;;  %v251_v23 = vadd.f32 %v1592_v7, %v180_v14  ;;  %v1196_v24 = vunpack.c.l.bf16 %v1470_v11 }
  0x2f   :  { %v505_v25 = vmax.f32 %v441_v16, 0.0  ;;  %v442_v26 = vadd.f32 %v1192_v10, %v250_v17  ;;  %v181_v27 = vmul.f32 %v1068_v18, %v1578_v1  ;;  %v182_v28 = vmul.f32 %v1069_v19, %v1578_v1  ;;  %v1444_v18 = vld [vmem:[%s1905_s0 + $0x98] sm:$0xff]  }
  0x30   :  { %1498 = vst [vmem:[#allocation2 + $0x58] sm:$0xff] %v1324_v21   ;;  %v443_v30 = vadd.f32 %v1193_v15, %v251_v23  ;;  %v1197_v31 = vunpack.c.h.bf16 %v1470_v11  ;;  %v1072_v32 = vunpack.c.l.bf16 %v1440_v20  ;;  %v1073_v33 = vunpack.c.h.bf16 %v1440_v20  ;;  %v1475_v23 = vld [vmem:[%s1908_s3 + $0x98] sm:$0xff]  }
  0x31   :  { %v1329_v35 = vpack.c.bf16 %v505_v25, %v504_v22  ;;  %v506_v36 = vmax.f32 %v442_v26, 0.0  ;;  %v252_v37 = vadd.f32 %v1592_v7, %v181_v27  ;;  %v253_v38 = vadd.f32 %v1592_v7, %v182_v28 }
  0x32   :  { %v507_v39 = vmax.f32 %v443_v30, 0.0  ;;  %v183_v40 = vmul.f32 %v1072_v32, %v1578_v1  ;;  %v184_v41 = vmul.f32 %v1073_v33, %v1578_v1  ;;  %v1200_v42 = vunpack.c.l.bf16 %v1471_v29  ;;  %v1445_v32 = vld [vmem:[%s1905_s0 + $0xa0] sm:$0xff]  }
  0x33   :  { %1499 = vst [vmem:[#allocation2 + $0x60] sm:$0xff] %v1329_v35   ;;  %v444_v44 = vadd.f32 %v1196_v24, %v252_v37  ;;  %v445_v45 = vadd.f32 %v1197_v31, %v253_v38  ;;  %v1201_v46 = vunpack.c.h.bf16 %v1471_v29  ;;  %v1076_v47 = vunpack.c.l.bf16 %v1441_v34 }
  0x34   :  { %v1334_v48 = vpack.c.bf16 %v507_v39, %v506_v36  ;;  %v254_v49 = vadd.f32 %v1592_v7, %v183_v40  ;;  %v255_v50 = vadd.f32 %v1592_v7, %v184_v41  ;;  %v1077_v51 = vunpack.c.h.bf16 %v1441_v34  ;;  %v1476_v41 = vld [vmem:[%s1908_s3 + $0xa0] sm:$0xff]  }
  0x35   :  { %v508_v53 = vmax.f32 %v444_v44, 0.0  ;;  %v509_v54 = vmax.f32 %v445_v45, 0.0  ;;  %v185_v55 = vmul.f32 %v1076_v47, %v1578_v1  ;;  %v1204_v56 = vunpack.c.l.bf16 %v1472_v43 }
  0x36   :  { %1500 = vst [vmem:[#allocation2 + $0x68] sm:$0xff] %v1334_v48   ;;  %v446_v58 = vadd.f32 %v1200_v42, %v254_v49  ;;  %v447_v59 = vadd.f32 %v1201_v46, %v255_v50  ;;  %v186_v60 = vmul.f32 %v1077_v51, %v1578_v1  ;;  %v1205_v61 = vunpack.c.h.bf16 %v1472_v43  ;;  %v1446_v50 = vld [vmem:[%s1905_s0 + $0xa8] sm:$0xff]  }
  0x37   :  { %v1339_v62 = vpack.c.bf16 %v509_v54, %v508_v53  ;;  %v256_v63 = vadd.f32 %v1592_v7, %v185_v55  ;;  %v1080_v0 = vunpack.c.l.bf16 %v1442_v52  ;;  %v1081_v2 = vunpack.c.h.bf16 %v1442_v52  ;;  %v1477_v55 = vld [vmem:[%s1908_s3 + $0xa8] sm:$0xff]  }
  0x38   :  { %v510_v4 = vmax.f32 %v446_v58, 0.0  ;;  %v511_v5 = vmax.f32 %v447_v59, 0.0  ;;  %v257_v6 = vadd.f32 %v1592_v7, %v186_v60  ;;  %v1208_v8 = vunpack.c.l.bf16 %v1473_v57 }
  0x39   :  { %1501 = vst [vmem:[#allocation2 + $0x70] sm:$0xff] %v1339_v62   ;;  %v448_v10 = vadd.f32 %v1204_v56, %v256_v63  ;;  %v187_v11 = vmul.f32 %v1080_v0, %v1578_v1  ;;  %v188_v12 = vmul.f32 %v1081_v2, %v1578_v1  ;;  %v1209_v13 = vunpack.c.h.bf16 %v1473_v57  ;;  %v1447_v0 = vld [vmem:[%s1905_s0 + $0xb0] sm:$0xff]  }
  0x3a   :  { %v1344_v14 = vpack.c.bf16 %v511_v5, %v510_v4  ;;  %v449_v15 = vadd.f32 %v1205_v61, %v257_v6  ;;  %v1084_v16 = vunpack.c.l.bf16 %v1443_v3  ;;  %v1085_v17 = vunpack.c.h.bf16 %v1443_v3  ;;  %v1478_v6 = vld [vmem:[%s1908_s3 + $0xb0] sm:$0xff]  }
  0x3b   :  { %v512_v19 = vmax.f32 %v448_v10, 0.0  ;;  %v258_v20 = vadd.f32 %v1592_v7, %v187_v11  ;;  %v259_v21 = vadd.f32 %v1592_v7, %v188_v12  ;;  %v1212_v22 = vunpack.c.l.bf16 %v1474_v9 }
  0x3c   :  { %1502 = vst [vmem:[#allocation2 + $0x78] sm:$0xff] %v1344_v14   ;;  %v513_v24 = vmax.f32 %v449_v15, 0.0  ;;  %v189_v25 = vmul.f32 %v1084_v16, %v1578_v1  ;;  %v190_v26 = vmul.f32 %v1085_v17, %v1578_v1  ;;  %v1213_v27 = vunpack.c.h.bf16 %v1474_v9  ;;  %v1448_v16 = vld [vmem:[%s1905_s0 + $0xb8] sm:$0xff]  }
  0x3d   :  { %v450_v28 = vadd.f32 %v1208_v8, %v258_v20  ;;  %v451_v29 = vadd.f32 %v1209_v13, %v259_v21  ;;  %v1088_v30 = vunpack.c.l.bf16 %v1444_v18  ;;  %v1089_v31 = vunpack.c.h.bf16 %v1444_v18  ;;  %v1479_v21 = vld [vmem:[%s1908_s3 + $0xb8] sm:$0xff]  }
  0x3e   :  { %v1349_v33 = vpack.c.bf16 %v513_v24, %v512_v19  ;;  %v260_v34 = vadd.f32 %v1592_v7, %v189_v25  ;;  %v261_v35 = vadd.f32 %v1592_v7, %v190_v26  ;;  %v1216_v36 = vunpack.c.l.bf16 %v1475_v23 }
  0x3f   :  { %v514_v37 = vmax.f32 %v450_v28, 0.0  ;;  %v515_v38 = vmax.f32 %v451_v29, 0.0  ;;  %v191_v39 = vmul.f32 %v1088_v30, %v1578_v1  ;;  %v192_v40 = vmul.f32 %v1089_v31, %v1578_v1  ;;  %v1449_v30 = vld [vmem:[%s1905_s0 + $0xc0] sm:$0xff]  }
  0x40   :  { %1503 = vst [vmem:[#allocation2 + $0x80] sm:$0xff] %v1349_v33   ;;  %v452_v42 = vadd.f32 %v1212_v22, %v260_v34  ;;  %v453_v43 = vadd.f32 %v1213_v27, %v261_v35  ;;  %v1217_v44 = vunpack.c.h.bf16 %v1475_v23  ;;  %v1092_v45 = vunpack.c.l.bf16 %v1445_v32 }
  0x41   :  { %v1354_v46 = vpack.c.bf16 %v515_v38, %v514_v37  ;;  %v262_v47 = vadd.f32 %v1592_v7, %v191_v39  ;;  %v263_v48 = vadd.f32 %v1592_v7, %v192_v40  ;;  %v1093_v49 = vunpack.c.h.bf16 %v1445_v32  ;;  %v1480_v39 = vld [vmem:[%s1908_s3 + $0xc0] sm:$0xff]  }
  0x42   :  { %v516_v51 = vmax.f32 %v452_v42, 0.0  ;;  %v517_v52 = vmax.f32 %v453_v43, 0.0  ;;  %v193_v53 = vmul.f32 %v1092_v45, %v1578_v1  ;;  %v1220_v54 = vunpack.c.l.bf16 %v1476_v41 }
  0x43   :  { %1504 = vst [vmem:[#allocation2 + $0x88] sm:$0xff] %v1354_v46   ;;  %v454_v56 = vadd.f32 %v1216_v36, %v262_v47  ;;  %v455_v57 = vadd.f32 %v1217_v44, %v263_v48  ;;  %v194_v58 = vmul.f32 %v1093_v49, %v1578_v1  ;;  %v1221_v59 = vunpack.c.h.bf16 %v1476_v41  ;;  %v1450_v48 = vld [vmem:[%s1905_s0 + $0xc8] sm:$0xff]  }
  0x44   :  { %v1359_v60 = vpack.c.bf16 %v517_v52, %v516_v51  ;;  %v264_v61 = vadd.f32 %v1592_v7, %v193_v53  ;;  %v1096_v62 = vunpack.c.l.bf16 %v1446_v50  ;;  %v1097_v63 = vunpack.c.h.bf16 %v1446_v50  ;;  %v1481_v53 = vld [vmem:[%s1908_s3 + $0xc8] sm:$0xff]  }
  0x45   :  { %v518_v2 = vmax.f32 %v454_v56, 0.0  ;;  %v519_v3 = vmax.f32 %v455_v57, 0.0  ;;  %v265_v4 = vadd.f32 %v1592_v7, %v194_v58  ;;  %v1224_v5 = vunpack.c.l.bf16 %v1477_v55 }
  0x46   :  { %1505 = vst [vmem:[#allocation2 + $0x90] sm:$0xff] %v1359_v60   ;;  %v456_v8 = vadd.f32 %v1220_v54, %v264_v61  ;;  %v195_v9 = vmul.f32 %v1096_v62, %v1578_v1  ;;  %v196_v10 = vmul.f32 %v1097_v63, %v1578_v1  ;;  %v1225_v11 = vunpack.c.h.bf16 %v1477_v55  ;;  %v1451_v62 = vld [vmem:[%s1905_s0 + $0xd0] sm:$0xff]  }
  0x47   :  { %v1364_v12 = vpack.c.bf16 %v519_v3, %v518_v2  ;;  %v457_v13 = vadd.f32 %v1221_v59, %v265_v4  ;;  %v1100_v14 = vunpack.c.l.bf16 %v1447_v0  ;;  %v1101_v15 = vunpack.c.h.bf16 %v1447_v0  ;;  %v1482_v4 = vld [vmem:[%s1908_s3 + $0xd0] sm:$0xff]  }
  0x48   :  { %v520_v17 = vmax.f32 %v456_v8, 0.0  ;;  %v266_v18 = vadd.f32 %v1592_v7, %v195_v9  ;;  %v267_v19 = vadd.f32 %v1592_v7, %v196_v10  ;;  %v1228_v20 = vunpack.c.l.bf16 %v1478_v6 }
  0x49   :  { %1506 = vst [vmem:[#allocation2 + $0x98] sm:$0xff] %v1364_v12   ;;  %v521_v22 = vmax.f32 %v457_v13, 0.0  ;;  %v197_v23 = vmul.f32 %v1100_v14, %v1578_v1  ;;  %v198_v24 = vmul.f32 %v1101_v15, %v1578_v1  ;;  %v1229_v25 = vunpack.c.h.bf16 %v1478_v6  ;;  %v1452_v14 = vld [vmem:[%s1905_s0 + $0xd8] sm:$0xff]  }
  0x4a   :  { %v458_v26 = vadd.f32 %v1224_v5, %v266_v18  ;;  %v459_v27 = vadd.f32 %v1225_v11, %v267_v19  ;;  %v1104_v28 = vunpack.c.l.bf16 %v1448_v16  ;;  %v1105_v29 = vunpack.c.h.bf16 %v1448_v16  ;;  %v1483_v19 = vld [vmem:[%s1908_s3 + $0xd8] sm:$0xff]  }
  0x4b   :  { %v1369_v31 = vpack.c.bf16 %v521_v22, %v520_v17  ;;  %v268_v32 = vadd.f32 %v1592_v7, %v197_v23  ;;  %v269_v33 = vadd.f32 %v1592_v7, %v198_v24  ;;  %v1232_v34 = vunpack.c.l.bf16 %v1479_v21 }
  0x4c   :  { %v522_v35 = vmax.f32 %v458_v26, 0.0  ;;  %v523_v36 = vmax.f32 %v459_v27, 0.0  ;;  %v199_v37 = vmul.f32 %v1104_v28, %v1578_v1  ;;  %v200_v38 = vmul.f32 %v1105_v29, %v1578_v1  ;;  %v1453_v28 = vld [vmem:[%s1905_s0 + $0xe0] sm:$0xff]  }
  0x4d   :  { %1507 = vst [vmem:[#allocation2 + $0xa0] sm:$0xff] %v1369_v31   ;;  %v460_v40 = vadd.f32 %v1228_v20, %v268_v32  ;;  %v461_v41 = vadd.f32 %v1229_v25, %v269_v33  ;;  %v1233_v42 = vunpack.c.h.bf16 %v1479_v21  ;;  %v1108_v43 = vunpack.c.l.bf16 %v1449_v30 }
  0x4e   :  { %v1374_v44 = vpack.c.bf16 %v523_v36, %v522_v35  ;;  %v270_v45 = vadd.f32 %v1592_v7, %v199_v37  ;;  %v271_v46 = vadd.f32 %v1592_v7, %v200_v38  ;;  %v1109_v47 = vunpack.c.h.bf16 %v1449_v30  ;;  %v1484_v37 = vld [vmem:[%s1908_s3 + $0xe0] sm:$0xff]  }
  0x4f   :  { %v524_v49 = vmax.f32 %v460_v40, 0.0  ;;  %v525_v50 = vmax.f32 %v461_v41, 0.0  ;;  %v201_v51 = vmul.f32 %v1108_v43, %v1578_v1  ;;  %v1236_v52 = vunpack.c.l.bf16 %v1480_v39 }
  0x50   :  { %1508 = vst [vmem:[#allocation2 + $0xa8] sm:$0xff] %v1374_v44   ;;  %v462_v54 = vadd.f32 %v1232_v34, %v270_v45  ;;  %v463_v55 = vadd.f32 %v1233_v42, %v271_v46  ;;  %v202_v56 = vmul.f32 %v1109_v47, %v1578_v1  ;;  %v1237_v57 = vunpack.c.h.bf16 %v1480_v39  ;;  %v1454_v46 = vld [vmem:[%s1905_s0 + $0xe8] sm:$0xff]  }
  0x51   :  { %v1379_v58 = vpack.c.bf16 %v525_v50, %v524_v49  ;;  %v272_v59 = vadd.f32 %v1592_v7, %v201_v51  ;;  %v1112_v60 = vunpack.c.l.bf16 %v1450_v48  ;;  %v1113_v61 = vunpack.c.h.bf16 %v1450_v48  ;;  %v1485_v51 = vld [vmem:[%s1908_s3 + $0xe8] sm:$0xff]  }
  0x52   :  { %v526_v63 = vmax.f32 %v462_v54, 0.0  ;;  %v527_v0 = vmax.f32 %v463_v55, 0.0  ;;  %v273_v2 = vadd.f32 %v1592_v7, %v202_v56  ;;  %v1240_v3 = vunpack.c.l.bf16 %v1481_v53 }
  0x53   :  { %1509 = vst [vmem:[#allocation2 + $0xb0] sm:$0xff] %v1379_v58   ;;  %v464_v5 = vadd.f32 %v1236_v52, %v272_v59  ;;  %v203_v6 = vmul.f32 %v1112_v60, %v1578_v1  ;;  %v204_v8 = vmul.f32 %v1113_v61, %v1578_v1  ;;  %v1241_v9 = vunpack.c.h.bf16 %v1481_v53  ;;  %v1455_v60 = vld [vmem:[%s1905_s0 + $0xf0] sm:$0xff]  }
  0x54   :  { %v1384_v10 = vpack.c.bf16 %v527_v0, %v526_v63  ;;  %v465_v11 = vadd.f32 %v1237_v57, %v273_v2  ;;  %v1116_v12 = vunpack.c.l.bf16 %v1451_v62  ;;  %v1117_v13 = vunpack.c.h.bf16 %v1451_v62  ;;  %v1486_v2 = vld [vmem:[%s1908_s3 + $0xf0] sm:$0xff]  }
  0x55   :  { %v528_v15 = vmax.f32 %v464_v5, 0.0  ;;  %v274_v16 = vadd.f32 %v1592_v7, %v203_v6  ;;  %v275_v17 = vadd.f32 %v1592_v7, %v204_v8  ;;  %v1244_v18 = vunpack.c.l.bf16 %v1482_v4 }
  0x56   :  { %1510 = vst [vmem:[#allocation2 + $0xb8] sm:$0xff] %v1384_v10   ;;  %v529_v20 = vmax.f32 %v465_v11, 0.0  ;;  %v205_v21 = vmul.f32 %v1116_v12, %v1578_v1  ;;  %v206_v22 = vmul.f32 %v1117_v13, %v1578_v1  ;;  %v1245_v23 = vunpack.c.h.bf16 %v1482_v4  ;;  %v1456_v12 = vld [vmem:[%s1905_s0 + $0xf8] sm:$0xff]   ;;  %s1544_s0 = smov [#allocation2]  }
  0x57   :  { %v466_v24 = vadd.f32 %v1240_v3, %v274_v16  ;;  %v467_v25 = vadd.f32 %v1241_v9, %v275_v17  ;;  %v1120_v26 = vunpack.c.l.bf16 %v1452_v14  ;;  %v1121_v27 = vunpack.c.h.bf16 %v1452_v14  ;;  %v1487_v17 = vld [vmem:[%s1908_s3 + $0xf8] sm:$0xff]   ;;  %s869_s3 = sshll.u32 %s1544_s0, 4  ;;  %s870_s3 = int_to_ptr.vmem [resolvable:$true] %s869_s3 }
  0x58   :  { %v1389_v29 = vpack.c.bf16 %v529_v20, %v528_v15  ;;  %v276_v30 = vadd.f32 %v1592_v7, %v205_v21  ;;  %v277_v31 = vadd.f32 %v1592_v7, %v206_v22  ;;  %v1248_v32 = vunpack.c.l.bf16 %v1483_v19  ;;  %s1522_s7 = scalar_lea.vmem %s870_s3, 4096  ;;  %p1527_p1 = scmp.lt.s32.totalorder %s870_s3, %s870_s3 }
  0x59   :  { %v530_v33 = vmax.f32 %v466_v24, 0.0  ;;  %v531_v34 = vmax.f32 %v467_v25, 0.0  ;;  %v207_v35 = vmul.f32 %v1120_v26, %v1578_v1  ;;  %v208_v36 = vmul.f32 %v1121_v27, %v1578_v1  ;;  %p1523_p0 = scmp.ne.s32.totalorder %s870_s3, %s1522_s7  ;;  %p1528_p2 = scmp.lt.s32.totalorder %s1522_s7, %s1522_s7 }
  0x5a   :  { %1511 = vst [vmem:[#allocation2 + $0xc0] sm:$0xff] %v1389_v29   ;;  %v468_v38 = vadd.f32 %v1244_v18, %v276_v30  ;;  %v469_v39 = vadd.f32 %v1245_v23, %v277_v31  ;;  %v1249_v40 = vunpack.c.h.bf16 %v1483_v19  ;;  %v1124_v41 = vunpack.c.l.bf16 %v1453_v28 }
  0x5b   :  { %v1394_v42 = vpack.c.bf16 %v531_v34, %v530_v33  ;;  %v278_v43 = vadd.f32 %v1592_v7, %v207_v35  ;;  %v279_v44 = vadd.f32 %v1592_v7, %v208_v36  ;;  %v1125_v45 = vunpack.c.h.bf16 %v1453_v28  ;;  %p1529_p3 = por %p1528_p2, %p1527_p1 }
  0x5c   :  { %v532_v47 = vmax.f32 %v468_v38, 0.0  ;;  %v533_v48 = vmax.f32 %v469_v39, 0.0  ;;  %v209_v49 = vmul.f32 %v1124_v41, %v1578_v1  ;;  %v1252_v50 = vunpack.c.l.bf16 %v1484_v37 }
  0x5d   :  { %1512 = vst [vmem:[#allocation2 + $0xc8] sm:$0xff] %v1394_v42   ;;  %v470_v52 = vadd.f32 %v1248_v32, %v278_v43  ;;  %v471_v53 = vadd.f32 %v1249_v40, %v279_v44  ;;  %v210_v54 = vmul.f32 %v1125_v45, %v1578_v1  ;;  %v1253_v55 = vunpack.c.h.bf16 %v1484_v37  ;;  %p1530_p4 = pnand %p1529_p3, %p1523_p0 }
  0x5e   :  { %v1399_v56 = vpack.c.bf16 %v533_v48, %v532_v47  ;;  %v280_v57 = vadd.f32 %v1592_v7, %v209_v49  ;;  %v1128_v58 = vunpack.c.l.bf16 %v1454_v46  ;;  %v1129_v59 = vunpack.c.h.bf16 %v1454_v46 }
  0x5f   :  { %v534_v61 = vmax.f32 %v470_v52, 0.0  ;;  %v535_v62 = vmax.f32 %v471_v53, 0.0  ;;  %v281_v63 = vadd.f32 %v1592_v7, %v210_v54  ;;  %v1256_v0 = vunpack.c.l.bf16 %v1485_v51 }
  0x60   :  { %1513 = vst [vmem:[#allocation2 + $0xd0] sm:$0xff] %v1399_v56   ;;  %v472_v3 = vadd.f32 %v1252_v50, %v280_v57  ;;  %v211_v4 = vmul.f32 %v1128_v58, %v1578_v1  ;;  %v212_v5 = vmul.f32 %v1129_v59, %v1578_v1  ;;  %v1257_v6 = vunpack.c.h.bf16 %v1485_v51 }
  0x61   :  { %v1404_v8 = vpack.c.bf16 %v535_v62, %v534_v61  ;;  %v473_v9 = vadd.f32 %v1253_v55, %v281_v63  ;;  %v1132_v10 = vunpack.c.l.bf16 %v1455_v60  ;;  %v1133_v11 = vunpack.c.h.bf16 %v1455_v60 }
  0x62   :  { %v536_v13 = vmax.f32 %v472_v3, 0.0  ;;  %v282_v14 = vadd.f32 %v1592_v7, %v211_v4  ;;  %v283_v15 = vadd.f32 %v1592_v7, %v212_v5  ;;  %v1260_v16 = vunpack.c.l.bf16 %v1486_v2 }
  0x63   :  { %1514 = vst [vmem:[#allocation2 + $0xd8] sm:$0xff] %v1404_v8   ;;  %v537_v18 = vmax.f32 %v473_v9, 0.0  ;;  %v213_v19 = vmul.f32 %v1132_v10, %v1578_v1  ;;  %v214_v20 = vmul.f32 %v1133_v11, %v1578_v1  ;;  %v1261_v21 = vunpack.c.h.bf16 %v1486_v2 }
  0x64   :  { %v474_v22 = vadd.f32 %v1256_v0, %v282_v14  ;;  %v475_v23 = vadd.f32 %v1257_v6, %v283_v15  ;;  %v1136_v24 = vunpack.c.l.bf16 %v1456_v12  ;;  %v1137_v25 = vunpack.c.h.bf16 %v1456_v12 }
  0x65   :  { %v1409_v26 = vpack.c.bf16 %v537_v18, %v536_v13  ;;  %v284_v27 = vadd.f32 %v1592_v7, %v213_v19  ;;  %v285_v28 = vadd.f32 %v1592_v7, %v214_v20  ;;  %v1264_v29 = vunpack.c.l.bf16 %v1487_v17 }
  0x66   :  { %v538_v30 = vmax.f32 %v474_v22, 0.0  ;;  %v539_v31 = vmax.f32 %v475_v23, 0.0  ;;  %v215_v32 = vmul.f32 %v1136_v24, %v1578_v1  ;;  %v216_v33 = vmul.f32 %v1137_v25, %v1578_v1 }
  0x67   :  { %1515 = vst [vmem:[#allocation2 + $0xe0] sm:$0xff] %v1409_v26   ;;  %v476_v34 = vadd.f32 %v1260_v16, %v284_v27  ;;  %v477_v35 = vadd.f32 %v1261_v21, %v285_v28  ;;  %v1265_v36 = vunpack.c.h.bf16 %v1487_v17 }
  0x68   :  { %v1414_v37 = vpack.c.bf16 %v539_v31, %v538_v30  ;;  %v286_v38 = vadd.f32 %v1592_v7, %v215_v32  ;;  %v287_v39 = vadd.f32 %v1592_v7, %v216_v33 }
  0x69   :  { %v540_v40 = vmax.f32 %v476_v34, 0.0  ;;  %v541_v41 = vmax.f32 %v477_v35, 0.0 }
  0x6a   :  { %1516 = vst [vmem:[#allocation2 + $0xe8] sm:$0xff] %v1414_v37   ;;  %v478_v42 = vadd.f32 %v1264_v29, %v286_v38  ;;  %v479_v43 = vadd.f32 %v1265_v36, %v287_v39 }
  0x6b   :  { %v1419_v44 = vpack.c.bf16 %v541_v41, %v540_v40 }
  0x6c   :  { %v542_v45 = vmax.f32 %v478_v42, 0.0  ;;  %v543_v46 = vmax.f32 %v479_v43, 0.0 }
  0x6d   :  { %1517 = vst [vmem:[#allocation2 + $0xf0] sm:$0xff] %v1419_v44  }
  0x6e   :  { %v1424_v1 = vpack.c.bf16 %v543_v46, %v542_v45 }
  0x70   :  { %1518 = vst [vmem:[#allocation2 + $0xf8] sm:$0xff] %v1424_v1  }
  0x71   :  { %1533 = shalt.err (!%p1530_p4)
}
  0x72   :  { %s1545_s8 = smov 64   ;;  %s1546_s9 = smov 4  }
  0x73   :  { %875 = dma.vmem_to_hbm [thread:$0]  %s870_s3, 4096, %s1909_s4, [#allocation3], %s1545_s8, %s1545_s8, %s1546_s9  }
  0x74   :  { %1542 = dma.done.wait [#allocation3], 4096  }
  0x75   :  { %1543 = vsyncadd [#allocation3], 4294963200 }
  0x76   :  { %879 = vsyncpa [#allocation3], 1 }

// kernel: bottleneck_forward.5
= control target key start
LH: loop header
LB: loop body
LE: loop exit
PB: predicated region body
PF: predicated region fallthrough
CT: control target
= control target key end

     0   :  { %s7459_s18 = smov 0   ;;  %s9364_s0 = inlined_call_operand.vmem [shape: bf16[512,128], index: 0, kind: input, shape index: {}]   ;;  %s9365_s1 = inlined_call_operand.vmem [shape: f32[1,128], index: 1, kind: input, shape index: {}]   ;;  %s9366_s2 = inlined_call_operand.vmem [shape: f32[1,128], index: 2, kind: input, shape index: {}]   ;;  %s9367_s3 = inlined_call_operand.vmem [shape: bf16[3,384,128], index: 3, kind: input, shape index: {}]   ;;  %s9368_s4 = inlined_call_operand.vmem [shape: bf16[512,128], index: 4, kind: output, shape index: {0}]   ;;  %s9369_s5 = inlined_call_operand.vmem [shape: f32[2,2,128], index: 5, kind: output, shape index: {1}]  }
   0x1 LB: > { %s7465_s19 = sadd.s32 4294967295, %s7425_s18   ;;  %p5995_p0 = scmp.ge.s32.totalorder %s7425_s18, 1  ;;  %s7425_s18 = sphi %s7459_s18, %s16_s18  }
   0x2   : > { %p191_p1 = scmp.lt.s32.totalorder %s7425_s18, 3 }
   0x4   : > { %p192_p2 = pnand %p5995_p0, %p191_p1 }
   0x6   : > { %195 = sbr.rel (%p192_p2) target bundleno = 713 (0x2c9), region = 36 }
   0xb   : > { %v7198_v0 = vld [vmem:[%s9367_s3 + $0x78] sm:$0xff]   ;;  %v7427_v2 = vmov 0   ;;  %s5996_s24 = sshll.u32 %s7465_s19, 5  ;;  %v7200_v4 = vld [vmem:[%s9367_s3 + $0x70] sm:$0xff]   ;;  %v584_v5 = vlaneseq  ;;  %v7202_v7 = vld [vmem:[%s9367_s3 + $0x68] sm:$0xff]   ;;  %vm7428_vm3 = vmmov 0  }
   0xc   : > { %v7199_v1 = vld [vmem:[%s9367_s3 + $0x38] sm:$0xff]   ;;  %432 = vst [vmem:[#allocation2] sm:$0xff] %v7427_v2  ;;  %434 = vst [vmem:[#allocation2 + $0xc] sm:$0xff] %v7427_v2  ;;  %v6037_v3 = vcombine.high %v7427_v2, %v7427_v2  ;;  %6620 = vmatprep.subr.bf16.mxu0 %v7198_v0  ;;  %7172 = vmatprep.subr.bf16.mxu1 %v7198_v0  ;;  %p224_p3 = scmp.lt.s32.totalorder %s5996_s24, 63  ;;  %v7201_v6 = vld [vmem:[%s9367_s3 + $0x30] sm:$0xff]   ;;  %v7549_v26 = vcombine.low %v7427_v2, %v7427_v2  ;;  %p235_p4 = scmp.lt.s32.totalorder %s7465_s19, 1 }
   0xd   : > { %433 = vst [vmem:[#allocation2 + $0x8] sm:$0xf] %v7427_v2  ;;  %435 = vst [vmem:[#allocation2 + $0x14] sm:$0xf] %v7427_v2  ;;  %6621 = vmatpush3.bf16.msra.mxu0 %v7199_v1  ;;  %7180 = vmatpush3.bf16.msra.mxu1 %v7199_v1  ;;  %v7496_v8 = vshrl.u32 %v584_v5, 7  ;;  %v7203_v9 = vld [vmem:[%s9367_s3 + $0x28] sm:$0xff]  }
   0xe   : > { %436 = vst [vmem:[#allocation2 + $0x198] sm:$0xff] %v7427_v2  ;;  %437 = vst [vmem:[#allocation2 + $0x1a0] sm:$0xf] %v7427_v2  ;;  %6622 = vmatprep.subr.bf16.mxu0 %v7200_v4  ;;  %7173 = vmatprep.subr.bf16.mxu1 %v7200_v4  ;;  %s9529_s24 = smov (!%p224_p3, %s5996_s24), 63  ;;  %v7204_v10 = vld [vmem:[%s9367_s3 + $0x60] sm:$0xff]   ;;  %v7206_v14 = vld [vmem:[%s9367_s3 + $0x58] sm:$0xff]  }
   0xf   : > { %439 = vst [vmem:[#allocation2 + $0x1ac] sm:$0xf] %v7427_v2  ;;  %3419 = vmatprep.mubr.bf16.mxu0 %v6037_v3  ;;  %v587_v11 = vadd.s32 16, %v7496_v8  ;;  %s5997_s10 = sshll.u32 %s9529_s24, 2  ;;  %v7205_v12 = vld [vmem:[%s9367_s3 + $0x20] sm:$0xff]   ;;  %v654_v13 = vand.u32 15, %v7496_v8  ;;  %vm1131_vm4 = vmpackc.low %vm7428_vm3, %vm7428_vm3 }
  0x10   : > { %v607_v16 = vadd.s32 176, %v7496_v8  ;;  %s7519_s17 = scalar_lea.vmem %s9364_s0, %s5997_s10  ;;  %v7522_v17 = vadd.s32 192, %v7496_v8  ;;  %v7207_v20 = vld [vmem:[%s9367_s3 + $0x18] sm:$0xff]   ;;  %v7208_v21 = vld [vmem:[%s9367_s3 + $0x50] sm:$0xff]   ;;  %v7538_v23 = vld [vmem:[%s9365_s1] ss:$0 sm:$0xff]  ;;  %s9240_s16 = scalar_lea.vmem %s9368_s4, %s5997_s10 }
  0x11   : > { %6623 = vmatpush3.bf16.msra.mxu0 %v7201_v6  ;;  %7181 = vmatpush3.bf16.msra.mxu1 %v7201_v6  ;;  %v668_v15 = vand.u32 15, %v587_v11  ;;  %vm7524_vm0 = vcmp.eq.s32.totalorder %v654_v13, 0  ;;  %v6447_v22 = vld [vmem:[%s7519_s17] sm:$0xff]   ;;  %v7209_v25 = vld [vmem:[%s9367_s3 + $0x10] sm:$0xff]   ;;  %v7210_v31 = vld [vmem:[%s9367_s3 + $0x48] sm:$0xff]   ;;  %v7574_v37 = vsel %vm1131_vm4, 65537, %v7427_v2 }
  0x12   : > { %6624 = vmatprep.subr.bf16.mxu0 %v7202_v7  ;;  %7174 = vmatprep.subr.bf16.mxu1 %v7202_v7  ;;  %v808_v19 = vand.u32 15, %v607_v16  ;;  %v6448_v27 = vunpack.c.l.bf16 %v6447_v22  ;;  %v6449_v28 = vunpack.c.h.bf16 %v6447_v22  ;;  %v7554_v29 = vld [vmem:[%s9366_s2] ss:$0 sm:$0xff]  ;;  %vm1130_vm2 = vmpackc.low %vm7524_vm0, %vm7524_vm0  ;;  %v822_v30 = vand.u32 15, %v7522_v17  ;;  %v7211_v43 = vld [vmem:[%s9367_s3 + $0x8] sm:$0xff]   ;;  %s9531_s19 = smov (!%p235_p4, %s7465_s19), 1 }
  0x13   : > { %vm7540_vm1 = vcmp.eq.s32.totalorder %v668_v15, 0  ;;  %v1162_v32 = vsel %vm1130_vm2, 65537, %v7427_v2  ;;  %vm1194_vm5 = vsmask.f32 3328  ;;  %vm1195_vm6 = vsmask.f32 7440 }
  0x14   : > { %vm7564_vm7 = vcmp.eq.s32.totalorder %v808_v19, 0  ;;  %v313_v34 = vmul.f32 %v6448_v27, %v7538_v23  ;;  %v314_v35 = vmul.f32 %v6449_v28, %v7538_v23  ;;  %v617_v36 = vld [vmem:[#allocation2 + $0x10] sm:$0x8]  ;;  %vm1132_vm8 = vmpackc.low %vm7540_vm1, %vm7540_vm1  ;;  %v1198_v38 = vshll.u32 %v1162_v32, 16  ;;  %v7212_v53 = vld [vmem:[%s9367_s3 + $0x40] sm:$0xff]   ;;  %s6000_s24 = sshll.u32 %s9531_s19, 1 }
  0x15   : > { %6625 = vmatpush3.bf16.msra.mxu0 %v7203_v9  ;;  %7182 = vmatpush3.bf16.msra.mxu1 %v7203_v9  ;;  %v7577_v39 = vsel %vm1132_vm8, 65537, %v7427_v2  ;;  %v1201_v40 = vshrl.u32 %v1162_v32, 16  ;;  %v1207_v41 = vshll.u32 %v7574_v37, 16  ;;  %v1211_v42 = vshrl.u32 %v7574_v37, 16  ;;  %v6599_v48 = vld [vmem:[%s7519_s17 + $0x50] sm:$0xff]   ;;  %v6600_v57 = vld [vmem:[%s7519_s17 + $0x58] sm:$0xff]   ;;  %vm1152_vm10 = vmpackc.low %vm7564_vm7, %vm7564_vm7  ;;  %s238_s21 = scalar_lea.vmem %s9369_s5, %s6000_s24 }
  0x16   : > { %6626 = vmatprep.subr.bf16.mxu0 %v7204_v10  ;;  %7175 = vmatprep.subr.bf16.mxu1 %v7204_v10  ;;  %v352_v44 = vadd.f32 %v7554_v29, %v313_v34  ;;  %v353_v45 = vadd.f32 %v7554_v29, %v314_v35  ;;  %v1200_v46 = vrot.slane %v1198_v38, 5  ;;  %v1217_v47 = vshll.u32 %v7577_v39, 16  ;;  %vm7607_vm11 = vmor %vm1194_vm5, %vm1195_vm6  ;;  %v7213_v4 = vld [vmem:[%s9367_s3] sm:$0xff]   ;;  %v7619_v10 = vld [vmem:[%s9367_s3 + $0xb8] sm:$0xff]  }
  0x17   : > { %v1203_v49 = vrot.slane %v1201_v40, 4  ;;  %v7590_v50 = vrot.slane %v1207_v41, 5  ;;  %v1213_v51 = vrot.slane %v1211_v42, 4  ;;  %v1221_v52 = vshrl.u32 %v7577_v39, 16  ;;  %v7221_v15 = vld [vmem:[%s9367_s3 + $0x178] sm:$0xff]   ;;  %v7325_v0 = vld [vmem:[%s9367_s3 + $0x230] sm:$0xff]  }
  0x18   : > { %v384_v54 = vmax.f32 %v352_v44, 0.0  ;;  %v385_v55 = vmax.f32 %v353_v45, 0.0  ;;  %v7596_v56 = vrot.slane %v1217_v47, 5  ;;  %vm1516_vm9 = vcmp.ne.s16.totalorder %v1200_v46, 0 }
  0x19   : > { %6627 = vmatpush3.bf16.msra.mxu0 %v7205_v12  ;;  %7183 = vmatpush3.bf16.msra.mxu1 %v7205_v12  ;;  %v1204_v58 = vor.u32 %v1203_v49, %v1200_v46  ;;  %v1214_v59 = vor.u32 %v1213_v51, %v7590_v50  ;;  %v1549_v60 = vsel %vm1516_vm9, 0, %v617_v36  ;;  %v7600_v61 = vrot.slane %v1211_v42, 7  ;;  %v7231_v36 = vld [vmem:[%s9367_s3 + $0x170] sm:$0xff]  }
  0x1a   : > { %6628 = vmatprep.subr.bf16.mxu0 %v7206_v14  ;;  %7176 = vmatprep.subr.bf16.mxu1 %v7206_v14  ;;  %v6382_v62 = vpack.c.bf16 %v384_v54, %v384_v54  ;;  %v6383_v63 = vpack.c.bf16 %v385_v55, %v385_v55  ;;  %v1586_v1 = vshrl.u32 %v1549_v60, 16  ;;  %v6489_v3 = vunpack.c.h.bf16 %v6599_v48  ;;  %v7247_v55 = vld [vmem:[%s9367_s3 + $0x168] sm:$0xff]  }
  0x1b   : > { %v1205_v5 = vrot.slane %v1204_v58, 4  ;;  %v7614_v6 = vrot.slane %v1214_v59, 4  ;;  %v6492_v7 = vunpack.c.l.bf16 %v6600_v57  ;;  %v6493_v9 = vunpack.c.h.bf16 %v6600_v57 }
  0x1c   : > { %552 = vst [vmem:[#allocation2 + $0x1c] sm:$0xf] %v6382_v62  ;;  %553 = vst [vmem:[#allocation2 + $0x28] sm:$0xf] %v6383_v63  ;;  %v7621_v11 = vrot.slane %v1586_v1, 11  ;;  %v334_v12 = vmul.f32 %v6489_v3, %v7538_v23  ;;  %vm7626_vm12 = vcmp.eq.s32.totalorder %v822_v30, 0 }
  0x1d   : > { %6629 = vmatpush3.bf16.msra.mxu0 %v7207_v20  ;;  %7184 = vmatpush3.bf16.msra.mxu1 %v7207_v20  ;;  %v1184_v14 = vsel %vm1152_vm10, 65537, %v7427_v2  ;;  %v1210_v16 = vsel %vm7607_vm11, %v1205_v5, %v7590_v50  ;;  %v1220_v17 = vsel %vm7607_vm11, %v7614_v6, %v7596_v56  ;;  %vm1582_vm13 = vsmask.f32 256  ;;  %vm1154_vm15 = vmpackc.low %vm7626_vm12, %vm7626_vm12 }
  0x1e   : > { %6630 = vmatprep.subr.bf16.mxu0 %v7208_v21  ;;  %7177 = vmatprep.subr.bf16.mxu1 %v7208_v21  ;;  %vm1583_vm14 = vsmask.f32 4368  ;;  %v335_v18 = vmul.f32 %v6492_v7, %v7538_v23  ;;  %v1417_v19 = vshll.u32 %v1184_v14, 16  ;;  %vm7650_vm0 = vcmp.ne.s16.totalorder %v1210_v16, 0 }
  0x1f   : > { %vm7654_vm1 = vcmp.ne.s16.totalorder %v1220_v17, 0  ;;  %v336_v22 = vmul.f32 %v6493_v9, %v7538_v23  ;;  %v373_v24 = vadd.f32 %v7554_v29, %v334_v12  ;;  %v1186_v28 = vsel %vm1154_vm15, 65537, %v7427_v2  ;;  %vm7693_vm3 = vmor %vm1582_vm13, %vm1583_vm14  ;;  %v7271_v17 = vld [vmem:[%s9367_s3 + $0x158] sm:$0xff]  }
  0x20   : > { %v374_v27 = vadd.f32 %v7554_v29, %v335_v18  ;;  %v1419_v30 = vrot.slane %v1417_v19, 5  ;;  %v1437_v34 = vshll.u32 %v1186_v28, 16  ;;  %v1441_v35 = vshrl.u32 %v1186_v28, 16 }
  0x21   : > { %6631 = vmatpush3.bf16.msra.mxu0 %v7209_v25  ;;  %7185 = vmatpush3.bf16.msra.mxu1 %v7209_v25  ;;  %v6590_v25 = vld [vmem:[%s7519_s17 + $0x8] sm:$0xff]   ;;  %v375_v32 = vadd.f32 %v7554_v29, %v336_v22  ;;  %v405_v33 = vmax.f32 %v373_v24, 0.0  ;;  %v1223_v19 = vrot.slane %v1221_v52, 4 }
  0x22   : > { %6632 = vmatprep.subr.bf16.mxu0 %v7210_v31  ;;  %7178 = vmatprep.subr.bf16.mxu1 %v7210_v31  ;;  %v1421_v31 = vshrl.u32 %v1184_v14, 16  ;;  %v406_v38 = vmax.f32 %v374_v27, 0.0  ;;  %v6452_v42 = vunpack.c.l.bf16 %v6590_v25  ;;  %v1439_v45 = vrot.slane %v1437_v34, 5 }
  0x23   : > { %v6403_v44 = vpack.c.bf16 %v405_v33, %v405_v33  ;;  %v1443_v46 = vrot.slane %v1441_v35, 4  ;;  %v618_v47 = vld [vmem:[#allocation2 + $0x1c] sm:$0xf]  ;;  %v619_v48 = vld [vmem:[#allocation2 + $0x28] sm:$0xf]  ;;  %v1420_v51 = vsel %vm7607_vm11, %v7614_v6, %v1419_v30  ;;  %v6453_v54 = vunpack.c.h.bf16 %v6590_v25  ;;  %v6601_v25 = vld [vmem:[%s7519_s17 + $0x60] sm:$0xff]  }
  0x24   : > { %v1423_v40 = vrot.slane %v1421_v31, 4  ;;  %v6404_v49 = vpack.c.bf16 %v406_v38, %v406_v38  ;;  %v1550_v57 = vsel %vm7650_vm0, 0, %v618_v47  ;;  %v1551_v58 = vsel %vm7654_vm1, 0, %v619_v48 }
  0x25   : > { %6633 = vmatpush3.bf16.msra.mxu0 %v7211_v43  ;;  %7186 = vmatpush3.bf16.msra.mxu1 %v7211_v43  ;;  %v407_v43 = vmax.f32 %v375_v32, 0.0  ;;  %573 = vst [vmem:[#allocation2 + $0x118] sm:$0xf] %v6403_v44  ;;  %v1440_v59 = vsel %vm7607_vm11, %v7614_v6, %v1439_v45  ;;  %v1591_v60 = vshrl.u32 %v1550_v57, 16  ;;  %v1594_v62 = vshll.u32 %v1550_v57, 16 }
  0x26   : > { %6634 = vmatprep.subr.bf16.mxu0 %v7212_v53  ;;  %7179 = vmatprep.subr.bf16.mxu1 %v7212_v53  ;;  %v1424_v53 = vor.u32 %v1423_v40, %v1419_v30  ;;  %v1600_v63 = vshrl.u32 %v1551_v58, 16  ;;  %v1603_v1 = vshll.u32 %v1551_v58, 16  ;;  %574 = vst [vmem:[#allocation2 + $0x124] sm:$0xf] %v6404_v49  ;;  %vm7682_vm2 = vcmp.ne.s16.totalorder %v1420_v51, 0 }
  0x27   : > { %v315_v7 = vmul.f32 %v6452_v42, %v7538_v23  ;;  %v1593_v9 = vrot.slane %v1591_v60, 7  ;;  %v316_v13 = vmul.f32 %v6453_v54, %v7538_v23  ;;  %v589_v14 = vadd.s32 32, %v7496_v8 }
  0x28   : > { %v1425_v3 = vrot.slane %v1424_v53, 4  ;;  %v7687_v12 = vrot.slane %v1600_v63, 7  ;;  %vm7700_vm4 = vcmp.ne.s16.totalorder %v1440_v59, 0  ;;  %v1224_v31 = vor.u32 %v1223_v19, %v7596_v56 }
  0x29   : > { %6635 = vmatpush3.bf16.msra.mxu0 %v7213_v4  ;;  %7187 = vmatpush3.bf16.msra.mxu1 %v7213_v4  ;;  %v1444_v4 = vor.u32 %v1443_v46, %v1439_v45  ;;  %v354_v18 = vadd.f32 %v7554_v29, %v315_v7  ;;  %v1596_v20 = vor.u32 %v1594_v62, %v1593_v9  ;;  %v1598_v21 = vrot.slane %v1593_v9, 4 }
  0x2a   : > { %7028 = vmatprep.subr.bf16.mxu1 %v7619_v10  ;;  %7076 = vmatprep.subr.bf16.mxu0 %v7221_v15  ;;  %v1430_v16 = vsel %vm7607_vm11, %v1425_v3, %v7590_v50  ;;  %v1605_v22 = vor.u32 %v1603_v1, %v7687_v12  ;;  %v355_v27 = vadd.f32 %v7554_v29, %v316_v13  ;;  %v682_v30 = vand.u32 15, %v589_v14  ;;  %v7214_v14 = vld [vmem:[#allocation2 + $0x1c] ss:$12 sps:$4 sm:$0xff]  }
  0x2b   : > { %vm7708_vm5 = vcmp.ne.s16.totalorder %v1430_v16, 0  ;;  %v386_v28 = vmax.f32 %v354_v18, 0.0  ;;  %v1597_v39 = vsel %vm7693_vm3, %v7621_v11, %v1596_v20  ;;  %v7720_v33 = vrot.slane %v1444_v4, 4  ;;  %v7256_v11 = vld [vmem:[%s9367_s3 + $0x160] sm:$0xff]   ;;  %v6591_v4 = vld [vmem:[%s7519_s17 + $0x10] sm:$0xff]  }
  0x2c   : > { %3420 = vmatmul.mubr.bf16.vlgmr.msra.gmra.mxu0 %v7549_v26  ;;  %v6405_v26 = vpack.c.bf16 %v407_v43, %v407_v43  ;;  %v1606_v52 = vsel %vm7693_vm3, %v1598_v21, %v1605_v22  ;;  %v639_v32 = vld [vmem:[#allocation2 + $0x118] sm:$0xf]  ;;  %v1607_v34 = vrot.slane %v7687_v12, 4  ;;  %1909 = vst [vmem:[#allocation2 + $0x18] sm:$0xf] %v1597_v39  ;;  %v387_v56 = vmax.f32 %v355_v27, 0.0 }
  0x2d   : > { %7077 = vmatpush3.bf16.msra.mxu0 %v7221_v15  ;;  %1910 = vst [vmem:[#allocation2 + $0x24] sm:$0xf] %v1606_v52  ;;  %v640_v35 = vld [vmem:[#allocation2 + $0x124] sm:$0xf]  ;;  %v6384_v38 = vpack.c.bf16 %v386_v28, %v386_v28  ;;  %vm7727_vm6 = vcmp.eq.s32.totalorder %v682_v30, 0  ;;  %v1225_v45 = vrot.slane %v1224_v31, 4  ;;  %v6496_v46 = vunpack.c.l.bf16 %v6601_v25  ;;  %3427 = vmatprep.mubr.bf16.mxu0 %v7214_v14 }
  0x2e   : > { %7078 = vmatprep.subr.bf16.mxu0 %v7231_v36  ;;  %575 = vst [vmem:[#allocation2 + $0x130] sm:$0xf] %v6405_v26  ;;  %v1572_v43 = vsel %vm7708_vm5, 0, %v640_v35  ;;  %vm1134_vm7 = vmpackc.low %vm7727_vm6, %vm7727_vm6  ;;  %v6385_v51 = vpack.c.bf16 %v387_v56, %v387_v56  ;;  %v6497_v3 = vunpack.c.h.bf16 %v6601_v25  ;;  %v611_v19 = vadd.s32 208, %v7496_v8  ;;  %v7340_v15 = vld [vmem:[%s9367_s3 + $0x228] sm:$0xff]  }
  0x2f   : > { %v1789_v48 = vshrl.u32 %v1572_v43, 16  ;;  %v1792_v49 = vshll.u32 %v1572_v43, 16  ;;  %554 = vst [vmem:[#allocation2 + $0x34] sm:$0xf] %v6384_v38  ;;  %v7745_v57 = vsel %vm1134_vm7, 65537, %v7427_v2  ;;  %v1230_v59 = vsel %vm7607_vm11, %v1225_v45, %v7590_v50 }
  0x30   : > { %555 = vst [vmem:[#allocation2 + $0x40] sm:$0xf] %v6385_v51  ;;  %v1237_v60 = vshll.u32 %v7745_v57, 16  ;;  %v1241_v1 = vshrl.u32 %v7745_v57, 16  ;;  %v337_v13 = vmul.f32 %v6496_v46, %v7538_v23  ;;  %vm7761_vm8 = vcmp.ne.s16.totalorder %v1230_v59, 0  ;;  %v6602_v51 = vld [vmem:[%s7519_s17 + $0x68] sm:$0xff]  }
  0x31   : > { %7079 = vmatpush3.bf16.msra.mxu0 %v7231_v36  ;;  %v7725_v36 = vsel %vm7682_vm2, 0, %v639_v32  ;;  %v1791_v26 = vrot.slane %v1789_v48, 7  ;;  %v338_v18 = vmul.f32 %v6497_v3, %v7538_v23  ;;  %v1450_v25 = vsel %vm7607_vm11, %v7720_v33, %v7590_v50 }
  0x32   : > { %7080 = vmatprep.subr.bf16.mxu0 %v7247_v55  ;;  %v1780_v44 = vshrl.u32 %v7725_v36, 16  ;;  %v1783_v58 = vshll.u32 %v7725_v36, 16  ;;  %v7757_v9 = vrot.slane %v1237_v60, 5  ;;  %v376_v24 = vadd.f32 %v7554_v29, %v337_v13 }
  0x33   : > { %v1794_v5 = vor.u32 %v1792_v49, %v1791_v26  ;;  %v1796_v7 = vrot.slane %v1791_v26, 4  ;;  %v377_v30 = vadd.f32 %v7554_v29, %v338_v18  ;;  %v836_v31 = vand.u32 15, %v611_v19 }
  0x34   : > { %v7742_v53 = vrot.slane %v1780_v44, 7  ;;  %v7220_v21 = vld [vmem:[#allocation2 + $0x18] ss:$12 sps:$4 sm:$0xff]   ;;  %v1240_v22 = vsel %vm7607_vm11, %v7614_v6, %v7757_v9  ;;  %v408_v52 = vmax.f32 %v376_v24, 0.0  ;;  %v6456_v35 = vunpack.c.l.bf16 %v6591_v4 }
  0x35   : > { %7081 = vmatpush3.bf16.msra.mxu0 %v7247_v55  ;;  %v641_v42 = vld [vmem:[#allocation2 + $0x130] sm:$0xf]  ;;  %vm1520_vm9 = vcmp.ne.s16.totalorder %v1240_v22, 0  ;;  %v409_v40 = vmax.f32 %v377_v30, 0.0  ;;  %vm1060_vm10 = vcmp.eq.s32.totalorder %v836_v31, 0  ;;  %vm7784_vm12 = vcmp.ne.s16.totalorder %v1450_v25, 0 }
  0x36   : > { %v1573_v47 = vsel %vm7700_vm4, 0, %v641_v42  ;;  %7082 = vmatprep.subr.bf16.mxu0 %v7256_v11  ;;  %v1787_v62 = vrot.slane %v7742_v53, 4  ;;  %v620_v28 = vld [vmem:[#allocation2 + $0x34] sm:$0xf]  ;;  %3428 = vmatmul.mubr.bf16.gmra.mxu0 %v7220_v21  ;;  %v6406_v43 = vpack.c.bf16 %v408_v52, %v408_v52  ;;  %vm1156_vm13 = vmpackc.low %vm1060_vm10, %vm1060_vm10  ;;  %v6457_v44 = vunpack.c.h.bf16 %v6591_v4  ;;  %v7218_v19 = vld [vmem:[#allocation2 + $0x124] ss:$12 sps:$4 sm:$0xff]  }
  0x37   : > { %v1798_v54 = vshrl.u32 %v1573_v47, 16  ;;  %v1801_v55 = vshll.u32 %v1573_v47, 16  ;;  %v1552_v39 = vsel %vm7761_vm8, 0, %v620_v28  ;;  %v621_v33 = vld [vmem:[#allocation2 + $0x40] sm:$0xf]  ;;  %v317_v45 = vmul.f32 %v6456_v35, %v7538_v23  ;;  %3515 = vmatprep.mubr.bf16.mxu1 %v7218_v19 }
  0x38   : > { %v1795_v20 = vsel %vm7693_vm3, %v1787_v62, %v1794_v5  ;;  %v1609_v56 = vshrl.u32 %v1552_v39, 16  ;;  %v1612_v38 = vshll.u32 %v1552_v39, 16  ;;  %v1553_v42 = vsel %vm1520_vm9, 0, %v621_v33  ;;  %576 = vst [vmem:[#allocation2 + $0x13c] sm:$0xf] %v6406_v43  ;;  %v7222_v5 = vld [vmem:[%s9367_s3 + $0xb0] sm:$0xff]  }
  0x39   : > { %7083 = vmatpush3.bf16.msra.mxu0 %v7256_v11  ;;  %v7753_v63 = vrot.slane %v1798_v54, 7  ;;  %1931 = vst [vmem:[#allocation2 + $0x120] sm:$0xf] %v1795_v20  ;;  %v1618_v47 = vshrl.u32 %v1553_v42, 16  ;;  %v1621_v48 = vshll.u32 %v1553_v42, 16  ;;  %v6407_v49 = vpack.c.bf16 %v409_v40, %v409_v40 }
  0x3a   : > { %v1611_v46 = vrot.slane %v1609_v56, 7  ;;  %v1188_v54 = vsel %vm1156_vm13, 65537, %v7427_v2  ;;  %v356_v26 = vadd.f32 %v7554_v29, %v317_v45  ;;  %v591_v59 = vadd.s32 48, %v7496_v8  ;;  %7084 = vmatprep.subr.bf16.mxu0 %v7271_v17 }
  0x3b   : > { %v1803_v16 = vor.u32 %v1801_v55, %v7753_v63  ;;  %v1805_v32 = vrot.slane %v7753_v63, 4  ;;  %v318_v55 = vmul.f32 %v6457_v44, %v7538_v23  ;;  %v7794_v3 = vrot.slane %v1618_v47, 7  ;;  %577 = vst [vmem:[#allocation2 + $0x148] sm:$0xf] %v6407_v49 }
  0x3c   : > { %v1614_v60 = vor.u32 %v1612_v38, %v1611_v46  ;;  %v1616_v62 = vrot.slane %v1611_v46, 4  ;;  %v1457_v4 = vshll.u32 %v1188_v54, 16  ;;  %v388_v14 = vmax.f32 %v356_v26, 0.0 }
  0x3d   : > { %v1804_v27 = vsel %vm7693_vm3, %v1796_v7, %v1803_v16  ;;  %v1461_v7 = vshrl.u32 %v1188_v54, 16  ;;  %v357_v13 = vadd.f32 %v7554_v29, %v318_v55  ;;  %v696_v16 = vand.u32 15, %v591_v59  ;;  %7085 = vmatpush3.bf16.msra.mxu0 %v7271_v17 }
  0x3e   : > { %1932 = vst [vmem:[#allocation2 + $0x12c] sm:$0xf] %v1804_v27  ;;  %v1615_v20 = vsel %vm7693_vm3, %v1607_v34, %v1614_v60  ;;  %v1623_v21 = vor.u32 %v1621_v48, %v7794_v3  ;;  %v7808_v22 = vrot.slane %v1457_v4, 5  ;;  %v6500_v24 = vunpack.c.l.bf16 %v6602_v51 }
  0x3f   : > { %1911 = vst [vmem:[#allocation2 + $0x30] sm:$0xf] %v1615_v20  ;;  %v389_v25 = vmax.f32 %v357_v13, 0.0  ;;  %v6386_v27 = vpack.c.bf16 %v388_v14, %v388_v14  ;;  %vm7810_vm14 = vcmp.eq.s32.totalorder %v696_v16, 0  ;;  %v1243_v30 = vrot.slane %v1241_v1, 4  ;;  %v7227_v1 = vld [vmem:[%s9367_s3 + $0xa8] sm:$0xff]  }
  0x40   : > { %v1624_v12 = vsel %vm7693_vm3, %v1616_v62, %v1623_v21  ;;  %v1460_v34 = vsel %vm7607_vm11, %v7614_v6, %v7808_v22  ;;  %vm1136_vm15 = vmpackc.low %vm7810_vm14, %vm7810_vm14  ;;  %v1625_v31 = vrot.slane %v7794_v3, 4  ;;  %v6501_v39 = vunpack.c.h.bf16 %v6602_v51  ;;  %v642_v56 = vld [vmem:[#allocation2 + $0x13c] sm:$0xf]  ;;  %v7230_v14 = vld [vmem:[%s9367_s3 + $0xa0] sm:$0xff]  }
  0x41   : > { %1912 = vst [vmem:[#allocation2 + $0x3c] sm:$0xf] %v1624_v12  ;;  %vm7826_vm0 = vcmp.ne.s16.totalorder %v1460_v34, 0  ;;  %v6387_v52 = vpack.c.bf16 %v389_v25, %v389_v25  ;;  %556 = vst [vmem:[#allocation2 + $0x4c] sm:$0xf] %v6386_v27  ;;  %v7834_v35 = vsel %vm1136_vm15, 65537, %v7427_v2  ;;  %v1244_v33 = vor.u32 %v1243_v30, %v7757_v9 }
  0x42   : > { %v1257_v38 = vshll.u32 %v7834_v35, 16  ;;  %v1261_v40 = vshrl.u32 %v7834_v35, 16  ;;  %v339_v42 = vmul.f32 %v6500_v24, %v7538_v23  ;;  %v340_v43 = vmul.f32 %v6501_v39, %v7538_v23  ;;  %v643_v44 = vld [vmem:[#allocation2 + $0x148] sm:$0xf] }
  0x43   : > { %v1574_v45 = vsel %vm7784_vm12, 0, %v642_v56  ;;  %557 = vst [vmem:[#allocation2 + $0x58] sm:$0xf] %v6387_v52  ;;  %v1245_v46 = vrot.slane %v1244_v33, 4  ;;  %v613_v9 = vadd.s32 224, %v7496_v8  ;;  %v1463_v47 = vrot.slane %v1461_v7, 4 }
  0x44   : > { %v1575_v48 = vsel %vm7826_vm0, 0, %v643_v44  ;;  %v1807_v49 = vshrl.u32 %v1574_v45, 16  ;;  %v1810_v51 = vshll.u32 %v1574_v45, 16  ;;  %v7850_v54 = vrot.slane %v1257_v38, 5  ;;  %v7236_v38 = vld [vmem:[%s9367_s3 + $0x98] sm:$0xff]  }
  0x45   : > { %v7216_v18 = vld [vmem:[#allocation2 + $0x120] ss:$12 sps:$4 sm:$0xff]   ;;  %v1816_v55 = vshrl.u32 %v1575_v48, 16  ;;  %v1819_v26 = vshll.u32 %v1575_v48, 16  ;;  %v1250_v11 = vsel %vm7607_vm11, %v1245_v46, %v7590_v50  ;;  %v378_v59 = vadd.f32 %v7554_v29, %v339_v42 }
  0x46   : > { %3516 = vmatmul.mubr.bf16.vlgmr.msra.gmra.mxu1 %v7216_v18  ;;  %v1809_v60 = vrot.slane %v1807_v49, 7  ;;  %v1260_v62 = vsel %vm7607_vm11, %v7614_v6, %v7850_v54  ;;  %vm7860_vm1 = vcmp.ne.s16.totalorder %v1250_v11, 0  ;;  %v379_v7 = vadd.f32 %v7554_v29, %v340_v43  ;;  %v7223_v18 = vld [vmem:[#allocation2 + $0x34] ss:$12 sps:$4 sm:$0xff]  }
  0x47   : > { %7029 = vmatpush3.bf16.msra.mxu1 %v7619_v10  ;;  %v7846_v10 = vld [vmem:[%s7519_s17 + $0x18] sm:$0xff]   ;;  %v7865_v13 = vrot.slane %v1816_v55, 7  ;;  %vm7870_vm2 = vcmp.ne.s16.totalorder %v1260_v62, 0  ;;  %v410_v16 = vmax.f32 %v378_v59, 0.0  ;;  %v850_v17 = vand.u32 15, %v613_v9  ;;  %3435 = vmatprep.mubr.bf16.mxu0 %v7223_v18 }
  0x48   : > { %7030 = vmatprep.subr.bf16.mxu1 %v7222_v5  ;;  %v1812_v19 = vor.u32 %v1810_v51, %v1809_v60  ;;  %v1814_v20 = vrot.slane %v1809_v60, 4  ;;  %v7228_v21 = vld [vmem:[#allocation2 + $0x30] ss:$12 sps:$4 sm:$0xff]   ;;  %v1464_v24 = vor.u32 %v1463_v47, %v7808_v22  ;;  %v6460_v25 = vunpack.c.l.bf16 %v7846_v10  ;;  %v622_v28 = vld [vmem:[#allocation2 + $0x4c] sm:$0xf] }
  0x49   : > { %v1821_v27 = vor.u32 %v1819_v26, %v7865_v13  ;;  %v411_v30 = vmax.f32 %v379_v7, 0.0  ;;  %v6408_v12 = vpack.c.bf16 %v410_v16, %v410_v16  ;;  %vm7877_vm4 = vcmp.eq.s32.totalorder %v850_v17, 0  ;;  %3436 = vmatmul.mubr.bf16.gmra.mxu0 %v7228_v21  ;;  %v7239_v60 = vld [vmem:[%s9367_s3 + $0x90] sm:$0xff]   ;;  %v7244_v21 = vld [vmem:[%s9367_s3 + $0x88] sm:$0xff]  }
  0x4a   : > { %v1813_v39 = vsel %vm7693_vm3, %v1805_v32, %v1812_v19  ;;  %v623_v57 = vld [vmem:[#allocation2 + $0x58] sm:$0xf]  ;;  %v1554_v22 = vsel %vm7860_vm1, 0, %v622_v28  ;;  %vm1158_vm5 = vmpackc.low %vm7877_vm4, %vm7877_vm4  ;;  %v1465_v52 = vrot.slane %v1464_v24, 4  ;;  %v1823_v33 = vrot.slane %v7865_v13, 4 }
  0x4b   : > { %7031 = vmatpush3.bf16.msra.mxu1 %v7222_v5  ;;  %v1822_v56 = vsel %vm7693_vm3, %v1814_v20, %v1821_v27  ;;  %1933 = vst [vmem:[#allocation2 + $0x138] sm:$0xf] %v1813_v39  ;;  %v1555_v63 = vsel %vm7870_vm2, 0, %v623_v57  ;;  %v1627_v32 = vshrl.u32 %v1554_v22, 16  ;;  %578 = vst [vmem:[#allocation2 + $0x154] sm:$0xf] %v6408_v12  ;;  %v6409_v44 = vpack.c.bf16 %v411_v30, %v411_v30 }
  0x4c   : > { %7032 = vmatprep.subr.bf16.mxu1 %v7227_v1  ;;  %1934 = vst [vmem:[#allocation2 + $0x144] sm:$0xf] %v1822_v56  ;;  %v1636_v42 = vshrl.u32 %v1555_v63, 16  ;;  %v1639_v43 = vshll.u32 %v1555_v63, 16  ;;  %v7904_v45 = vsel %vm1158_vm5, 65537, %v7427_v2  ;;  %v1470_v9 = vsel %vm7607_vm11, %v1465_v52, %v7590_v50  ;;  %v6603_v5 = vld [vmem:[%s7519_s17 + $0x70] sm:$0xff]  }
  0x4d   : > { %v1629_v46 = vrot.slane %v1627_v32, 7  ;;  %v1477_v47 = vshll.u32 %v7904_v45, 16  ;;  %v1481_v48 = vshrl.u32 %v7904_v45, 16  ;;  %579 = vst [vmem:[#allocation2 + $0x160] sm:$0xf] %v6409_v44  ;;  %vm7913_vm6 = vcmp.ne.s16.totalorder %v1470_v9, 0 }
  0x4e   : > { %v7911_v49 = vrot.slane %v1636_v42, 7  ;;  %v6461_v2 = vunpack.c.h.bf16 %v7846_v10  ;;  %v319_v55 = vmul.f32 %v6460_v25, %v7538_v23  ;;  %v593_v62 = vadd.s32 64, %v7496_v8  ;;  %v7225_v24 = vld [vmem:[#allocation2 + $0x13c] ss:$12 sps:$4 sm:$0xff]   ;;  %v7279_v44 = vld [vmem:[%s9367_s3 + $0x150] sm:$0xff]  }
  0x4f   : > { %7033 = vmatpush3.bf16.msra.mxu1 %v7227_v1  ;;  %v1630_v1 = vshll.u32 %v1554_v22, 16  ;;  %v1634_v11 = vrot.slane %v1629_v46, 4  ;;  %v7919_v59 = vrot.slane %v1477_v47, 5  ;;  %v1263_v10 = vrot.slane %v1261_v40, 4  ;;  %3523 = vmatprep.mubr.bf16.mxu1 %v7225_v24  ;;  %v7252_v40 = vld [vmem:[%s9367_s3 + $0x138] sm:$0xff]  }
  0x50   : > { %7034 = vmatprep.subr.bf16.mxu1 %v7230_v14  ;;  %v1641_v4 = vor.u32 %v1639_v43, %v7911_v49  ;;  %v320_v7 = vmul.f32 %v6461_v2, %v7538_v23  ;;  %v710_v18 = vand.u32 15, %v593_v62  ;;  %v1643_v19 = vrot.slane %v7911_v49, 4  ;;  %v6593_v2 = vld [vmem:[%s7519_s17 + $0x20] sm:$0xff]   ;;  %7086 = vmatprep.subr.bf16.mxu0 %v7279_v44 }
  0x51   : > { %v1632_v26 = vor.u32 %v1630_v1, %v1629_v46  ;;  %v1480_v17 = vsel %vm7607_vm11, %v7614_v6, %v7919_v59  ;;  %v1264_v28 = vor.u32 %v1263_v10, %v7850_v54  ;;  %v6504_v30 = vunpack.c.l.bf16 %v6603_v5  ;;  %7087 = vmatpush3.bf16.msra.mxu0 %v7279_v44 }
  0x52   : > { %v1642_v20 = vsel %vm7693_vm3, %v1634_v11, %v1641_v4  ;;  %v644_v35 = vld [vmem:[#allocation2 + $0x154] sm:$0xf]  ;;  %vm7942_vm7 = vcmp.ne.s16.totalorder %v1480_v17, 0  ;;  %v359_v3 = vadd.f32 %v7554_v29, %v320_v7  ;;  %v6505_v12 = vunpack.c.h.bf16 %v6603_v5  ;;  %v7232_v5 = vld [vmem:[#allocation2 + $0x4c] ss:$12 sps:$4 sm:$0xff]  }
  0x53   : > { %7035 = vmatpush3.bf16.msra.mxu1 %v7230_v14  ;;  %v358_v14 = vadd.f32 %v7554_v29, %v319_v55  ;;  %v1633_v16 = vsel %vm7693_vm3, %v1625_v31, %v1632_v26  ;;  %v7229_v25 = vld [vmem:[#allocation2 + $0x138] ss:$12 sps:$4 sm:$0xff]   ;;  %1914 = vst [vmem:[#allocation2 + $0x54] sm:$0xf] %v1642_v20  ;;  %v1576_v27 = vsel %vm7913_vm6, 0, %v644_v35  ;;  %vm7953_vm8 = vcmp.eq.s32.totalorder %v710_v18, 0  ;;  %3443 = vmatprep.mubr.bf16.mxu0 %v7232_v5 }
  0x54   : > { %7036 = vmatprep.subr.bf16.mxu1 %v7236_v38  ;;  %1913 = vst [vmem:[#allocation2 + $0x48] sm:$0xf] %v1633_v16  ;;  %v1825_v34 = vshrl.u32 %v1576_v27, 16  ;;  %v1828_v39 = vshll.u32 %v1576_v27, 16  ;;  %v391_v57 = vmax.f32 %v359_v3, 0.0  ;;  %v1265_v63 = vrot.slane %v1264_v28, 4  ;;  %3524 = vmatmul.mubr.bf16.gmra.mxu1 %v7229_v25  ;;  %vm1138_vm9 = vmpackc.low %vm7953_vm8, %vm7953_vm8 }
  0x55   : > { %v390_v31 = vmax.f32 %v358_v14, 0.0  ;;  %v645_v52 = vld [vmem:[#allocation2 + $0x160] sm:$0xf]  ;;  %v341_v32 = vmul.f32 %v6504_v30, %v7538_v23  ;;  %v342_v1 = vmul.f32 %v6505_v12, %v7538_v23  ;;  %v615_v43 = vadd.s32 240, %v7496_v8 }
  0x56   : > { %v1577_v54 = vsel %vm7942_vm7, 0, %v645_v52  ;;  %v6389_v42 = vpack.c.bf16 %v391_v57, %v391_v57  ;;  %v7968_v23 = vld [vmem:[#allocation2] sm:$0xff]  ;;  %v1270_v51 = vsel %vm7607_vm11, %v1265_v63, %v7590_v50  ;;  %v6464_v20 = vunpack.c.l.bf16 %v6593_v2 }
  0x57   : > { %7037 = vmatpush3.bf16.msra.mxu1 %v7236_v38  ;;  %v6388_v22 = vpack.c.bf16 %v390_v31, %v390_v31  ;;  %v1827_v38 = vrot.slane %v1825_v34, 7  ;;  %v1834_v46 = vshrl.u32 %v1577_v54, 16  ;;  %v1837_v9 = vshll.u32 %v1577_v54, 16  ;;  %v8010_v27 = vld [vmem:[%s9365_s1] ss:$0 sm:$0xff] }
  0x58   : > { %7038 = vmatprep.subr.bf16.mxu1 %v7239_v60  ;;  %v7971_v47 = vsel %vm1138_vm9, 65537, %v7968_v23  ;;  %559 = vst [vmem:[#allocation2 + $0x70] sm:$0xf] %v6389_v42  ;;  %vm7984_vm10 = vcmp.ne.s16.totalorder %v1270_v51, 0  ;;  %v380_v14 = vadd.f32 %v7554_v29, %v341_v32  ;;  %v381_v10 = vadd.f32 %v7554_v29, %v342_v1  ;;  %v8026_v63 = vld [vmem:[%s9366_s2] ss:$0 sm:$0xff] }
  0x59   : > { %558 = vst [vmem:[#allocation2 + $0x64] sm:$0xf] %v6388_v22  ;;  %v1830_v55 = vor.u32 %v1828_v39, %v1827_v38  ;;  %v1832_v26 = vrot.slane %v1827_v38, 4  ;;  %v1277_v11 = vshll.u32 %v7971_v47, 16  ;;  %v1281_v62 = vshrl.u32 %v7971_v47, 16  ;;  %v8038_v51 = vld [vmem:[%s7519_s17 + $0x28] sm:$0xff]  }
  0x5a   : > { %v7982_v4 = vrot.slane %v1834_v46, 7  ;;  %v6465_v35 = vunpack.c.h.bf16 %v6593_v2  ;;  %v412_v29 = vmax.f32 %v380_v14, 0.0  ;;  %v413_v31 = vmax.f32 %v381_v10, 0.0 }
  0x5b   : > { %7039 = vmatpush3.bf16.msra.mxu1 %v7239_v60  ;;  %v7248_v60 = vld [vmem:[%s9367_s3 + $0x80] sm:$0xff]   ;;  %v1831_v16 = vsel %vm7693_vm3, %v1823_v33, %v1830_v55  ;;  %v7237_v17 = vld [vmem:[#allocation2 + $0x48] ss:$12 sps:$4 sm:$0xff]   ;;  %v7994_v18 = vrot.slane %v1277_v11, 5  ;;  %v864_v24 = vand.u32 15, %v615_v43  ;;  %v1483_v33 = vrot.slane %v1481_v48, 4 }
  0x5c   : > { %7040 = vmatprep.subr.bf16.mxu1 %v7244_v21  ;;  %v1839_v3 = vor.u32 %v1837_v9, %v7982_v4  ;;  %1935 = vst [vmem:[#allocation2 + $0x150] sm:$0xf] %v1831_v16  ;;  %v1841_v25 = vrot.slane %v7982_v4, 4  ;;  %v321_v28 = vmul.f32 %v8010_v27, %v6464_v20  ;;  %3444 = vmatmul.mubr.bf16.gmra.mxu0 %v7237_v17  ;;  %v595_v1 = vadd.s32 80, %v7496_v8 }
  0x5d   : > { %v1280_v13 = vsel %vm7607_vm11, %v7614_v6, %v7994_v18  ;;  %v6410_v45 = vpack.c.bf16 %v412_v29, %v412_v29  ;;  %v6411_v48 = vpack.c.bf16 %v413_v31, %v413_v31  ;;  %vm1064_vm13 = vcmp.eq.s32.totalorder %v864_v24, 0 }
  0x5e   : > { %vm8015_vm12 = vcmp.ne.s16.totalorder %v1280_v13, 0  ;;  %v1484_v39 = vor.u32 %v1483_v33, %v7919_v59  ;;  %v322_v57 = vmul.f32 %v8010_v27, %v6465_v35  ;;  %vm1160_vm14 = vmpackc.low %vm1064_vm13, %vm1064_vm13  ;;  %v360_v32 = vadd.f32 %v8026_v63, %v321_v28  ;;  %v7234_v35 = vld [vmem:[#allocation2 + $0x154] ss:$12 sps:$4 sm:$0xff]  }
  0x5f   : > { %7041 = vmatpush3.bf16.msra.mxu1 %v7244_v21  ;;  %v1840_v21 = vsel %vm7693_vm3, %v1832_v26, %v1839_v3  ;;  %v625_v22 = vld [vmem:[#allocation2 + $0x70] sm:$0xf]  ;;  %580 = vst [vmem:[#allocation2 + $0x16c] sm:$0xf] %v6410_v45  ;;  %581 = vst [vmem:[#allocation2 + $0x178] sm:$0xf] %v6411_v48  ;;  %v6468_v28 = vunpack.c.l.bf16 %v8038_v51  ;;  %3531 = vmatprep.mubr.bf16.mxu1 %v7234_v35 }
  0x60   : > { %7042 = vmatprep.subr.bf16.mxu1 %v7248_v60  ;;  %v624_v30 = vld [vmem:[#allocation2 + $0x64] sm:$0xf]  ;;  %1936 = vst [vmem:[#allocation2 + $0x15c] sm:$0xf] %v1840_v21  ;;  %v1557_v59 = vsel %vm8015_vm12, 0, %v625_v22  ;;  %v8033_v54 = vsel %vm1160_vm14, 65537, %v7968_v23  ;;  %v361_v42 = vadd.f32 %v8026_v63, %v322_v57 }
  0x61   : > { %v1556_v34 = vsel %vm7984_vm10, 0, %v624_v30  ;;  %v1485_v38 = vrot.slane %v1484_v39, 4  ;;  %v1654_v44 = vshrl.u32 %v1557_v59, 16  ;;  %v1657_v46 = vshll.u32 %v1557_v59, 16  ;;  %v8082_v48 = vld [vmem:[%s7519_s17 + $0x30] sm:$0xff]  }
  0x62   : > { %v1645_v52 = vshrl.u32 %v1556_v34, 16  ;;  %v1648_v56 = vshll.u32 %v1556_v34, 16  ;;  %v1497_v9 = vshll.u32 %v8033_v54, 16  ;;  %v1501_v55 = vshrl.u32 %v8033_v54, 16 }
  0x63   : > { %7043 = vmatpush3.bf16.msra.mxu1 %v7248_v60  ;;  %v1490_v2 = vsel %vm7607_vm11, %v1485_v38, %v7590_v50  ;;  %v392_v26 = vmax.f32 %v360_v32, 0.0  ;;  %v393_v11 = vmax.f32 %v361_v42, 0.0  ;;  %v8044_v14 = vrot.slane %v1654_v44, 7 }
  0x64   : > { %6756 = vmatprep.subr.bf16.mxu1 %v7252_v40  ;;  %v1647_v43 = vrot.slane %v1645_v52, 7  ;;  %v8046_v10 = vrot.slane %v1497_v9, 5  ;;  %vm8048_vm15 = vcmp.ne.s16.totalorder %v1490_v2, 0  ;;  %v724_v20 = vand.u32 15, %v595_v1 }
  0x65   : > { %v6390_v16 = vpack.c.bf16 %v392_v26, %v392_v26  ;;  %v6391_v17 = vpack.c.bf16 %v393_v11, %v393_v11  ;;  %v1659_v29 = vor.u32 %v1657_v46, %v8044_v14  ;;  %v1283_v24 = vrot.slane %v1281_v62, 4 }
  0x66   : > { %v1650_v60 = vor.u32 %v1648_v56, %v1647_v43  ;;  %v1652_v7 = vrot.slane %v1647_v43, 4  ;;  %v1500_v31 = vsel %vm7607_vm11, %v7614_v6, %v8046_v10  ;;  %v646_v13 = vld [vmem:[#allocation2 + $0x16c] sm:$0xf]  ;;  %v647_v33 = vld [vmem:[#allocation2 + $0x178] sm:$0xf]  ;;  %vm8063_vm1 = vcmp.eq.s32.totalorder %v724_v20, 0 }
  0x67   : > { %v7238_v40 = vld [vmem:[#allocation2 + $0x150] ss:$12 sps:$4 sm:$0xff]   ;;  %vm1546_vm0 = vcmp.ne.s16.totalorder %v1500_v31, 0  ;;  %560 = vst [vmem:[#allocation2 + $0x7c] sm:$0xf] %v6390_v16  ;;  %v1578_v62 = vsel %vm8048_vm15, 0, %v646_v13  ;;  %vm1140_vm2 = vmpackc.low %vm8063_vm1, %vm8063_vm1  ;;  %v1284_v30 = vor.u32 %v1283_v24, %v7994_v18  ;;  %v6469_v26 = vunpack.c.h.bf16 %v8038_v51 }
  0x68   : > { %v1651_v3 = vsel %vm7693_vm3, %v1643_v19, %v1650_v60  ;;  %561 = vst [vmem:[#allocation2 + $0x88] sm:$0xf] %v6391_v17  ;;  %v8070_v19 = vor.u32 %v7600_v61, %v1207_v41  ;;  %v1660_v47 = vsel %vm7693_vm3, %v1652_v7, %v1659_v29  ;;  %v1579_v21 = vsel %vm1546_vm0, 0, %v647_v33  ;;  %3532 = vmatmul.mubr.bf16.gmra.mxu1 %v7238_v40  ;;  %v1941_v17 = vld [vmem:[#allocation2 + $0x1c] sm:$0xf] }
  0x69   : > { %1915 = vst [vmem:[#allocation2 + $0x60] sm:$0xf] %v1651_v3  ;;  %1916 = vst [vmem:[#allocation2 + $0x6c] sm:$0xf] %v1660_v47  ;;  %v1843_v37 = vshrl.u32 %v1578_v62, 16  ;;  %v1846_v41 = vshll.u32 %v1578_v62, 16  ;;  %v323_v11 = vmul.f32 %v8010_v27, %v6468_v28  ;;  %v6472_v60 = vunpack.c.l.bf16 %v8082_v48 }
  0x6a   : > { %v1852_v12 = vshrl.u32 %v1579_v21, 16  ;;  %v1855_v45 = vshll.u32 %v1579_v21, 16  ;;  %v8085_v34 = vsel %vm1140_vm2, 65537, %v7968_v23  ;;  %v1285_v39 = vrot.slane %v1284_v30, 4  ;;  %v7240_v51 = vld [vmem:[#allocation2 + $0x64] ss:$12 sps:$4 sm:$0xff]  }
  0x6b   : > { %v1661_v57 = vrot.slane %v8044_v14, 4  ;;  %v586_v22 = vadd.s32 8, %v7496_v8  ;;  %v1845_v52 = vrot.slane %v1843_v37, 7  ;;  %v1297_v18 = vshll.u32 %v8085_v34, 16  ;;  %3451 = vmatprep.mubr.bf16.mxu0 %v7240_v51 }
  0x6c   : > { %v8089_v56 = vrot.slane %v1852_v12, 7  ;;  %v1301_v32 = vshrl.u32 %v8085_v34, 16  ;;  %v1290_v1 = vsel %vm7607_vm11, %v1285_v39, %v7590_v50  ;;  %v8097_v38 = vrot.slane %v7600_v61, 4 }
  0x6d   : > { %v661_v59 = vand.u32 15, %v586_v22  ;;  %vm2421_vm4 = vcmp.ne.s16.totalorder %v8070_v19, 0  ;;  %v1848_v42 = vor.u32 %v1846_v41, %v1845_v52  ;;  %v1850_v43 = vrot.slane %v1845_v52, 4  ;;  %v7251_v52 = vld [vmem:[#allocation2 + $0x8] ss:$12 sps:$4 sm:$0xff]  }
  0x6e   : > { %v1857_v44 = vor.u32 %v1855_v45, %v8089_v56  ;;  %v8101_v46 = vrot.slane %v1297_v18, 5  ;;  %v626_v9 = vld [vmem:[#allocation2 + $0x7c] sm:$0xf]  ;;  %vm1525_vm5 = vcmp.ne.s16.totalorder %v1290_v1, 0  ;;  %v324_v4 = vmul.f32 %v8010_v27, %v6469_v26 }
  0x6f   : > { %v627_v2 = vld [vmem:[#allocation2 + $0x88] sm:$0xf]  ;;  %v1849_v61 = vsel %vm7693_vm3, %v1841_v25, %v1848_v42  ;;  %v1558_v16 = vsel %vm1525_vm5, 0, %v626_v9  ;;  %v362_v35 = vadd.f32 %v8026_v63, %v323_v11  ;;  %v6473_v25 = vunpack.c.h.bf16 %v8082_v48  ;;  %v7242_v42 = vld [vmem:[#allocation2 + $0x16c] ss:$12 sps:$4 sm:$0xff]  }
  0x70   : > { %v1858_v7 = vsel %vm7693_vm3, %v1850_v43, %v1857_v44  ;;  %v1300_v5 = vsel %vm7607_vm11, %v7614_v6, %v8101_v46  ;;  %1937 = vst [vmem:[#allocation2 + $0x168] sm:$0xf] %v1849_v61  ;;  %v7245_v20 = vld [vmem:[#allocation2 + $0x60] ss:$12 sps:$4 sm:$0xff]   ;;  %v1663_v3 = vshrl.u32 %v1558_v16, 16  ;;  %v1666_v29 = vshll.u32 %v1558_v16, 16  ;;  %3539 = vmatprep.mubr.bf16.mxu1 %v7242_v42 }
  0x71   : > { %1938 = vst [vmem:[#allocation2 + $0x174] sm:$0xf] %v1858_v7  ;;  %vm1526_vm6 = vcmp.ne.s16.totalorder %v1300_v5, 0  ;;  %vm1975_vm7 = vcmp.eq.s32.totalorder %v661_v59, 15  ;;  %v2454_v13 = vsel %vm2421_vm4, 0, %v1941_v17  ;;  %v363_v33 = vadd.f32 %v8026_v63, %v324_v4  ;;  %3452 = vmatmul.mubr.bf16.gmra.mxu0 %v7245_v20 }
  0x72   : > { %v1559_v40 = vsel %vm1526_vm6, 0, %v627_v2  ;;  %vm2071_vm8 = vmpackc.low %vm1975_vm7, %vm1975_vm7  ;;  %v1665_v49 = vrot.slane %v1663_v3, 7  ;;  %v2488_v47 = vshrl.u32 %v2454_v13, 16  ;;  %v2491_v62 = vshll.u32 %v2454_v13, 16  ;;  %v1942_v44 = vld [vmem:[#allocation2 + $0x28] sm:$0xf] }
  0x73   : > { %v1672_v31 = vshrl.u32 %v1559_v40, 16  ;;  %v1675_v24 = vshll.u32 %v1559_v40, 16  ;;  %v2103_v28 = vsel %vm2071_vm8, 65537, %v7968_v23  ;;  %v394_v41 = vmax.f32 %v362_v35, 0.0  ;;  %v1943_v9 = vld [vmem:[#allocation2 + $0x34] sm:$0xf] }
  0x74   : > { %v2143_v30 = vshrl.u32 %v2103_v28, 16  ;;  %v2146_v37 = vshll.u32 %v2103_v28, 16  ;;  %v1668_v12 = vor.u32 %v1666_v29, %v1665_v49  ;;  %v1670_v45 = vrot.slane %v1665_v49, 4  ;;  %v8144_v3 = vld [vmem:[%s7519_s17 + $0x38] sm:$0xff]  }
  0x75   : > { %v8123_v21 = vrot.slane %v1672_v31, 7  ;;  %v2490_v34 = vrot.slane %v2488_v47, 4  ;;  %v2493_v39 = vrot.slane %v2491_v62, 5  ;;  %v395_v1 = vmax.f32 %v363_v33, 0.0 }
  0x76   : > { %v2145_v18 = vrot.slane %v2143_v30, 7  ;;  %v6392_v59 = vpack.c.bf16 %v394_v41, %v394_v41  ;;  %v1669_v43 = vsel %vm7693_vm3, %v1661_v57, %v1668_v12  ;;  %v597_v26 = vadd.s32 96, %v7496_v8 }
  0x77   : > { %v1677_v22 = vor.u32 %v1675_v24, %v8123_v21  ;;  %v2494_v2 = vor.u32 %v2493_v39, %v2490_v34  ;;  %v1303_v11 = vrot.slane %v1301_v32, 4  ;;  %1917 = vst [vmem:[#allocation2 + $0x78] sm:$0xf] %v1669_v43  ;;  %v6393_v17 = vpack.c.bf16 %v395_v1, %v395_v1 }
  0x78   : > { %v7246_v61 = vld [vmem:[#allocation2 + $0x168] ss:$12 sps:$4 sm:$0xff]   ;;  %v2148_v5 = vor.u32 %v2146_v37, %v2145_v18  ;;  %v2150_v16 = vrot.slane %v2145_v18, 4  ;;  %562 = vst [vmem:[#allocation2 + $0x94] sm:$0xf] %v6392_v59  ;;  %v738_v57 = vand.u32 15, %v597_v26  ;;  %v8171_v59 = vmul.f32 %v8010_v27, %v6473_v25 }
  0x79   : > { %v1678_v7 = vsel %vm7693_vm3, %v1670_v45, %v1677_v22  ;;  %v2495_v14 = vrot.slane %v2494_v2, 4  ;;  %v1304_v51 = vor.u32 %v1303_v11, %v8101_v46  ;;  %v1679_v20 = vrot.slane %v8123_v21, 4  ;;  %3540 = vmatmul.mubr.bf16.gmra.mxu1 %v7246_v61  ;;  %563 = vst [vmem:[#allocation2 + $0xa0] sm:$0xf] %v6393_v17 }
  0x7a   : > { %1918 = vst [vmem:[#allocation2 + $0x84] sm:$0xf] %v1678_v7  ;;  %v2149_v32 = vsel %vm7693_vm3, %v8097_v38, %v2148_v5  ;;  %v2158_v4 = vsel %vm7693_vm3, %v2150_v16, %v8070_v19  ;;  %v588_v35 = vadd.s32 24, %v7496_v8  ;;  %v590_v40 = vadd.s32 40, %v7496_v8  ;;  %7044 = vmatprep.mubr.bf16.mxu1 %v7251_v52  ;;  %v7249_v52 = vld [vmem:[#allocation2 + $0x7c] ss:$12 sps:$4 sm:$0xff]  }
  0x7b   : > { %vm2422_vm9 = vcmp.ne.s16.totalorder %v2149_v32, 0  ;;  %vm2423_vm10 = vcmp.ne.s16.totalorder %v2158_v4, 0  ;;  %vm1046_vm12 = vcmp.eq.s32.totalorder %v738_v57, 0  ;;  %v1305_v46 = vrot.slane %v1304_v51, 4  ;;  %3459 = vmatprep.mubr.bf16.mxu0 %v7249_v52 }
  0x7c   : > { %v2455_v29 = vsel %vm2422_vm9, 0, %v1942_v44  ;;  %v2456_v31 = vsel %vm2423_vm10, 0, %v1943_v9  ;;  %vm1142_vm13 = vmpackc.low %vm1046_vm12, %vm1046_vm12  ;;  %v675_v24 = vand.u32 15, %v588_v35  ;;  %v689_v13 = vand.u32 15, %v590_v40  ;;  %v1944_v35 = vld [vmem:[#allocation2 + $0x40] sm:$0xf] }
  0x7d   : > { %v2497_v33 = vshll.u32 %v2455_v29, 16  ;;  %v2501_v49 = vshrl.u32 %v2455_v29, 16  ;;  %v2507_v28 = vshll.u32 %v2456_v31, 16  ;;  %v8147_v47 = vsel %vm1142_vm13, 65537, %v7968_v23 }
  0x7e   : > { %v1310_v62 = vsel %vm7607_vm11, %v1305_v46, %v7590_v50  ;;  %v1317_v30 = vshll.u32 %v8147_v47, 16  ;;  %v1321_v37 = vshrl.u32 %v8147_v47, 16  ;;  %vm8154_vm14 = vcmp.eq.s32.totalorder %v675_v24, 15 }
  0x7f   : > { %v2499_v12 = vrot.slane %v2497_v33, 5  ;;  %v2503_v45 = vrot.slane %v2501_v49, 4  ;;  %v2509_v34 = vrot.slane %v2507_v28, 5  ;;  %v628_v39 = vld [vmem:[#allocation2 + $0x94] sm:$0xf]  ;;  %vm2073_vm15 = vmpackc.low %vm8154_vm14, %vm8154_vm14  ;;  %v8164_v22 = vmul.f32 %v8010_v27, %v6472_v60 }
  0x80   : > { %v8166_v1 = vrot.slane %v1317_v30, 5  ;;  %v6476_v42 = vunpack.c.l.bf16 %v8144_v3  ;;  %v6477_v43 = vunpack.c.h.bf16 %v8144_v3  ;;  %v629_v2 = vld [vmem:[#allocation2 + $0xa0] sm:$0xf]  ;;  %vm1527_vm0 = vcmp.ne.s16.totalorder %v1310_v62, 0  ;;  %v7293_v62 = vld [vmem:[%s9367_s3 + $0x148] sm:$0xff]  }
  0x81   : > { %v7253_v18 = vld [vmem:[#allocation2 + $0x78] ss:$12 sps:$4 sm:$0xff]   ;;  %v2500_v44 = vsel %vm7607_vm11, %v2495_v14, %v2499_v12  ;;  %v2504_v9 = vor.u32 %v2503_v45, %v2499_v12  ;;  %v2105_v60 = vsel %vm2073_vm15, 65537, %v7968_v23  ;;  %v1560_v25 = vsel %vm1527_vm0, 0, %v628_v39  ;;  %7088 = vmatprep.subr.bf16.mxu0 %v7293_v62 }
  0x82   : > { %2843 = vst [vmem:[#allocation2 + $0x20] sm:$0xf] %v2500_v44  ;;  %v1320_v48 = vsel %vm7607_vm11, %v7614_v6, %v8166_v1  ;;  %v2161_v26 = vshrl.u32 %v2105_v60, 16  ;;  %v2164_v11 = vshll.u32 %v2105_v60, 16  ;;  %3460 = vmatmul.mubr.bf16.gmra.mxu0 %v7253_v18  ;;  %v1681_v7 = vshrl.u32 %v1560_v25, 16  ;;  %v7255_v18 = vld [vmem:[%s9367_s3 + $0xf8] sm:$0xff]  }
  0x83   : > { %v2505_v61 = vrot.slane %v2504_v9, 4  ;;  %vm1528_vm1 = vcmp.ne.s16.totalorder %v1320_v48, 0  ;;  %v1684_v5 = vshll.u32 %v1560_v25, 16  ;;  %v2511_v14 = vshrl.u32 %v2456_v31, 16  ;;  %v1945_v31 = vld [vmem:[#allocation2 + $0x4c] sm:$0xf]  ;;  %7089 = vmatpush3.bf16.msra.mxu0 %v7293_v62 }
  0x84   : > { %v1561_v16 = vsel %vm1528_vm1, 0, %v629_v2  ;;  %v2163_v17 = vrot.slane %v2161_v26, 7  ;;  %vm1979_vm2 = vcmp.eq.s32.totalorder %v689_v13, 15  ;;  %v1683_v51 = vrot.slane %v1681_v7, 7  ;;  %v7260_v25 = vld [vmem:[%s9367_s3 + $0x130] sm:$0xff]  }
  0x85   : > { %v2510_v57 = vsel %vm7607_vm11, %v2505_v61, %v2509_v34  ;;  %v1690_v32 = vshrl.u32 %v1561_v16, 16  ;;  %v1693_v4 = vshll.u32 %v1561_v16, 16  ;;  %vm2075_vm4 = vmpackc.low %vm1979_vm2, %vm1979_vm2  ;;  %v2513_v29 = vrot.slane %v2511_v14, 4  ;;  %v1946_v26 = vld [vmem:[#allocation2 + $0x58] sm:$0xf] }
  0x86   : > { %2844 = vst [vmem:[#allocation2 + $0x2c] sm:$0xf] %v2510_v57  ;;  %v2166_v40 = vor.u32 %v2164_v11, %v2163_v17  ;;  %v2168_v46 = vrot.slane %v2163_v17, 4  ;;  %v2107_v24 = vsel %vm2075_vm4, 65537, %v7968_v23  ;;  %v1686_v33 = vor.u32 %v1684_v5, %v1683_v51  ;;  %v1947_v61 = vld [vmem:[#allocation2 + $0x64] sm:$0xf] }
  0x87   : > { %v1688_v49 = vrot.slane %v1683_v51, 4  ;;  %v8185_v28 = vrot.slane %v1690_v32, 7  ;;  %v2179_v13 = vshrl.u32 %v2107_v24, 16  ;;  %v2514_v12 = vor.u32 %v2513_v29, %v2509_v34 }
  0x88   : > { %v2167_v30 = vsel %vm7693_vm3, %v8097_v38, %v2166_v40  ;;  %v2176_v41 = vsel %vm7693_vm3, %v2168_v46, %v8070_v19  ;;  %v2182_v45 = vshll.u32 %v2107_v24, 16  ;;  %v1687_v39 = vsel %vm7693_vm3, %v1679_v20, %v1686_v33 }
  0x89   : > { %v1695_v52 = vor.u32 %v1693_v4, %v8185_v28  ;;  %vm2424_vm5 = vcmp.ne.s16.totalorder %v2167_v30, 0  ;;  %vm2425_vm6 = vcmp.ne.s16.totalorder %v2176_v41, 0  ;;  %1919 = vst [vmem:[#allocation2 + $0x90] sm:$0xf] %v1687_v39  ;;  %v2515_v2 = vrot.slane %v2514_v12, 4 }
  0x8a   : > { %v2457_v44 = vsel %vm2424_vm5, 0, %v1944_v35  ;;  %v2458_v9 = vsel %vm2425_vm6, 0, %v1945_v31  ;;  %v2181_v34 = vrot.slane %v2179_v13, 7  ;;  %v364_v16 = vadd.f32 %v8026_v63, %v8164_v22  ;;  %v7267_v31 = vld [vmem:[%s9367_s3 + $0x128] sm:$0xff]  }
  0x8b   : > { %v1696_v21 = vsel %vm7693_vm3, %v1688_v49, %v1695_v52  ;;  %v2517_v60 = vshll.u32 %v2457_v44, 16  ;;  %v2521_v20 = vshrl.u32 %v2457_v44, 16  ;;  %v2527_v48 = vshll.u32 %v2458_v9, 16  ;;  %v7257_v44 = vld [vmem:[#allocation2 + $0x94] ss:$12 sps:$4 sm:$0xff]  }
  0x8c   : > { %1920 = vst [vmem:[#allocation2 + $0x9c] sm:$0xf] %v1696_v21  ;;  %v2531_v11 = vshrl.u32 %v2458_v9, 16  ;;  %v2184_v7 = vor.u32 %v2182_v45, %v2181_v34  ;;  %v2186_v5 = vrot.slane %v2181_v34, 4  ;;  %v365_v51 = vadd.f32 %v8026_v63, %v8171_v59  ;;  %v7263_v59 = vld [vmem:[%s9367_s3 + $0xf0] sm:$0xff]   ;;  %3467 = vmatprep.mubr.bf16.mxu0 %v7257_v44 }
  0x8d   : > { %v7254_v17 = vld [vmem:[#allocation2 + $0x20] ss:$12 sps:$4 sm:$0xff]   ;;  %v2519_v14 = vrot.slane %v2517_v60, 5  ;;  %v2523_v57 = vrot.slane %v2521_v20, 4  ;;  %v327_v32 = vmul.f32 %v8010_v27, %v6476_v42  ;;  %v2529_v4 = vrot.slane %v2527_v48, 5 }
  0x8e   : > { %v2185_v35 = vsel %vm7693_vm3, %v8097_v38, %v2184_v7  ;;  %v2194_v40 = vsel %vm7693_vm3, %v2186_v5, %v8070_v19  ;;  %v2533_v22 = vrot.slane %v2531_v11, 4  ;;  %7045 = vmatmul.mubr.bf16.vlgmr.msra.gmra.mxu1 %v7254_v17  ;;  %v396_v49 = vmax.f32 %v364_v16, 0.0  ;;  %v7275_v7 = vld [vmem:[%s9367_s3 + $0x120] sm:$0xff]  }
  0x8f   : > { %v2520_v46 = vsel %vm7607_vm11, %v2515_v2, %v2519_v14  ;;  %v2524_v29 = vor.u32 %v2523_v57, %v2519_v14  ;;  %vm2426_vm7 = vcmp.ne.s16.totalorder %v2185_v35, 0  ;;  %vm2427_vm8 = vcmp.ne.s16.totalorder %v2194_v40, 0  ;;  %6757 = vmatpush3.bf16.msra.mxu1 %v7255_v18  ;;  %v6597_v57 = vld [vmem:[%s7519_s17 + $0x40] sm:$0xff]  }
  0x90   : > { %2845 = vst [vmem:[#allocation2 + $0x38] sm:$0xf] %v2520_v46  ;;  %v2459_v42 = vsel %vm2426_vm7, 0, %v1946_v26  ;;  %v2460_v24 = vsel %vm2427_vm8, 0, %v1947_v61  ;;  %v2534_v33 = vor.u32 %v2533_v22, %v2529_v4  ;;  %6758 = vmatprep.subr.bf16.mxu1 %v7260_v25  ;;  %v397_v39 = vmax.f32 %v365_v51, 0.0  ;;  %v7270_v26 = vld [vmem:[%s9367_s3 + $0xe8] sm:$0xff]  }
  0x91   : > { %v2525_v13 = vrot.slane %v2524_v29, 4  ;;  %v2537_v62 = vshll.u32 %v2459_v42, 16  ;;  %v2541_v30 = vshrl.u32 %v2459_v42, 16  ;;  %v2547_v41 = vshll.u32 %v2460_v24, 16  ;;  %v7278_v22 = vld [vmem:[%s9367_s3 + $0xe0] sm:$0xff]  }
  0x92   : > { %v2535_v12 = vrot.slane %v2534_v33, 4  ;;  %v2551_v45 = vshrl.u32 %v2460_v24, 16  ;;  %v6394_v52 = vpack.c.bf16 %v396_v49, %v396_v49  ;;  %v328_v34 = vmul.f32 %v8010_v27, %v6477_v43  ;;  %v7301_v42 = vld [vmem:[%s9367_s3 + $0x140] sm:$0xff]  }
  0x93   : > { %v2530_v18 = vsel %vm7607_vm11, %v2525_v13, %v2529_v4  ;;  %v7261_v9 = vld [vmem:[#allocation2 + $0x90] ss:$12 sps:$4 sm:$0xff]   ;;  %v2539_v2 = vrot.slane %v2537_v62, 5  ;;  %v366_v21 = vadd.f32 %v8026_v63, %v327_v32  ;;  %v2543_v60 = vrot.slane %v2541_v30, 4  ;;  %6759 = vmatpush3.bf16.msra.mxu1 %v7263_v59  ;;  %7090 = vmatprep.subr.bf16.mxu0 %v7301_v42 }
  0x94   : > { %2846 = vst [vmem:[#allocation2 + $0x44] sm:$0xf] %v2530_v18  ;;  %v2549_v20 = vrot.slane %v2547_v41, 5  ;;  %v6395_v48 = vpack.c.bf16 %v397_v39, %v397_v39  ;;  %564 = vst [vmem:[#allocation2 + $0xac] sm:$0xf] %v6394_v52  ;;  %v599_v25 = vadd.s32 112, %v7496_v8  ;;  %6760 = vmatprep.subr.bf16.mxu1 %v7267_v31  ;;  %3468 = vmatmul.mubr.bf16.gmra.mxu0 %v7261_v9 }
  0x95   : > { %v2540_v3 = vsel %vm7607_vm11, %v2535_v12, %v2539_v2  ;;  %v1323_v43 = vrot.slane %v1321_v37, 4  ;;  %v1697_v11 = vrot.slane %v8185_v28, 4  ;;  %v592_v61 = vadd.s32 56, %v7496_v8  ;;  %v7286_v18 = vld [vmem:[%s9367_s3 + $0xd8] sm:$0xff]   ;;  %7091 = vmatpush3.bf16.msra.mxu0 %v7301_v42  ;;  %v7300_v28 = vld [vmem:[%s9367_s3 + $0xc8] sm:$0xff]  }
  0x96   : > { %v2544_v5 = vor.u32 %v2543_v60, %v2539_v2  ;;  %2847 = vst [vmem:[#allocation2 + $0x50] sm:$0xf] %v2540_v3  ;;  %565 = vst [vmem:[#allocation2 + $0xb8] sm:$0xf] %v6395_v48  ;;  %v752_v16 = vand.u32 15, %v599_v25  ;;  %v2553_v17 = vrot.slane %v2551_v45, 4  ;;  %v367_v51 = vadd.f32 %v8026_v63, %v328_v34 }
  0x97   : > { %v594_v14 = vadd.s32 72, %v7496_v8  ;;  %v1324_v47 = vor.u32 %v1323_v43, %v8166_v1  ;;  %v703_v37 = vand.u32 15, %v592_v61  ;;  %v398_v32 = vmax.f32 %v366_v21, 0.0  ;;  %6761 = vmatpush3.bf16.msra.mxu1 %v7270_v26  ;;  %v7283_v63 = vld [vmem:[%s9367_s3 + $0x118] sm:$0xff]   ;;  %v7290_v60 = vld [vmem:[%s9367_s3 + $0x110] sm:$0xff]  }
  0x98   : > { %v2545_v4 = vrot.slane %v2544_v5, 4  ;;  %vm1048_vm9 = vcmp.eq.s32.totalorder %v752_v16, 0  ;;  %v2554_v35 = vor.u32 %v2553_v17, %v2549_v20  ;;  %v399_v1 = vmax.f32 %v367_v51, 0.0  ;;  %6762 = vmatprep.subr.bf16.mxu1 %v7275_v7  ;;  %v1948_v17 = vld [vmem:[#allocation2 + $0x70] sm:$0xf] }
  0x99   : > { %v717_v40 = vand.u32 15, %v594_v14  ;;  %vm1144_vm10 = vmpackc.low %vm1048_vm9, %vm1048_vm9  ;;  %v1325_v46 = vrot.slane %v1324_v47, 4  ;;  %vm8256_vm12 = vcmp.eq.s32.totalorder %v703_v37, 15  ;;  %v6396_v59 = vpack.c.bf16 %v398_v32, %v398_v32  ;;  %v1949_v14 = vld [vmem:[#allocation2 + $0x7c] sm:$0xf]  ;;  %v7292_v37 = vld [vmem:[%s9367_s3 + $0xd0] sm:$0xff]  }
  0x9a   : > { %v2550_v24 = vsel %vm7607_vm11, %v2545_v4, %v2549_v20  ;;  %v1176_v33 = vsel %vm1144_vm10, 65537, %v7968_v23  ;;  %vm2077_vm13 = vmpackc.low %vm8256_vm12, %vm8256_vm12  ;;  %v8272_v49 = vrot.slane %v2554_v35, 4  ;;  %v6397_v41 = vpack.c.bf16 %v399_v1, %v399_v1  ;;  %v7297_v4 = vld [vmem:[%s9367_s3 + $0x108] sm:$0xff]  }
  0x9b   : > { %vm8274_vm14 = vcmp.eq.s32.totalorder %v717_v40, 15  ;;  %v7259_v13 = vld [vmem:[#allocation2 + $0x38] ss:$12 sps:$4 sm:$0xff]   ;;  %2848 = vst [vmem:[#allocation2 + $0x5c] sm:$0xf] %v2550_v24  ;;  %v1330_v30 = vsel %vm7607_vm11, %v1325_v46, %v7590_v50  ;;  %v6480_v12 = vunpack.c.l.bf16 %v6597_v57  ;;  %v6481_v45 = vunpack.c.h.bf16 %v6597_v57  ;;  %6763 = vmatpush3.bf16.msra.mxu1 %v7278_v22 }
  0x9c   : > { %v630_v62 = vld [vmem:[#allocation2 + $0xac] sm:$0xf]  ;;  %566 = vst [vmem:[#allocation2 + $0xc4] sm:$0xf] %v6396_v59  ;;  %v1337_v39 = vshll.u32 %v1176_v33, 16  ;;  %v1341_v52 = vshrl.u32 %v1176_v33, 16  ;;  %vm2079_vm0 = vmpackc.low %vm8274_vm14, %vm8274_vm14  ;;  %7048 = vmatprep.mubr.bf16.mxu1 %v7259_v13  ;;  %6764 = vmatprep.subr.bf16.mxu1 %v7283_v63 }
  0x9d   : > { %vm1529_vm15 = vcmp.ne.s16.totalorder %v1330_v30, 0  ;;  %v2109_v44 = vsel %vm2077_vm13, 65537, %v7968_v23  ;;  %567 = vst [vmem:[#allocation2 + $0xd0] sm:$0xf] %v6397_v41  ;;  %v8289_v34 = vmul.f32 %v8010_v27, %v6480_v12  ;;  %v8292_v21 = vmul.f32 %v8010_v27, %v6481_v45  ;;  %v631_v20 = vld [vmem:[#allocation2 + $0xb8] sm:$0xf] }
  0x9e   : > { %v1562_v9 = vsel %vm1529_vm15, 0, %v630_v62  ;;  %v2197_v2 = vshrl.u32 %v2109_v44, 16  ;;  %v8297_v48 = vrot.slane %v1337_v39, 5  ;;  %v2200_v3 = vshll.u32 %v2109_v44, 16 }
  0x9f   : > { %v1699_v25 = vshrl.u32 %v1562_v9, 16  ;;  %v1702_v26 = vshll.u32 %v1562_v9, 16  ;;  %v2111_v27 = vsel %vm2079_vm0, 65537, %v7968_v23  ;;  %v601_v61 = vadd.s32 128, %v7496_v8  ;;  %6765 = vmatpush3.bf16.msra.mxu1 %v7286_v18 }
  0xa0   : > { %v2199_v43 = vrot.slane %v2197_v2, 7  ;;  %v1343_v7 = vrot.slane %v1341_v52, 4  ;;  %v1340_v5 = vsel %vm7607_vm11, %v7614_v6, %v8297_v48  ;;  %v2215_v57 = vshrl.u32 %v2111_v27, 16  ;;  %6766 = vmatprep.subr.bf16.mxu1 %v7290_v60  ;;  %v1950_v52 = vld [vmem:[#allocation2 + $0x88] sm:$0xf]  ;;  %v8343_v2 = vld [vmem:[#allocation2] sm:$0xff] }
  0xa1   : > { %v1701_v16 = vrot.slane %v1699_v25, 7  ;;  %v2218_v47 = vshll.u32 %v2111_v27, 16  ;;  %vm1530_vm1 = vcmp.ne.s16.totalorder %v1340_v5, 0  ;;  %v766_v32 = vand.u32 15, %v601_v61  ;;  %v7305_v5 = vld [vmem:[%s9367_s3 + $0xc0] sm:$0xff]  }
  0xa2   : > { %v2202_v23 = vor.u32 %v2200_v3, %v2199_v43  ;;  %v2204_v51 = vrot.slane %v2199_v43, 4  ;;  %v7262_v35 = vld [vmem:[#allocation2 + $0x50] ss:$12 sps:$4 sm:$0xff]   ;;  %v1563_v40 = vsel %vm1530_vm1, 0, %v631_v20  ;;  %v1344_v29 = vor.u32 %v1343_v7, %v8297_v48 }
  0xa3   : > { %v1704_v22 = vor.u32 %v1702_v26, %v1701_v16  ;;  %v1706_v46 = vrot.slane %v1701_v16, 4  ;;  %v1708_v1 = vshrl.u32 %v1563_v40, 16  ;;  %v1711_v59 = vshll.u32 %v1563_v40, 16  ;;  %7049 = vmatmul.mubr.bf16.gmra.mxu1 %v7262_v35  ;;  %v1951_v26 = vld [vmem:[#allocation2 + $0x94] sm:$0xf] }
  0xa4   : > { %v2203_v63 = vsel %vm7693_vm3, %v8097_v38, %v2202_v23  ;;  %v2212_v42 = vsel %vm7693_vm3, %v2204_v51, %v8070_v19  ;;  %v2217_v33 = vrot.slane %v2215_v57, 7  ;;  %vm8329_vm5 = vcmp.eq.s32.totalorder %v766_v32, 0  ;;  %6767 = vmatpush3.bf16.msra.mxu1 %v7292_v37  ;;  %v632_v23 = vld [vmem:[#allocation2 + $0xc4] sm:$0xf] }
  0xa5   : > { %v1705_v24 = vsel %vm7693_vm3, %v1697_v11, %v1704_v22  ;;  %vm2428_vm2 = vcmp.ne.s16.totalorder %v2203_v63, 0  ;;  %vm2429_vm4 = vcmp.ne.s16.totalorder %v2212_v42, 0  ;;  %v8327_v31 = vrot.slane %v1708_v1, 7  ;;  %v7303_v11 = vld [vmem:[%s9367_s3 + $0x100] sm:$0xff]   ;;  %vm1146_vm6 = vmpackc.low %vm8329_vm5, %vm8329_vm5  ;;  %6768 = vmatprep.subr.bf16.mxu1 %v7297_v4 }
  0xa6   : > { %1921 = vst [vmem:[#allocation2 + $0xa8] sm:$0xf] %v1705_v24  ;;  %v2461_v13 = vsel %vm2428_vm2, 0, %v1948_v17  ;;  %v2462_v62 = vsel %vm2429_vm4, 0, %v1949_v14  ;;  %v2220_v18 = vor.u32 %v2218_v47, %v2217_v33  ;;  %v2222_v9 = vrot.slane %v2217_v33, 4  ;;  %v7311_v14 = vld [vmem:[%s9367_s3 + $0x238] sm:$0xff]  }
  0xa7   : > { %v2557_v41 = vshll.u32 %v2461_v13, 16  ;;  %v2561_v12 = vshrl.u32 %v2461_v13, 16  ;;  %v2567_v45 = vshll.u32 %v2462_v62, 16  ;;  %v2571_v39 = vshrl.u32 %v2462_v62, 16  ;;  %v633_v24 = vld [vmem:[#allocation2 + $0xd0] sm:$0xf] }
  0xa8   : > { %v1713_v44 = vor.u32 %v1711_v59, %v8327_v31  ;;  %v8346_v60 = vsel %vm1146_vm6, 65537, %v8343_v2  ;;  %v2221_v27 = vsel %vm7693_vm3, %v8097_v38, %v2220_v18  ;;  %v2230_v61 = vsel %vm7693_vm3, %v2222_v9, %v8070_v19  ;;  %6769 = vmatpush3.bf16.msra.mxu1 %v7300_v28 }
  0xa9   : > { %v2559_v20 = vrot.slane %v2557_v41, 5  ;;  %v2563_v48 = vrot.slane %v2561_v12, 4  ;;  %v2569_v25 = vrot.slane %v2567_v45, 5  ;;  %v2573_v3 = vrot.slane %v2571_v39, 4  ;;  %6770 = vmatprep.subr.bf16.mxu1 %v7303_v11  ;;  %v7264_v12 = vld [vmem:[#allocation2 + $0xac] ss:$12 sps:$4 sm:$0xff]  }
  0xaa   : > { %v1714_v43 = vsel %vm7693_vm3, %v1706_v46, %v1713_v44  ;;  %v1345_v7 = vrot.slane %v1344_v29, 4  ;;  %vm2430_vm7 = vcmp.ne.s16.totalorder %v2221_v27, 0  ;;  %vm2431_vm8 = vcmp.ne.s16.totalorder %v2230_v61, 0  ;;  %3475 = vmatprep.mubr.bf16.mxu0 %v7264_v12  ;;  %v8393_v27 = vld [vmem:[%s7519_s17 + $0x48] sm:$0xff]   ;;  %v7312_v61 = vld [vmem:[%s9367_s3 + $0x1f8] sm:$0xff]  }
  0xab   : > { %1922 = vst [vmem:[#allocation2 + $0xb4] sm:$0xf] %v1714_v43  ;;  %v2560_v16 = vsel %vm7607_vm11, %v8272_v49, %v2559_v20  ;;  %v2564_v17 = vor.u32 %v2563_v48, %v2559_v20  ;;  %v2463_v57 = vsel %vm2430_vm7, 0, %v1950_v52  ;;  %v2464_v47 = vsel %vm2431_vm8, 0, %v1951_v26  ;;  %6892 = vmatprep.subr.bf16.mxu0 %v7312_v61 }
  0xac   : > { %2849 = vst [vmem:[#allocation2 + $0x68] sm:$0xf] %v2560_v16  ;;  %v2574_v37 = vor.u32 %v2573_v3, %v2569_v25  ;;  %v1350_v51 = vsel %vm7607_vm11, %v1345_v7, %v7590_v50  ;;  %v2577_v4 = vshll.u32 %v2463_v57, 16  ;;  %v2581_v49 = vshrl.u32 %v2463_v57, 16  ;;  %6771 = vmatpush3.bf16.msra.mxu1 %v7305_v5 }
  0xad   : > { %v2565_v32 = vrot.slane %v2564_v17, 4  ;;  %v2587_v35 = vshll.u32 %v2464_v47, 16  ;;  %v2591_v22 = vshrl.u32 %v2464_v47, 16  ;;  %v1357_v46 = vshll.u32 %v8346_v60, 16  ;;  %7124 = vmatprep.subr.bf16.mxu1 %v7311_v14 }
  0xae   : > { %v2575_v40 = vrot.slane %v2574_v37, 4  ;;  %v1361_v29 = vshrl.u32 %v8346_v60, 16  ;;  %v2579_v59 = vrot.slane %v2577_v4, 5  ;;  %v2583_v63 = vrot.slane %v2581_v49, 4 }
  0xaf   : > { %v2570_v1 = vsel %vm7607_vm11, %v2565_v32, %v2569_v25  ;;  %v2589_v42 = vrot.slane %v2587_v35, 5  ;;  %v8372_v33 = vrot.slane %v1357_v46, 5  ;;  %vm1531_vm9 = vcmp.ne.s16.totalorder %v1350_v51, 0 }
  0xb0   : > { %2850 = vst [vmem:[#allocation2 + $0x74] sm:$0xf] %v2570_v1  ;;  %v1715_v13 = vrot.slane %v8327_v31, 4  ;;  %v596_v62 = vadd.s32 88, %v7496_v8  ;;  %v2580_v30 = vsel %vm7607_vm11, %v2575_v40, %v2579_v59  ;;  %v2584_v28 = vor.u32 %v2583_v63, %v2579_v59  ;;  %v8385_v31 = vld [vmem:[%s9366_s2] ss:$0 sm:$0xff] }
  0xb1   : > { %v1564_v11 = vsel %vm1531_vm9, 0, %v632_v23  ;;  %v2593_v41 = vrot.slane %v2591_v22, 4  ;;  %2851 = vst [vmem:[#allocation2 + $0x80] sm:$0xf] %v2580_v30  ;;  %v1360_v39 = vsel %vm7607_vm11, %v7614_v6, %v8372_v33  ;;  %v368_v44 = vadd.f32 %v8385_v31, %v8289_v34 }
  0xb2   : > { %v7268_v45 = vld [vmem:[#allocation2 + $0xa8] ss:$12 sps:$4 sm:$0xff]   ;;  %v1717_v52 = vshrl.u32 %v1564_v11, 16  ;;  %v369_v18 = vadd.f32 %v8385_v31, %v8292_v21  ;;  %v2585_v9 = vrot.slane %v2584_v28, 4  ;;  %vm1532_vm10 = vcmp.ne.s16.totalorder %v1360_v39, 0 }
  0xb3   : > { %v1720_v20 = vshll.u32 %v1564_v11, 16  ;;  %v731_v48 = vand.u32 15, %v596_v62  ;;  %v1565_v25 = vsel %vm1532_vm10, 0, %v633_v24  ;;  %v2594_v3 = vor.u32 %v2593_v41, %v2589_v42  ;;  %3476 = vmatmul.mubr.bf16.gmra.mxu0 %v7268_v45  ;;  %v1953_v11 = vld [vmem:[#allocation2 + $0xac] sm:$0xf] }
  0xb4   : > { %v1719_v26 = vrot.slane %v1717_v52, 7  ;;  %v598_v43 = vadd.s32 104, %v7496_v8  ;;  %v2590_v34 = vsel %vm7607_vm11, %v2585_v9, %v2589_v42  ;;  %v1726_v21 = vshrl.u32 %v1565_v25, 16 }
  0xb5   : > { %v1729_v7 = vshll.u32 %v1565_v25, 16  ;;  %vm1985_vm12 = vcmp.eq.s32.totalorder %v731_v48, 15  ;;  %2852 = vst [vmem:[#allocation2 + $0x8c] sm:$0xf] %v2590_v34  ;;  %v8400_v17 = vrot.slane %v2594_v3, 4  ;;  %v6484_v23 = vunpack.c.l.bf16 %v8393_v27 }
  0xb6   : > { %v1722_v5 = vor.u32 %v1720_v20, %v1719_v26  ;;  %v1724_v16 = vrot.slane %v1719_v26, 4  ;;  %vm2081_vm13 = vmpackc.low %vm1985_vm12, %vm1985_vm12  ;;  %v745_v14 = vand.u32 15, %v598_v43  ;;  %v8402_v47 = vrot.slane %v1726_v21, 7 }
  0xb7   : > { %v7266_v57 = vld [vmem:[#allocation2 + $0x68] ss:$12 sps:$4 sm:$0xff]   ;;  %v2113_v37 = vsel %vm2081_vm13, 65537, %v8343_v2  ;;  %v6485_v51 = vunpack.c.h.bf16 %v8393_v27  ;;  %v400_v40 = vmax.f32 %v368_v44, 0.0  ;;  %v401_v22 = vmax.f32 %v369_v18, 0.0 }
  0xb8   : > { %v1723_v32 = vsel %vm7693_vm3, %v1715_v13, %v1722_v5  ;;  %v2233_v4 = vshrl.u32 %v2113_v37, 16  ;;  %v2236_v49 = vshll.u32 %v2113_v37, 16  ;;  %vm1987_vm14 = vcmp.eq.s32.totalorder %v745_v14, 15  ;;  %7052 = vmatprep.mubr.bf16.mxu1 %v7266_v57  ;;  %v1952_v13 = vld [vmem:[#allocation2 + $0xa0] sm:$0xf] }
  0xb9   : > { %v1731_v35 = vor.u32 %v1729_v7, %v8402_v47  ;;  %1923 = vst [vmem:[#allocation2 + $0xc0] sm:$0xf] %v1723_v32  ;;  %vm2083_vm15 = vmpackc.low %vm1987_vm14, %vm1987_vm14  ;;  %v603_v46 = vadd.s32 144, %v7496_v8  ;;  %v1363_v63 = vrot.slane %v1361_v29, 4  ;;  %v1733_v42 = vrot.slane %v8402_v47, 4 }
  0xba   : > { %v2235_v1 = vrot.slane %v2233_v4, 7  ;;  %v2115_v59 = vsel %vm2083_vm15, 65537, %v8343_v2  ;;  %v6398_v28 = vpack.c.bf16 %v400_v40, %v400_v40  ;;  %v6399_v45 = vpack.c.bf16 %v401_v22, %v401_v22  ;;  %v8424_v18 = vld [vmem:[%s9365_s1] ss:$0 sm:$0xff]  ;;  %v1954_v14 = vld [vmem:[#allocation2 + $0xb8] sm:$0xf] }
  0xbb   : > { %v1732_v24 = vsel %vm7693_vm3, %v1724_v16, %v1731_v35  ;;  %v2251_v62 = vshrl.u32 %v2115_v59, 16  ;;  %v2254_v30 = vshll.u32 %v2115_v59, 16  ;;  %v780_v39 = vand.u32 15, %v603_v46  ;;  %v1955_v57 = vld [vmem:[#allocation2 + $0xc4] sm:$0xf] }
  0xbc   : > { %1924 = vst [vmem:[#allocation2 + $0xcc] sm:$0xf] %v1732_v24  ;;  %v2238_v41 = vor.u32 %v2236_v49, %v2235_v1  ;;  %v2240_v12 = vrot.slane %v2235_v1, 4  ;;  %v7269_v52 = vld [vmem:[#allocation2 + $0x80] ss:$12 sps:$4 sm:$0xff]   ;;  %v1364_v60 = vor.u32 %v1363_v63, %v8372_v33  ;;  %v8419_v29 = vadd.s32 120, %v7496_v8 }
  0xbd   : > { %v2253_v44 = vrot.slane %v2251_v62, 7  ;;  %568 = vst [vmem:[#allocation2 + $0xdc] sm:$0xf] %v6398_v28  ;;  %v331_v9 = vmul.f32 %v8424_v18, %v6484_v23  ;;  %569 = vst [vmem:[#allocation2 + $0xe8] sm:$0xf] %v6399_v45  ;;  %vm1052_vm0 = vcmp.eq.s32.totalorder %v780_v39, 0  ;;  %7053 = vmatmul.mubr.bf16.gmra.mxu1 %v7269_v52 }
  0xbe   : > { %v2239_v20 = vsel %vm7693_vm3, %v8097_v38, %v2238_v41  ;;  %v2248_v48 = vsel %vm7693_vm3, %v2240_v12, %v8070_v19  ;;  %v8434_v33 = vadd.s32 136, %v7496_v8  ;;  %vm1148_vm4 = vmpackc.low %vm1052_vm0, %vm1052_vm0  ;;  %v1365_v34 = vrot.slane %v1364_v60, 4  ;;  %v7272_v49 = vld [vmem:[#allocation2 + $0xc4] ss:$12 sps:$4 sm:$0xff]  }
  0xbf   : > { %vm2432_vm1 = vcmp.ne.s16.totalorder %v2239_v20, 0  ;;  %vm2433_vm2 = vcmp.ne.s16.totalorder %v2248_v48, 0  ;;  %v2256_v25 = vor.u32 %v2254_v30, %v2253_v44  ;;  %v2258_v26 = vrot.slane %v2253_v44, 4  ;;  %3483 = vmatprep.mubr.bf16.mxu0 %v7272_v49 }
  0xc0   : > { %v2465_v3 = vsel %vm2432_vm1, 0, %v1952_v13  ;;  %v2466_v43 = vsel %vm2433_vm2, 0, %v1953_v11  ;;  %v8437_v61 = vsel %vm1148_vm4, 65537, %v8343_v2  ;;  %v1370_v32 = vsel %vm7607_vm11, %v1365_v34, %v7590_v50 }
  0xc1   : > { %v2597_v21 = vshll.u32 %v2465_v3, 16  ;;  %v2601_v7 = vshrl.u32 %v2465_v3, 16  ;;  %v2607_v5 = vshll.u32 %v2466_v43, 16  ;;  %v2611_v16 = vshrl.u32 %v2466_v43, 16 }
  0xc2   : > { %v2257_v37 = vsel %vm7693_vm3, %v8097_v38, %v2256_v25  ;;  %v2266_v23 = vsel %vm7693_vm3, %v2258_v26, %v8070_v19  ;;  %v1377_v4 = vshll.u32 %v8437_v61, 16  ;;  %v370_v46 = vadd.f32 %v8385_v31, %v331_v9 }
  0xc3   : > { %v2599_v35 = vrot.slane %v2597_v21, 5  ;;  %v2603_v40 = vrot.slane %v2601_v7, 4  ;;  %v2609_v22 = vrot.slane %v2607_v5, 5  ;;  %v7276_v1 = vld [vmem:[#allocation2 + $0xc0] ss:$12 sps:$4 sm:$0xff]   ;;  %vm2434_vm5 = vcmp.ne.s16.totalorder %v2257_v37, 0 }
  0xc4   : > { %vm2435_vm6 = vcmp.ne.s16.totalorder %v2266_v23, 0  ;;  %v2613_v59 = vrot.slane %v2611_v16, 4  ;;  %v8450_v63 = vrot.slane %v1377_v4, 5  ;;  %v2467_v62 = vsel %vm2434_vm5, 0, %v1954_v14  ;;  %3484 = vmatmul.mubr.bf16.gmra.mxu0 %v7276_v1  ;;  %v634_v45 = vld [vmem:[#allocation2 + $0xdc] sm:$0xf] }
  0xc5   : > { %v2600_v24 = vsel %vm7607_vm11, %v8400_v17, %v2599_v35  ;;  %v2604_v13 = vor.u32 %v2603_v40, %v2599_v35  ;;  %v2468_v30 = vsel %vm2435_vm6, 0, %v1955_v57  ;;  %v2617_v11 = vshll.u32 %v2467_v62, 16  ;;  %v635_v44 = vld [vmem:[#allocation2 + $0xe8] sm:$0xf] }
  0xc6   : > { %2853 = vst [vmem:[#allocation2 + $0x98] sm:$0xf] %v2600_v24  ;;  %v2614_v28 = vor.u32 %v2613_v59, %v2609_v22  ;;  %v2621_v41 = vshrl.u32 %v2467_v62, 16  ;;  %v2627_v12 = vshll.u32 %v2468_v30, 16  ;;  %v2631_v52 = vshrl.u32 %v2468_v30, 16 }
  0xc7   : > { %v2605_v39 = vrot.slane %v2604_v13, 4  ;;  %v1380_v60 = vsel %vm7607_vm11, %v7614_v6, %v8450_v63  ;;  %v1381_v17 = vshrl.u32 %v8437_v61, 16  ;;  %v2619_v20 = vrot.slane %v2617_v11, 5 }
  0xc8   : > { %v2615_v9 = vrot.slane %v2614_v28, 4  ;;  %v2623_v48 = vrot.slane %v2621_v41, 4  ;;  %v2629_v25 = vrot.slane %v2627_v12, 5  ;;  %vm1533_vm7 = vcmp.ne.s16.totalorder %v1370_v32, 0  ;;  %v1956_v12 = vld [vmem:[#allocation2 + $0xd0] sm:$0xf] }
  0xc9   : > { %v2610_v26 = vsel %vm7607_vm11, %v2605_v39, %v2609_v22  ;;  %vm1534_vm8 = vcmp.ne.s16.totalorder %v1380_v60, 0  ;;  %v759_v3 = vand.u32 15, %v8419_v29  ;;  %v1566_v21 = vsel %vm1533_vm7, 0, %v634_v45 }
  0xca   : > { %2854 = vst [vmem:[#allocation2 + $0xa4] sm:$0xf] %v2610_v26  ;;  %v2620_v43 = vsel %vm7607_vm11, %v2615_v9, %v2619_v20  ;;  %v2624_v34 = vor.u32 %v2623_v48, %v2619_v20  ;;  %v1567_v7 = vsel %vm1534_vm8, 0, %v635_v44  ;;  %v1735_v61 = vshrl.u32 %v1566_v21, 16  ;;  %v1957_v20 = vld [vmem:[#allocation2 + $0xdc] sm:$0xf] }
  0xcb   : > { %2855 = vst [vmem:[#allocation2 + $0xb0] sm:$0xf] %v2620_v43  ;;  %v1738_v5 = vshll.u32 %v1566_v21, 16  ;;  %v1744_v16 = vshrl.u32 %v1567_v7, 16  ;;  %v1747_v14 = vshll.u32 %v1567_v7, 16  ;;  %vm1989_vm9 = vcmp.eq.s32.totalorder %v759_v3, 15 }
  0xcc   : > { %v2625_v57 = vrot.slane %v2624_v34, 4  ;;  %v2633_v37 = vrot.slane %v2631_v52, 4  ;;  %v402_v23 = vmax.f32 %v370_v46, 0.0  ;;  %v1737_v32 = vrot.slane %v1735_v61, 7  ;;  %vm2085_vm10 = vmpackc.low %vm1989_vm9, %vm1989_vm9  ;;  %v7416_v3 = vld [vmem:[%s7519_s17 + $0x50] sm:$0xff]  }
  0xcd   : > { %v8465_v4 = vrot.slane %v1744_v16, 7  ;;  %v773_v29 = vand.u32 15, %v8434_v33  ;;  %v332_v49 = vmul.f32 %v8424_v18, %v6485_v51  ;;  %v2117_v40 = vsel %vm2085_vm10, 65537, %v8343_v2 }
  0xce   : > { %v2630_v35 = vsel %vm7607_vm11, %v2625_v57, %v2629_v25  ;;  %v2634_v22 = vor.u32 %v2633_v37, %v2629_v25  ;;  %v6400_v1 = vpack.c.bf16 %v402_v23, %v402_v23  ;;  %v1740_v59 = vor.u32 %v1738_v5, %v1737_v32 }
  0xcf   : > { %2856 = vst [vmem:[#allocation2 + $0xbc] sm:$0xf] %v2630_v35  ;;  %v1742_v46 = vrot.slane %v1737_v32, 4  ;;  %v1749_v24 = vor.u32 %v1747_v14, %v8465_v4  ;;  %v2269_v13 = vshrl.u32 %v2117_v40, 16  ;;  %v2272_v62 = vshll.u32 %v2117_v40, 16 }
  0xd0   : > { %v8475_v30 = vrot.slane %v2634_v22, 4  ;;  %570 = vst [vmem:[#allocation2 + $0xf4] sm:$0xf] %v6400_v1  ;;  %vm1991_vm12 = vcmp.eq.s32.totalorder %v773_v29, 15  ;;  %v371_v27 = vadd.f32 %v8385_v31, %v332_v49  ;;  %v1741_v33 = vsel %vm7693_vm3, %v1733_v42, %v1740_v59  ;;  %v1958_v14 = vld [vmem:[#allocation2 + $0xe8] sm:$0xf] }
  0xd1   : > { %v7274_v51 = vld [vmem:[#allocation2 + $0x98] ss:$12 sps:$4 sm:$0xff]   ;;  %v1750_v28 = vsel %vm7693_vm3, %v1742_v46, %v1749_v24  ;;  %v2271_v11 = vrot.slane %v2269_v13, 7  ;;  %vm2087_vm13 = vmpackc.low %vm1991_vm12, %vm1991_vm12  ;;  %v605_v41 = vadd.s32 160, %v7496_v8  ;;  %1925 = vst [vmem:[#allocation2 + $0xd8] sm:$0xf] %v1741_v33  ;;  %v6488_v43 = vunpack.c.l.bf16 %v7416_v3 }
  0xd2   : > { %1926 = vst [vmem:[#allocation2 + $0xe4] sm:$0xf] %v1750_v28  ;;  %v2119_v45 = vsel %vm2087_vm13, 65537, %v8343_v2  ;;  %v403_v39 = vmax.f32 %v371_v27, 0.0  ;;  %v1383_v52 = vrot.slane %v1381_v17, 4  ;;  %v1751_v47 = vrot.slane %v8465_v4, 4  ;;  %7056 = vmatprep.mubr.bf16.mxu1 %v7274_v51 }
  0xd3   : > { %v2274_v44 = vor.u32 %v2272_v62, %v2271_v11  ;;  %v2276_v42 = vrot.slane %v2271_v11, 4  ;;  %v2287_v60 = vshrl.u32 %v2119_v45, 16  ;;  %v2290_v9 = vshll.u32 %v2119_v45, 16  ;;  %v7280_v40 = vld [vmem:[#allocation2 + $0xdc] ss:$12 sps:$4 sm:$0xff]  }
  0xd4   : > { %v6401_v48 = vpack.c.bf16 %v403_v39, %v403_v39  ;;  %v794_v25 = vand.u32 15, %v605_v41  ;;  %v1384_v26 = vor.u32 %v1383_v52, %v8450_v63  ;;  %v8496_v7 = vadd.s32 152, %v7496_v8  ;;  %3491 = vmatprep.mubr.bf16.mxu0 %v7280_v40 }
  0xd5   : > { %v2275_v34 = vsel %vm7693_vm3, %v8097_v38, %v2274_v44  ;;  %v2284_v17 = vsel %vm7693_vm3, %v2276_v42, %v8070_v19  ;;  %v2289_v21 = vrot.slane %v2287_v60, 7  ;;  %v333_v63 = vmul.f32 %v8424_v18, %v6488_v43 }
  0xd6   : > { %v7277_v61 = vld [vmem:[#allocation2 + $0xb0] ss:$12 sps:$4 sm:$0xff]   ;;  %vm2436_vm14 = vcmp.ne.s16.totalorder %v2275_v34, 0  ;;  %vm2437_vm15 = vcmp.ne.s16.totalorder %v2284_v17, 0  ;;  %571 = vst [vmem:[#allocation2 + $0x100] sm:$0xf] %v6401_v48 }
  0xd7   : > { %v2469_v5 = vsel %vm2436_vm14, 0, %v1956_v12  ;;  %v2470_v16 = vsel %vm2437_vm15, 0, %v1957_v20  ;;  %v2292_v57 = vor.u32 %v2290_v9, %v2289_v21  ;;  %v2294_v37 = vrot.slane %v2289_v21, 4  ;;  %7057 = vmatmul.mubr.bf16.gmra.mxu1 %v7277_v61  ;;  %v1959_v35 = vld [vmem:[#allocation2 + $0xf4] sm:$0xf] }
  0xd8   : > { %v2637_v23 = vshll.u32 %v2469_v5, 16  ;;  %v2641_v32 = vshrl.u32 %v2469_v5, 16  ;;  %v2647_v29 = vshll.u32 %v2470_v16, 16  ;;  %v2651_v49 = vshrl.u32 %v2470_v16, 16  ;;  %v636_v9 = vld [vmem:[#allocation2 + $0xf4] sm:$0xf] }
  0xd9   : > { %v2293_v22 = vsel %vm7693_vm3, %v8097_v38, %v2292_v57  ;;  %v2302_v1 = vsel %vm7693_vm3, %v2294_v37, %v8070_v19  ;;  %vm1054_vm0 = vcmp.eq.s32.totalorder %v794_v25, 0  ;;  %v1385_v59 = vrot.slane %v1384_v26, 4  ;;  %v7284_v62 = vld [vmem:[#allocation2 + $0xd8] ss:$12 sps:$4 sm:$0xff]  }
  0xda   : > { %v2639_v46 = vrot.slane %v2637_v23, 5  ;;  %v2643_v24 = vrot.slane %v2641_v32, 4  ;;  %v2649_v13 = vrot.slane %v2647_v29, 5  ;;  %vm2438_vm1 = vcmp.ne.s16.totalorder %v2293_v22, 0  ;;  %vm1150_vm2 = vmpackc.low %vm1054_vm0, %vm1054_vm0  ;;  %3492 = vmatmul.mubr.bf16.gmra.mxu0 %v7284_v62 }
  0xdb   : > { %vm2439_vm4 = vcmp.ne.s16.totalorder %v2302_v1, 0  ;;  %v2471_v27 = vsel %vm2438_vm1, 0, %v1958_v14  ;;  %v2653_v51 = vrot.slane %v2651_v49, 4  ;;  %v1182_v33 = vsel %vm1150_vm2, 65537, %v8343_v2 }
  0xdc   : > { %v2640_v28 = vsel %vm7607_vm11, %v8475_v30, %v2639_v46  ;;  %v2644_v11 = vor.u32 %v2643_v24, %v2639_v46  ;;  %v2472_v41 = vsel %vm2439_vm4, 0, %v1959_v35  ;;  %v2657_v12 = vshll.u32 %v2471_v27, 16  ;;  %v8526_v24 = vld [vmem:[%s7519_s17 + $0x78] sm:$0xff]  }
  0xdd   : > { %2857 = vst [vmem:[#allocation2 + $0xc8] sm:$0xf] %v2640_v28  ;;  %v2654_v45 = vor.u32 %v2653_v51, %v2649_v13  ;;  %v2661_v39 = vshrl.u32 %v2471_v27, 16  ;;  %v2667_v52 = vshll.u32 %v2472_v41, 16  ;;  %v2671_v44 = vshrl.u32 %v2472_v41, 16 }
  0xde   : > { %v2645_v42 = vrot.slane %v2644_v11, 4  ;;  %v2659_v60 = vrot.slane %v2657_v12, 5  ;;  %v1390_v20 = vsel %vm7607_vm11, %v1385_v59, %v7590_v50  ;;  %v1397_v48 = vshll.u32 %v1182_v33, 16  ;;  %v637_v5 = vld [vmem:[#allocation2 + $0x100] sm:$0xf] }
  0xdf   : > { %v2655_v25 = vrot.slane %v2654_v45, 4  ;;  %v2663_v26 = vrot.slane %v2661_v39, 4  ;;  %v2669_v30 = vrot.slane %v2667_v52, 5  ;;  %v1401_v3 = vshrl.u32 %v1182_v33, 16 }
  0xe0   : > { %v2650_v43 = vsel %vm7607_vm11, %v2645_v42, %v2649_v13  ;;  %v1399_v34 = vrot.slane %v1397_v48, 5  ;;  %vm1535_vm5 = vcmp.ne.s16.totalorder %v1390_v20, 0  ;;  %v372_v17 = vadd.f32 %v8385_v31, %v333_v63 }
  0xe1   : > { %2858 = vst [vmem:[#allocation2 + $0xd4] sm:$0xf] %v2650_v43  ;;  %v2660_v21 = vsel %vm7607_vm11, %v2655_v25, %v2659_v60  ;;  %v2664_v61 = vor.u32 %v2663_v26, %v2659_v60  ;;  %v1568_v16 = vsel %vm1535_vm5, 0, %v636_v9  ;;  %v787_v14 = vand.u32 15, %v8496_v7  ;;  %v1960_v43 = vld [vmem:[#allocation2 + $0x100] sm:$0xf] }
  0xe2   : > { %2859 = vst [vmem:[#allocation2 + $0xe0] sm:$0xf] %v2660_v21  ;;  %v1400_v57 = vsel %vm7607_vm11, %v7614_v6, %v1399_v34  ;;  %v1753_v37 = vshrl.u32 %v1568_v16, 16  ;;  %v1756_v23 = vshll.u32 %v1568_v16, 16  ;;  %v404_v32 = vmax.f32 %v372_v17, 0.0 }
  0xe3   : > { %v2665_v29 = vrot.slane %v2664_v61, 4  ;;  %vm1536_vm6 = vcmp.ne.s16.totalorder %v1400_v57, 0  ;;  %vm1993_vm7 = vcmp.eq.s32.totalorder %v787_v14, 15  ;;  %v2673_v63 = vrot.slane %v2671_v44, 4 }
  0xe4   : > { %v1569_v49 = vsel %vm1536_vm6, 0, %v637_v5  ;;  %v1755_v35 = vrot.slane %v1753_v37, 7  ;;  %v6402_v40 = vpack.c.bf16 %v404_v32, %v404_v32  ;;  %vm2089_vm8 = vmpackc.low %vm1993_vm7, %vm1993_vm7  ;;  %v606_v22 = vadd.s32 168, %v7496_v8 }
  0xe5   : > { %v2670_v7 = vsel %vm7607_vm11, %v2665_v29, %v2669_v30  ;;  %v1762_v1 = vshrl.u32 %v1569_v49, 16  ;;  %v1765_v59 = vshll.u32 %v1569_v49, 16  ;;  %v2121_v46 = vsel %vm2089_vm8, 65537, %v8343_v2 }
  0xe6   : > { %2860 = vst [vmem:[#allocation2 + $0xec] sm:$0xf] %v2670_v7  ;;  %v1758_v13 = vor.u32 %v1756_v23, %v1755_v35  ;;  %v1760_v62 = vrot.slane %v1755_v35, 4  ;;  %572 = vst [vmem:[#allocation2 + $0x10c] sm:$0xf] %v6402_v40  ;;  %v2305_v27 = vshrl.u32 %v2121_v46, 16  ;;  %v2674_v28 = vor.u32 %v2673_v63, %v2669_v30 }
  0xe7   : > { %v2308_v51 = vshll.u32 %v2121_v46, 16  ;;  %v8528_v33 = vrot.slane %v1762_v1, 7  ;;  %v801_v11 = vand.u32 15, %v606_v22  ;;  %v1403_v41 = vrot.slane %v1401_v3, 4  ;;  %v1962_v7 = vld [vmem:[#allocation2 + $0x118] sm:$0xf] }
  0xe8   : > { %v7282_v12 = vld [vmem:[#allocation2 + $0xc8] ss:$12 sps:$4 sm:$0xff]   ;;  %v1759_v45 = vsel %vm7693_vm3, %v1751_v47, %v1758_v13  ;;  %v2307_v39 = vrot.slane %v2305_v27, 7  ;;  %v608_v52 = vadd.s32 184, %v7496_v8  ;;  %v6508_v44 = vunpack.c.l.bf16 %v8526_v24 }
  0xe9   : > { %v1767_v42 = vor.u32 %v1765_v59, %v8528_v33  ;;  %1927 = vst [vmem:[#allocation2 + $0xf0] sm:$0xf] %v1759_v45  ;;  %v2675_v60 = vrot.slane %v2674_v28, 4  ;;  %vm1995_vm9 = vcmp.eq.s32.totalorder %v801_v11, 15  ;;  %v1404_v9 = vor.u32 %v1403_v41, %v1399_v34  ;;  %7060 = vmatprep.mubr.bf16.mxu1 %v7282_v12  ;;  %v1963_v59 = vld [vmem:[#allocation2 + $0x124] sm:$0xf] }
  0xea   : > { %v2310_v20 = vor.u32 %v2308_v51, %v2307_v39  ;;  %v2312_v48 = vrot.slane %v2307_v39, 4  ;;  %vm2091_vm10 = vmpackc.low %vm1995_vm9, %vm1995_vm9  ;;  %v1769_v4 = vrot.slane %v8528_v33, 4  ;;  %v815_v25 = vand.u32 15, %v608_v52  ;;  %v7287_v45 = vld [vmem:[#allocation2 + $0xf4] ss:$12 sps:$4 sm:$0xff]  }
  0xeb   : > { %v1768_v47 = vsel %vm7693_vm3, %v1760_v62, %v1767_v42  ;;  %v2123_v26 = vsel %vm2091_vm10, 65537, %v8343_v2  ;;  %v1405_v30 = vrot.slane %v1404_v9, 4  ;;  %v8542_v3 = vadd.s32 200, %v7496_v8  ;;  %3499 = vmatprep.mubr.bf16.mxu0 %v7287_v45 }
  0xec   : > { %1928 = vst [vmem:[#allocation2 + $0xfc] sm:$0xf] %v1768_v47  ;;  %v2311_v34 = vsel %vm7693_vm3, %v8097_v38, %v2310_v20  ;;  %v2320_v17 = vsel %vm7693_vm3, %v2312_v48, %v8070_v19  ;;  %v2323_v21 = vshrl.u32 %v2123_v26, 16  ;;  %v2326_v61 = vshll.u32 %v2123_v26, 16 }
  0xed   : > { %v7285_v5 = vld [vmem:[#allocation2 + $0xe0] ss:$12 sps:$4 sm:$0xff]   ;;  %v1410_v14 = vsel %vm7607_vm11, %v1405_v30, %v7590_v50  ;;  %v8556_v57 = vor.u32 %v1783_v58, %v7742_v53  ;;  %v8559_v37 = vmul.f32 %v8424_v18, %v6508_v44  ;;  %v6509_v23 = vunpack.c.h.bf16 %v8526_v24 }
  0xee   : > { %v1961_v16 = vld [vmem:[#allocation2 + $0x10c] sm:$0xf]  ;;  %vm2440_vm12 = vcmp.ne.s16.totalorder %v2311_v34, 0  ;;  %vm2441_vm13 = vcmp.ne.s16.totalorder %v2320_v17, 0  ;;  %v2325_v32 = vrot.slane %v2323_v21, 7  ;;  %vm1537_vm14 = vcmp.ne.s16.totalorder %v1410_v14, 0  ;;  %7061 = vmatmul.mubr.bf16.gmra.mxu1 %v7285_v5 }
  0xef   : > { %v638_v29 = vld [vmem:[#allocation2 + $0x10c] sm:$0xf]  ;;  %v2473_v63 = vsel %vm2440_vm12, 0, %v1960_v43  ;;  %v2474_v49 = vsel %vm2441_vm13, 0, %v1961_v16  ;;  %vm8562_vm15 = vcmp.eq.s32.totalorder %v815_v25, 15 }
  0xf0   : > { %v1570_v35 = vsel %vm1537_vm14, 0, %v638_v29  ;;  %v2677_v36 = vshll.u32 %v2473_v63, 16  ;;  %v2681_v53 = vshrl.u32 %v2473_v63, 16  ;;  %v2687_v58 = vshll.u32 %v2474_v49, 16  ;;  %vm2093_vm0 = vmpackc.low %vm8562_vm15, %vm8562_vm15  ;;  %v2915_v1 = vld [vmem:[#allocation2 + $0xf0] sm:$0xff] }
  0xf1   : > { %v2691_v22 = vshrl.u32 %v2474_v49, 16  ;;  %v2328_v46 = vor.u32 %v2326_v61, %v2325_v32  ;;  %v2330_v13 = vrot.slane %v2325_v32, 4  ;;  %v1771_v62 = vshrl.u32 %v1570_v35, 16 }
  0xf2   : > { %v1774_v27 = vshll.u32 %v1570_v35, 16  ;;  %v2679_v51 = vrot.slane %v2677_v36, 5  ;;  %v2683_v28 = vrot.slane %v2681_v53, 4  ;;  %v2689_v11 = vrot.slane %v2687_v58, 5 }
  0xf3   : > { %v2693_v41 = vrot.slane %v2691_v22, 4  ;;  %v2917_v12 = vld [vmem:[#allocation2 + $0xfc] sm:$0xff]  ;;  %v2329_v39 = vsel %vm7693_vm3, %v8097_v38, %v2328_v46  ;;  %v2338_v52 = vsel %vm7693_vm3, %v2330_v13, %v8070_v19  ;;  %v1773_v44 = vrot.slane %v1771_v62, 7  ;;  %v1964_v46 = vld [vmem:[#allocation2 + $0x130] sm:$0xf] }
  0xf4   : > { %v2125_v42 = vsel %vm2093_vm0, 65537, %v8343_v2  ;;  %v2680_v9 = vsel %vm7607_vm11, %v2675_v60, %v2679_v51  ;;  %v2684_v20 = vor.u32 %v2683_v28, %v2679_v51  ;;  %v6066_v48 = vcombine.low %v2915_v1, %v2917_v12  ;;  %v1965_v13 = vld [vmem:[#allocation2 + $0x13c] sm:$0xf] }
  0xf5   : > { %vm2442_vm1 = vcmp.ne.s16.totalorder %v2329_v39, 0  ;;  %2861 = vst [vmem:[#allocation2 + $0xf8] sm:$0xf] %v2680_v9  ;;  %vm2443_vm2 = vcmp.ne.s16.totalorder %v2338_v52, 0  ;;  %v2694_v47 = vor.u32 %v2693_v41, %v2689_v11  ;;  %v1776_v26 = vor.u32 %v1774_v27, %v1773_v44 }
  0xf6   : > { %v2475_v25 = vsel %vm2442_vm1, 0, %v1962_v7  ;;  %v2685_v30 = vrot.slane %v2684_v20, 4  ;;  %3500 = vmatmul.mubr.bf16.gmra.mxu0 %v6066_v48  ;;  %v2476_v43 = vsel %vm2443_vm2, 0, %v1963_v59  ;;  %v1778_v29 = vrot.slane %v1773_v44, 4  ;;  %v7306_v44 = vld [vmem:[#allocation2 + $0x20] ss:$12 sps:$4 sm:$0xff]  }
  0xf7   : > { %v2697_v34 = vshll.u32 %v2475_v25, 16  ;;  %v2701_v17 = vshrl.u32 %v2475_v25, 16  ;;  %v2695_v21 = vrot.slane %v2694_v47, 4  ;;  %v2707_v61 = vshll.u32 %v2476_v43, 16  ;;  %v8615_v48 = vld [vmem:[#allocation2 + $0x10c] ss:$12 sps:$4 sm:$0xff]  }
  0xf8   : > { %v2711_v5 = vshrl.u32 %v2476_v43, 16  ;;  %v1777_v60 = vsel %vm7693_vm3, %v1769_v4, %v1776_v26  ;;  %v2690_v16 = vsel %vm7607_vm11, %v2685_v30, %v2689_v11  ;;  %v2341_v49 = vshrl.u32 %v2125_v42, 16  ;;  %v1966_v47 = vld [vmem:[#allocation2 + $0x148] sm:$0xf]  ;;  %3507 = vmatprep.mubr.bf16.mxu0 %v8615_v48 }
  0xf9   : > { %v2699_v14 = vrot.slane %v2697_v34, 5  ;;  %v2703_v32 = vrot.slane %v2701_v17, 4  ;;  %1929 = vst [vmem:[#allocation2 + $0x108] sm:$0xf] %v1777_v60  ;;  %2862 = vst [vmem:[#allocation2 + $0x104] sm:$0xf] %v2690_v16  ;;  %v1786_v33 = vsel %vm7693_vm3, %v1778_v29, %v8556_v57  ;;  %v382_v1 = vadd.f32 %v8385_v31, %v8559_v37 }
  0xfa   : > { %v2709_v63 = vrot.slane %v2707_v61, 5  ;;  %v2344_v35 = vshll.u32 %v2125_v42, 16  ;;  %v2713_v40 = vrot.slane %v2711_v5, 4  ;;  %v829_v4 = vand.u32 15, %v8542_v3  ;;  %1930 = vst [vmem:[#allocation2 + $0x114] sm:$0xf] %v1786_v33 }
  0xfb   : > { %v2700_v36 = vsel %vm7607_vm11, %v2695_v21, %v2699_v14  ;;  %v2704_v53 = vor.u32 %v2703_v32, %v2699_v14  ;;  %v2343_v58 = vrot.slane %v2341_v49, 7  ;;  %v612_v7 = vadd.s32 216, %v7496_v8  ;;  %v1967_v5 = vld [vmem:[#allocation2 + $0x154] sm:$0xf]  ;;  %v8626_v16 = vld [vmem:[#allocation2] sm:$0xff] }
  0xfc   : > { %2863 = vst [vmem:[#allocation2 + $0x110] sm:$0xf] %v2700_v36  ;;  %v2714_v22 = vor.u32 %v2713_v40, %v2709_v63  ;;  %vm1999_vm4 = vcmp.eq.s32.totalorder %v829_v4, 15  ;;  %v614_v62 = vadd.s32 232, %v7496_v8  ;;  %v344_v57 = vmul.f32 %v8424_v18, %v6509_v23 }
  0xfd   : > { %v2705_v59 = vrot.slane %v2704_v53, 4  ;;  %v2346_v3 = vor.u32 %v2344_v35, %v2343_v58  ;;  %v2348_v27 = vrot.slane %v2343_v58, 4  ;;  %vm2095_vm5 = vmpackc.low %vm1999_vm4, %vm1999_vm4  ;;  %v843_v28 = vand.u32 15, %v612_v7  ;;  %v6636_v35 = vpop.f32.mrf.mxu0 }
  0xfe   : > { %v2715_v51 = vrot.slane %v2714_v22, 4  ;;  %v2127_v37 = vsel %vm2095_vm5, 65537, %v8343_v2  ;;  %v414_v41 = vmax.f32 %v382_v1, 0.0  ;;  %v857_v12 = vand.u32 15, %v614_v62 }
  0xff   : > { %v2710_v11 = vsel %vm7607_vm11, %v2705_v59, %v2709_v63  ;;  %v2347_v45 = vsel %vm7693_vm3, %v8097_v38, %v2346_v3  ;;  %v2356_v18 = vsel %vm7693_vm3, %v2348_v27, %v8070_v19  ;;  %v2359_v24 = vshrl.u32 %v2127_v37, 16 }
 0x100   : > { %2864 = vst [vmem:[#allocation2 + $0x11c] sm:$0xf] %v2710_v11  ;;  %v2362_v23 = vshll.u32 %v2127_v37, 16  ;;  %v7289_v39 = vld [vmem:[#allocation2 + $0xf8] ss:$12 sps:$4 sm:$0xff]   ;;  %vm2444_vm6 = vcmp.ne.s16.totalorder %v2347_v45, 0  ;;  %v6412_v52 = vpack.c.bf16 %v414_v41, %v414_v41  ;;  %v8618_v26 = vadd.f32 %v8385_v31, %v344_v57 }
 0x101   : > { %vm2445_vm7 = vcmp.ne.s16.totalorder %v2356_v18, 0  ;;  %v2477_v42 = vsel %vm2444_vm6, 0, %v1964_v46  ;;  %v2361_v9 = vrot.slane %v2359_v24, 7  ;;  %vm8611_vm8 = vcmp.eq.s32.totalorder %v843_v28, 15  ;;  %7064 = vmatprep.mubr.bf16.mxu1 %v7289_v39  ;;  %v8620_v17 = vld [vmem:[#allocation2 + $0x108] ss:$12 sps:$4 sm:$0xff]   ;;  %v6637_v28 = vpop.f32.mrf.mxu0 }
 0x102   : > { %v2478_v2 = vsel %vm2445_vm7, 0, %v1965_v13  ;;  %v2717_v25 = vshll.u32 %v2477_v42, 16  ;;  %582 = vst [vmem:[#allocation2 + $0x184] sm:$0xf] %v6412_v52  ;;  %v2721_v30 = vshrl.u32 %v2477_v42, 16  ;;  %vm2097_vm9 = vmpackc.low %vm8611_vm8, %vm8611_vm8  ;;  %vm8629_vm10 = vcmp.eq.s32.totalorder %v857_v12, 15  ;;  %3508 = vmatmul.mubr.bf16.gmra.mxu0 %v8620_v17 }
 0x103   : > { %v2727_v43 = vshll.u32 %v2478_v2, 16  ;;  %v2731_v34 = vshrl.u32 %v2478_v2, 16  ;;  %v2364_v21 = vor.u32 %v2362_v23, %v2361_v9  ;;  %v2366_v60 = vrot.slane %v2361_v9, 4  ;;  %7092 = vmatprep.mubr.bf16.mxu0 %v7306_v44  ;;  %vm2099_vm14 = vmpackc.low %vm8629_vm10, %vm8629_vm10  ;;  %v7307_v13 = vld [vmem:[#allocation2 + $0x38] ss:$12 sps:$4 sm:$0xff]   ;;  %v7319_v42 = vld [vmem:[%s9367_s3 + $0x1f0] sm:$0xff]   ;;  %v8659_v2 = vpop.f32.mrf.mxu0 }
 0x104   : > { %v2719_v61 = vrot.slane %v2717_v25, 5  ;;  %v2129_v31 = vsel %vm2097_vm9, 65537, %v8626_v16  ;;  %v2723_v32 = vrot.slane %v2721_v30, 4  ;;  %v7314_v45 = vld [vmem:[#allocation2 + $0x50] ss:$12 sps:$4 sm:$0xff]   ;;  %v2131_v44 = vsel %vm2099_vm14, 65537, %v8626_v16 }
 0x105   : > { %v2729_v29 = vrot.slane %v2727_v43, 5  ;;  %v2365_v63 = vsel %vm7693_vm3, %v8097_v38, %v2364_v21  ;;  %v2733_v49 = vrot.slane %v2731_v34, 4  ;;  %v2374_v53 = vsel %vm7693_vm3, %v2366_v60, %v8070_v19  ;;  %v1968_v23 = vld [vmem:[#allocation2 + $0x160] sm:$0xf]  ;;  %v1969_v39 = vld [vmem:[#allocation2 + $0x16c] sm:$0xf] }
 0x106   : > { %v2720_v36 = vsel %vm7607_vm11, %v2715_v51, %v2719_v61  ;;  %vm2446_vm12 = vcmp.ne.s16.totalorder %v2365_v63, 0  ;;  %v2377_v33 = vshrl.u32 %v2129_v31, 16  ;;  %v2724_v4 = vor.u32 %v2723_v32, %v2719_v61  ;;  %v7313_v51 = vld [vmem:[%s9367_s3 + $0x1b8] sm:$0xff]   ;;  %v7320_v30 = vld [vmem:[%s9367_s3 + $0x1b0] sm:$0xff]   ;;  %v7327_v61 = vld [vmem:[%s9367_s3 + $0x1e8] sm:$0xff]   ;;  %v6708_v60 = vpop.f32.mrf.mxu1 }
 0x107   : > { %v7291_v40 = vld [vmem:[#allocation2 + $0x110] ss:$12 sps:$4 sm:$0xff]   ;;  %2865 = vst [vmem:[#allocation2 + $0x128] sm:$0xf] %v2720_v36  ;;  %vm2447_vm13 = vcmp.ne.s16.totalorder %v2374_v53, 0  ;;  %v2479_v58 = vsel %vm2446_vm12, 0, %v1966_v47  ;;  %v2734_v22 = vor.u32 %v2733_v49, %v2729_v29 }
 0x108   : > { %7065 = vmatmul.mubr.bf16.gmra.mxu1 %v7291_v40  ;;  %v2480_v7 = vsel %vm2447_vm13, 0, %v1967_v5  ;;  %v2737_v1 = vshll.u32 %v2479_v58, 16  ;;  %v2741_v59 = vshrl.u32 %v2479_v58, 16  ;;  %v2379_v46 = vrot.slane %v2377_v33, 7  ;;  %v8672_v5 = vpop.f32.mrf.mxu0  ;;  %v7315_v36 = vld [vmem:[#allocation2 + $0x68] ss:$12 sps:$4 sm:$0xff]  }
 0x109   : > { %v2725_v62 = vrot.slane %v2724_v4, 4  ;;  %v2735_v57 = vrot.slane %v2734_v22, 4  ;;  %v2747_v3 = vshll.u32 %v2480_v7, 16  ;;  %v2751_v27 = vshrl.u32 %v2480_v7, 16 }
 0x10a   : > { %v2739_v11 = vrot.slane %v2737_v1, 5  ;;  %v2743_v37 = vrot.slane %v2741_v59, 4  ;;  %v2380_v41 = vshll.u32 %v2129_v31, 16  ;;  %v2384_v12 = vrot.slane %v2379_v46, 4  ;;  %7093 = vmatmul.mubr.bf16.vlgmr.msra.gmra.mxu0 %v7307_v13  ;;  %v6642_v53 = vpop.f32.mrf.mxu0  ;;  %v7321_v13 = vld [vmem:[#allocation2 + $0x80] ss:$12 sps:$4 sm:$0xff]  }
 0x10b   : > { %v2730_v18 = vsel %vm7607_vm11, %v2725_v62, %v2729_v29  ;;  %v2749_v24 = vrot.slane %v2747_v3, 5  ;;  %v2753_v52 = vrot.slane %v2751_v27, 4  ;;  %v2395_v34 = vshrl.u32 %v2131_v44, 16  ;;  %6893 = vmatpush3.bf16.msra.mxu0 %v7313_v51  ;;  %7096 = vmatprep.mubr.bf16.mxu0 %v7314_v45  ;;  %v1971_v3 = vld [vmem:[#allocation2 + $0x184] sm:$0xf] }
 0x10c   : > { %2866 = vst [vmem:[#allocation2 + $0x134] sm:$0xf] %v2730_v18  ;;  %v2740_v9 = vsel %vm7607_vm11, %v2735_v57, %v2739_v11  ;;  %v2744_v20 = vor.u32 %v2743_v37, %v2739_v11  ;;  %v2382_v25 = vor.u32 %v2380_v41, %v2379_v46  ;;  %v2392_v47 = vsel %vm7693_vm3, %v2384_v12, %v8070_v19  ;;  %v6643_v62 = vpop.f32.mrf.mxu0  ;;  %v6709_v57 = vpop.f32.mrf.mxu1 }
 0x10d   : > { %2867 = vst [vmem:[#allocation2 + $0x140] sm:$0xf] %v2740_v9  ;;  %vm2449_vm15 = vcmp.ne.s16.totalorder %v2392_v47, 0  ;;  %v2754_v43 = vor.u32 %v2753_v52, %v2749_v24  ;;  %v2398_v21 = vshll.u32 %v2131_v44, 16  ;;  %v8677_v29 = vadd.f32 %v6637_v28, %v6636_v35  ;;  %6894 = vmatprep.subr.bf16.mxu0 %v7319_v42  ;;  %v1970_v35 = vld [vmem:[#allocation2 + $0x178] sm:$0xf] }
 0x10e   : > { %v2745_v31 = vrot.slane %v2744_v20, 4  ;;  %v2383_v14 = vsel %vm7693_vm3, %v8097_v38, %v2382_v25  ;;  %v2482_v32 = vsel %vm2449_vm15, 0, %v1969_v39  ;;  %v2397_v58 = vrot.slane %v2395_v34, 7  ;;  %v7328_v28 = vld [vmem:[%s9367_s3 + $0x1a8] sm:$0xff]   ;;  %v7342_v34 = vld [vmem:[%s9367_s3 + $0x1d8] sm:$0xff]  }
 0x10f   : > { %vm2448_vm0 = vcmp.ne.s16.totalorder %v2383_v14, 0  ;;  %v2755_v63 = vrot.slane %v2754_v43, 4  ;;  %v2767_v49 = vshll.u32 %v2482_v32, 16  ;;  %v2771_v40 = vshrl.u32 %v2482_v32, 16  ;;  %6895 = vmatpush3.bf16.msra.mxu0 %v7320_v30  ;;  %v7335_v43 = vld [vmem:[%s9367_s3 + $0x1a0] sm:$0xff]  }
 0x110   : > { %v2750_v33 = vsel %vm7607_vm11, %v2745_v31, %v2749_v24  ;;  %v2481_v4 = vsel %vm2448_vm0, 0, %v1968_v23  ;;  %v415_v22 = vmax.f32 %v8618_v26, 0.0  ;;  %v2400_v27 = vor.u32 %v2398_v21, %v2397_v58  ;;  %v7334_v26 = vld [vmem:[%s9367_s3 + $0x1e0] sm:$0xff]   ;;  %6896 = vmatprep.subr.bf16.mxu0 %v7327_v61  ;;  %v8689_v24 = vpop.f32.mrf.mxu0  ;;  %v8691_v23 = vpop.f32.mrf.mxu1 }
 0x111   : > { %2868 = vst [vmem:[#allocation2 + $0x14c] sm:$0xf] %v2750_v33  ;;  %v2757_v7 = vshll.u32 %v2481_v4, 16  ;;  %v2761_v1 = vshrl.u32 %v2481_v4, 16  ;;  %v2769_v59 = vrot.slane %v2767_v49, 5  ;;  %v2773_v46 = vrot.slane %v2771_v40, 4 }
 0x112   : > { %v2402_v51 = vrot.slane %v2397_v58, 4  ;;  %v6413_v11 = vpack.c.bf16 %v415_v22, %v415_v22  ;;  %v616_v37 = vadd.s32 248, %v7496_v8  ;;  %v2401_v39 = vsel %vm7693_vm3, %v8097_v38, %v2400_v27  ;;  %7097 = vmatmul.mubr.bf16.gmra.mxu0 %v7315_v36  ;;  %v8705_v20 = vpop.f32.mrf.mxu0  ;;  %v8707_v25 = vpop.f32.mrf.mxu1  ;;  %v7322_v4 = vld [vmem:[#allocation2 + $0x98] ss:$12 sps:$4 sm:$0xff]  }
 0x113   : > { %v7296_v41 = vld [vmem:[#allocation2 + $0x128] ss:$12 sps:$4 sm:$0xff]   ;;  %v2759_v12 = vrot.slane %v2757_v7, 5  ;;  %v2763_v45 = vrot.slane %v2761_v1, 4  ;;  %v2774_v18 = vor.u32 %v2773_v46, %v2769_v59  ;;  %v8699_v44 = vadd.f32 %v6643_v62, %v6642_v53  ;;  %7100 = vmatprep.mubr.bf16.mxu0 %v7321_v13  ;;  %6897 = vmatpush3.bf16.msra.mxu0 %v7328_v28  ;;  %v7329_v7 = vld [vmem:[#allocation2 + $0xb0] ss:$12 sps:$4 sm:$0xff]  }
 0x114   : > { %v2410_v52 = vsel %vm7693_vm3, %v2402_v51, %v8070_v19  ;;  %583 = vst [vmem:[#allocation2 + $0x190] sm:$0xf] %v6413_v11  ;;  %v8701_v8 = vadd.f32 %v6709_v57, %v6708_v60  ;;  %7068 = vmatprep.mubr.bf16.mxu1 %v7296_v41  ;;  %vm2450_vm1 = vcmp.ne.s16.totalorder %v2401_v39, 0  ;;  %v871_v21 = vand.u32 15, %v616_v37  ;;  %6898 = vmatprep.subr.bf16.mxu0 %v7334_v26  ;;  %v6648_v32 = vpop.f32.mrf.mxu0  ;;  %v6714_v40 = vpop.f32.mrf.mxu1  ;;  %v7343_v1 = vld [vmem:[%s9367_s3 + $0x198] sm:$0xff]   ;;  %v7350_v39 = vld [vmem:[%s9367_s3 + $0x190] sm:$0xff]  }
 0x115   : > { %v2760_v42 = vsel %vm7607_vm11, %v2755_v63, %v2759_v12  ;;  %v2764_v9 = vor.u32 %v2763_v45, %v2759_v12  ;;  %vm2451_vm2 = vcmp.ne.s16.totalorder %v2410_v52, 0  ;;  %v2483_v47 = vsel %vm2450_vm1, 0, %v1970_v35 }
 0x116   : > { %2869 = vst [vmem:[#allocation2 + $0x158] sm:$0xf] %v2760_v42  ;;  %v2484_v19 = vsel %vm2451_vm2, 0, %v1971_v3  ;;  %v2775_v30 = vrot.slane %v2774_v18, 4  ;;  %v2777_v60 = vshll.u32 %v2483_v47, 16  ;;  %v2781_v31 = vshrl.u32 %v2483_v47, 16  ;;  %v6649_v58 = vpop.f32.mrf.mxu0 }
 0x117   : > { %v2765_v61 = vrot.slane %v2764_v9, 4  ;;  %v2787_v14 = vshll.u32 %v2484_v19, 16  ;;  %v2791_v49 = vshrl.u32 %v2484_v19, 16  ;;  %vm2005_vm4 = vcmp.eq.s32.totalorder %v871_v21, 15  ;;  %6899 = vmatpush3.bf16.msra.mxu0 %v7335_v43  ;;  %v7349_v3 = vld [vmem:[%s9367_s3 + $0x1d0] sm:$0xff]  }
 0x118   : > { %v7299_v63 = vld [vmem:[#allocation2 + $0x140] ss:$12 sps:$4 sm:$0xff]   ;;  %v2779_v53 = vrot.slane %v2777_v60, 5  ;;  %v2783_v33 = vrot.slane %v2781_v31, 4  ;;  %vm2101_vm5 = vmpackc.low %vm2005_vm4, %vm2005_vm4  ;;  %v8721_v13 = vadd.f32 %v6649_v58, %v6648_v32  ;;  %6900 = vmatprep.subr.bf16.mxu0 %v7342_v34  ;;  %v8728_v28 = vpop.f32.mrf.mxu0  ;;  %v1503_v41 = vrot.slane %v1501_v55, 4 }
 0x119   : > { %v2770_v36 = vsel %vm7607_vm11, %v2765_v61, %v2769_v59  ;;  %7069 = vmatmul.mubr.bf16.gmra.mxu1 %v7299_v63  ;;  %v2789_v22 = vrot.slane %v2787_v14, 5  ;;  %v2133_v35 = vsel %vm2101_vm5, 65537, %v8626_v16  ;;  %v2793_v46 = vrot.slane %v2791_v49, 4  ;;  %v6715_v59 = vpop.f32.mrf.mxu1  ;;  %v7330_v55 = vld [vmem:[#allocation2 + $0xc8] ss:$12 sps:$4 sm:$0xff]   ;;  %v7364_v32 = vld [vmem:[%s9367_s3 + $0x1c0] sm:$0xff]  }
 0x11a   : > { %2870 = vst [vmem:[#allocation2 + $0x164] sm:$0xf] %v2770_v36  ;;  %v2780_v62 = vsel %vm7607_vm11, %v2775_v30, %v2779_v53  ;;  %v2784_v57 = vor.u32 %v2783_v33, %v2779_v53  ;;  %v2413_v27 = vshrl.u32 %v2133_v35, 16  ;;  %v2416_v51 = vshll.u32 %v2133_v35, 16  ;;  %7101 = vmatmul.mubr.bf16.gmra.mxu0 %v7322_v4  ;;  %v8735_v18 = vpop.f32.mrf.mxu0  ;;  %v1973_v9 = vld [vmem:[#allocation2 + $0x19c] sm:$0x1] }
 0x11b   : > { %2871 = vst [vmem:[#allocation2 + $0x170] sm:$0xf] %v2780_v62  ;;  %v2794_v26 = vor.u32 %v2793_v46, %v2789_v22  ;;  %v8730_v11 = vadd.f32 %v6715_v59, %v6714_v40  ;;  %v649_v37 = vld [vmem:[#allocation2 + $0x190] sm:$0xf]  ;;  %vm1548_vm6 = vcmp.ne.s16.totalorder %v7614_v6, 0  ;;  %7104 = vmatprep.mubr.bf16.mxu0 %v7329_v7  ;;  %6901 = vmatpush3.bf16.msra.mxu0 %v7343_v1  ;;  %v7357_v6 = vld [vmem:[%s9367_s3 + $0x1c8] sm:$0xff]   ;;  %v8758_v49 = vpop.f32.mrf.mxu1 }
 0x11c   : > { %v2785_v12 = vrot.slane %v2784_v57, 4  ;;  %v2415_v45 = vrot.slane %v2413_v27, 7  ;;  %v1504_v52 = vor.u32 %v1503_v41, %v8046_v10  ;;  %v8741_v42 = vsel %vm1548_vm6, 0, %v649_v37  ;;  %6902 = vmatprep.subr.bf16.mxu0 %v7349_v3  ;;  %v6654_v30 = vpop.f32.mrf.mxu0  ;;  %v7336_v43 = vld [vmem:[#allocation2 + $0xe0] ss:$12 sps:$4 sm:$0xff]  }
 0x11d   : > { %v7358_v10 = vld [vmem:[%s9367_s3 + $0x188] sm:$0xff]   ;;  %v1972_v34 = vld [vmem:[#allocation2 + $0x190] sm:$0xf]  ;;  %v2795_v21 = vrot.slane %v2794_v26, 4  ;;  %v1870_v60 = vshrl.u32 %v8741_v42, 16  ;;  %v1873_v35 = vshll.u32 %v8741_v42, 16  ;;  %v8769_v57 = vpop.f32.mrf.mxu1 }
 0x11e   : > { %v2790_v54 = vsel %vm7607_vm11, %v2785_v12, %v2789_v22  ;;  %v2418_v47 = vor.u32 %v2416_v51, %v2415_v45  ;;  %v2420_v19 = vrot.slane %v2415_v45, 4  ;;  %v1505_v61 = vrot.slane %v1504_v52, 4  ;;  %v6655_v63 = vpop.f32.mrf.mxu0  ;;  %v648_v36 = vld [vmem:[#allocation2 + $0x184] sm:$0xf]  ;;  %v7310_v7 = vld [vmem:[#allocation2 + $0x1c] ss:$12 sps:$4 sm:$0xff]  }
 0x11f   : > { %2872 = vst [vmem:[#allocation2 + $0x17c] sm:$0xf] %v2790_v54  ;;  %6903 = vmatpush3.bf16.msra.mxu0 %v7350_v39  ;;  %v8760_v40 = vadd.f32 %v6655_v63, %v6654_v30  ;;  %v1872_v3 = vrot.slane %v1870_v60, 7  ;;  %v7337_v12 = vld [vmem:[#allocation2 + $0xf8] ss:$12 sps:$4 sm:$0xff]   ;;  %v1859_v42 = vrot.slane %v8089_v56, 4 }
 0x120   : > { %v2419_v14 = vsel %vm7693_vm3, %v8097_v38, %v2418_v47  ;;  %vm2453_vm8 = vcmp.ne.s16.totalorder %v2420_v19, 0  ;;  %v1510_v53 = vsel %vm7607_vm11, %v1505_v61, %v7590_v50  ;;  %6904 = vmatprep.subr.bf16.mxu0 %v7357_v6  ;;  %v7365_v50 = vld [vmem:[%s9367_s3 + $0x180] sm:$0xff]   ;;  %v7344_v45 = vld [vmem:[#allocation2 + $0x110] ss:$12 sps:$4 sm:$0xff]   ;;  %v8776_v47 = vpop.f32.mrf.mxu0  ;;  %v7345_v60 = vld [vmem:[#allocation2 + $0x128] ss:$12 sps:$4 sm:$0xff]  }
 0x121   : > { %v7302_v31 = vld [vmem:[#allocation2 + $0x158] ss:$12 sps:$4 sm:$0xff]   ;;  %vm2452_vm7 = vcmp.ne.s16.totalorder %v2419_v14, 0  ;;  %v2486_v33 = vsel %vm2453_vm8, 0, %v1973_v9  ;;  %vm1547_vm9 = vcmp.ne.s16.totalorder %v1510_v53, 0 }
 0x122   : > { %7072 = vmatprep.mubr.bf16.mxu1 %v7302_v31  ;;  %v2485_v38 = vsel %vm2452_vm7, 0, %v1972_v34  ;;  %v2807_v22 = vshll.u32 %v2486_v33, 16  ;;  %7105 = vmatmul.mubr.bf16.gmra.mxu0 %v7330_v55  ;;  %v1580_v1 = vsel %vm1547_vm9, 0, %v648_v36  ;;  %v1875_v55 = vor.u32 %v1873_v35, %v1872_v3  ;;  %v7316_v34 = vld [vmem:[#allocation2 + $0x34] ss:$12 sps:$4 sm:$0xff]   ;;  %v8787_v61 = vpop.f32.mrf.mxu0  ;;  %v7418_v31 = vld [vmem:[%s9367_s3 + $0x238] sm:$0xff]  }
 0x123   : > { %v2797_v4 = vshll.u32 %v2485_v38, 16  ;;  %v2801_v58 = vshrl.u32 %v2485_v38, 16  ;;  %7108 = vmatprep.mubr.bf16.mxu0 %v7336_v43  ;;  %6905 = vmatpush3.bf16.msra.mxu0 %v7358_v10  ;;  %v1861_v37 = vshrl.u32 %v1580_v1, 16  ;;  %v1864_v41 = vshll.u32 %v1580_v1, 16  ;;  %v7308_v43 = vld [vmem:[#allocation2 + $0x18] ss:$12 sps:$4 sm:$0xff]  }
 0x124   : > { %v2809_v62 = vrot.slane %v2807_v22, 5  ;;  %6906 = vmatprep.subr.bf16.mxu0 %v7364_v32  ;;  %v7351_v14 = vld [vmem:[#allocation2 + $0x140] ss:$12 sps:$4 sm:$0xff]   ;;  %v7318_v36 = vld [vmem:[#allocation2 + $0x30] ss:$12 sps:$4 sm:$0xff]  }
 0x125   : > { %v2799_v46 = vrot.slane %v2797_v4, 5  ;;  %v2803_v59 = vrot.slane %v2801_v58, 4  ;;  %v1863_v54 = vrot.slane %v1861_v37, 7  ;;  %v7323_v53 = vld [vmem:[#allocation2 + $0x4c] ss:$12 sps:$4 sm:$0xff]   ;;  %v7355_v33 = vld [vmem:[%s9367_s3 + $0x220] sm:$0xff]  }
 0x126   : > { %v7304_v27 = vld [vmem:[#allocation2 + $0x170] ss:$12 sps:$4 sm:$0xff]   ;;  %v7352_v22 = vld [vmem:[#allocation2 + $0x158] ss:$12 sps:$4 sm:$0xff]   ;;  %v7379_v37 = vld [vmem:[%s9367_s3 + $0x208] sm:$0xff]  }
 0x127   : > { %v2800_v51 = vsel %vm7607_vm11, %v2795_v21, %v2799_v46  ;;  %v2804_v26 = vor.u32 %v2803_v59, %v2799_v46  ;;  %7073 = vmatmul.mubr.bf16.gmra.mxu1 %v7304_v27  ;;  %6907 = vmatpush3.bf16.msra.mxu0 %v7365_v50  ;;  %v1866_v19 = vor.u32 %v1864_v41, %v1863_v54  ;;  %v1868_v30 = vrot.slane %v1863_v54, 4  ;;  %v7368_v1 = vld [vmem:[%s9367_s3 + $0x218] sm:$0xff]   ;;  %v7326_v59 = vld [vmem:[#allocation2 + $0x48] ss:$12 sps:$4 sm:$0xff]   ;;  %v7331_v50 = vld [vmem:[#allocation2 + $0x64] ss:$12 sps:$4 sm:$0xff]  }
 0x128   : > { %2873 = vst [vmem:[#allocation2 + $0x188] sm:$0xf] %v2800_v51  ;;  %4318 = vmatprep.mubr.bf16.mxu1 %v7310_v7  ;;  %v6720_v52 = vpop.f32.mrf.mxu1  ;;  %v7359_v7 = vld [vmem:[#allocation2 + $0x170] ss:$12 sps:$4 sm:$0xff]  }
 0x129   : > { %v2805_v39 = vrot.slane %v2804_v26, 4  ;;  %v1867_v56 = vsel %vm7693_vm3, %v1859_v42, %v1866_v19  ;;  %v1876_v21 = vsel %vm7693_vm3, %v1868_v30, %v1875_v55  ;;  %v7373_v27 = vld [vmem:[%s9367_s3 + $0x210] sm:$0xff]  }
 0x12a   : > { %v6721_v9 = vpop.f32.mrf.mxu1  ;;  %7109 = vmatmul.mubr.bf16.gmra.mxu0 %v7337_v12  ;;  %1939 = vst [vmem:[#allocation2 + $0x180] sm:$0xf] %v1867_v56  ;;  %1940 = vst [vmem:[#allocation2 + $0x18c] sm:$0xf] %v1876_v21  ;;  %v7333_v12 = vld [vmem:[#allocation2 + $0x60] ss:$12 sps:$4 sm:$0xff]   ;;  %v6647_v56 = vadd.f32 %v8705_v20, %v8689_v24 }
 0x12b   : > { %v2810_v6 = vsel %vm7607_vm11, %v2805_v39, %v2809_v62  ;;  %v8778_v10 = vadd.f32 %v6721_v9, %v6720_v52  ;;  %7112 = vmatprep.mubr.bf16.mxu0 %v7344_v45  ;;  %v7338_v45 = vld [vmem:[#allocation2 + $0x7c] ss:$12 sps:$4 sm:$0xff]   ;;  %v7386_v52 = vld [vmem:[%s9367_s3 + $0x200] sm:$0xff]   ;;  %vm5901_vm11 = vcmask 1040384  }
 0x12c   : > { %2874 = vst [vmem:[#allocation2 + $0x194] sm:$0xf] %v2810_v6  ;;  %v8795_v32 = vpop.f32.mrf.mxu1  ;;  %v7341_v6 = vld [vmem:[#allocation2 + $0x78] ss:$12 sps:$4 sm:$0xff]   ;;  %v7346_v9 = vld [vmem:[#allocation2 + $0x94] ss:$12 sps:$4 sm:$0xff]  }
 0x12d   : > { %v7361_v24 = vld [vmem:[#allocation2 + $0xc4] ss:$12 sps:$4 sm:$0xff]   ;;  %v7363_v20 = vld [vmem:[#allocation2 + $0xc0] ss:$12 sps:$4 sm:$0xff]  }
 0x12e   : > { %v8800_v4 = vpop.f32.mrf.mxu1 }
 0x12f   : > { %4319 = vmatmul.mubr.bf16.vlgmr.msra.gmra.mxu1 %v7308_v43 }
 0x130   : > { %7125 = vmatpush3.bf16.msra.mxu1 %v7418_v31  ;;  %4326 = vmatprep.mubr.bf16.mxu1 %v7316_v34  ;;  %v7348_v31 = vld [vmem:[#allocation2 + $0x90] ss:$12 sps:$4 sm:$0xff]  }
 0x131   : > { %7126 = vmatprep.subr.bf16.mxu1 %v7325_v0  ;;  %v6660_v63 = vpop.f32.mrf.mxu0 }
 0x132   : > { %7113 = vmatmul.mubr.bf16.gmra.mxu0 %v7345_v60 }
 0x133   : > { %7116 = vmatprep.mubr.bf16.mxu0 %v7351_v14  ;;  %v6661_v38 = vpop.f32.mrf.mxu0  ;;  %v7360_v26 = vld [vmem:[#allocation2 + $0x188] ss:$12 sps:$4 sm:$0xff]  }
 0x134   : > { %7127 = vmatpush3.bf16.msra.mxu1 %v7325_v0  ;;  %v8802_v58 = vadd.f32 %v6661_v38, %v6660_v63 }
 0x135   : > { %7128 = vmatprep.subr.bf16.mxu1 %v7340_v15  ;;  %v8807_v46 = vpop.f32.mrf.mxu0 }
 0x137   : > { %4327 = vmatmul.mubr.bf16.gmra.mxu1 %v7318_v36  ;;  %v8814_v51 = vpop.f32.mrf.mxu0 }
 0x138   : > { %4334 = vmatprep.mubr.bf16.mxu1 %v7323_v53  ;;  %7129 = vmatpush3.bf16.msra.mxu1 %v7340_v15  ;;  %v7353_v15 = vld [vmem:[#allocation2 + $0xac] ss:$12 sps:$4 sm:$0xff]  }
 0x139   : > { %7130 = vmatprep.subr.bf16.mxu1 %v7355_v33  ;;  %v6726_v35 = vpop.f32.mrf.mxu1 }
 0x13a   : > { %7117 = vmatmul.mubr.bf16.gmra.mxu0 %v7352_v22 }
 0x13b   : > { %v6727_v62 = vpop.f32.mrf.mxu1  ;;  %7120 = vmatprep.mubr.bf16.mxu0 %v7359_v7 }
 0x13c   : > { %7131 = vmatpush3.bf16.msra.mxu1 %v7355_v33  ;;  %v8809_v3 = vadd.f32 %v6727_v62, %v6726_v35  ;;  %v7366_v33 = vld [vmem:[#allocation2 + $0xdc] ss:$12 sps:$4 sm:$0xff]  }
 0x13d   : > { %7132 = vmatprep.subr.bf16.mxu1 %v7368_v1  ;;  %v8824_v54 = vpop.f32.mrf.mxu1 }
 0x13f   : > { %4335 = vmatmul.mubr.bf16.gmra.mxu1 %v7326_v59  ;;  %v8826_v55 = vpop.f32.mrf.mxu1 }
 0x140   : > { %4342 = vmatprep.mubr.bf16.mxu1 %v7331_v50  ;;  %7133 = vmatpush3.bf16.msra.mxu1 %v7368_v1  ;;  %v6659_v1 = vadd.f32 %v8787_v61, %v8776_v47 }
 0x141   : > { %7134 = vmatprep.subr.bf16.mxu1 %v7373_v27 }
 0x142   : > { %v6666_v41 = vpop.f32.mrf.mxu0  ;;  %7121 = vmatmul.mubr.bf16.gmra.mxu0 %v7360_v26  ;;  %v7370_v26 = vld [vmem:[#allocation2 + $0xf4] ss:$12 sps:$4 sm:$0xff]  }
 0x143   : > { %5249 = vmatprep.mubr.bf16.mxu0 %v7316_v34 }
 0x144   : > { %7135 = vmatpush3.bf16.msra.mxu1 %v7373_v27  ;;  %v6667_v39 = vpop.f32.mrf.mxu0 }
 0x145   : > { %7136 = vmatprep.subr.bf16.mxu1 %v7379_v37  ;;  %v8822_v42 = vadd.f32 %v6667_v39, %v6666_v41 }
 0x146   : > { %v8828_v19 = vpop.f32.mrf.mxu0 }
 0x147   : > { %4343 = vmatmul.mubr.bf16.gmra.mxu1 %v7333_v12 }
 0x148   : > { %4350 = vmatprep.mubr.bf16.mxu1 %v7338_v45  ;;  %7137 = vmatpush3.bf16.msra.mxu1 %v7379_v37  ;;  %v6670_v0 = vpop.f32.mrf.mxu0  ;;  %v7372_v37 = vld [vmem:[#allocation2 + $0xf0] ss:$12 sps:$4 sm:$0xff]  }
 0x149   : > { %7138 = vmatprep.subr.bf16.mxu1 %v7386_v52 }
 0x14a   : > { %5250 = vmatmul.mubr.bf16.vlgmr.msra.gmra.mxu0 %v7318_v36 }
 0x14b   : > { %5257 = vmatprep.mubr.bf16.mxu0 %v7323_v53  ;;  %v7356_v53 = vld [vmem:[#allocation2 + $0xa8] ss:$12 sps:$4 sm:$0xff]  }
 0x14c   : > { %7139 = vmatpush3.bf16.msra.mxu1 %v7386_v52 }
 0x14e   : > { %v7046_v30 = vpop.f32.mrf.mxu1 }
 0x14f   : > { %4351 = vmatmul.mubr.bf16.gmra.mxu1 %v7341_v6  ;;  %v8831_v43 = vadd.f32 %v7046_v30, %v8699_v44 }
 0x150   : > { %4358 = vmatprep.mubr.bf16.mxu1 %v7346_v9  ;;  %v3582_v34 = vpop.f32.mrf.mxu1 }
 0x151   : > { %v8836_v21 = vadd.f32 %v8677_v29, %v3582_v34 }
 0x152   : > { %v7047_v60 = vpop.f32.mrf.mxu1  ;;  %5258 = vmatmul.mubr.bf16.gmra.mxu0 %v7326_v59 }
 0x153   : > { %v8838_v14 = vadd.f32 %v7047_v60, %v6647_v56  ;;  %5265 = vmatprep.mubr.bf16.mxu0 %v7331_v50  ;;  %v7369_v50 = vld [vmem:[#allocation2 + $0xd8] ss:$12 sps:$4 sm:$0xff]   ;;  %v7376_v60 = vld [vmem:[#allocation2 + $0x120] ss:$12 sps:$4 sm:$0xff]  }
 0x154   : > { %v6672_v63 = vpop.f32.mrf.mxu0  ;;  %v8842_v29 = vpop.f32.mrf.mxu1 }
 0x156   : > { %v6673_v44 = vpop.f32.mrf.mxu0 }
 0x157   : > { %4359 = vmatmul.mubr.bf16.gmra.mxu1 %v7348_v31  ;;  %v8840_v36 = vadd.f32 %v6673_v44, %v6672_v63 }
 0x158   : > { %4366 = vmatprep.mubr.bf16.mxu1 %v7353_v15  ;;  %v8854_v27 = vpop.f32.mrf.mxu0 }
 0x15a   : > { %5266 = vmatmul.mubr.bf16.gmra.mxu0 %v7333_v12  ;;  %v7374_v12 = vld [vmem:[#allocation2 + $0x124] ss:$12 sps:$4 sm:$0xff]  }
 0x15b   : > { %5273 = vmatprep.mubr.bf16.mxu0 %v7338_v45 }
 0x15f   : > { %4367 = vmatmul.mubr.bf16.gmra.mxu1 %v7356_v53 }
 0x160   : > { %4374 = vmatprep.mubr.bf16.mxu1 %v7361_v24 }
 0x162   : > { %5274 = vmatmul.mubr.bf16.gmra.mxu0 %v7341_v6 }
 0x163   : > { %v7050_v38 = vpop.f32.mrf.mxu1  ;;  %5281 = vmatprep.mubr.bf16.mxu0 %v7346_v9  ;;  %v6671_v9 = vadd.f32 %v6670_v0, %v8828_v19  ;;  %v7380_v19 = vld [vmem:[#allocation2 + $0x138] ss:$12 sps:$4 sm:$0xff]   ;;  %v7381_v0 = vld [vmem:[#allocation2 + $0x154] ss:$12 sps:$4 sm:$0xff]  }
 0x164   : > { %v8845_v22 = vadd.f32 %v7050_v38, %v8760_v40  ;;  %v8856_v40 = vpop.f32.mrf.mxu0  ;;  %v7383_v38 = vld [vmem:[#allocation2 + $0x150] ss:$12 sps:$4 sm:$0xff]  }
 0x165   : > { %v3598_v7 = vpop.f32.mrf.mxu1 }
 0x166   : > { %v8850_v35 = vadd.f32 %v8721_v13, %v3598_v7 }
 0x167   : > { %4375 = vmatmul.mubr.bf16.gmra.mxu1 %v7363_v20  ;;  %v7051_v59 = vpop.f32.mrf.mxu1 }
 0x168   : > { %4382 = vmatprep.mubr.bf16.mxu1 %v7366_v33  ;;  %v8852_v62 = vadd.f32 %v7051_v59, %v6659_v1 }
 0x169   : > { %v8859_v41 = vpop.f32.mrf.mxu1 }
 0x16a   : > { %5282 = vmatmul.mubr.bf16.gmra.mxu0 %v7348_v31  ;;  %v7377_v31 = vld [vmem:[#allocation2 + $0x13c] ss:$12 sps:$4 sm:$0xff]  }
 0x16b   : > { %5289 = vmatprep.mubr.bf16.mxu0 %v7353_v15 }
 0x16f   : > { %4383 = vmatmul.mubr.bf16.gmra.mxu1 %v7369_v50 }
 0x170   : > { %4390 = vmatprep.mubr.bf16.mxu1 %v7370_v26 }
 0x172   : > { %5290 = vmatmul.mubr.bf16.gmra.mxu0 %v7356_v53 }
 0x173   : > { %v6678_v47 = vpop.f32.mrf.mxu0  ;;  %5297 = vmatprep.mubr.bf16.mxu0 %v7361_v24  ;;  %v7393_v24 = vld [vmem:[#allocation2 + $0x108] ss:$12 sps:$4 sm:$0xff]  }
 0x175   : > { %v6679_v13 = vpop.f32.mrf.mxu0 }
 0x176   : > { %v6680_v61 = vadd.f32 %v6679_v13, %v6678_v47  ;;  %v7387_v13 = vld [vmem:[#allocation2 + $0x168] ss:$12 sps:$4 sm:$0xff]  }
 0x177   : > { %4391 = vmatmul.mubr.bf16.gmra.mxu1 %v7372_v37  ;;  %v6681_v45 = vpop.f32.mrf.mxu0 }
 0x178   : > { %4398 = vmatprep.mubr.bf16.mxu1 %v8615_v48 }
 0x179   : > { %v6682_v48 = vpop.f32.mrf.mxu0 }
 0x17a   : > { %5298 = vmatmul.mubr.bf16.gmra.mxu0 %v7363_v20  ;;  %v6683_v1 = vadd.f32 %v6682_v48, %v6681_v45  ;;  %v7390_v48 = vld [vmem:[#allocation2 + $0x180] ss:$12 sps:$4 sm:$0xff]  }
 0x17b   : > { %5305 = vmatprep.mubr.bf16.mxu0 %v7366_v33  ;;  %v7384_v33 = vld [vmem:[#allocation2 + $0x16c] ss:$12 sps:$4 sm:$0xff]  }
 0x17d   : > { %v7054_v39 = vpop.f32.mrf.mxu1 }
 0x17e   : > { %v8862_v52 = vadd.f32 %v7054_v39, %v8822_v42 }
 0x17f   : > { %4399 = vmatmul.mubr.bf16.gmra.mxu1 %v8620_v17  ;;  %v3614_v6 = vpop.f32.mrf.mxu1  ;;  %v7395_v17 = vld [vmem:[#allocation2 + $0x10c] ss:$12 sps:$4 sm:$0xff]  }
 0x180   : > { %4406 = vmatprep.mubr.bf16.mxu1 %v7374_v12  ;;  %v8867_v30 = vadd.f32 %v8802_v58, %v3614_v6  ;;  %v7388_v6 = vld [vmem:[#allocation2 + $0x184] ss:$12 sps:$4 sm:$0xff]  }
 0x181   : > { %v7055_v34 = vpop.f32.mrf.mxu1 }
 0x182   : > { %v8869_v56 = vadd.f32 %v7055_v34, %v6671_v9  ;;  %5306 = vmatmul.mubr.bf16.gmra.mxu0 %v7369_v50 }
 0x183   : > { %5313 = vmatprep.mubr.bf16.mxu0 %v7370_v26  ;;  %v8871_v20 = vpop.f32.mrf.mxu1 }
 0x184   : > { %v6684_v15 = vpop.f32.mrf.mxu0 }
 0x186   : > { %v6685_v42 = vpop.f32.mrf.mxu0 }
 0x187   : > { %4407 = vmatmul.mubr.bf16.gmra.mxu1 %v7376_v60  ;;  %v6686_v63 = vadd.f32 %v6685_v42, %v6684_v15  ;;  %v7391_v15 = vld [vmem:[#allocation2 + $0x38] ss:$12 sps:$4 sm:$0xff]   ;;  %v7396_v42 = vld [vmem:[#allocation2 + $0x68] ss:$12 sps:$4 sm:$0xff]  }
 0x188   : > { %4414 = vmatprep.mubr.bf16.mxu1 %v7377_v31  ;;  %v6687_v44 = vpop.f32.mrf.mxu0 }
 0x18a   : > { %v6688_v53 = vpop.f32.mrf.mxu0  ;;  %5314 = vmatmul.mubr.bf16.gmra.mxu0 %v7372_v37 }
 0x18b   : > { %v6689_v58 = vadd.f32 %v6688_v53, %v6687_v44  ;;  %5321 = vmatprep.mubr.bf16.mxu0 %v7395_v17 }
 0x18f   : > { %4415 = vmatmul.mubr.bf16.gmra.mxu1 %v7380_v19 }
 0x190   : > { %4422 = vmatprep.mubr.bf16.mxu1 %v7381_v0 }
 0x192   : > { %5322 = vmatmul.mubr.bf16.gmra.mxu0 %v7393_v24 }
 0x193   : > { %5329 = vmatprep.mubr.bf16.mxu0 %v7374_v12 }
 0x197   : > { %v7058_v7 = vpop.f32.mrf.mxu1  ;;  %4423 = vmatmul.mubr.bf16.gmra.mxu1 %v7383_v38 }
 0x198   : > { %v8873_v59 = vadd.f32 %v7058_v7, %v6680_v61  ;;  %4430 = vmatprep.mubr.bf16.mxu1 %v7384_v33 }
 0x199   : > { %v3630_v50 = vpop.f32.mrf.mxu1 }
 0x19a   : > { %v8876_v26 = vadd.f32 %v8840_v36, %v3630_v50  ;;  %v6690_v47 = vpop.f32.mrf.mxu0  ;;  %5330 = vmatmul.mubr.bf16.gmra.mxu0 %v7376_v60  ;;  %v7392_v60 = vld [vmem:[#allocation2 + $0x50] ss:$12 sps:$4 sm:$0xff]  }
 0x19b   : > { %v7059_v37 = vpop.f32.mrf.mxu1  ;;  %5337 = vmatprep.mubr.bf16.mxu0 %v7377_v31 }
 0x19c   : > { %v8878_v39 = vadd.f32 %v7059_v37, %v6683_v1  ;;  %v6691_v9 = vpop.f32.mrf.mxu0  ;;  %v7398_v1 = vld [vmem:[#allocation2 + $0x98] ss:$12 sps:$4 sm:$0xff]  }
 0x19d   : > { %v6692_v12 = vadd.f32 %v6691_v9, %v6690_v47  ;;  %v8880_v36 = vpop.f32.mrf.mxu1 }
 0x19e   : > { %v6693_v34 = vpop.f32.mrf.mxu0 }
 0x19f   : > { %4431 = vmatmul.mubr.bf16.gmra.mxu1 %v7387_v13 }
 0x1a0   : > { %4438 = vmatprep.mubr.bf16.mxu1 %v7388_v6  ;;  %v6694_v61 = vpop.f32.mrf.mxu0 }
 0x1a1   : > { %v6695_v45 = vadd.f32 %v6694_v61, %v6693_v34  ;;  %v7400_v61 = vld [vmem:[#allocation2 + $0xc8] ss:$12 sps:$4 sm:$0xff]  }
 0x1a2   : > { %5338 = vmatmul.mubr.bf16.gmra.mxu0 %v7380_v19 }
 0x1a3   : > { %5345 = vmatprep.mubr.bf16.mxu0 %v7381_v0  ;;  %v7397_v0 = vld [vmem:[#allocation2 + $0x80] ss:$12 sps:$4 sm:$0xff]  }
 0x1a7   : > { %4439 = vmatmul.mubr.bf16.gmra.mxu1 %v7390_v48 }
 0x1a8   : > { %7140 = vmatprep.mubr.bf16.mxu1 %v7391_v15 }
 0x1aa   : > { %5346 = vmatmul.mubr.bf16.gmra.mxu0 %v7383_v38 }
 0x1ab   : > { %5353 = vmatprep.mubr.bf16.mxu0 %v7384_v33 }
 0x1ae   : > { %v7062_v31 = vpop.f32.mrf.mxu1 }
 0x1af   : > { %v8882_v17 = vadd.f32 %v7062_v31, %v6692_v12  ;;  %7141 = vmatmul.mubr.bf16.vlgmr.msra.gmra.mxu1 %v7392_v60  ;;  %v7399_v12 = vld [vmem:[#allocation2 + $0xb0] ss:$12 sps:$4 sm:$0xff]  }
 0x1b0   : > { %v3646_v44 = vpop.f32.mrf.mxu1  ;;  %7144 = vmatprep.mubr.bf16.mxu1 %v7396_v42 }
 0x1b1   : > { %v8884_v53 = vadd.f32 %v6686_v63, %v3646_v44  ;;  %v6322_v63 = vcombine.high %v8626_v16, %v8626_v16 }
 0x1b2   : > { %v7063_v24 = vpop.f32.mrf.mxu1  ;;  %5354 = vmatmul.mubr.bf16.gmra.mxu0 %v7387_v13  ;;  %v7401_v13 = vld [vmem:[#allocation2 + $0xe0] ss:$12 sps:$4 sm:$0xff]  }
 0x1b3   : > { %v8886_v19 = vadd.f32 %v7063_v24, %v6695_v45  ;;  %5361 = vmatprep.mubr.bf16.mxu0 %v7388_v6  ;;  %v7402_v45 = vld [vmem:[#allocation2 + $0xf8] ss:$12 sps:$4 sm:$0xff]  }
 0x1b4   : > { %v3649_v7 = vpop.f32.mrf.mxu1 }
 0x1b5   : > { %v8888_v50 = vadd.f32 %v6689_v58, %v3649_v7  ;;  %v6321_v58 = vcombine.low %v8626_v16, %v8626_v16  ;;  %v7403_v16 = vld [vmem:[#allocation2 + $0x110] ss:$12 sps:$4 sm:$0xff]  }
 0x1b6   : > { %v6696_v38 = vpop.f32.mrf.mxu0 }
 0x1b7   : > { %7145 = vmatmul.mubr.bf16.gmra.mxu1 %v7397_v0 }
 0x1b8   : > { %v6697_v33 = vpop.f32.mrf.mxu0  ;;  %7148 = vmatprep.mubr.bf16.mxu1 %v7398_v1 }
 0x1b9   : > { %v6698_v37 = vadd.f32 %v6697_v33, %v6696_v38  ;;  %v7404_v33 = vld [vmem:[#allocation2 + $0x128] ss:$12 sps:$4 sm:$0xff]  }
 0x1ba   : > { %v6699_v47 = vpop.f32.mrf.mxu0  ;;  %5362 = vmatmul.mubr.bf16.gmra.mxu0 %v7390_v48 }
 0x1bb   : > { %5369 = vmatprep.mubr.bf16.mxu0 %v6322_v63 }
 0x1bc   : > { %v6700_v9 = vpop.f32.mrf.mxu0 }
 0x1bd   : > { %v6701_v34 = vadd.f32 %v6700_v9, %v6699_v47 }
 0x1bf   : > { %7149 = vmatmul.mubr.bf16.gmra.mxu1 %v7399_v12 }
 0x1c0   : > { %7152 = vmatprep.mubr.bf16.mxu1 %v7400_v61 }
 0x1c2   : > { %v6702_v6 = vpop.f32.mrf.mxu0  ;;  %5370 = vmatmul.mubr.bf16.gmra.mxu0 %v6321_v58 }
 0x1c4   : > { %v6703_v15 = vpop.f32.mrf.mxu0 }
 0x1c5   : > { %v6704_v42 = vadd.f32 %v6703_v15, %v6702_v6  ;;  %v7406_v6 = vld [vmem:[#allocation2 + $0x158] ss:$12 sps:$4 sm:$0xff]  }
 0x1c6   : > { %v6705_v31 = vpop.f32.mrf.mxu0 }
 0x1c7   : > { %7153 = vmatmul.mubr.bf16.gmra.mxu1 %v7401_v13 }
 0x1c8   : > { %v7066_v60 = vpop.f32.mrf.mxu1  ;;  %7156 = vmatprep.mubr.bf16.mxu1 %v7402_v45  ;;  %v6706_v0 = vpop.f32.mrf.mxu0 }
 0x1c9   : > { %v8894_v48 = vadd.f32 %v7066_v60, %v6704_v42  ;;  %v6707_v1 = vadd.f32 %v6706_v0, %v6705_v31  ;;  %v7407_v0 = vld [vmem:[#allocation2 + $0x170] ss:$12 sps:$4 sm:$0xff]  }
 0x1ca   : > { %v3662_v44 = vpop.f32.mrf.mxu1  ;;  %v8898_v38 = vpop.f32.mrf.mxu0 }
 0x1cb   : > { %9436 = vst [vmem:[#allocation4_spill] sm:$0xff] %v8894_v48  ;;  %v8896_v24 = vadd.f32 %v6698_v37, %v3662_v44  ;;  %v7405_v37 = vld [vmem:[#allocation2 + $0x140] ss:$12 sps:$4 sm:$0xff]   ;;  %v6719_v44 = vadd.f32 %v8769_v57, %v8758_v49 }
 0x1cc   : > { %v7067_v7 = vpop.f32.mrf.mxu1  ;;  %v4481_v12 = vpop.f32.mrf.mxu0  ;;  %v7409_v57 = vld [vmem:[#allocation2 + $0x1a0] ss:$12 sps:$4 sm:$0xff]  }
 0x1cd   : > { %9437 = vst [vmem:[#allocation5_spill] sm:$0xff] %v8896_v24  ;;  %v8900_v63 = vadd.f32 %v7067_v7, %v6707_v1 }
 0x1ce   : > { %v3665_v47 = vpop.f32.mrf.mxu1  ;;  %v8904_v61 = vpop.f32.mrf.mxu0 }
 0x1cf   : > { %9438 = vst [vmem:[#allocation6_spill] sm:$0xff] %v8900_v63  ;;  %v8902_v9 = vadd.f32 %v6701_v34, %v3665_v47  ;;  %7157 = vmatmul.mubr.bf16.gmra.mxu1 %v7403_v16  ;;  %v6713_v47 = vadd.f32 %v8707_v25, %v8691_v23 }
 0x1d0   : > { %7160 = vmatprep.mubr.bf16.mxu1 %v7404_v33  ;;  %v4484_v58 = vpop.f32.mrf.mxu0  ;;  %v7408_v33 = vld [vmem:[#allocation2 + $0x188] ss:$12 sps:$4 sm:$0xff]  }
 0x1d1   : > { %9439 = vst [vmem:[#allocation7_spill] sm:$0xff] %v8902_v9 }
 0x1d2   : > { %v8906_v13 = vpop.f32.mrf.mxu0 }
 0x1d4   : > { %v8908_v45 = vpop.f32.mrf.mxu0 }
 0x1d6   : > { %v8910_v15 = vpop.f32.mrf.mxu0 }
 0x1d7   : > { %7161 = vmatmul.mubr.bf16.gmra.mxu1 %v7405_v37 }
 0x1d8   : > { %7164 = vmatprep.mubr.bf16.mxu1 %v7406_v6  ;;  %v8915_v42 = vpop.f32.mrf.mxu0 }
 0x1d9   : > { %v7070_v60 = vpop.f32.mrf.mxu1 }
 0x1da   : > { %v8913_v34 = vadd.f32 %v7070_v60, %v8730_v11  ;;  %v8922_v1 = vpop.f32.mrf.mxu0 }
 0x1db   : > { %v3678_v31 = vpop.f32.mrf.mxu1 }
 0x1dc   : > { %9440 = vst [vmem:[#allocation8_spill] sm:$0xff] %v8913_v34  ;;  %v8920_v7 = vadd.f32 %v8701_v8, %v3678_v31  ;;  %v8928_v11 = vpop.f32.mrf.mxu0 }
 0x1dd   : > { %v7071_v16 = vpop.f32.mrf.mxu1 }
 0x1de   : > { %9441 = vst [vmem:[#allocation9_spill] sm:$0xff] %v8920_v7  ;;  %v8926_v37 = vadd.f32 %v7071_v16, %v6719_v44  ;;  %v8932_v49 = vpop.f32.mrf.mxu0  ;;  %v6731_v16 = vadd.f32 %v8826_v55, %v8824_v54 }
 0x1df   : > { %v3681_v6 = vpop.f32.mrf.mxu1  ;;  %7165 = vmatmul.mubr.bf16.gmra.mxu1 %v7407_v0 }
 0x1e0   : > { %9442 = vst [vmem:[#allocation10_spill] sm:$0xff] %v8926_v37  ;;  %v8930_v60 = vadd.f32 %v6713_v47, %v3681_v6  ;;  %7168 = vmatprep.mubr.bf16.mxu1 %v7408_v33  ;;  %v8934_v8 = vpop.f32.mrf.mxu0 }
 0x1e2   : > { %9443 = vst [vmem:[#allocation11_spill] sm:$0xff] %v8930_v60  ;;  %v8936_v31 = vpop.f32.mrf.mxu0 }
 0x1e4   : > { %v8938_v34 = vpop.f32.mrf.mxu0 }
 0x1e6   : > { %v8940_v23 = vpop.f32.mrf.mxu0 }
 0x1e7   : > { %v7074_v7 = vpop.f32.mrf.mxu1  ;;  %7169 = vmatmul.mubr.bf16.gmra.mxu1 %v7409_v57  ;;  %v6725_v57 = vadd.f32 %v8800_v4, %v8795_v32  ;;  %v6641_v4 = vadd.f32 %v8672_v5, %v8659_v2 }
 0x1e8   : > { %v8943_v25 = vadd.f32 %v7074_v7, %v8809_v3  ;;  %v8945_v0 = vpop.f32.mrf.mxu0 }
 0x1e9   : > { %v3694_v44 = vpop.f32.mrf.mxu1 }
 0x1ea   : > { %9444 = vst [vmem:[#allocation12_spill] sm:$0xff] %v8943_v25  ;;  %v8950_v33 = vadd.f32 %v8778_v10, %v3694_v44  ;;  %v8952_v6 = vpop.f32.mrf.mxu0 }
 0x1eb   : > { %v7075_v47 = vpop.f32.mrf.mxu1 }
 0x1ec   : > { %9445 = vst [vmem:[#allocation13_spill] sm:$0xff] %v8950_v33  ;;  %v8956_v37 = vadd.f32 %v7075_v47, %v6731_v16  ;;  %v8958_v3 = vpop.f32.mrf.mxu0 }
 0x1ed   : > { %v3697_v60 = vpop.f32.mrf.mxu1 }
 0x1ee   : > { %9446 = vst [vmem:[#allocation14_spill] sm:$0xff] %v8956_v37  ;;  %v8960_v7 = vadd.f32 %v6725_v57, %v3697_v60  ;;  %v8962_v63 = vpop.f32.mrf.mxu0  ;;  %v3586_v37 = vadd.f32 %v6641_v4, %v8842_v29 }
 0x1ef   : > { %v6772_v25 = vpop.f32.mrf.mxu1 }
 0x1f0   : > { %9447 = vst [vmem:[#allocation15_spill] sm:$0xff] %v8960_v7  ;;  %v8964_v55 = vpop.f32.mrf.mxu0 }
 0x1f1   : > { %v6773_v54 = vpop.f32.mrf.mxu1 }
 0x1f2   : > { %v6774_v10 = vadd.f32 %v6773_v54, %v6772_v25  ;;  %v8966_v33 = vpop.f32.mrf.mxu0 }
 0x1f3   : > { %v6775_v44 = vpop.f32.mrf.mxu1  ;;  %9448 = vst [vmem:[#allocation16_spill] sm:$0xff] %v8966_v33 }
 0x1f4   : > { %v4482_v48 = vadd.f32 %v6774_v10, %v4481_v12  ;;  %v8968_v32 = vpop.f32.mrf.mxu0 }
 0x1f5   : > { %v6776_v9 = vpop.f32.mrf.mxu1 }
 0x1f6   : > { %v6777_v16 = vadd.f32 %v6776_v9, %v6775_v44  ;;  %v8973_v60 = vadd.f32 %v4482_v48, %v8836_v21  ;;  %v8975_v57 = vpop.f32.mrf.mxu0 }
 0x1f7   : > { %v6778_v47 = vpop.f32.mrf.mxu1 }
 0x1f8   : > { %v4485_v25 = vadd.f32 %v6777_v16, %v4484_v58  ;;  %v8978_v7 = vpop.f32.mrf.mxu0 }
 0x1f9   : > { %v6779_v54 = vpop.f32.mrf.mxu1 }
 0x1fa   : > { %v6780_v12 = vadd.f32 %v6779_v54, %v6778_v47  ;;  %v8980_v10 = vadd.f32 %v4485_v25, %v3586_v37  ;;  %v8982_v24 = vpop.f32.mrf.mxu0 }
 0x1fb   : > { %v6781_v33 = vpop.f32.mrf.mxu1 }
 0x1fc   : > { %9449 = vst [vmem:[#allocation17_spill] sm:$0xff] %v8980_v10  ;;  %v4490_v2 = vadd.f32 %v8898_v38, %v6780_v12  ;;  %v8985_v21 = vpop.f32.mrf.mxu0  ;;  %v6653_v12 = vadd.f32 %v8735_v18, %v8728_v28 }
 0x1fd   : > { %v6782_v5 = vpop.f32.mrf.mxu1 }
 0x1fe   : > { %v6783_v48 = vadd.f32 %v6782_v5, %v6781_v33  ;;  %v8988_v9 = vadd.f32 %v4490_v2, %v8831_v43  ;;  %v8990_v58 = vpop.f32.mrf.mxu0 }
 0x1ff   : > { %v6784_v29 = vpop.f32.mrf.mxu1 }
 0x200   : > { %v4493_v44 = vadd.f32 %v8904_v61, %v6783_v48  ;;  %v8993_v37 = vpop.f32.mrf.mxu0 }
 0x201   : > { %v6785_v4 = vpop.f32.mrf.mxu1 }
 0x202   : > { %v6786_v16 = vadd.f32 %v6785_v4, %v6784_v29  ;;  %v8996_v47 = vadd.f32 %v4493_v44, %v8838_v14  ;;  %v8998_v25 = vpop.f32.mrf.mxu0  ;;  %v3602_v14 = vadd.f32 %v6653_v12, %v8859_v41 }
 0x203   : > { %v6787_v38 = vpop.f32.mrf.mxu1 }
 0x204   : > { %9450 = vst [vmem:[#allocation18_spill] sm:$0xff] %v8996_v47  ;;  %v4498_v33 = vadd.f32 %v6786_v16, %v8908_v45  ;;  %v9001_v43 = vpop.f32.mrf.mxu0 }
 0x205   : > { %v6788_v54 = vpop.f32.mrf.mxu1 }
 0x206   : > { %v6789_v2 = vadd.f32 %v6788_v54, %v6787_v38  ;;  %v9006_v61 = vadd.f32 %v4498_v33, %v8850_v35  ;;  %v9008_v48 = vpop.f32.mrf.mxu0 }
 0x207   : > { %v6790_v5 = vpop.f32.mrf.mxu1  ;;  %9451 = vst [vmem:[#allocation19_spill] sm:$0xff] %v9008_v48 }
 0x208   : > { %v4501_v29 = vadd.f32 %v6789_v2, %v8915_v42  ;;  %v9012_v4 = vpop.f32.mrf.mxu0 }
 0x209   : > { %v6791_v44 = vpop.f32.mrf.mxu1 }
 0x20a   : > { %v6792_v45 = vadd.f32 %v6791_v44, %v6790_v5  ;;  %v9014_v16 = vadd.f32 %v4501_v29, %v3602_v14  ;;  %v6908_v47 = vpop.f32.mrf.mxu0 }
 0x20b   : > { %v6793_v10 = vpop.f32.mrf.mxu1 }
 0x20c   : > { %v4506_v28 = vadd.f32 %v8906_v13, %v6792_v45  ;;  %v6909_v35 = vpop.f32.mrf.mxu0 }
 0x20d   : > { %v6794_v18 = vpop.f32.mrf.mxu1  ;;  %v9017_v33 = vadd.f32 %v6909_v35, %v6908_v47 }
 0x20e   : > { %v6795_v38 = vadd.f32 %v6794_v18, %v6793_v10  ;;  %v9020_v54 = vadd.f32 %v4506_v28, %v8845_v22  ;;  %v6911_v42 = vpop.f32.mrf.mxu0  ;;  %v6665_v28 = vadd.f32 %v8814_v51, %v8807_v46 }
 0x20f   : > { %v6796_v41 = vpop.f32.mrf.mxu1 }
 0x210   : > { %v4509_v12 = vadd.f32 %v8910_v15, %v6795_v38  ;;  %v6912_v5 = vpop.f32.mrf.mxu0 }
 0x211   : > { %v6797_v2 = vpop.f32.mrf.mxu1  ;;  %v9023_v29 = vadd.f32 %v6912_v5, %v6911_v42 }
 0x212   : > { %v6798_v14 = vadd.f32 %v6797_v2, %v6796_v41  ;;  %v9026_v44 = vadd.f32 %v4509_v12, %v8852_v62  ;;  %v9028_v45 = vpop.f32.mrf.mxu0  ;;  %v3618_v62 = vadd.f32 %v6665_v28, %v8871_v20 }
 0x213   : > { %v6799_v13 = vpop.f32.mrf.mxu1 }
 0x214   : > { %v4514_v10 = vadd.f32 %v6798_v14, %v8928_v11  ;;  %v9031_v22 = vpop.f32.mrf.mxu0 }
 0x215   : > { %v6800_v47 = vpop.f32.mrf.mxu1 }
 0x216   : > { %v6801_v15 = vadd.f32 %v6800_v47, %v6799_v13  ;;  %v9036_v18 = vadd.f32 %v4514_v10, %v8867_v30  ;;  %v9038_v38 = vpop.f32.mrf.mxu0 }
 0x217   : > { %v6802_v35 = vpop.f32.mrf.mxu1 }
 0x218   : > { %v4517_v41 = vadd.f32 %v6801_v15, %v8934_v8  ;;  %v9042_v12 = vpop.f32.mrf.mxu0 }
 0x219   : > { %v6803_v42 = vpop.f32.mrf.mxu1 }
 0x21a   : > { %v6804_v11 = vadd.f32 %v6803_v42, %v6802_v35  ;;  %v9044_v2 = vadd.f32 %v4517_v41, %v3618_v62  ;;  %v9046_v14 = vpop.f32.mrf.mxu0 }
 0x21b   : > { %v6805_v5 = vpop.f32.mrf.mxu1 }
 0x21c   : > { %9452 = vst [vmem:[#allocation20_spill] sm:$0xff] %v9044_v2  ;;  %v4522_v46 = vadd.f32 %v8922_v1, %v6804_v11  ;;  %v9049_v30 = vpop.f32.mrf.mxu0 }
 0x21d   : > { %v6806_v51 = vpop.f32.mrf.mxu1 }
 0x21e   : > { %v6807_v13 = vadd.f32 %v6806_v51, %v6805_v5  ;;  %v9052_v10 = vadd.f32 %v4522_v46, %v8862_v52  ;;  %v9054_v8 = vpop.f32.mrf.mxu0  ;;  %v6677_v5 = vadd.f32 %v8856_v40, %v8854_v27 }
 0x21f   : > { %v6808_v20 = vpop.f32.mrf.mxu1 }
 0x220   : > { %v4525_v47 = vadd.f32 %v8932_v49, %v6807_v13  ;;  %v9057_v15 = vpop.f32.mrf.mxu0 }
 0x221   : > { %v6809_v28 = vpop.f32.mrf.mxu1 }
 0x222   : > { %v6810_v35 = vadd.f32 %v6809_v28, %v6808_v20  ;;  %v9060_v62 = vadd.f32 %v4525_v47, %v8869_v56  ;;  %v9062_v41 = vpop.f32.mrf.mxu0  ;;  %v3634_v56 = vadd.f32 %v6677_v5, %v8880_v36 }
 0x223   : > { %v6811_v1 = vpop.f32.mrf.mxu1 }
 0x224   : > { %v4530_v42 = vadd.f32 %v6810_v35, %v8938_v34  ;;  %v9065_v52 = vpop.f32.mrf.mxu0 }
 0x225   : > { %v6812_v11 = vpop.f32.mrf.mxu1 }
 0x226   : > { %v6813_v46 = vadd.f32 %v6812_v11, %v6811_v1  ;;  %v9070_v49 = vadd.f32 %v4530_v42, %v8876_v26  ;;  %v9072_v13 = vpop.f32.mrf.mxu0 }
 0x227   : > { %v6814_v51 = vpop.f32.mrf.mxu1 }
 0x228   : > { %9453 = vst [vmem:[#allocation21_spill] sm:$0xff] %v9070_v49  ;;  %v4533_v20 = vadd.f32 %v6813_v46, %v8945_v0  ;;  %v9076_v28 = vpop.f32.mrf.mxu0 }
 0x229   : > { %v6815_v47 = vpop.f32.mrf.mxu1 }
 0x22a   : > { %v6816_v34 = vadd.f32 %v6815_v47, %v6814_v51  ;;  %v9078_v35 = vadd.f32 %v4533_v20, %v3634_v56  ;;  %v9080_v2 = vpop.f32.mrf.mxu0 }
 0x22b   : > { %v6817_v48 = vpop.f32.mrf.mxu1 }
 0x22c   : > { %9454 = vst [vmem:[#allocation22_spill] sm:$0xff] %v9078_v35  ;;  %v4538_v27 = vadd.f32 %v8936_v31, %v6816_v34  ;;  %v9083_v26 = vpop.f32.mrf.mxu0 }
 0x22d   : > { %v6818_v40 = vpop.f32.mrf.mxu1 }
 0x22e   : > { %v6819_v1 = vadd.f32 %v6818_v40, %v6817_v48  ;;  %v9086_v42 = vadd.f32 %v4538_v27, %v8873_v59  ;;  %v9088_v0 = vpop.f32.mrf.mxu0 }
 0x22f   : > { %v6820_v36 = vpop.f32.mrf.mxu1 }
 0x230   : > { %9455 = vst [vmem:[#allocation23_spill] sm:$0xff] %v9086_v42  ;;  %v4541_v11 = vadd.f32 %v8940_v23, %v6819_v1  ;;  %v9091_v46 = vpop.f32.mrf.mxu0  ;;  %v9466_v42 = vld [vmem:[#allocation16_spill] sm:$0xff] }
 0x231   : > { %v6821_v5 = vpop.f32.mrf.mxu1 }
 0x232   : > { %v6822_v51 = vadd.f32 %v6821_v5, %v6820_v36  ;;  %v9094_v56 = vadd.f32 %v4541_v11, %v8878_v39  ;;  %v9096_v20 = vpop.f32.mrf.mxu0 }
 0x233   : > { %v6823_v31 = vpop.f32.mrf.mxu1 }
 0x234   : > { %9456 = vst [vmem:[#allocation24_spill] sm:$0xff] %v9094_v56  ;;  %v4546_v48 = vadd.f32 %v6822_v51, %v8958_v3  ;;  %v9099_v59 = vpop.f32.mrf.mxu0 }
 0x235   : > { %v6824_v47 = vpop.f32.mrf.mxu1 }
 0x236   : > { %v6825_v34 = vadd.f32 %v6824_v47, %v6823_v31  ;;  %v9102_v27 = vadd.f32 %v4546_v48, %v8884_v53  ;;  %v9104_v40 = vpop.f32.mrf.mxu0 }
 0x237   : > { %v6826_v23 = vpop.f32.mrf.mxu1 }
 0x238   : > { %9457 = vst [vmem:[#allocation25_spill] sm:$0xff] %v9102_v27  ;;  %v4549_v1 = vadd.f32 %v6825_v34, %v8964_v55  ;;  %v9107_v39 = vpop.f32.mrf.mxu0 }
 0x239   : > { %v6827_v36 = vpop.f32.mrf.mxu1 }
 0x23a   : > { %v6828_v11 = vadd.f32 %v6827_v36, %v6826_v23  ;;  %v9110_v5 = vadd.f32 %v4549_v1, %v8888_v50  ;;  %v9112_v51 = vpop.f32.mrf.mxu0 }
 0x23b   : > { %v6829_v3 = vpop.f32.mrf.mxu1 }
 0x23c   : > { %9458 = vst [vmem:[#allocation26_spill] sm:$0xff] %v9110_v5  ;;  %v4554_v31 = vadd.f32 %v8952_v6, %v6828_v11  ;;  %v9115_v53 = vpop.f32.mrf.mxu0 }
 0x23d   : > { %v6830_v47 = vpop.f32.mrf.mxu1 }
 0x23e   : > { %v6831_v48 = vadd.f32 %v6830_v47, %v6829_v3  ;;  %v9118_v27 = vadd.f32 %v4554_v31, %v8882_v17  ;;  %v9120_v34 = vpop.f32.mrf.mxu0 }
 0x23f   : > { %v6832_v55 = vpop.f32.mrf.mxu1 }
 0x240   : > { %9459 = vst [vmem:[#allocation27_spill] sm:$0xff] %v9118_v27  ;;  %v4557_v23 = vadd.f32 %v8962_v63, %v6831_v48  ;;  %v9123_v50 = vpop.f32.mrf.mxu0  ;;  %v9461_v27 = vld [vmem:[#allocation5_spill] sm:$0xff] }
 0x241   : > { %v6833_v36 = vpop.f32.mrf.mxu1 }
 0x242   : > { %v6834_v1 = vadd.f32 %v6833_v36, %v6832_v55  ;;  %v9126_v5 = vadd.f32 %v4557_v23, %v8886_v19  ;;  %v9128_v11 = vpop.f32.mrf.mxu0 }
 0x243   : > { %v6835_v6 = vpop.f32.mrf.mxu1 }
 0x244   : > { %9460 = vst [vmem:[#allocation28_spill] sm:$0xff] %v9126_v5  ;;  %v4562_v3 = vadd.f32 %v6834_v1, %v8968_v32  ;;  %v9131_v17 = vpop.f32.mrf.mxu0  ;;  %v9463_v5 = vld [vmem:[#allocation7_spill] sm:$0xff] }
 0x245   : > { %v6836_v47 = vpop.f32.mrf.mxu1 }
 0x246   : > { %v6837_v31 = vadd.f32 %v6836_v47, %v6835_v6  ;;  %v9134_v35 = vadd.f32 %v4562_v3, %v9461_v27  ;;  %v9136_v48 = vpop.f32.mrf.mxu0 }
 0x247   : > { %v6838_v63 = vpop.f32.mrf.mxu1 }
 0x248   : > { %9462 = vst [vmem:[#allocation5_spill] sm:$0xff] %v9134_v35  ;;  %v4565_v55 = vadd.f32 %v6837_v31, %v8978_v7  ;;  %v9139_v19 = vpop.f32.mrf.mxu0  ;;  %v9467_v35 = vld [vmem:[#allocation4_spill] sm:$0xff] }
 0x249   : > { %v6839_v36 = vpop.f32.mrf.mxu1 }
 0x24a   : > { %v6840_v23 = vadd.f32 %v6839_v36, %v6838_v63  ;;  %v9142_v56 = vadd.f32 %v4565_v55, %v9463_v5  ;;  %v9144_v1 = vpop.f32.mrf.mxu0 }
 0x24b   : > { %v6841_v32 = vpop.f32.mrf.mxu1  ;;  %9465 = vst [vmem:[#allocation29_spill] sm:$0xff] %v9144_v1 }
 0x24c   : > { %9464 = vst [vmem:[#allocation7_spill] sm:$0xff] %v9142_v56  ;;  %v4570_v6 = vadd.f32 %v9466_v42, %v6840_v23  ;;  %v9147_v27 = vpop.f32.mrf.mxu0  ;;  %v9471_v56 = vld [vmem:[#allocation6_spill] sm:$0xff] }
 0x24d   : > { %v6842_v47 = vpop.f32.mrf.mxu1 }
 0x24e   : > { %v6843_v3 = vadd.f32 %v6842_v47, %v6841_v32  ;;  %v9150_v49 = vadd.f32 %v4570_v6, %v9467_v35  ;;  %v9152_v31 = vpop.f32.mrf.mxu0 }
 0x24f   : > { %v6844_v7 = vpop.f32.mrf.mxu1  ;;  %9469 = vst [vmem:[#allocation4_spill] sm:$0xff] %v9152_v31 }
 0x250   : > { %9468 = vst [vmem:[#allocation16_spill] sm:$0xff] %v9150_v49  ;;  %v4573_v63 = vadd.f32 %v8975_v57, %v6843_v3  ;;  %v9155_v5 = vpop.f32.mrf.mxu0  ;;  %v9473_v49 = vld [vmem:[#allocation9_spill] sm:$0xff] }
 0x251   : > { %v6845_v36 = vpop.f32.mrf.mxu1  ;;  %9470 = vst [vmem:[#allocation30_spill] sm:$0xff] %v9155_v5 }
 0x252   : > { %v6846_v55 = vadd.f32 %v6845_v36, %v6844_v7  ;;  %v9158_v1 = vadd.f32 %v4573_v63, %v9471_v56  ;;  %v9160_v23 = vpop.f32.mrf.mxu0 }
 0x253   : > { %v6847_v42 = vpop.f32.mrf.mxu1 }
 0x254   : > { %9472 = vst [vmem:[#allocation6_spill] sm:$0xff] %v9158_v1  ;;  %v4578_v32 = vadd.f32 %v6846_v55, %v8985_v21  ;;  %v9163_v35 = vpop.f32.mrf.mxu0  ;;  %v9476_v1 = vld [vmem:[#allocation11_spill] sm:$0xff] }
 0x255   : > { %v6848_v47 = vpop.f32.mrf.mxu1 }
 0x256   : > { %v6849_v6 = vadd.f32 %v6848_v47, %v6847_v42  ;;  %v9166_v31 = vadd.f32 %v4578_v32, %v9473_v49  ;;  %v9168_v3 = vpop.f32.mrf.mxu0 }
 0x257   : > { %v6850_v57 = vpop.f32.mrf.mxu1  ;;  %9475 = vst [vmem:[#allocation31_spill] sm:$0xff] %v9168_v3 }
 0x258   : > { %9474 = vst [vmem:[#allocation9_spill] sm:$0xff] %v9166_v31  ;;  %v4581_v7 = vadd.f32 %v6849_v6, %v8993_v37  ;;  %v9171_v56 = vpop.f32.mrf.mxu0  ;;  %v9479_v31 = vld [vmem:[#allocation8_spill] sm:$0xff] }
 0x259   : > { %v6851_v36 = vpop.f32.mrf.mxu1 }
 0x25a   : > { %v6852_v63 = vadd.f32 %v6851_v36, %v6850_v57  ;;  %v9174_v5 = vadd.f32 %v4581_v7, %v9476_v1  ;;  %v9176_v55 = vpop.f32.mrf.mxu0 }
 0x25b   : > { %v6853_v21 = vpop.f32.mrf.mxu1  ;;  %9478 = vst [vmem:[#allocation32_spill] sm:$0xff] %v9176_v55 }
 0x25c   : > { %9477 = vst [vmem:[#allocation11_spill] sm:$0xff] %v9174_v5  ;;  %v4586_v42 = vadd.f32 %v8982_v24, %v6852_v63  ;;  %v9179_v49 = vpop.f32.mrf.mxu0  ;;  %v9483_v5 = vld [vmem:[#allocation10_spill] sm:$0xff] }
 0x25d   : > { %v6854_v47 = vpop.f32.mrf.mxu1 }
 0x25e   : > { %v6855_v32 = vadd.f32 %v6854_v47, %v6853_v21  ;;  %v9182_v3 = vadd.f32 %v4586_v42, %v9479_v31  ;;  %v9184_v6 = vpop.f32.mrf.mxu0 }
 0x25f   : > { %v6856_v37 = vpop.f32.mrf.mxu1  ;;  %9481 = vst [vmem:[#allocation33_spill] sm:$0xff] %v9184_v6 }
 0x260   : > { %9480 = vst [vmem:[#allocation8_spill] sm:$0xff] %v9182_v3  ;;  %v4589_v57 = vadd.f32 %v8990_v58, %v6855_v32  ;;  %v9187_v1 = vpop.f32.mrf.mxu0  ;;  %v9485_v3 = vld [vmem:[#allocation13_spill] sm:$0xff] }
 0x261   : > { %v6857_v36 = vpop.f32.mrf.mxu1  ;;  %9482 = vst [vmem:[#allocation34_spill] sm:$0xff] %v9187_v1 }
 0x262   : > { %v6858_v7 = vadd.f32 %v6857_v36, %v6856_v37  ;;  %v9190_v55 = vadd.f32 %v4589_v57, %v9483_v5  ;;  %v9192_v63 = vpop.f32.mrf.mxu0 }
 0x263   : > { %v6859_v24 = vpop.f32.mrf.mxu1 }
 0x264   : > { %9484 = vst [vmem:[#allocation10_spill] sm:$0xff] %v9190_v55  ;;  %v4594_v21 = vadd.f32 %v6858_v7, %v9001_v43  ;;  %v9195_v31 = vpop.f32.mrf.mxu0  ;;  %v9487_v55 = vld [vmem:[#allocation15_spill] sm:$0xff] }
 0x265   : > { %v6860_v47 = vpop.f32.mrf.mxu1 }
 0x266   : > { %v6861_v42 = vadd.f32 %v6860_v47, %v6859_v24  ;;  %v9198_v6 = vadd.f32 %v4594_v21, %v9485_v3  ;;  %v9200_v32 = vpop.f32.mrf.mxu0  ;;  %v9491_v47 = vld [vmem:[#allocation12_spill] sm:$0xff] }
 0x267   : > { %v6862_v58 = vpop.f32.mrf.mxu1 }
 0x268   : > { %9486 = vst [vmem:[#allocation13_spill] sm:$0xff] %v9198_v6  ;;  %v4597_v37 = vadd.f32 %v6861_v42, %v9012_v4  ;;  %v9203_v5 = vpop.f32.mrf.mxu0  ;;  %v6916_v42 = vadd.f32 %v9031_v22, %v9028_v45 }
 0x269   : > { %v6863_v36 = vpop.f32.mrf.mxu1 }
 0x26a   : > { %v6864_v57 = vadd.f32 %v6863_v36, %v6862_v58  ;;  %v9206_v1 = vadd.f32 %v4597_v37, %v9487_v55  ;;  %v9210_v7 = vpop.f32.mrf.mxu0  ;;  %v6919_v37 = vadd.f32 %v9042_v12, %v9038_v38  ;;  %v9495_v38 = vld [vmem:[#allocation17_spill] sm:$0xff] }
 0x26b   : > { %v9208_v43 = vpop.f32.mrf.mxu1 }
 0x26c   : > { %9488 = vst [vmem:[#allocation15_spill] sm:$0xff] %v9206_v1  ;;  %9489 = vst [vmem:[#allocation35_spill] sm:$0xff] %v9208_v43  ;;  %v4602_v24 = vadd.f32 %v8998_v25, %v6864_v57  ;;  %v9215_v21 = vpop.f32.mrf.mxu0  ;;  %v9494_v43 = vld [vmem:[#allocation18_spill] sm:$0xff] }
 0x26d   : > { %v9213_v3 = vpop.f32.mrf.mxu1 }
 0x26e   : > { %9490 = vst [vmem:[#allocation36_spill] sm:$0xff] %v9213_v3  ;;  %v9218_v6 = vadd.f32 %v4602_v24, %v9491_v47  ;;  %v9222_v58 = vpop.f32.mrf.mxu0 }
 0x26f   : > { %v7142_v4 = vpop.f32.mrf.mxu1  ;;  %9493 = vst [vmem:[#allocation37_spill] sm:$0xff] %v9222_v58  ;;  %v6928_v58 = vadd.f32 %v9065_v52, %v9062_v41 }
 0x270   : > { %9492 = vst [vmem:[#allocation12_spill] sm:$0xff] %v9218_v6  ;;  %v5421_v36 = vadd.f32 %v7142_v4, %v6916_v42  ;;  %v9228_v47 = vpop.f32.mrf.mxu0 }
 0x271   : > { %v5412_v55 = vpop.f32.mrf.mxu1 }
 0x272   : > { %v5413_v25 = vadd.f32 %v9017_v33, %v5412_v55  ;;  %v5541_v6 = vadd.f32 %v5421_v36, %v8988_v9  ;;  %v6922_v9 = vadd.f32 %v9049_v30, %v9046_v14  ;;  %v9247_v52 = vpop.f32.mrf.mxu0 }
 0x273   : > { %v7143_v57 = vpop.f32.mrf.mxu1 }
 0x274   : > { %v5539_v1 = vadd.f32 %v5413_v25, %v8973_v60  ;;  %v5424_v3 = vadd.f32 %v7143_v57, %v6919_v37  ;;  %v6925_v37 = vadd.f32 %v9057_v15, %v9054_v8  ;;  %v5834_v57 = vmul.f32 %v5541_v6, %v5541_v6 }
 0x275   : > { %v5415_v24 = vpop.f32.mrf.mxu1 }
 0x276   : > { %v5542_v45 = vadd.f32 %v5424_v3, %v9494_v43  ;;  %v5416_v22 = vadd.f32 %v9023_v29, %v5415_v24  ;;  %v6931_v29 = vadd.f32 %v9076_v28, %v9072_v13  ;;  %v5832_v3 = vmul.f32 %v5539_v1, %v5539_v1 }
 0x277   : > { %v7146_v60 = vpop.f32.mrf.mxu1 }
 0x278   : > { %v6518_v33 = vpack.c.bf16 %v5542_v45, %v5541_v6  ;;  %v5540_v12 = vadd.f32 %v5416_v22, %v9495_v38  ;;  %v5437_v43 = vadd.f32 %v7146_v60, %v6928_v58  ;;  %v5835_v13 = vmul.f32 %v5542_v45, %v5542_v45  ;;  %v9255_v60 = vpop.f32.mrf.mxu0 }
 0x279   : > { %v5428_v41 = vpop.f32.mrf.mxu1  ;;  %v6934_v38 = vadd.f32 %v9083_v26, %v9080_v2 }
 0x27a   : > { %6605 = vst [vmem:[%s9240_s16 + $0x8] sm:$0xff] %v6518_v33   ;;  %v6513_v4 = vpack.c.bf16 %v5540_v12, %v5539_v1  ;;  %v5795_v42 = vadd.f32 %v5540_v12, %v5539_v1  ;;  %v5833_v55 = vmul.f32 %v5540_v12, %v5540_v12  ;;  %v5429_v36 = vadd.f32 %v6922_v9, %v5428_v41 }
 0x27b   : > { %v7147_v25 = vpop.f32.mrf.mxu1  ;;  %v5545_v28 = vadd.f32 %v5437_v43, %v9020_v54 }
 0x27c   : > { %6514 = vst [vmem:[%s9240_s16] sm:$0xff] %v6513_v4   ;;  %v5796_v14 = vadd.f32 %v5795_v42, %v5541_v6  ;;  %v5864_v30 = vadd.f32 %v5833_v55, %v5832_v3  ;;  %v5440_v24 = vadd.f32 %v7147_v25, %v6931_v29  ;;  %v5543_v58 = vadd.f32 %v5429_v36, %v9006_v61  ;;  %v9263_v3 = vpop.f32.mrf.mxu0 }
 0x27d   : > { %v5431_v22 = vpop.f32.mrf.mxu1  ;;  %v6940_v6 = vadd.f32 %v9099_v59, %v9096_v20  ;;  %v6937_v55 = vadd.f32 %v9091_v46, %v9088_v0  ;;  %v5838_v36 = vmul.f32 %v5545_v28, %v5545_v28  ;;  %v6946_v46 = vadd.f32 %v9115_v53, %v9112_v51 }
 0x27e   : > { %v5865_v1 = vadd.f32 %v5864_v30, %v5834_v57  ;;  %v5797_v33 = vadd.f32 %v5796_v14, %v5542_v45  ;;  %v5546_v8 = vadd.f32 %v5440_v24, %v9026_v44  ;;  %v5432_v15 = vadd.f32 %v6925_v37, %v5431_v22 }
 0x27f   : > { %v7150_v12 = vpop.f32.mrf.mxu1  ;;  %v5836_v54 = vmul.f32 %v5543_v58, %v5543_v58  ;;  %v6943_v44 = vadd.f32 %v9107_v39, %v9104_v40  ;;  %v9272_v40 = vpop.f32.mrf.mxu0 }
 0x280   : > { %v5798_v9 = vadd.f32 %v5797_v33, %v5543_v58  ;;  %v5866_v29 = vadd.f32 %v5865_v1, %v5835_v13  ;;  %v6528_v61 = vpack.c.bf16 %v5546_v8, %v5545_v28  ;;  %v5544_v43 = vadd.f32 %v5432_v15, %v9014_v16  ;;  %v9496_v1 = vld [vmem:[#allocation20_spill] sm:$0xff] }
 0x281   : > { %v5444_v41 = vpop.f32.mrf.mxu1  ;;  %v5453_v2 = vadd.f32 %v7150_v12, %v6940_v6  ;;  %v5839_v13 = vmul.f32 %v5546_v8, %v5546_v8  ;;  %v9283_v12 = vpop.f32.mrf.mxu0 }
 0x282   : > { %v5867_v45 = vadd.f32 %v5866_v29, %v5836_v54  ;;  %6607 = vst [vmem:[%s9240_s16 + $0x18] sm:$0xff] %v6528_v61   ;;  %v5445_v26 = vadd.f32 %v6934_v38, %v5444_v41  ;;  %v6523_v4 = vpack.c.bf16 %v5544_v43, %v5543_v58  ;;  %v5799_v20 = vadd.f32 %v5798_v9, %v5544_v43  ;;  %v9497_v41 = vld [vmem:[#allocation21_spill] sm:$0xff] }
 0x283   : > { %v5837_v59 = vmul.f32 %v5544_v43, %v5544_v43  ;;  %v7151_v42 = vpop.f32.mrf.mxu1  ;;  %v5549_v39 = vadd.f32 %v5453_v2, %v9052_v10  ;;  %v6955_v10 = vadd.f32 %v9139_v19, %v9136_v48  ;;  %v6949_v29 = vadd.f32 %v9123_v50, %v9120_v34  ;;  %v9290_v2 = vpop.f32.mrf.mxu0  ;;  %v9500_v50 = vld [vmem:[#allocation29_spill] sm:$0xff] }
 0x284   : > { %v5456_v37 = vadd.f32 %v7151_v42, %v6943_v44  ;;  %6606 = vst [vmem:[%s9240_s16 + $0x10] sm:$0xff] %v6523_v4   ;;  %v5800_v16 = vadd.f32 %v5799_v20, %v5545_v28  ;;  %v5547_v57 = vadd.f32 %v5445_v26, %v9036_v18  ;;  %v6952_v28 = vadd.f32 %v9131_v17, %v9128_v11  ;;  %v9498_v26 = vld [vmem:[#allocation23_spill] sm:$0xff]  ;;  %v9499_v20 = vld [vmem:[#allocation24_spill] sm:$0xff] }
 0x285   : > { %v5868_v25 = vadd.f32 %v5867_v45, %v5837_v59  ;;  %v5447_v14 = vpop.f32.mrf.mxu1  ;;  %v5842_v48 = vmul.f32 %v5549_v39, %v5549_v39 }
 0x286   : > { %v5550_v30 = vadd.f32 %v5456_v37, %v9060_v62  ;;  %v5448_v24 = vadd.f32 %v6937_v55, %v5447_v14  ;;  %v5801_v22 = vadd.f32 %v5800_v16, %v5546_v8  ;;  %v5840_v15 = vmul.f32 %v5547_v57, %v5547_v57  ;;  %v9501_v14 = vld [vmem:[#allocation22_spill] sm:$0xff] }
 0x287   : > { %v5869_v58 = vadd.f32 %v5868_v25, %v5838_v36  ;;  %v7154_v0 = vpop.f32.mrf.mxu1  ;;  %v6958_v16 = vadd.f32 %v9147_v27, %v9500_v50  ;;  %v6964_v25 = vadd.f32 %v9163_v35, %v9160_v23 }
 0x288   : > { %v6538_v18 = vpack.c.bf16 %v5550_v30, %v5549_v39  ;;  %v5548_v33 = vadd.f32 %v5448_v24, %v9496_v1  ;;  %v5802_v62 = vadd.f32 %v5801_v22, %v5547_v57  ;;  %v5469_v51 = vadd.f32 %v7154_v0, %v6952_v28  ;;  %v9502_v24 = vld [vmem:[#allocation31_spill] sm:$0xff]  ;;  %v9301_v28 = vpop.f32.mrf.mxu0 }
 0x289   : > { %v5870_v38 = vadd.f32 %v5869_v58, %v5839_v13  ;;  %v5460_v6 = vpop.f32.mrf.mxu1  ;;  %v5843_v55 = vmul.f32 %v5550_v30, %v5550_v30  ;;  %v6967_v13 = vadd.f32 %v9171_v56, %v9502_v24 }
 0x28a   : > { %6609 = vst [vmem:[%s9240_s16 + $0x28] sm:$0xff] %v6538_v18   ;;  %v6533_v8 = vpack.c.bf16 %v5548_v33, %v5547_v57  ;;  %v5841_v9 = vmul.f32 %v5548_v33, %v5548_v33  ;;  %v5461_v53 = vadd.f32 %v6946_v46, %v5460_v6  ;;  %v5803_v11 = vadd.f32 %v5802_v62, %v5548_v33  ;;  %v9504_v62 = vld [vmem:[#allocation30_spill] sm:$0xff] }
 0x28b   : > { %v5871_v54 = vadd.f32 %v5870_v38, %v5840_v15  ;;  %v7155_v17 = vpop.f32.mrf.mxu1  ;;  %v5553_v4 = vadd.f32 %v5469_v51, %v9498_v26 }
 0x28c   : > { %6608 = vst [vmem:[%s9240_s16 + $0x20] sm:$0xff] %v6533_v8   ;;  %v5472_v61 = vadd.f32 %v7155_v17, %v6955_v10  ;;  %v5804_v19 = vadd.f32 %v5803_v11, %v5549_v39  ;;  %v5551_v44 = vadd.f32 %v5461_v53, %v9497_v41  ;;  %v9503_v10 = vld [vmem:[#allocation4_spill] sm:$0xff]  ;;  %v9506_v11 = vld [vmem:[#allocation27_spill] sm:$0xff] }
 0x28d   : > { %v5872_v43 = vadd.f32 %v5871_v54, %v5841_v9  ;;  %v5463_v45 = vpop.f32.mrf.mxu1  ;;  %v6961_v15 = vadd.f32 %v9504_v62, %v9503_v10  ;;  %v5846_v56 = vmul.f32 %v5553_v4, %v5553_v4  ;;  %v9505_v9 = vld [vmem:[#allocation25_spill] sm:$0xff]  ;;  %v9308_v54 = vpop.f32.mrf.mxu0 }
 0x28e   : > { %v5554_v59 = vadd.f32 %v5472_v61, %v9499_v20  ;;  %v5464_v42 = vadd.f32 %v6949_v29, %v5463_v45  ;;  %v5805_v36 = vadd.f32 %v5804_v19, %v5550_v30  ;;  %v5844_v22 = vmul.f32 %v5551_v44, %v5551_v44  ;;  %v9507_v29 = vld [vmem:[#allocation28_spill] sm:$0xff] }
 0x28f   : > { %v5873_v37 = vadd.f32 %v5872_v43, %v5842_v48  ;;  %v7158_v34 = vpop.f32.mrf.mxu1  ;;  %v9508_v45 = vld [vmem:[#allocation32_spill] sm:$0xff] }
 0x290   : > { %v6548_v57 = vpack.c.bf16 %v5554_v59, %v5553_v4  ;;  %v5552_v39 = vadd.f32 %v5464_v42, %v9501_v14  ;;  %v5806_v58 = vadd.f32 %v5805_v36, %v5551_v44  ;;  %v5485_v27 = vadd.f32 %v7158_v34, %v6964_v25  ;;  %v9509_v42 = vld [vmem:[#allocation26_spill] sm:$0xff]  ;;  %v6998_v25 = vpop.f32.mrf.mxu0 }
 0x291   : > { %v5874_v0 = vadd.f32 %v5873_v37, %v5843_v55  ;;  %v5476_v46 = vpop.f32.mrf.mxu1  ;;  %v5847_v19 = vmul.f32 %v5554_v59, %v5554_v59  ;;  %v6970_v26 = vadd.f32 %v9179_v49, %v9508_v45  ;;  %v6979_v37 = vadd.f32 %v9203_v5, %v9200_v32  ;;  %v9517_v45 = vld [vmem:[#allocation36_spill] sm:$0xff] }
 0x292   : > { %6611 = vst [vmem:[%s9240_s16 + $0x38] sm:$0xff] %v6548_v57   ;;  %v6543_v30 = vpack.c.bf16 %v5552_v39, %v5551_v44  ;;  %v5845_v18 = vmul.f32 %v5552_v39, %v5552_v39  ;;  %v5477_v1 = vadd.f32 %v6958_v16, %v5476_v46  ;;  %v5807_v23 = vadd.f32 %v5806_v58, %v5552_v39  ;;  %v9512_v46 = vld [vmem:[#allocation5_spill] sm:$0xff] }
 0x293   : > { %v5875_v33 = vadd.f32 %v5874_v0, %v5844_v22  ;;  %v7159_v35 = vpop.f32.mrf.mxu1  ;;  %v5557_v17 = vadd.f32 %v5485_v27, %v9506_v11  ;;  %v6999_v27 = vpop.f32.mrf.mxu0  ;;  %v6991_v11 = vadd.f32 %v9272_v40, %v9263_v3 }
 0x294   : > { %6610 = vst [vmem:[%s9240_s16 + $0x30] sm:$0xff] %v6543_v30   ;;  %v5488_v38 = vadd.f32 %v7159_v35, %v6967_v13  ;;  %v5808_v6 = vadd.f32 %v5807_v23, %v5553_v4  ;;  %v5555_v51 = vadd.f32 %v5477_v1, %v9505_v9  ;;  %v6976_v4 = vadd.f32 %v9195_v31, %v9192_v63  ;;  %v9510_v31 = vld [vmem:[#allocation33_spill] sm:$0xff]  ;;  %v9511_v13 = vld [vmem:[#allocation34_spill] sm:$0xff]  ;;  %v9513_v1 = vld [vmem:[#allocation16_spill] sm:$0xff] }
 0x295   : > { %v5876_v8 = vadd.f32 %v5875_v33, %v5845_v18  ;;  %v5479_v53 = vpop.f32.mrf.mxu1  ;;  %v6973_v58 = vadd.f32 %v9511_v13, %v9510_v31  ;;  %v5850_v0 = vmul.f32 %v5557_v17, %v5557_v17  ;;  %v9514_v23 = vld [vmem:[#allocation6_spill] sm:$0xff] }
 0x296   : > { %v5558_v61 = vadd.f32 %v5488_v38, %v9507_v29  ;;  %v5480_v48 = vadd.f32 %v6961_v15, %v5479_v53  ;;  %v5809_v41 = vadd.f32 %v5808_v6, %v5554_v59  ;;  %v5848_v34 = vmul.f32 %v5555_v51, %v5555_v51 }
 0x297   : > { %v5877_v43 = vadd.f32 %v5876_v8, %v5846_v56  ;;  %v7162_v44 = vpop.f32.mrf.mxu1  ;;  %v6982_v6 = vadd.f32 %v9215_v21, %v9210_v7  ;;  %v6988_v8 = vadd.f32 %v9255_v60, %v9247_v52  ;;  %v9516_v21 = vld [vmem:[#allocation35_spill] sm:$0xff] }
 0x298   : > { %v6558_v20 = vpack.c.bf16 %v5558_v61, %v5557_v17  ;;  %v5556_v55 = vadd.f32 %v5480_v48, %v9509_v42  ;;  %v5810_v36 = vadd.f32 %v5809_v41, %v5555_v51  ;;  %v5501_v14 = vadd.f32 %v7162_v44, %v6976_v4 }
 0x299   : > { %v5878_v50 = vadd.f32 %v5877_v43, %v5847_v19  ;;  %v5492_v16 = vpop.f32.mrf.mxu1  ;;  %v5851_v62 = vmul.f32 %v5558_v61, %v5558_v61  ;;  %v7001_v43 = vpop.f32.mrf.mxu0  ;;  %v6867_v52 = vadd.f32 %v9517_v45, %v9516_v21 }
 0x29a   : > { %6613 = vst [vmem:[%s9240_s16 + $0x48] sm:$0xff] %v6558_v20   ;;  %v6553_v59 = vpack.c.bf16 %v5556_v55, %v5555_v51  ;;  %v5849_v57 = vmul.f32 %v5556_v55, %v5556_v55  ;;  %v5493_v49 = vadd.f32 %v6970_v26, %v5492_v16  ;;  %v5811_v24 = vadd.f32 %v5810_v36, %v5556_v55  ;;  %v9515_v51 = vld [vmem:[#allocation7_spill] sm:$0xff]  ;;  %v9518_v20 = vld [vmem:[#allocation37_spill] sm:$0xff] }
 0x29b   : > { %v5879_v39 = vadd.f32 %v5878_v50, %v5848_v34  ;;  %v7163_v63 = vpop.f32.mrf.mxu1  ;;  %v5561_v33 = vadd.f32 %v5501_v14, %v9513_v1  ;;  %v6985_v3 = vadd.f32 %v9228_v47, %v9518_v20  ;;  %v9519_v36 = vld [vmem:[#allocation9_spill] sm:$0xff]  ;;  %v7002_v16 = vpop.f32.mrf.mxu0  ;;  %v9521_v14 = vld [vmem:[#allocation10_spill] sm:$0xff] }
 0x29c   : > { %6612 = vst [vmem:[%s9240_s16 + $0x40] sm:$0xff] %v6553_v59   ;;  %v5504_v22 = vadd.f32 %v7163_v63, %v6979_v37  ;;  %v5812_v32 = vadd.f32 %v5811_v24, %v5557_v17  ;;  %v5559_v30 = vadd.f32 %v5493_v49, %v9512_v46  ;;  %v9520_v59 = vld [vmem:[#allocation8_spill] sm:$0xff]  ;;  %v9522_v63 = vld [vmem:[#allocation19_spill] sm:$0xff] }
 0x29d   : > { %v5880_v5 = vadd.f32 %v5879_v39, %v5849_v57  ;;  %v5495_v18 = vpop.f32.mrf.mxu1  ;;  %v5854_v42 = vmul.f32 %v5561_v33, %v5561_v33  ;;  %v7000_v39 = vadd.f32 %v6999_v27, %v6998_v25  ;;  %v4605_v31 = vadd.f32 %v9522_v63, %v6867_v52 }
 0x29e   : > { %v5562_v35 = vadd.f32 %v5504_v22, %v9514_v23  ;;  %v5496_v10 = vadd.f32 %v6973_v58, %v5495_v18  ;;  %v5813_v38 = vadd.f32 %v5812_v32, %v5558_v61  ;;  %v5852_v29 = vmul.f32 %v5559_v30, %v5559_v30 }
 0x29f   : > { %v5881_v15 = vadd.f32 %v5880_v5, %v5850_v0  ;;  %v7166_v56 = vpop.f32.mrf.mxu1  ;;  %v6994_v0 = vadd.f32 %v9290_v2, %v9283_v12  ;;  %v9523_v5 = vld [vmem:[#allocation11_spill] sm:$0xff]  ;;  %v6997_v12 = vadd.f32 %v9308_v54, %v9301_v28  ;;  %v9524_v2 = vld [vmem:[#allocation14_spill] sm:$0xff] }
 0x2a0   : > { %v6568_v9 = vpack.c.bf16 %v5562_v35, %v5561_v33  ;;  %v5560_v53 = vadd.f32 %v5496_v10, %v9515_v51  ;;  %v5814_v17 = vadd.f32 %v5813_v38, %v5559_v30  ;;  %v5517_v44 = vadd.f32 %v7166_v56, %v6988_v8  ;;  %v9527_v54 = vld [vmem:[#allocation15_spill] sm:$0xff] }
 0x2a1   : > { %v5882_v48 = vadd.f32 %v5881_v15, %v5851_v62  ;;  %v5508_v19 = vpop.f32.mrf.mxu1  ;;  %v5855_v13 = vmul.f32 %v5562_v35, %v5562_v35  ;;  %v4639_v56 = vadd.f32 %v4605_v31, %v9524_v2 }
 0x2a2   : > { %6615 = vst [vmem:[%s9240_s16 + $0x58] sm:$0xff] %v6568_v9   ;;  %v6563_v61 = vpack.c.bf16 %v5560_v53, %v5559_v30  ;;  %v5853_v41 = vmul.f32 %v5560_v53, %v5560_v53  ;;  %v5509_v7 = vadd.f32 %v6982_v6, %v5508_v19  ;;  %v5815_v26 = vadd.f32 %v5814_v17, %v5560_v53  ;;  %v9525_v53 = vld [vmem:[#allocation13_spill] sm:$0xff] }
 0x2a3   : > { %v5883_v60 = vadd.f32 %v5882_v48, %v5852_v29  ;;  %v7167_v4 = vpop.f32.mrf.mxu1  ;;  %v5565_v57 = vadd.f32 %v5517_v44, %v9520_v59  ;;  %v7003_v30 = vadd.f32 %v7002_v16, %v7001_v43  ;;  %v9526_v29 = vld [vmem:[#allocation12_spill] sm:$0xff] }
 0x2a4   : > { %6614 = vst [vmem:[%s9240_s16 + $0x50] sm:$0xff] %v6563_v61   ;;  %v5520_v40 = vadd.f32 %v7167_v4, %v6991_v11  ;;  %v5816_v55 = vadd.f32 %v5815_v26, %v5561_v33  ;;  %v5563_v34 = vadd.f32 %v5509_v7, %v9519_v36 }
 0x2a5   : > { %v5884_v37 = vadd.f32 %v5883_v60, %v5853_v41  ;;  %v5511_v50 = vpop.f32.mrf.mxu1  ;;  %v5858_v8 = vmul.f32 %v5565_v57, %v5565_v57 }
 0x2a6   : > { %v5566_v49 = vadd.f32 %v5520_v40, %v9521_v14  ;;  %v5512_v24 = vadd.f32 %v6985_v3, %v5511_v50  ;;  %v5817_v58 = vadd.f32 %v5816_v55, %v5562_v35  ;;  %v5856_v1 = vmul.f32 %v5563_v34, %v5563_v34 }
 0x2a7   : > { %v5885_v47 = vadd.f32 %v5884_v37, %v5854_v42  ;;  %v7170_v22 = vpop.f32.mrf.mxu1 }
 0x2a8   : > { %v6578_v32 = vpack.c.bf16 %v5566_v49, %v5565_v57  ;;  %v5564_v46 = vadd.f32 %v5512_v24, %v9523_v5  ;;  %v5818_v18 = vadd.f32 %v5817_v58, %v5563_v34  ;;  %v5533_v10 = vadd.f32 %v7170_v22, %v7000_v39 }
 0x2a9   : > { %v5886_v33 = vadd.f32 %v5885_v47, %v5855_v13  ;;  %v5524_v23 = vpop.f32.mrf.mxu1  ;;  %v5859_v61 = vmul.f32 %v5566_v49, %v5566_v49 }
 0x2aa   : > { %6617 = vst [vmem:[%s9240_s16 + $0x68] sm:$0xff] %v6578_v32   ;;  %v6573_v25 = vpack.c.bf16 %v5564_v46, %v5563_v34  ;;  %v5857_v27 = vmul.f32 %v5564_v46, %v5564_v46  ;;  %v5525_v62 = vadd.f32 %v6994_v0, %v5524_v23  ;;  %v5819_v35 = vadd.f32 %v5818_v18, %v5564_v46 }
 0x2ab   : > { %v5887_v15 = vadd.f32 %v5886_v33, %v5856_v1  ;;  %v7171_v38 = vpop.f32.mrf.mxu1  ;;  %v5569_v48 = vadd.f32 %v5533_v10, %v9526_v29 }
 0x2ac   : > { %6616 = vst [vmem:[%s9240_s16 + $0x60] sm:$0xff] %v6573_v25   ;;  %v5536_v6 = vadd.f32 %v7171_v38, %v7003_v30  ;;  %v5820_v9 = vadd.f32 %v5819_v35, %v5565_v57  ;;  %v5567_v11 = vadd.f32 %v5525_v62, %v9525_v53 }
 0x2ad   : > { %v5888_v51 = vadd.f32 %v5887_v15, %v5857_v27  ;;  %v5527_v17 = vpop.f32.mrf.mxu1  ;;  %v5862_v3 = vmul.f32 %v5569_v48, %v5569_v48 }
 0x2ae   : > { %v5570_v19 = vadd.f32 %v5536_v6, %v4639_v56  ;;  %v5528_v43 = vadd.f32 %v6997_v12, %v5527_v17  ;;  %v5821_v44 = vadd.f32 %v5820_v9, %v5566_v49  ;;  %v5860_v45 = vmul.f32 %v5567_v11, %v5567_v11 }
 0x2af   : > { %v5889_v41 = vadd.f32 %v5888_v51, %v5858_v8 }
 0x2b0   : > { %v6588_v28 = vpack.c.bf16 %v5570_v19, %v5569_v48  ;;  %v5568_v7 = vadd.f32 %v5528_v43, %v9527_v54  ;;  %v5822_v21 = vadd.f32 %v5821_v44, %v5567_v11  ;;  %v5863_v55 = vmul.f32 %v5570_v19, %v5570_v19 }
 0x2b1   : > { %v5890_v52 = vadd.f32 %v5889_v41, %v5859_v61 }
 0x2b2   : > { %6619 = vst [vmem:[%s9240_s16 + $0x78] sm:$0xff] %v6588_v28   ;;  %v6583_v60 = vpack.c.bf16 %v5568_v7, %v5567_v11  ;;  %v5861_v26 = vmul.f32 %v5568_v7, %v5568_v7  ;;  %v5823_v20 = vadd.f32 %v5822_v21, %v5568_v7 }
 0x2b3   : > { %v5891_v4 = vadd.f32 %v5890_v52, %v5860_v45 }
 0x2b4   : > { %6618 = vst [vmem:[%s9240_s16 + $0x70] sm:$0xff] %v6583_v60   ;;  %v5824_v40 = vadd.f32 %v5823_v20, %v5569_v48 }
 0x2b5   : > { %v5892_v42 = vadd.f32 %v5891_v4, %v5861_v26 }
 0x2b6   : > { %v5825_v37 = vadd.f32 %v5824_v40, %v5570_v19 }
 0x2b7   : > { %v5893_v36 = vadd.f32 %v5892_v42, %v5862_v3 }
 0x2b8   : > { %v5826_v34 = vrot.slane %v5825_v37, 4 }
 0x2b9   : > { %v5894_v50 = vadd.f32 %v5893_v36, %v5863_v55 }
 0x2ba   : > { %v5827_v16 = vadd.f32 %v5826_v34, %v5825_v37 }
 0x2bb   : > { %v5895_v59 = vrot.slane %v5894_v50, 4 }
 0x2bc   : > { %v5828_v57 = vrot.slane %v5827_v16, 2 }
 0x2bd   : > { %v5896_v14 = vadd.f32 %v5895_v59, %v5894_v50 }
 0x2be   : > { %v5829_v49 = vadd.f32 %v5828_v57, %v5827_v16 }
 0x2bf   : > { %v5897_v39 = vrot.slane %v5896_v14, 2 }
 0x2c0   : > { %v5830_v24 = vrot.slane %v5829_v49, 1 }
 0x2c1   : > { %v5898_v63 = vadd.f32 %v5897_v39, %v5896_v14 }
 0x2c2   : > { %v5831_v13 = vadd.f32 %v5830_v24, %v5829_v49 }
 0x2c3   : > { %v5899_v31 = vrot.slane %v5898_v63, 1 }
 0x2c5   : > { %v5900_v47 = vadd.f32 %v5899_v31, %v5898_v63 }
 0x2c7   : > { %v5902_v58 = vsel %vm5901_vm11, %v5831_v13, %v5900_v47 }
 0x2c8   : > { %5903 = vst [vmem:[%s238_s21] sm:$0x3] %v5902_v58 }
 0x2c9 PF: > { %s16_s18 = sadd.s32 1, %s7425_s18  }
 0x2ca   : > { %p13_p5 = scmp.ge.s32.totalorder %s16_s18, 4  }
 0x2cc   :  { %15 = sbr.rel (!%p13_p5) target bundleno = 1 (0x1), region = 80 }

</bundles_post_ra>
